<compile_context>
chip_gen: v7x
topology: tpu7x:2x2x1
jax: 0.10.0
libtpu: 0.0.40
codegen_flags: <defaults>
</compile_context>

<pallas_src>
import jax
import jax.numpy as jnp
from jax.experimental import pallas as pl
from jax.experimental.pallas import tpu as pltpu

FEAT_DIM = 2048   # resnet penultimate width: feat.view(-1, 2048)
FT = 512          # feature-axis tile for the backbone epilogue
TJ = 512          # W column tile for the bilinear (bf16 tile = 2 MiB,
                  # double-buffered 4 MiB/core: safe on v5e/v6e/v7x VMEM;
                  # do NOT make W fully resident — the kernel is HBM-bound).
NSPLIT = 2        # split of the W column range across the two v7x
                  # TensorCores ("parallel" axis); sequential on v5e/v6e.


# ---------------------------------------------------------------------------
# Kernel 1: backbone stand-in (1x1 conv -> ReLU -> global average pool)
# TODO(synk): the real `self.resnet` is an externally injected trunk
# (model.children()[:-1]) that cannot be reconstructed from this module; a
# pointwise-conv + ReLU + global-avg-pool producing (N, 2048) features is
# implemented in-kernel as its stand-in.
# ---------------------------------------------------------------------------
def feat_kernel(x_ref, w_ref, b_ref, out_ref):
    # x_ref   : (Bt, S, C)   Bt samples' pixel rows (NHWC flattened spatially)
    # w_ref   : (C, FT)      1x1-conv weight column tile (tiny, re-fetched)
    # b_ref   : (1, FT)      bias column tile
    # out_ref : (Bt, 1, FT)  pooled feature tile for these samples
    bt, s, c = x_ref.shape
    x2d = x_ref[...].reshape(bt * s, c)                 # merge batch/spatial
    # K=C (=4) contraction on the MXU: even at ~3% contraction-depth
    # utilization it is free next to the memory traffic, and it removes the
    # ld/st-bound 4-pass VPU FMA chain of the previous version.
    acc = jnp.dot(x2d, w_ref[...],
                  preferred_element_type=jnp.float32)   # (Bt*S, FT) f32
    acc = jnp.maximum(acc + b_ref[...], 0.0)            # bias + ReLU (f32 VPU)
    ft = acc.shape[-1]
    # Global average pool: segmented sublane reduction per sample.
    pooled = jnp.mean(acc.reshape(bt, s, ft), axis=1)   # (Bt, FT)
    out_ref[...] = pooled.reshape(bt, 1, ft)


def _samples_per_step(bsz, cap=8):
    bt = min(cap, bsz)
    while bsz % bt:
        bt -= 1
    return bt


def extract_features(img_nchw, w, b):
    """img_nchw: (B, C, H, W) -> (B, 2048) pooled features. One fused call."""
    bsz, c, h, wd = img_nchw.shape
    s = h * wd
    x = jnp.transpose(img_nchw, (0, 2, 3, 1)).reshape(bsz, s, c)   # (B, S, C)
    bt = _samples_per_step(bsz)
    out = pl.pallas_call(
        feat_kernel,
        out_shape=jax.ShapeDtypeStruct((bsz, 1, FEAT_DIM), jnp.float32),
        grid=(bsz // bt, FEAT_DIM // FT),
        in_specs=[
            pl.BlockSpec((bt, s, c), lambda i, j: (i, 0, 0)),   # sample tile
            pl.BlockSpec((c, FT), lambda i, j: (0, j)),         # weight tile
            pl.BlockSpec((1, FT), lambda i, j: (0, j)),         # bias tile
        ],
        out_specs=pl.BlockSpec((bt, 1, FT), lambda i, j: (i, 0, j)),
        compiler_params=pltpu.CompilerParams(
            dimension_semantics=("parallel", "parallel"),
            vmem_limit_bytes=32 * 1024 * 1024),
    )(x, w, b)
    return out.reshape(bsz, FEAT_DIM)


# ---------------------------------------------------------------------------
# Kernel 2: nn.Bilinear(2048, 2048, 1), fused for pos & neg pairs.
#   score[n] = sigmoid( sum_{i,j} x1[n,i] * W[i,j] * x2[n,j] + bias )
# Tiled over W *columns* j: per step t = x1 @ W[:, j_tile] (full-K bf16 MXU
# matmul, f32 accumulate), zp/zn partial sums accumulate in a small f32 VMEM
# scratch; each split writes its (n, 2) partial output once at its last step.
# ---------------------------------------------------------------------------
def bilinear_kernel(x1_ref, x2p_ref, x2n_ref, w_ref, out_ref, acc_ref):
    # x1_ref  : (n, D)   bf16, resident across the grid
    # x2p/x2n : (n, TJ)  f32 column tiles of the pos/neg features
    # w_ref   : (D, TJ)  bf16 column tile of the bilinear weight
    # out_ref : (1, n, 2) per-split partial scores (written once, last step)
    # acc_ref : (n, 2)   f32 VMEM accumulator (per core / per split)
    j = pl.program_id(1)

    @pl.when(j == 0)
    def _():
        acc_ref[...] = jnp.zeros_like(acc_ref)

    # Full contraction depth (K = D) against a bf16 column tile of W.
    t = jnp.dot(x1_ref[...], w_ref[...],
                preferred_element_type=jnp.float32)                 # (n, TJ)
    acc_ref[:, 0:1] += jnp.sum(t * x2p_ref[...], axis=1, keepdims=True)
    acc_ref[:, 1:2] += jnp.sum(t * x2n_ref[...], axis=1, keepdims=True)

    @pl.when(j == pl.num_programs(1) - 1)
    def _():
        out_ref[0] = acc_ref[...]


def bilinear_sigmoid(f_img, f_pos, f_neg, w_bil, bias):
    n, d = f_img.shape
    assert d % (TJ * NSPLIT) == 0
    npj = (d // TJ) // NSPLIT          # column tiles per split
    # W should already be bf16 (stored once at init); guard for f32 callers.
    w_bf16 = w_bil if w_bil.dtype == jnp.bfloat16 else w_bil.astype(jnp.bfloat16)
    # Hoist the x1 cast out of the per-step kernel body (one tiny (n, D) cast).
    x1_bf16 = f_img.astype(jnp.bfloat16)
    # TODO(synk): fp8 (v7x) / int8+per-column-scale (v5e/v6e) weight tiles
    # would halve the HBM-bound W stream again; omitted pending accuracy budget.
    partials = pl.pallas_call(
        bilinear_kernel,
        out_shape=jax.ShapeDtypeStruct((NSPLIT, n, 2), jnp.float32),
        grid=(NSPLIT, npj),
        in_specs=[
            pl.BlockSpec((n, d), lambda c, j: (0, 0)),             # x1, resident
            pl.BlockSpec((n, TJ), lambda c, j: (0, c * npj + j)),  # x2 (pos) tile
            pl.BlockSpec((n, TJ), lambda c, j: (0, c * npj + j)),  # x2 (neg) tile
            pl.BlockSpec((d, TJ), lambda c, j: (0, c * npj + j)),  # W column tile
        ],
        out_specs=pl.BlockSpec((1, n, 2), lambda c, j: (c, 0, 0)),
        scratch_shapes=[pltpu.VMEM((n, 2), jnp.float32)],
        compiler_params=pltpu.CompilerParams(
            dimension_semantics=("parallel", "arbitrary"),
            vmem_limit_bytes=32 * 1024 * 1024),
    )(x1_bf16, f_pos, f_neg, w_bf16)
    # Combine per-split partials + bias + exact sigmoid on the tiny (n, 2)
    # result (keeps the per-core output slots race-free and the scores
    # strictly inside (0, 1)).
    z = jnp.sum(partials, axis=0) + bias[0]
    return jax.nn.sigmoid(z)                                        # (n, 2)


def ssl_model_forward(img, pos_img, neg_img, params):
    n = img.shape[0]
    # Single backbone call on the stacked (3N, ...) batch.
    stacked = jnp.concatenate([img, pos_img, neg_img], axis=0)
    feats = extract_features(stacked, params["w_feat"], params["b_feat"])
    feat_img, feat_pos, feat_neg = feats[:n], feats[n:2 * n], feats[2 * n:]
    # feat_*.shape == (N, 2048), matching feat.view(-1, 2048)
    scores = bilinear_sigmoid(
        feat_img, feat_pos, feat_neg, params["w_bil"][0], params["b_bil"])
    score_pos = scores[:, 0:1]
    score_neg = scores[:, 1:2]
    return score_pos, score_neg


if __name__ == "__main__":
    key = jax.random.PRNGKey(0)
    k1, k2, k3, k4, k5, k6 = jax.random.split(key, 6)

    N, C, H, W = 2, 4, 16, 16
    img = jax.random.normal(k1, (N, C, H, W), jnp.float32)
    pos_img = jax.random.normal(k2, (N, C, H, W), jnp.float32)
    neg_img = jax.random.normal(k3, (N, C, H, W), jnp.float32)

    params = {
        # backbone stand-in (deterministic)
        "w_feat": jax.random.normal(k4, (C, FEAT_DIM), jnp.float32) / jnp.sqrt(C * 1.0),
        "b_feat": jnp.zeros((1, FEAT_DIM), jnp.float32),
        # nn.Bilinear(1024*2, 1024*2, 1): weight (1, 2048, 2048), bias (1,).
        # Weight is stored in bf16 ONCE at init so the forward never pays a
        # per-call 16 MiB f32 read + 8 MiB bf16 write cast.
        "w_bil": (jax.random.normal(k5, (1, FEAT_DIM, FEAT_DIM), jnp.float32)
                  / FEAT_DIM).astype(jnp.bfloat16),
        "b_bil": jax.random.normal(k6, (1,), jnp.float32) * 0.01,
    }

    score_pos, score_neg = ssl_model_forward(img, pos_img, neg_img, params)
    jax.block_until_ready((score_pos, score_neg))
    assert score_pos.shape == (N, 1) and score_neg.shape == (N, 1)
    assert bool(jnp.all((score_pos > 0) & (score_pos < 1)))
    assert bool(jnp.all((score_neg > 0) & (score_neg < 1)))
    print("KERNEL_OK")
</pallas_src>

<mosaic_0001>
module attributes {stable_mosaic.version = 11 : i64} {
  func.func @feat_kernel(%arg0: i32, %arg1: i32, %arg2: memref<6x256x4xf32, #tpu.memory_space<vmem>>, %arg3: memref<4x512xf32, #tpu.memory_space<vmem>>, %arg4: memref<1x512xf32, #tpu.memory_space<vmem>>, %arg5: memref<6x1x512xf32, #tpu.memory_space<vmem>>) attributes {dimension_semantics = [#tpu.dimension_semantics<parallel>, #tpu.dimension_semantics<parallel>], iteration_bounds = array<i64: 1, 4>, scalar_prefetch = 0 : i64, scratch_operands = 0 : i64, tpu.core_type = #tpu.core_type<tc>, window_params = [{transform_indices = @transform_0, window_bounds = array<i64: 6, 256, 4>}, {transform_indices = @transform_1, window_bounds = array<i64: 4, 512>}, {transform_indices = @transform_2, window_bounds = array<i64: 1, 512>}, {transform_indices = @transform_3, window_bounds = array<i64: 6, 1, 512>}]} {
    %c0 = arith.constant 0 : index
    %c0_0 = arith.constant 0 : index
    %c0_1 = arith.constant 0 : index
    %0 = vector.load %arg2[%c0, %c0_0, %c0_1] : memref<6x256x4xf32, #tpu.memory_space<vmem>>, vector<6x256x4xf32>
    %1 = vector.shape_cast %0 : vector<6x256x4xf32> to vector<1536x4xf32>
    %c0_2 = arith.constant 0 : index
    %c0_3 = arith.constant 0 : index
    %2 = vector.load %arg3[%c0_2, %c0_3] : memref<4x512xf32, #tpu.memory_space<vmem>>, vector<4x512xf32>
    %cst = arith.constant dense<0.000000e+00> : vector<1536x512xf32>
    %3 = tpu.matmul %1, %2, %cst {dimension_numbers = #tpu.dot_dimension_numbers<[1], [0], [0], [1], [0, 0, 1, 1], [], []>} : vector<1536x4xf32>, vector<4x512xf32>, vector<1536x512xf32> -> vector<1536x512xf32>
    %c0_4 = arith.constant 0 : index
    %c0_5 = arith.constant 0 : index
    %4 = vector.load %arg4[%c0_4, %c0_5] : memref<1x512xf32, #tpu.memory_space<vmem>>, vector<1x512xf32>
    %5 = vector.broadcast %4 : vector<1x512xf32> to vector<1536x512xf32>
    %6 = arith.addf %3, %5 : vector<1536x512xf32>
    %cst_6 = arith.constant 0.000000e+00 : f32
    %7 = vector.broadcast %cst_6 : f32 to vector<1536x512xf32>
    %8 = arith.maximumf %6, %7 : vector<1536x512xf32>
    %9 = vector.shape_cast %8 : vector<1536x512xf32> to vector<6x256x512xf32>
    %cst_7 = arith.constant dense<0.000000e+00> : vector<6x512xf32>
    %10 = vector.multi_reduction <add>, %9, %cst_7 [1] : vector<6x256x512xf32> to vector<6x512xf32>
    %cst_8 = arith.constant 2.560000e+02 : f32
    %11 = vector.broadcast %cst_8 : f32 to vector<6x512xf32>
    %12 = arith.divf %10, %11 : vector<6x512xf32>
    %13 = vector.shape_cast %12 : vector<6x512xf32> to vector<6x1x512xf32>
    %c0_9 = arith.constant 0 : index
    %c0_10 = arith.constant 0 : index
    %c0_11 = arith.constant 0 : index
    %14 = vector.load %arg5[%c0_9, %c0_10, %c0_11] : memref<6x1x512xf32, #tpu.memory_space<vmem>>, vector<6x1x512xf32>
    tpu.vector_store %arg5[%c0_9, %c0_10, %c0_11], %13 {strides = array<i32>} : memref<6x1x512xf32, #tpu.memory_space<vmem>>, vector<6x1x512xf32>,
    return
  }
  func.func @transform_0(%arg0: i32, %arg1: i32) -> (i32, i32, i32) {
    %c0_i32 = arith.constant 0 : i32
    %c0_i32_0 = arith.constant 0 : i32
    %c0_i32_1 = arith.constant 0 : i32
    return %arg0, %c0_i32, %c0_i32_0 : i32, i32, i32
  }
  func.func @transform_1(%arg0: i32, %arg1: i32) -> (i32, i32) {
    %c0_i32 = arith.constant 0 : i32
    %c0_i32_0 = arith.constant 0 : i32
    return %c0_i32, %arg1 : i32, i32
  }
  func.func @transform_2(%arg0: i32, %arg1: i32) -> (i32, i32) {
    %c0_i32 = arith.constant 0 : i32
    %c0_i32_0 = arith.constant 0 : i32
    return %c0_i32, %arg1 : i32, i32
  }
  func.func @transform_3(%arg0: i32, %arg1: i32) -> (i32, i32, i32) {
    %c0_i32 = arith.constant 0 : i32
    %c0_i32_0 = arith.constant 0 : i32
    return %arg0, %c0_i32, %arg1 : i32, i32, i32
  }
}

</mosaic_0001>

<bundles_post_ra>
// kernel: tpu_custom_call.1
= control target key start
LH: loop header
LB: loop body
LE: loop exit
PB: predicated region body
PF: predicated region fallthrough
CT: control target
= control target key end

     0   :  { %8 = vsyncpa [#allocation3], 0  ;;  %s8323_s0 = inlined_call_operand.vmem [shape: f32[6,256,4], index: 0, kind: input, shape index: {}]   ;;  %s8324_s1 = inlined_call_operand.vmem [shape: f32[4,2048], index: 1, kind: input, shape index: {}]   ;;  %s8325_s2 = inlined_call_operand.vmem [shape: f32[1,2048], index: 2, kind: input, shape index: {}]   ;;  %s8326_s3 = inlined_call_operand.hbm [shape: f32[6,1,2048], index: 3, kind: output, shape index: {}]  }
   0x1   :  { %10 = vsyncpa [#allocation3 + $0x1], 0  ;;  %s6021_s12 = smov 0   ;;  %s6023_s13 = smov 0  }
   0x2   :  { %s6025_s14 = smov 0   ;;  %s6027_s15 = smov 0  }
   0x3   :  { %s6029_s16 = smov 0   ;;  %s6031_s17 = smov 0  }
   0x4 LB: > { %s5450_s18 = sadd.s32 4294967295, %s5993_s17   ;;  %s5451_s19 = sadd.s32 4294967294, %s5993_s17   ;;  %s5993_s17 = sphi %s6031_s17, %s16_s17   ;;  %s5989_s16 = sphi %s6029_s16, %s8335_s16   ;;  %s5985_s15 = sphi %s6027_s15, %s8334_s15   ;;  %s5981_s14 = sphi %s6025_s14, %s8333_s14   ;;  %s5977_s13 = sphi %s6023_s13, %s8332_s13   ;;  %s5973_s12 = sphi %s6021_s12, %s8331_s12  }
   0x5   : > { %s25_s20 = sadd.s32 1, %s5989_s16  ;;  %s115_s21 = sadd.s32 1, %s5981_s14 }
   0x6   : > { %p26_p0 = scmp.ge.s32.totalorder %s25_s20, 4  ;;  %p125_p1 = scmp.ne.s32.totalorder %s5981_s14, %s5977_s13 }
   0x7   : > { %p126_p2 = scmp.eq.s32.totalorder %s5450_s18, 3  ;;  %p131_p3 = scmp.ne.s32.totalorder %s5977_s13, %s5973_s12 }
   0x8   : > { %s8337_s20 = smov (%p26_p0, %s25_s20), 0  ;;  %p132_p5 = scmp.eq.s32.totalorder %s5451_s19, 3 }
   0x9   : > { %p6061_p4 = por %p126_p2, %p125_p1  ;;  %s111_s23 = ssub.s32 %s5989_s16, %s8337_s20 }
   0xa   : > { %p5455_p6 = scmp.ge.s32.totalorder %s5993_s17, 1  ;;  %p113_p7 = scmp.eq.s32.totalorder %s111_s23, 0 }
   0xb   : > { %p6068_p8 = por %p132_p5, %p131_p3  ;;  %p177_p9 = scmp.lt.s32.totalorder %s5993_s17, 5 }
   0xc   : > { %s6074_s25 = scalar_select %p113_p7, %s5981_s14, %s115_s21  }
   0xd   : > { %p178_p10 = pnand %p5455_p6, %p177_p9 }
   0xe   : > { %s5456_s26 = sshll.u32 (!%p178_p10), %s5985_s15, 2  ;;  %v5995_v0 = vmov (!%p178_p10), 0.0   ;;  %vm1028_vm0 = vcmask (!%p178_p10), 1043456   ;;  %v231_v5 = vld [vmem:[%s8323_s0] sm:$0xff] (!%p178_p10)  ;;  %vm451_vm1 = vcmask (!%p178_p10), 31744   ;;  %v232_v6 = vld [vmem:[%s8323_s0 + $0x8] sm:$0xff] (!%p178_p10)  ;;  %v427_v56 = vlaneseq (!%p178_p10) }
   0xf   : > { %181 = sbr.rel (%p178_p10) target bundleno = 1053 (0x41d), region = 32  ;;  %p219_p11 = scmp.lt.s32.totalorder (!%p178_p10), %s5456_s26, 15  ;;  %1101 = vmatprep.mubr.f32.mxu0 (!%p178_p10), %v5995_v0  ;;  %2318 = vmatprep.mubr.f32.mxu1 (!%p178_p10), %v5995_v0  ;;  %v233_v7 = vld [vmem:[%s8323_s0 + $0x10] sm:$0xff] (!%p178_p10)  ;;  %v234_v8 = vld [vmem:[%s8323_s0 + $0x18] sm:$0xff] (!%p178_p10)  ;;  %v235_v9 = vld [vmem:[%s8323_s0 + $0x20] sm:$0xff] (!%p178_p10) }
  0x10   : > { %v236_v10 = vld [vmem:[%s8323_s0 + $0x28] sm:$0xff] (!%p178_p10)  ;;  %v237_v11 = vld [vmem:[%s8323_s0 + $0x30] sm:$0xff] (!%p178_p10)  ;;  %v238_v12 = vld [vmem:[%s8323_s0 + $0x38] sm:$0xff] (!%p178_p10)  ;;  %v6446_v58 = vshrl.u32 (!%p178_p10), %v427_v56, 7  ;;  %vm6873_vm2 = vcmp.lt.s32.totalorder (!%p178_p10), %v427_v56, 512  ;;  %s208_s6 = sand.u32 (!%p178_p10), 1, %s5977_s13  }
  0x11   : > { %v239_v13 = vld [vmem:[%s8323_s0 + $0x40] sm:$0xff] (!%p178_p10)  ;;  %v240_v14 = vld [vmem:[%s8323_s0 + $0x48] sm:$0xff] (!%p178_p10)  ;;  %v241_v15 = vld [vmem:[%s8323_s0 + $0x50] sm:$0xff] (!%p178_p10)  ;;  %s6892_s9 = smul.u32 (!%p178_p10), 24, %s208_s6  ;;  %s5851_s28 = sshll.u32 (!%p178_p10), %s5985_s15, 6 }
  0x12   : > { %v242_v16 = vld [vmem:[%s8323_s0 + $0x58] sm:$0xff] (!%p178_p10)  ;;  %v243_v17 = vld [vmem:[%s8323_s0 + $0x60] sm:$0xff] (!%p178_p10)  ;;  %v244_v18 = vld [vmem:[%s8323_s0 + $0x68] sm:$0xff] (!%p178_p10)  ;;  %v429_v60 = vsub.s32 (!%p178_p10), 0, %v6446_v58  ;;  %v437_v61 = vsub.s32 (!%p178_p10), 2, %v6446_v58  ;;  %v433_v63 = vsub.s32 (!%p178_p10), 1, %v6446_v58  ;;  %s8267_s5 = scalar_lea.hbm (!%p178_p10), %s8326_s3, %s5851_s28 }
  0x13   : > { %v245_v19 = vld [vmem:[%s8323_s0 + $0x70] sm:$0xff] (!%p178_p10)  ;;  %v246_v20 = vld [vmem:[%s8323_s0 + $0x78] sm:$0xff] (!%p178_p10)  ;;  %v247_v21 = vld [vmem:[%s8323_s0 + $0x80] sm:$0xff] (!%p178_p10)  ;;  %s6915_s18 = scalar_lea.vmem (!%p178_p10), [#allocation2], %s6892_s9  ;;  %s8277_s15 = scalar_lea.sflag (!%p178_p10), [#allocation3], %s208_s6 }
  0x14   : > { %v248_v22 = vld [vmem:[%s8323_s0 + $0x88] sm:$0xff] (!%p178_p10)  ;;  %v249_v23 = vld [vmem:[%s8323_s0 + $0x90] sm:$0xff] (!%p178_p10)  ;;  %v250_v24 = vld [vmem:[%s8323_s0 + $0x98] sm:$0xff] (!%p178_p10)  ;;  %s5353_s29 = sshll.u32 (!%p178_p10), %s6915_s18, 4  ;;  %s5997_s8 = smov (!%p178_p10), [#allocation2]   ;;  %s8269_s29 = int_to_ptr.vmem [resolvable:$true] %s5353_s29 }
  0x15   : > { %v251_v25 = vld [vmem:[%s8323_s0 + $0xa0] sm:$0xff] (!%p178_p10)  ;;  %v252_v26 = vld [vmem:[%s8323_s0 + $0xa8] sm:$0xff] (!%p178_p10)  ;;  %v253_v27 = vld [vmem:[%s8323_s0 + $0xb0] sm:$0xff] (!%p178_p10)  ;;  %s5915_s7 = scalar_lea.vmem (!%p178_p10), %s8269_s29, 384  ;;  %s5919_s9 = sshll.u32 (!%p178_p10), %s5997_s8, 4  ;;  %s5920_s9 = int_to_ptr.vmem [resolvable:$false] %s5919_s9 }
  0x16   : > { %s8339_s26 = smov (!%p219_p11, %s5456_s26), 15  ;;  %v254_v28 = vld [vmem:[%s8323_s0 + $0xb8] sm:$0xff]  ;;  %v255_v29 = vld [vmem:[%s8323_s0 + $0xc0] sm:$0xff]  ;;  %v256_v30 = vld [vmem:[%s8323_s0 + $0xc8] sm:$0xff]  ;;  %p5916_p12 = scmp.ne.s32.totalorder %s8269_s29, %s5915_s7 }
  0x17   : > { %s5457_s27 = sshll.u32 %s8339_s26, 2  ;;  %v257_v31 = vld [vmem:[%s8323_s0 + $0xd0] sm:$0xff]  ;;  %v258_v32 = vld [vmem:[%s8323_s0 + $0xd8] sm:$0xff]  ;;  %v259_v33 = vld [vmem:[%s8323_s0 + $0xe0] sm:$0xff]  ;;  %s227_s21 = scalar_lea.vmem %s8325_s2, %s8339_s26 }
  0x18   : > { %s222_s30 = scalar_lea.vmem %s8324_s1, %s5457_s27  ;;  %v260_v34 = vld [vmem:[%s8323_s0 + $0xe8] sm:$0xff]  ;;  %v261_v35 = vld [vmem:[%s8323_s0 + $0xf0] sm:$0xff]  ;;  %v262_v36 = vld [vmem:[%s8323_s0 + $0xf8] sm:$0xff]  ;;  %p5917_p13 = pnand %p5916_p12, %p6061_p4 }
  0x19   : > { %v423_v1 = vld [vmem:[%s222_s30] sm:$0xff]  ;;  %v424_v2 = vld [vmem:[%s222_s30 + $0x8] sm:$0xff]  ;;  %v265_v39 = vld [vmem:[%s8323_s0 + $0x110] sm:$0xff]  ;;  %s5921_s10 = scalar_lea.vmem %s5920_s9, 768  ;;  %p5922_p1 = scmp.lt.s32.totalorder %s8269_s29, %s5920_s9 }
  0x1a   : > { %v449_v3 = vcombine.high %v423_v1, %v423_v1  ;;  %v450_v4 = vcombine.high %v424_v2, %v424_v2  ;;  %v263_v37 = vld [vmem:[%s8323_s0 + $0x100] sm:$0xff]  ;;  %v264_v38 = vld [vmem:[%s8323_s0 + $0x108] sm:$0xff]  ;;  %v266_v40 = vld [vmem:[%s8323_s0 + $0x118] sm:$0xff]  ;;  %p5918_p0 = pneg %p5917_p13  ;;  %p5923_p2 = scmp.lt.s32.totalorder %s5921_s10, %s5915_s7 }
  0x1b   : > { %v267_v41 = vld [vmem:[%s8323_s0 + $0x120] sm:$0xff]  ;;  %v268_v42 = vld [vmem:[%s8323_s0 + $0x128] sm:$0xff]  ;;  %v269_v43 = vld [vmem:[%s8323_s0 + $0x130] sm:$0xff] }
  0x1c   : > { %5459 = vmatprep.subr.msk.mxu0 %vm1028_vm0, %v449_v3  ;;  %5653 = vmatprep.subr.msk.mxu1 %vm1028_vm0, %v450_v4  ;;  %v270_v44 = vld [vmem:[%s8323_s0 + $0x138] sm:$0xff]  ;;  %v271_v45 = vld [vmem:[%s8323_s0 + $0x140] sm:$0xff]  ;;  %v272_v46 = vld [vmem:[%s8323_s0 + $0x148] sm:$0xff]  ;;  %p5924_p3 = por %p5923_p2, %p5922_p1 }
  0x1d   : > { %5460 = vmatpush1.msk.msra.mxu0 %vm1028_vm0, %v423_v1  ;;  %5654 = vmatpush1.msk.msra.mxu1 %vm1028_vm0, %v424_v2  ;;  %v273_v47 = vld [vmem:[%s8323_s0 + $0x150] sm:$0xff]  ;;  %v274_v48 = vld [vmem:[%s8323_s0 + $0x158] sm:$0xff]  ;;  %v275_v49 = vld [vmem:[%s8323_s0 + $0x160] sm:$0xff]  ;;  %v441_v1 = vsub.s32 3, %v6446_v58 }
  0x1e   : > { %5461 = vmatmul.mubr.msk.f32.vlgmr.msra.gmra.mrb[0].mxu0 %vm451_vm1, %v231_v5  ;;  %5655 = vmatmul.mubr.msk.f32.vlgmr.msra.gmra.mrb[0].mxu1 %vm451_vm1, %v231_v5  ;;  %v276_v50 = vld [vmem:[%s8323_s0 + $0x168] sm:$0xff]  ;;  %v277_v51 = vld [vmem:[%s8323_s0 + $0x170] sm:$0xff]  ;;  %v278_v52 = vld [vmem:[%s8323_s0 + $0x178] sm:$0xff]  ;;  %p5925_p5 = pnand %p5924_p3, %p5918_p0 }
  0x1f   : > { %1107 = vmatprep.mubr.f32.mxu0 %v5995_v0  ;;  %2324 = vmatprep.mubr.f32.mxu1 %v5995_v0  ;;  %v279_v53 = vld [vmem:[%s8323_s0 + $0x180] sm:$0xff]  ;;  %v280_v54 = vld [vmem:[%s8323_s0 + $0x188] sm:$0xff]  ;;  %v281_v55 = vld [vmem:[%s8323_s0 + $0x190] sm:$0xff] }
  0x20   : > { %v282_v57 = vld [vmem:[%s8323_s0 + $0x198] sm:$0xff]  ;;  %v283_v59 = vld [vmem:[%s8323_s0 + $0x1a0] sm:$0xff]  ;;  %v284_v2 = vld [vmem:[%s8323_s0 + $0x1a8] sm:$0xff] }
  0x21   : > { %v425_v62 = vld [vmem:[%s227_s21] sm:$0xf] }
  0x22   : > { %5462 = vmatmul.mubr.msk.f32.gmra.mrb[2].mxu0 %vm451_vm1, %v232_v6  ;;  %5656 = vmatmul.mubr.msk.f32.gmra.mrb[2].mxu1 %vm451_vm1, %v232_v6  ;;  %v6470_v3 = vrot.slane %v425_v62, %v429_v60  ;;  %v6472_v4 = vrot.slane %v425_v62, %v437_v61  ;;  %v6474_v5 = vrot.slane %v425_v62, %v433_v63 }
  0x23   : > { %1113 = vmatprep.mubr.f32.mxu0 %v5995_v0  ;;  %2330 = vmatprep.mubr.f32.mxu1 %v5995_v0  ;;  %v6476_v6 = vrot.slane %v425_v62, %v441_v1  ;;  %v288_v1 = vld [vmem:[%s8323_s0 + $0x1c8] sm:$0xff] }
  0x26   : > { %5463 = vmatmul.mubr.msk.f32.gmra.mrb[4].mxu0 %vm451_vm1, %v233_v7  ;;  %5657 = vmatmul.mubr.msk.f32.gmra.mrb[4].mxu1 %vm451_vm1, %v233_v7 }
  0x27   : > { %1119 = vmatprep.mubr.f32.mxu0 %v5995_v0  ;;  %2336 = vmatprep.mubr.f32.mxu1 %v5995_v0 }
  0x2a   : > { %5464 = vmatmul.mubr.msk.f32.gmra.mrb[6].mxu0 %vm451_vm1, %v234_v8  ;;  %5658 = vmatmul.mubr.msk.f32.gmra.mrb[6].mxu1 %vm451_vm1, %v234_v8 }
  0x2b   : > { %1125 = vmatprep.mubr.f32.mxu0 %v5995_v0  ;;  %2342 = vmatprep.mubr.f32.mxu1 %v5995_v0 }
  0x2e   : > { %5465 = vmatmul.mubr.msk.f32.gmra.mrb[8].mxu0 %vm451_vm1, %v235_v9  ;;  %5659 = vmatmul.mubr.msk.f32.gmra.mrb[8].mxu1 %vm451_vm1, %v235_v9 }
  0x2f   : > { %1131 = vmatprep.mubr.f32.mxu0 %v5995_v0  ;;  %2348 = vmatprep.mubr.f32.mxu1 %v5995_v0 }
  0x32   : > { %5466 = vmatmul.mubr.msk.f32.gmra.mrb[10].mxu0 %vm451_vm1, %v236_v10  ;;  %5660 = vmatmul.mubr.msk.f32.gmra.mrb[10].mxu1 %vm451_vm1, %v236_v10 }
  0x33   : > { %1137 = vmatprep.mubr.f32.mxu0 %v5995_v0  ;;  %2354 = vmatprep.mubr.f32.mxu1 %v5995_v0 }
  0x36   : > { %5467 = vmatmul.mubr.msk.f32.gmra.mrb[12].mxu0 %vm451_vm1, %v237_v11  ;;  %5661 = vmatmul.mubr.msk.f32.gmra.mrb[12].mxu1 %vm451_vm1, %v237_v11  ;;  %v285_v11 = vld [vmem:[%s8323_s0 + $0x1b0] sm:$0xff] }
  0x37   : > { %1143 = vmatprep.mubr.f32.mxu0 %v5995_v0  ;;  %2360 = vmatprep.mubr.f32.mxu1 %v5995_v0 }
  0x3a   : > { %5468 = vmatmul.mubr.msk.f32.gmra.mrb[14].mxu0 %vm451_vm1, %v238_v12  ;;  %5662 = vmatmul.mubr.msk.f32.gmra.mrb[14].mxu1 %vm451_vm1, %v238_v12 }
  0x3b   : > { %1149 = vmatprep.mubr.f32.mxu0 %v5995_v0  ;;  %2366 = vmatprep.mubr.f32.mxu1 %v5995_v0 }
  0x3e   : > { %5469 = vmatmul.mubr.msk.f32.gmra.mrb[16].mxu0 %vm451_vm1, %v239_v13  ;;  %5663 = vmatmul.mubr.msk.f32.gmra.mrb[16].mxu1 %vm451_vm1, %v239_v13 }
  0x3f   : > { %1155 = vmatprep.mubr.f32.mxu0 %v5995_v0  ;;  %2372 = vmatprep.mubr.f32.mxu1 %v5995_v0 }
  0x42   : > { %5470 = vmatmul.mubr.msk.f32.gmra.mrb[18].mxu0 %vm451_vm1, %v240_v14  ;;  %5664 = vmatmul.mubr.msk.f32.gmra.mrb[18].mxu1 %vm451_vm1, %v240_v14 }
  0x43   : > { %1161 = vmatprep.mubr.f32.mxu0 %v5995_v0  ;;  %2378 = vmatprep.mubr.f32.mxu1 %v5995_v0 }
  0x46   : > { %5471 = vmatmul.mubr.msk.f32.gmra.mrb[20].mxu0 %vm451_vm1, %v241_v15  ;;  %5665 = vmatmul.mubr.msk.f32.gmra.mrb[20].mxu1 %vm451_vm1, %v241_v15 }
  0x47   : > { %1167 = vmatprep.mubr.f32.mxu0 %v5995_v0  ;;  %2384 = vmatprep.mubr.f32.mxu1 %v5995_v0 }
  0x4a   : > { %5472 = vmatmul.mubr.msk.f32.gmra.mrb[22].mxu0 %vm451_vm1, %v242_v16  ;;  %5666 = vmatmul.mubr.msk.f32.gmra.mrb[22].mxu1 %vm451_vm1, %v242_v16 }
  0x4b   : > { %1173 = vmatprep.mubr.f32.mxu0 %v5995_v0  ;;  %2390 = vmatprep.mubr.f32.mxu1 %v5995_v0 }
  0x4e   : > { %5473 = vmatmul.mubr.msk.f32.gmra.mrb[24].mxu0 %vm451_vm1, %v243_v17  ;;  %5667 = vmatmul.mubr.msk.f32.gmra.mrb[24].mxu1 %vm451_vm1, %v243_v17 }
  0x4f   : > { %1179 = vmatprep.mubr.f32.mxu0 %v5995_v0  ;;  %2396 = vmatprep.mubr.f32.mxu1 %v5995_v0 }
  0x52   : > { %5474 = vmatmul.mubr.msk.f32.gmra.mrb[26].mxu0 %vm451_vm1, %v244_v18  ;;  %5668 = vmatmul.mubr.msk.f32.gmra.mrb[26].mxu1 %vm451_vm1, %v244_v18 }
  0x53   : > { %1185 = vmatprep.mubr.f32.mxu0 %v5995_v0  ;;  %2402 = vmatprep.mubr.f32.mxu1 %v5995_v0 }
  0x56   : > { %5475 = vmatmul.mubr.msk.f32.gmra.mrb[28].mxu0 %vm451_vm1, %v245_v19  ;;  %5669 = vmatmul.mubr.msk.f32.gmra.mrb[28].mxu1 %vm451_vm1, %v245_v19 }
  0x57   : > { %1191 = vmatprep.mubr.f32.mxu0 %v5995_v0  ;;  %2408 = vmatprep.mubr.f32.mxu1 %v5995_v0 }
  0x5a   : > { %5476 = vmatmul.mubr.msk.f32.gmra.mrb[30].mxu0 %vm451_vm1, %v246_v20  ;;  %5670 = vmatmul.mubr.msk.f32.gmra.mrb[30].mxu1 %vm451_vm1, %v246_v20 }
  0x5b   : > { %1197 = vmatprep.mubr.f32.mxu0 %v5995_v0  ;;  %2414 = vmatprep.mubr.f32.mxu1 %v5995_v0 }
  0x5e   : > { %5477 = vmatmul.mubr.msk.f32.gmra.mrb[32].mxu0 %vm451_vm1, %v247_v21  ;;  %5671 = vmatmul.mubr.msk.f32.gmra.mrb[32].mxu1 %vm451_vm1, %v247_v21 }
  0x5f   : > { %1203 = vmatprep.mubr.f32.mxu0 %v5995_v0  ;;  %2420 = vmatprep.mubr.f32.mxu1 %v5995_v0 }
  0x62   : > { %5478 = vmatmul.mubr.msk.f32.gmra.mrb[34].mxu0 %vm451_vm1, %v248_v22  ;;  %5672 = vmatmul.mubr.msk.f32.gmra.mrb[34].mxu1 %vm451_vm1, %v248_v22 }
  0x63   : > { %1209 = vmatprep.mubr.f32.mxu0 %v5995_v0  ;;  %2426 = vmatprep.mubr.f32.mxu1 %v5995_v0 }
  0x66   : > { %5479 = vmatmul.mubr.msk.f32.gmra.mrb[36].mxu0 %vm451_vm1, %v249_v23  ;;  %5673 = vmatmul.mubr.msk.f32.gmra.mrb[36].mxu1 %vm451_vm1, %v249_v23 }
  0x67   : > { %1215 = vmatprep.mubr.f32.mxu0 %v5995_v0  ;;  %2432 = vmatprep.mubr.f32.mxu1 %v5995_v0 }
  0x6a   : > { %5480 = vmatmul.mubr.msk.f32.gmra.mrb[38].mxu0 %vm451_vm1, %v250_v24  ;;  %5674 = vmatmul.mubr.msk.f32.gmra.mrb[38].mxu1 %vm451_vm1, %v250_v24  ;;  %v286_v24 = vld [vmem:[%s8323_s0 + $0x1b8] sm:$0xff] }
  0x6b   : > { %1221 = vmatprep.mubr.f32.mxu0 %v5995_v0  ;;  %2438 = vmatprep.mubr.f32.mxu1 %v5995_v0 }
  0x6e   : > { %5481 = vmatmul.mubr.msk.f32.gmra.mrb[40].mxu0 %vm451_vm1, %v251_v25  ;;  %5675 = vmatmul.mubr.msk.f32.gmra.mrb[40].mxu1 %vm451_vm1, %v251_v25 }
  0x6f   : > { %1227 = vmatprep.mubr.f32.mxu0 %v5995_v0  ;;  %2444 = vmatprep.mubr.f32.mxu1 %v5995_v0 }
  0x72   : > { %5482 = vmatmul.mubr.msk.f32.gmra.mrb[42].mxu0 %vm451_vm1, %v252_v26  ;;  %5676 = vmatmul.mubr.msk.f32.gmra.mrb[42].mxu1 %vm451_vm1, %v252_v26 }
  0x73   : > { %1233 = vmatprep.mubr.f32.mxu0 %v5995_v0  ;;  %2450 = vmatprep.mubr.f32.mxu1 %v5995_v0 }
  0x76   : > { %5483 = vmatmul.mubr.msk.f32.gmra.mrb[44].mxu0 %vm451_vm1, %v253_v27  ;;  %5677 = vmatmul.mubr.msk.f32.gmra.mrb[44].mxu1 %vm451_vm1, %v253_v27 }
  0x77   : > { %1239 = vmatprep.mubr.f32.mxu0 %v5995_v0  ;;  %2456 = vmatprep.mubr.f32.mxu1 %v5995_v0 }
  0x7a   : > { %5484 = vmatmul.mubr.msk.f32.gmra.mrb[46].mxu0 %vm451_vm1, %v254_v28  ;;  %5678 = vmatmul.mubr.msk.f32.gmra.mrb[46].mxu1 %vm451_vm1, %v254_v28 }
  0x7b   : > { %1245 = vmatprep.mubr.f32.mxu0 %v5995_v0  ;;  %2462 = vmatprep.mubr.f32.mxu1 %v5995_v0 }
  0x7e   : > { %5485 = vmatmul.mubr.msk.f32.gmra.mrb[48].mxu0 %vm451_vm1, %v255_v29  ;;  %5679 = vmatmul.mubr.msk.f32.gmra.mrb[48].mxu1 %vm451_vm1, %v255_v29 }
  0x7f   : > { %1251 = vmatprep.mubr.f32.mxu0 %v5995_v0  ;;  %2468 = vmatprep.mubr.f32.mxu1 %v5995_v0 }
  0x82   : > { %5486 = vmatmul.mubr.msk.f32.gmra.mrb[50].mxu0 %vm451_vm1, %v256_v30  ;;  %5680 = vmatmul.mubr.msk.f32.gmra.mrb[50].mxu1 %vm451_vm1, %v256_v30 }
  0x83   : > { %1257 = vmatprep.mubr.f32.mxu0 %v5995_v0  ;;  %2474 = vmatprep.mubr.f32.mxu1 %v5995_v0 }
  0x86   : > { %5487 = vmatmul.mubr.msk.f32.gmra.mrb[52].mxu0 %vm451_vm1, %v257_v31  ;;  %5681 = vmatmul.mubr.msk.f32.gmra.mrb[52].mxu1 %vm451_vm1, %v257_v31 }
  0x87   : > { %1263 = vmatprep.mubr.f32.mxu0 %v5995_v0  ;;  %2480 = vmatprep.mubr.f32.mxu1 %v5995_v0 }
  0x8a   : > { %5488 = vmatmul.mubr.msk.f32.gmra.mrb[54].mxu0 %vm451_vm1, %v258_v32  ;;  %5682 = vmatmul.mubr.msk.f32.gmra.mrb[54].mxu1 %vm451_vm1, %v258_v32 }
  0x8b   : > { %1269 = vmatprep.mubr.f32.mxu0 %v5995_v0  ;;  %2486 = vmatprep.mubr.f32.mxu1 %v5995_v0 }
  0x8e   : > { %5489 = vmatmul.mubr.msk.f32.gmra.mrb[56].mxu0 %vm451_vm1, %v259_v33  ;;  %5683 = vmatmul.mubr.msk.f32.gmra.mrb[56].mxu1 %vm451_vm1, %v259_v33 }
  0x8f   : > { %1275 = vmatprep.mubr.f32.mxu0 %v5995_v0  ;;  %2492 = vmatprep.mubr.f32.mxu1 %v5995_v0 }
  0x92   : > { %5490 = vmatmul.mubr.msk.f32.gmra.mrb[58].mxu0 %vm451_vm1, %v260_v34  ;;  %5684 = vmatmul.mubr.msk.f32.gmra.mrb[58].mxu1 %vm451_vm1, %v260_v34 }
  0x93   : > { %1281 = vmatprep.mubr.f32.mxu0 %v5995_v0  ;;  %2498 = vmatprep.mubr.f32.mxu1 %v5995_v0 }
  0x96   : > { %5491 = vmatmul.mubr.msk.f32.gmra.mrb[60].mxu0 %vm451_vm1, %v261_v35  ;;  %5685 = vmatmul.mubr.msk.f32.gmra.mrb[60].mxu1 %vm451_vm1, %v261_v35 }
  0x97   : > { %1287 = vmatprep.mubr.f32.mxu0 %v5995_v0  ;;  %2504 = vmatprep.mubr.f32.mxu1 %v5995_v0 }
  0x9a   : > { %5492 = vmatmul.mubr.msk.f32.gmra.mrb[62].mxu0 %vm451_vm1, %v262_v36  ;;  %5686 = vmatmul.mubr.msk.f32.gmra.mrb[62].mxu1 %vm451_vm1, %v262_v36 }
  0x9b   : > { %1293 = vmatprep.mubr.f32.mxu0 %v5995_v0  ;;  %2510 = vmatprep.mubr.f32.mxu1 %v5995_v0 }
  0x9e   : > { %5493 = vmatmul.mubr.msk.f32.gmra.mrb[64].mxu0 %vm451_vm1, %v263_v37  ;;  %5687 = vmatmul.mubr.msk.f32.gmra.mrb[64].mxu1 %vm451_vm1, %v263_v37 }
  0x9f   : > { %1299 = vmatprep.mubr.f32.mxu0 %v5995_v0  ;;  %2516 = vmatprep.mubr.f32.mxu1 %v5995_v0 }
  0xa2   : > { %5494 = vmatmul.mubr.msk.f32.gmra.mrb[66].mxu0 %vm451_vm1, %v264_v38  ;;  %5688 = vmatmul.mubr.msk.f32.gmra.mrb[66].mxu1 %vm451_vm1, %v264_v38 }
  0xa3   : > { %1305 = vmatprep.mubr.f32.mxu0 %v5995_v0  ;;  %2522 = vmatprep.mubr.f32.mxu1 %v5995_v0 }
  0xa6   : > { %5495 = vmatmul.mubr.msk.f32.gmra.mrb[68].mxu0 %vm451_vm1, %v265_v39  ;;  %5689 = vmatmul.mubr.msk.f32.gmra.mrb[68].mxu1 %vm451_vm1, %v265_v39 }
  0xa7   : > { %1311 = vmatprep.mubr.f32.mxu0 %v5995_v0  ;;  %2528 = vmatprep.mubr.f32.mxu1 %v5995_v0 }
  0xaa   : > { %5496 = vmatmul.mubr.msk.f32.gmra.mrb[70].mxu0 %vm451_vm1, %v266_v40  ;;  %5690 = vmatmul.mubr.msk.f32.gmra.mrb[70].mxu1 %vm451_vm1, %v266_v40 }
  0xab   : > { %1317 = vmatprep.mubr.f32.mxu0 %v5995_v0  ;;  %2534 = vmatprep.mubr.f32.mxu1 %v5995_v0 }
  0xae   : > { %5497 = vmatmul.mubr.msk.f32.gmra.mrb[72].mxu0 %vm451_vm1, %v267_v41  ;;  %5691 = vmatmul.mubr.msk.f32.gmra.mrb[72].mxu1 %vm451_vm1, %v267_v41 }
  0xaf   : > { %1323 = vmatprep.mubr.f32.mxu0 %v5995_v0  ;;  %2540 = vmatprep.mubr.f32.mxu1 %v5995_v0 }
  0xb2   : > { %5498 = vmatmul.mubr.msk.f32.gmra.mrb[74].mxu0 %vm451_vm1, %v268_v42  ;;  %5692 = vmatmul.mubr.msk.f32.gmra.mrb[74].mxu1 %vm451_vm1, %v268_v42 }
  0xb3   : > { %1329 = vmatprep.mubr.f32.mxu0 %v5995_v0  ;;  %2546 = vmatprep.mubr.f32.mxu1 %v5995_v0 }
  0xb6   : > { %5499 = vmatmul.mubr.msk.f32.gmra.mrb[76].mxu0 %vm451_vm1, %v269_v43  ;;  %5693 = vmatmul.mubr.msk.f32.gmra.mrb[76].mxu1 %vm451_vm1, %v269_v43 }
  0xb7   : > { %1335 = vmatprep.mubr.f32.mxu0 %v5995_v0  ;;  %2552 = vmatprep.mubr.f32.mxu1 %v5995_v0 }
  0xba   : > { %5500 = vmatmul.mubr.msk.f32.gmra.mrb[78].mxu0 %vm451_vm1, %v270_v44  ;;  %5694 = vmatmul.mubr.msk.f32.gmra.mrb[78].mxu1 %vm451_vm1, %v270_v44 }
  0xbb   : > { %1341 = vmatprep.mubr.f32.mxu0 %v5995_v0  ;;  %2558 = vmatprep.mubr.f32.mxu1 %v5995_v0 }
  0xbe   : > { %5501 = vmatmul.mubr.msk.f32.gmra.mrb[80].mxu0 %vm451_vm1, %v271_v45  ;;  %5695 = vmatmul.mubr.msk.f32.gmra.mrb[80].mxu1 %vm451_vm1, %v271_v45  ;;  %v287_v45 = vld [vmem:[%s8323_s0 + $0x1c0] sm:$0xff] }
  0xbf   : > { %1347 = vmatprep.mubr.f32.mxu0 %v5995_v0  ;;  %2564 = vmatprep.mubr.f32.mxu1 %v5995_v0 }
  0xc2   : > { %5502 = vmatmul.mubr.msk.f32.gmra.mrb[82].mxu0 %vm451_vm1, %v272_v46  ;;  %5696 = vmatmul.mubr.msk.f32.gmra.mrb[82].mxu1 %vm451_vm1, %v272_v46 }
  0xc3   : > { %1353 = vmatprep.mubr.f32.mxu0 %v5995_v0  ;;  %2570 = vmatprep.mubr.f32.mxu1 %v5995_v0 }
  0xc6   : > { %5503 = vmatmul.mubr.msk.f32.gmra.mrb[84].mxu0 %vm451_vm1, %v273_v47  ;;  %5697 = vmatmul.mubr.msk.f32.gmra.mrb[84].mxu1 %vm451_vm1, %v273_v47 }
  0xc7   : > { %1359 = vmatprep.mubr.f32.mxu0 %v5995_v0  ;;  %2576 = vmatprep.mubr.f32.mxu1 %v5995_v0 }
  0xca   : > { %5504 = vmatmul.mubr.msk.f32.gmra.mrb[86].mxu0 %vm451_vm1, %v274_v48  ;;  %5698 = vmatmul.mubr.msk.f32.gmra.mrb[86].mxu1 %vm451_vm1, %v274_v48 }
  0xcb   : > { %1365 = vmatprep.mubr.f32.mxu0 %v5995_v0  ;;  %2582 = vmatprep.mubr.f32.mxu1 %v5995_v0 }
  0xce   : > { %5505 = vmatmul.mubr.msk.f32.gmra.mrb[88].mxu0 %vm451_vm1, %v275_v49  ;;  %5699 = vmatmul.mubr.msk.f32.gmra.mrb[88].mxu1 %vm451_vm1, %v275_v49 }
  0xcf   : > { %1371 = vmatprep.mubr.f32.mxu0 %v5995_v0  ;;  %2588 = vmatprep.mubr.f32.mxu1 %v5995_v0 }
  0xd2   : > { %5506 = vmatmul.mubr.msk.f32.gmra.mrb[90].mxu0 %vm451_vm1, %v276_v50  ;;  %5700 = vmatmul.mubr.msk.f32.gmra.mrb[90].mxu1 %vm451_vm1, %v276_v50 }
  0xd3   : > { %1377 = vmatprep.mubr.f32.mxu0 %v5995_v0  ;;  %2594 = vmatprep.mubr.f32.mxu1 %v5995_v0 }
  0xd6   : > { %5507 = vmatmul.mubr.msk.f32.gmra.mrb[92].mxu0 %vm451_vm1, %v277_v51  ;;  %5701 = vmatmul.mubr.msk.f32.gmra.mrb[92].mxu1 %vm451_vm1, %v277_v51 }
  0xd7   : > { %1383 = vmatprep.mubr.f32.mxu0 %v5995_v0  ;;  %2600 = vmatprep.mubr.f32.mxu1 %v5995_v0 }
  0xda   : > { %5508 = vmatmul.mubr.msk.f32.gmra.mrb[94].mxu0 %vm451_vm1, %v278_v52  ;;  %5702 = vmatmul.mubr.msk.f32.gmra.mrb[94].mxu1 %vm451_vm1, %v278_v52 }
  0xdb   : > { %1389 = vmatprep.mubr.f32.mxu0 %v5995_v0  ;;  %2606 = vmatprep.mubr.f32.mxu1 %v5995_v0 }
  0xde   : > { %5509 = vmatmul.mubr.msk.f32.gmra.mrb[96].mxu0 %vm451_vm1, %v279_v53  ;;  %5703 = vmatmul.mubr.msk.f32.gmra.mrb[96].mxu1 %vm451_vm1, %v279_v53 }
  0xdf   : > { %1395 = vmatprep.mubr.f32.mxu0 %v5995_v0  ;;  %2612 = vmatprep.mubr.f32.mxu1 %v5995_v0 }
  0xe2   : > { %5510 = vmatmul.mubr.msk.f32.gmra.mrb[98].mxu0 %vm451_vm1, %v280_v54  ;;  %5704 = vmatmul.mubr.msk.f32.gmra.mrb[98].mxu1 %vm451_vm1, %v280_v54 }
  0xe3   : > { %1401 = vmatprep.mubr.f32.mxu0 %v5995_v0  ;;  %2618 = vmatprep.mubr.f32.mxu1 %v5995_v0 }
  0xe6   : > { %5511 = vmatmul.mubr.msk.f32.gmra.mrb[100].mxu0 %vm451_vm1, %v281_v55  ;;  %5705 = vmatmul.mubr.msk.f32.gmra.mrb[100].mxu1 %vm451_vm1, %v281_v55 }
  0xe7   : > { %1407 = vmatprep.mubr.f32.mxu0 %v5995_v0  ;;  %2624 = vmatprep.mubr.f32.mxu1 %v5995_v0 }
  0xea   : > { %5512 = vmatmul.mubr.msk.f32.gmra.mrb[102].mxu0 %vm451_vm1, %v282_v57  ;;  %5706 = vmatmul.mubr.msk.f32.gmra.mrb[102].mxu1 %vm451_vm1, %v282_v57 }
  0xeb   : > { %1413 = vmatprep.mubr.f32.mxu0 %v5995_v0  ;;  %2630 = vmatprep.mubr.f32.mxu1 %v5995_v0 }
  0xee   : > { %5513 = vmatmul.mubr.msk.f32.gmra.mrb[104].mxu0 %vm451_vm1, %v283_v59  ;;  %5707 = vmatmul.mubr.msk.f32.gmra.mrb[104].mxu1 %vm451_vm1, %v283_v59 }
  0xef   : > { %1419 = vmatprep.mubr.f32.mxu0 %v5995_v0  ;;  %2636 = vmatprep.mubr.f32.mxu1 %v5995_v0 }
  0xf1   : > { %v1103_v7 = vpop.f32.mrb[0].mxu0  ;;  %v2320_v8 = vpop.f32.mrb[0].mxu1 }
  0xf2   : > { %v1105_v9 = vpop.f32.mrb[1].mxu0  ;;  %5514 = vmatmul.mubr.msk.f32.gmra.mrb[106].mxu0 %vm451_vm1, %v284_v2  ;;  %v2322_v10 = vpop.f32.mrb[1].mxu1  ;;  %5708 = vmatmul.mubr.msk.f32.gmra.mrb[106].mxu1 %vm451_vm1, %v284_v2  ;;  %v1104_v12 = vadd.f32 %v1103_v7, %v6470_v3  ;;  %v2321_v13 = vadd.f32 %v2320_v8, %v6472_v4 }
  0xf3   : > { %1425 = vmatprep.mubr.f32.mxu0 %v5995_v0  ;;  %2642 = vmatprep.mubr.f32.mxu1 %v5995_v0  ;;  %v1106_v14 = vadd.f32 %v1105_v9, %v6474_v5  ;;  %v2323_v15 = vadd.f32 %v2322_v10, %v6476_v6 }
  0xf4   : > { %v3471_v25 = vmax.f32 %v1104_v12, 0.0  ;;  %v3473_v26 = vmax.f32 %v2321_v13, 0.0 }
  0xf5   : > { %v1109_v16 = vpop.f32.mrb[2].mxu0  ;;  %v2326_v17 = vpop.f32.mrb[2].mxu1  ;;  %v3472_v29 = vmax.f32 %v1106_v14, 0.0  ;;  %v3474_v30 = vmax.f32 %v2323_v15, 0.0 }
  0xf6   : > { %v1110_v18 = vadd.f32 %v1109_v16, %v6470_v3  ;;  %v2327_v19 = vadd.f32 %v2326_v17, %v6472_v4  ;;  %v1111_v20 = vpop.f32.mrb[3].mxu0  ;;  %5515 = vmatmul.mubr.msk.f32.gmra.mrb[108].mxu0 %vm451_vm1, %v285_v11  ;;  %v2328_v21 = vpop.f32.mrb[3].mxu1  ;;  %5709 = vmatmul.mubr.msk.f32.gmra.mrb[108].mxu1 %vm451_vm1, %v285_v11 }
  0xf7   : > { %v1112_v22 = vadd.f32 %v1111_v20, %v6474_v5  ;;  %v2329_v23 = vadd.f32 %v2328_v21, %v6476_v6  ;;  %1431 = vmatprep.mubr.f32.mxu0 %v5995_v0  ;;  %2648 = vmatprep.mubr.f32.mxu1 %v5995_v0 }
  0xf8   : > { %v3475_v27 = vmax.f32 %v1110_v18, 0.0  ;;  %v3477_v28 = vmax.f32 %v2327_v19, 0.0 }
  0xf9   : > { %v3476_v31 = vmax.f32 %v1112_v22, 0.0  ;;  %v3478_v32 = vmax.f32 %v2329_v23, 0.0  ;;  %v1115_v33 = vpop.f32.mrb[4].mxu0  ;;  %v2332_v34 = vpop.f32.mrb[4].mxu1  ;;  %v289_v22 = vld [vmem:[%s8323_s0 + $0x1d0] sm:$0xff] }
  0xfa   : > { %v4239_v35 = vadd.f32 %v3475_v27, %v3471_v25  ;;  %v4313_v36 = vadd.f32 %v3477_v28, %v3473_v26  ;;  %v1116_v37 = vadd.f32 %v1115_v33, %v6470_v3  ;;  %v2333_v38 = vadd.f32 %v2332_v34, %v6472_v4  ;;  %v1117_v39 = vpop.f32.mrb[5].mxu0  ;;  %5516 = vmatmul.mubr.msk.f32.gmra.mrb[110].mxu0 %vm451_vm1, %v286_v24  ;;  %v2334_v40 = vpop.f32.mrb[5].mxu1 }
  0xfb   : > { %v4276_v41 = vadd.f32 %v3476_v31, %v3472_v29  ;;  %v4350_v42 = vadd.f32 %v3478_v32, %v3474_v30  ;;  %v1118_v43 = vadd.f32 %v1117_v39, %v6474_v5  ;;  %v2335_v44 = vadd.f32 %v2334_v40, %v6476_v6  ;;  %5710 = vmatmul.mubr.msk.f32.gmra.mrb[110].mxu1 %vm451_vm1, %v286_v24  ;;  %v290_v39 = vld [vmem:[%s8323_s0 + $0x1d8] sm:$0xff] }
  0xfc   : > { %v3479_v46 = vmax.f32 %v1116_v37, 0.0  ;;  %v3481_v47 = vmax.f32 %v2333_v38, 0.0  ;;  %1437 = vmatprep.mubr.f32.mxu0 %v5995_v0  ;;  %2654 = vmatprep.mubr.f32.mxu1 %v5995_v0 }
  0xfd   : > { %v3480_v48 = vmax.f32 %v1118_v43, 0.0  ;;  %v3482_v49 = vmax.f32 %v2335_v44, 0.0  ;;  %v1121_v50 = vpop.f32.mrb[6].mxu0  ;;  %v2338_v51 = vpop.f32.mrb[6].mxu1 }
  0xfe   : > { %v4240_v52 = vadd.f32 %v4239_v35, %v3479_v46  ;;  %v4314_v53 = vadd.f32 %v4313_v36, %v3481_v47  ;;  %v1122_v54 = vadd.f32 %v1121_v50, %v6470_v3  ;;  %v2339_v55 = vadd.f32 %v2338_v51, %v6472_v4  ;;  %v1123_v57 = vpop.f32.mrb[7].mxu0  ;;  %5517 = vmatmul.mubr.msk.f32.gmra.mrb[112].mxu0 %vm451_vm1, %v287_v45  ;;  %v2340_v59 = vpop.f32.mrb[7].mxu1 }
  0xff   : > { %v4277_v60 = vadd.f32 %v4276_v41, %v3480_v48  ;;  %v4351_v61 = vadd.f32 %v4350_v42, %v3482_v49  ;;  %v1124_v62 = vadd.f32 %v1123_v57, %v6474_v5  ;;  %v2341_v63 = vadd.f32 %v2340_v59, %v6476_v6  ;;  %5711 = vmatmul.mubr.msk.f32.gmra.mrb[112].mxu1 %vm451_vm1, %v287_v45  ;;  %v291_v57 = vld [vmem:[%s8323_s0 + $0x1e0] sm:$0xff] }
 0x100   : > { %v3483_v2 = vmax.f32 %v1122_v54, 0.0  ;;  %v3485_v7 = vmax.f32 %v2339_v55, 0.0  ;;  %1443 = vmatprep.mubr.f32.mxu0 %v5995_v0  ;;  %2660 = vmatprep.mubr.f32.mxu1 %v5995_v0 }
 0x101   : > { %v3484_v8 = vmax.f32 %v1124_v62, 0.0  ;;  %v3486_v9 = vmax.f32 %v2341_v63, 0.0  ;;  %v1127_v10 = vpop.f32.mrb[8].mxu0  ;;  %v2344_v11 = vpop.f32.mrb[8].mxu1 }
 0x102   : > { %v4241_v12 = vadd.f32 %v4240_v52, %v3483_v2  ;;  %v4315_v13 = vadd.f32 %v4314_v53, %v3485_v7  ;;  %v1128_v14 = vadd.f32 %v1127_v10, %v6470_v3  ;;  %v2345_v15 = vadd.f32 %v2344_v11, %v6472_v4  ;;  %v1129_v16 = vpop.f32.mrb[9].mxu0  ;;  %5518 = vmatmul.mubr.msk.f32.gmra.mrb[114].mxu0 %vm451_vm1, %v288_v1  ;;  %v2346_v17 = vpop.f32.mrb[9].mxu1 }
 0x103   : > { %v4278_v18 = vadd.f32 %v4277_v60, %v3484_v8  ;;  %v4352_v19 = vadd.f32 %v4351_v61, %v3486_v9  ;;  %v1130_v20 = vadd.f32 %v1129_v16, %v6474_v5  ;;  %v2347_v21 = vadd.f32 %v2346_v17, %v6476_v6  ;;  %5712 = vmatmul.mubr.msk.f32.gmra.mrb[114].mxu1 %vm451_vm1, %v288_v1  ;;  %v292_v16 = vld [vmem:[%s8323_s0 + $0x1e8] sm:$0xff] }
 0x104   : > { %v3487_v23 = vmax.f32 %v1128_v14, 0.0  ;;  %v3489_v24 = vmax.f32 %v2345_v15, 0.0  ;;  %1449 = vmatprep.mubr.f32.mxu0 %v5995_v0  ;;  %2666 = vmatprep.mubr.f32.mxu1 %v5995_v0 }
 0x105   : > { %v3488_v25 = vmax.f32 %v1130_v20, 0.0  ;;  %v3490_v26 = vmax.f32 %v2347_v21, 0.0  ;;  %v1133_v27 = vpop.f32.mrb[10].mxu0  ;;  %v2350_v28 = vpop.f32.mrb[10].mxu1 }
 0x106   : > { %v4242_v29 = vadd.f32 %v4241_v12, %v3487_v23  ;;  %v4316_v30 = vadd.f32 %v4315_v13, %v3489_v24  ;;  %v1134_v31 = vadd.f32 %v1133_v27, %v6470_v3  ;;  %v2351_v32 = vadd.f32 %v2350_v28, %v6472_v4  ;;  %v1135_v33 = vpop.f32.mrb[11].mxu0  ;;  %5519 = vmatmul.mubr.msk.f32.gmra.mrb[116].mxu0 %vm451_vm1, %v289_v22  ;;  %v2352_v34 = vpop.f32.mrb[11].mxu1 }
 0x107   : > { %v4279_v35 = vadd.f32 %v4278_v18, %v3488_v25  ;;  %v4353_v36 = vadd.f32 %v4352_v19, %v3490_v26  ;;  %v1136_v37 = vadd.f32 %v1135_v33, %v6474_v5  ;;  %v2353_v38 = vadd.f32 %v2352_v34, %v6476_v6  ;;  %5713 = vmatmul.mubr.msk.f32.gmra.mrb[116].mxu1 %vm451_vm1, %v289_v22  ;;  %v293_v33 = vld [vmem:[%s8323_s0 + $0x1f0] sm:$0xff] }
 0x108   : > { %v3491_v40 = vmax.f32 %v1134_v31, 0.0  ;;  %v3493_v41 = vmax.f32 %v2351_v32, 0.0  ;;  %1455 = vmatprep.mubr.f32.mxu0 %v5995_v0  ;;  %2672 = vmatprep.mubr.f32.mxu1 %v5995_v0 }
 0x109   : > { %v3492_v42 = vmax.f32 %v1136_v37, 0.0  ;;  %v3494_v43 = vmax.f32 %v2353_v38, 0.0  ;;  %v1139_v44 = vpop.f32.mrb[12].mxu0  ;;  %v2356_v45 = vpop.f32.mrb[12].mxu1 }
 0x10a   : > { %v4243_v46 = vadd.f32 %v4242_v29, %v3491_v40  ;;  %v4317_v47 = vadd.f32 %v4316_v30, %v3493_v41  ;;  %v1140_v48 = vadd.f32 %v1139_v44, %v6470_v3  ;;  %v2357_v49 = vadd.f32 %v2356_v45, %v6472_v4  ;;  %v1141_v50 = vpop.f32.mrb[13].mxu0  ;;  %5520 = vmatmul.mubr.msk.f32.gmra.mrb[118].mxu0 %vm451_vm1, %v290_v39  ;;  %v2358_v51 = vpop.f32.mrb[13].mxu1 }
 0x10b   : > { %v4280_v52 = vadd.f32 %v4279_v35, %v3492_v42  ;;  %v4354_v53 = vadd.f32 %v4353_v36, %v3494_v43  ;;  %v1142_v54 = vadd.f32 %v1141_v50, %v6474_v5  ;;  %v2359_v55 = vadd.f32 %v2358_v51, %v6476_v6  ;;  %5714 = vmatmul.mubr.msk.f32.gmra.mrb[118].mxu1 %vm451_vm1, %v290_v39  ;;  %v294_v50 = vld [vmem:[%s8323_s0 + $0x1f8] sm:$0xff] }
 0x10c   : > { %v3495_v59 = vmax.f32 %v1140_v48, 0.0  ;;  %v3497_v60 = vmax.f32 %v2357_v49, 0.0  ;;  %1461 = vmatprep.mubr.f32.mxu0 %v5995_v0  ;;  %2678 = vmatprep.mubr.f32.mxu1 %v5995_v0 }
 0x10d   : > { %v3496_v61 = vmax.f32 %v1142_v54, 0.0  ;;  %v3498_v62 = vmax.f32 %v2359_v55, 0.0  ;;  %v1145_v63 = vpop.f32.mrb[14].mxu0  ;;  %v2362_v1 = vpop.f32.mrb[14].mxu1 }
 0x10e   : > { %v4244_v2 = vadd.f32 %v4243_v46, %v3495_v59  ;;  %v4318_v7 = vadd.f32 %v4317_v47, %v3497_v60  ;;  %v1146_v8 = vadd.f32 %v1145_v63, %v6470_v3  ;;  %v2363_v9 = vadd.f32 %v2362_v1, %v6472_v4  ;;  %v1147_v10 = vpop.f32.mrb[15].mxu0  ;;  %5521 = vmatmul.mubr.msk.f32.gmra.mrb[120].mxu0 %vm451_vm1, %v291_v57  ;;  %v2364_v11 = vpop.f32.mrb[15].mxu1 }
 0x10f   : > { %v4281_v12 = vadd.f32 %v4280_v52, %v3496_v61  ;;  %v4355_v13 = vadd.f32 %v4354_v53, %v3498_v62  ;;  %v1148_v14 = vadd.f32 %v1147_v10, %v6474_v5  ;;  %v2365_v15 = vadd.f32 %v2364_v11, %v6476_v6  ;;  %5715 = vmatmul.mubr.msk.f32.gmra.mrb[120].mxu1 %vm451_vm1, %v291_v57  ;;  %v295_v10 = vld [vmem:[%s8323_s0 + $0x200] sm:$0xff] }
 0x110   : > { %v3499_v17 = vmax.f32 %v1146_v8, 0.0  ;;  %v3501_v18 = vmax.f32 %v2363_v9, 0.0  ;;  %1467 = vmatprep.mubr.f32.mxu0 %v5995_v0  ;;  %2684 = vmatprep.mubr.f32.mxu1 %v5995_v0 }
 0x111   : > { %v3500_v19 = vmax.f32 %v1148_v14, 0.0  ;;  %v3502_v20 = vmax.f32 %v2365_v15, 0.0  ;;  %v1151_v21 = vpop.f32.mrb[16].mxu0  ;;  %v2368_v22 = vpop.f32.mrb[16].mxu1 }
 0x112   : > { %v4245_v23 = vadd.f32 %v4244_v2, %v3499_v17  ;;  %v4319_v24 = vadd.f32 %v4318_v7, %v3501_v18  ;;  %v1152_v25 = vadd.f32 %v1151_v21, %v6470_v3  ;;  %v2369_v26 = vadd.f32 %v2368_v22, %v6472_v4  ;;  %v1153_v27 = vpop.f32.mrb[17].mxu0  ;;  %5522 = vmatmul.mubr.msk.f32.gmra.mrb[122].mxu0 %vm451_vm1, %v292_v16  ;;  %v2370_v28 = vpop.f32.mrb[17].mxu1 }
 0x113   : > { %v4282_v29 = vadd.f32 %v4281_v12, %v3500_v19  ;;  %v4356_v30 = vadd.f32 %v4355_v13, %v3502_v20  ;;  %v1154_v31 = vadd.f32 %v1153_v27, %v6474_v5  ;;  %v2371_v32 = vadd.f32 %v2370_v28, %v6476_v6  ;;  %5716 = vmatmul.mubr.msk.f32.gmra.mrb[122].mxu1 %vm451_vm1, %v292_v16  ;;  %v296_v27 = vld [vmem:[%s8323_s0 + $0x208] sm:$0xff] }
 0x114   : > { %v3503_v34 = vmax.f32 %v1152_v25, 0.0  ;;  %v3505_v35 = vmax.f32 %v2369_v26, 0.0  ;;  %1473 = vmatprep.mubr.f32.mxu0 %v5995_v0  ;;  %2690 = vmatprep.mubr.f32.mxu1 %v5995_v0 }
 0x115   : > { %v3504_v36 = vmax.f32 %v1154_v31, 0.0  ;;  %v3506_v37 = vmax.f32 %v2371_v32, 0.0  ;;  %v1157_v38 = vpop.f32.mrb[18].mxu0  ;;  %v2374_v39 = vpop.f32.mrb[18].mxu1 }
 0x116   : > { %v4246_v40 = vadd.f32 %v4245_v23, %v3503_v34  ;;  %v4320_v41 = vadd.f32 %v4319_v24, %v3505_v35  ;;  %v1158_v42 = vadd.f32 %v1157_v38, %v6470_v3  ;;  %v2375_v43 = vadd.f32 %v2374_v39, %v6472_v4  ;;  %v1159_v44 = vpop.f32.mrb[19].mxu0  ;;  %5523 = vmatmul.mubr.msk.f32.gmra.mrb[124].mxu0 %vm451_vm1, %v293_v33  ;;  %v2376_v45 = vpop.f32.mrb[19].mxu1 }
 0x117   : > { %v4283_v46 = vadd.f32 %v4282_v29, %v3504_v36  ;;  %v4357_v47 = vadd.f32 %v4356_v30, %v3506_v37  ;;  %v1160_v48 = vadd.f32 %v1159_v44, %v6474_v5  ;;  %v2377_v49 = vadd.f32 %v2376_v45, %v6476_v6  ;;  %5717 = vmatmul.mubr.msk.f32.gmra.mrb[124].mxu1 %vm451_vm1, %v293_v33  ;;  %v297_v44 = vld [vmem:[%s8323_s0 + $0x210] sm:$0xff] }
 0x118   : > { %v3507_v51 = vmax.f32 %v1158_v42, 0.0  ;;  %v3509_v52 = vmax.f32 %v2375_v43, 0.0  ;;  %1479 = vmatprep.mubr.f32.mxu0 %v5995_v0  ;;  %2696 = vmatprep.mubr.f32.mxu1 %v5995_v0 }
 0x119   : > { %v3508_v53 = vmax.f32 %v1160_v48, 0.0  ;;  %v3510_v54 = vmax.f32 %v2377_v49, 0.0  ;;  %v1163_v55 = vpop.f32.mrb[20].mxu0  ;;  %v2380_v57 = vpop.f32.mrb[20].mxu1 }
 0x11a   : > { %v4247_v59 = vadd.f32 %v4246_v40, %v3507_v51  ;;  %v4321_v60 = vadd.f32 %v4320_v41, %v3509_v52  ;;  %v1164_v61 = vadd.f32 %v1163_v55, %v6470_v3  ;;  %v2381_v62 = vadd.f32 %v2380_v57, %v6472_v4  ;;  %v1165_v63 = vpop.f32.mrb[21].mxu0  ;;  %5524 = vmatmul.mubr.msk.f32.gmra.mrb[126].mxu0 %vm451_vm1, %v294_v50  ;;  %v2382_v1 = vpop.f32.mrb[21].mxu1 }
 0x11b   : > { %v4284_v2 = vadd.f32 %v4283_v46, %v3508_v53  ;;  %v4358_v7 = vadd.f32 %v4357_v47, %v3510_v54  ;;  %v1166_v8 = vadd.f32 %v1165_v63, %v6474_v5  ;;  %v2383_v9 = vadd.f32 %v2382_v1, %v6476_v6  ;;  %5718 = vmatmul.mubr.msk.f32.gmra.mrb[126].mxu1 %vm451_vm1, %v294_v50  ;;  %v298_v63 = vld [vmem:[%s8323_s0 + $0x218] sm:$0xff] }
 0x11c   : > { %v3511_v11 = vmax.f32 %v1164_v61, 0.0  ;;  %v3513_v12 = vmax.f32 %v2381_v62, 0.0  ;;  %1485 = vmatprep.mubr.f32.mxu0 %v5995_v0  ;;  %2702 = vmatprep.mubr.f32.mxu1 %v5995_v0 }
 0x11d   : > { %v3512_v13 = vmax.f32 %v1166_v8, 0.0  ;;  %v3514_v14 = vmax.f32 %v2383_v9, 0.0  ;;  %v1169_v15 = vpop.f32.mrb[22].mxu0  ;;  %v2386_v16 = vpop.f32.mrb[22].mxu1 }
 0x11e   : > { %v4248_v17 = vadd.f32 %v4247_v59, %v3511_v11  ;;  %v4322_v18 = vadd.f32 %v4321_v60, %v3513_v12  ;;  %v1170_v19 = vadd.f32 %v1169_v15, %v6470_v3  ;;  %v2387_v20 = vadd.f32 %v2386_v16, %v6472_v4  ;;  %v1171_v21 = vpop.f32.mrb[23].mxu0  ;;  %5525 = vmatmul.mubr.msk.f32.gmra.mrb[128].mxu0 %vm451_vm1, %v295_v10  ;;  %v2388_v22 = vpop.f32.mrb[23].mxu1 }
 0x11f   : > { %v4285_v23 = vadd.f32 %v4284_v2, %v3512_v13  ;;  %v4359_v24 = vadd.f32 %v4358_v7, %v3514_v14  ;;  %v1172_v25 = vadd.f32 %v1171_v21, %v6474_v5  ;;  %v2389_v26 = vadd.f32 %v2388_v22, %v6476_v6  ;;  %5719 = vmatmul.mubr.msk.f32.gmra.mrb[128].mxu1 %vm451_vm1, %v295_v10  ;;  %v299_v21 = vld [vmem:[%s8323_s0 + $0x220] sm:$0xff] }
 0x120   : > { %v3515_v28 = vmax.f32 %v1170_v19, 0.0  ;;  %v3517_v29 = vmax.f32 %v2387_v20, 0.0  ;;  %1491 = vmatprep.mubr.f32.mxu0 %v5995_v0  ;;  %2708 = vmatprep.mubr.f32.mxu1 %v5995_v0 }
 0x121   : > { %v3516_v30 = vmax.f32 %v1172_v25, 0.0  ;;  %v3518_v31 = vmax.f32 %v2389_v26, 0.0  ;;  %v1175_v32 = vpop.f32.mrb[24].mxu0  ;;  %v2392_v33 = vpop.f32.mrb[24].mxu1 }
 0x122   : > { %v4249_v34 = vadd.f32 %v4248_v17, %v3515_v28  ;;  %v4323_v35 = vadd.f32 %v4322_v18, %v3517_v29  ;;  %v1176_v36 = vadd.f32 %v1175_v32, %v6470_v3  ;;  %v2393_v37 = vadd.f32 %v2392_v33, %v6472_v4  ;;  %v1177_v38 = vpop.f32.mrb[25].mxu0  ;;  %5526 = vmatmul.mubr.msk.f32.gmra.mrb[130].mxu0 %vm451_vm1, %v296_v27  ;;  %v2394_v39 = vpop.f32.mrb[25].mxu1 }
 0x123   : > { %v4286_v40 = vadd.f32 %v4285_v23, %v3516_v30  ;;  %v4360_v41 = vadd.f32 %v4359_v24, %v3518_v31  ;;  %v1178_v42 = vadd.f32 %v1177_v38, %v6474_v5  ;;  %v2395_v43 = vadd.f32 %v2394_v39, %v6476_v6  ;;  %5720 = vmatmul.mubr.msk.f32.gmra.mrb[130].mxu1 %vm451_vm1, %v296_v27  ;;  %v300_v38 = vld [vmem:[%s8323_s0 + $0x228] sm:$0xff] }
 0x124   : > { %v3519_v45 = vmax.f32 %v1176_v36, 0.0  ;;  %v3521_v46 = vmax.f32 %v2393_v37, 0.0  ;;  %1497 = vmatprep.mubr.f32.mxu0 %v5995_v0  ;;  %2714 = vmatprep.mubr.f32.mxu1 %v5995_v0 }
 0x125   : > { %v3520_v47 = vmax.f32 %v1178_v42, 0.0  ;;  %v3522_v48 = vmax.f32 %v2395_v43, 0.0  ;;  %v1181_v49 = vpop.f32.mrb[26].mxu0  ;;  %v2398_v50 = vpop.f32.mrb[26].mxu1 }
 0x126   : > { %v4250_v51 = vadd.f32 %v4249_v34, %v3519_v45  ;;  %v4324_v52 = vadd.f32 %v4323_v35, %v3521_v46  ;;  %v1182_v53 = vadd.f32 %v1181_v49, %v6470_v3  ;;  %v2399_v54 = vadd.f32 %v2398_v50, %v6472_v4  ;;  %v1183_v55 = vpop.f32.mrb[27].mxu0  ;;  %5527 = vmatmul.mubr.msk.f32.gmra.mrb[132].mxu0 %vm451_vm1, %v297_v44  ;;  %v2400_v57 = vpop.f32.mrb[27].mxu1 }
 0x127   : > { %v4287_v59 = vadd.f32 %v4286_v40, %v3520_v47  ;;  %v4361_v60 = vadd.f32 %v4360_v41, %v3522_v48  ;;  %v1184_v61 = vadd.f32 %v1183_v55, %v6474_v5  ;;  %v2401_v62 = vadd.f32 %v2400_v57, %v6476_v6  ;;  %5721 = vmatmul.mubr.msk.f32.gmra.mrb[132].mxu1 %vm451_vm1, %v297_v44  ;;  %v301_v55 = vld [vmem:[%s8323_s0 + $0x230] sm:$0xff] }
 0x128   : > { %v3523_v1 = vmax.f32 %v1182_v53, 0.0  ;;  %v3525_v2 = vmax.f32 %v2399_v54, 0.0  ;;  %1503 = vmatprep.mubr.f32.mxu0 %v5995_v0  ;;  %2720 = vmatprep.mubr.f32.mxu1 %v5995_v0 }
 0x129   : > { %v3524_v7 = vmax.f32 %v1184_v61, 0.0  ;;  %v3526_v8 = vmax.f32 %v2401_v62, 0.0  ;;  %v1187_v9 = vpop.f32.mrb[28].mxu0  ;;  %v2404_v10 = vpop.f32.mrb[28].mxu1 }
 0x12a   : > { %v4251_v11 = vadd.f32 %v4250_v51, %v3523_v1  ;;  %v4325_v12 = vadd.f32 %v4324_v52, %v3525_v2  ;;  %v1188_v13 = vadd.f32 %v1187_v9, %v6470_v3  ;;  %v2405_v14 = vadd.f32 %v2404_v10, %v6472_v4  ;;  %v1189_v15 = vpop.f32.mrb[29].mxu0  ;;  %5528 = vmatmul.mubr.msk.f32.gmra.mrb[134].mxu0 %vm451_vm1, %v298_v63  ;;  %v2406_v16 = vpop.f32.mrb[29].mxu1 }
 0x12b   : > { %v4288_v17 = vadd.f32 %v4287_v59, %v3524_v7  ;;  %v4362_v18 = vadd.f32 %v4361_v60, %v3526_v8  ;;  %v1190_v19 = vadd.f32 %v1189_v15, %v6474_v5  ;;  %v2407_v20 = vadd.f32 %v2406_v16, %v6476_v6  ;;  %5722 = vmatmul.mubr.msk.f32.gmra.mrb[134].mxu1 %vm451_vm1, %v298_v63  ;;  %v302_v15 = vld [vmem:[%s8323_s0 + $0x238] sm:$0xff] }
 0x12c   : > { %v3527_v22 = vmax.f32 %v1188_v13, 0.0  ;;  %v3529_v23 = vmax.f32 %v2405_v14, 0.0  ;;  %1509 = vmatprep.mubr.f32.mxu0 %v5995_v0  ;;  %2726 = vmatprep.mubr.f32.mxu1 %v5995_v0 }
 0x12d   : > { %v3528_v24 = vmax.f32 %v1190_v19, 0.0  ;;  %v3530_v25 = vmax.f32 %v2407_v20, 0.0  ;;  %v1193_v26 = vpop.f32.mrb[30].mxu0  ;;  %v2410_v27 = vpop.f32.mrb[30].mxu1 }
 0x12e   : > { %v4252_v28 = vadd.f32 %v4251_v11, %v3527_v22  ;;  %v4326_v29 = vadd.f32 %v4325_v12, %v3529_v23  ;;  %v1194_v30 = vadd.f32 %v1193_v26, %v6470_v3  ;;  %v2411_v31 = vadd.f32 %v2410_v27, %v6472_v4  ;;  %v1195_v32 = vpop.f32.mrb[31].mxu0  ;;  %5529 = vmatmul.mubr.msk.f32.gmra.mrb[136].mxu0 %vm451_vm1, %v299_v21  ;;  %v2412_v33 = vpop.f32.mrb[31].mxu1 }
 0x12f   : > { %v4289_v34 = vadd.f32 %v4288_v17, %v3528_v24  ;;  %v4363_v35 = vadd.f32 %v4362_v18, %v3530_v25  ;;  %v1196_v36 = vadd.f32 %v1195_v32, %v6474_v5  ;;  %v2413_v37 = vadd.f32 %v2412_v33, %v6476_v6  ;;  %5723 = vmatmul.mubr.msk.f32.gmra.mrb[136].mxu1 %vm451_vm1, %v299_v21  ;;  %v303_v32 = vld [vmem:[%s8323_s0 + $0x240] sm:$0xff] }
 0x130   : > { %v3531_v39 = vmax.f32 %v1194_v30, 0.0  ;;  %v3533_v40 = vmax.f32 %v2411_v31, 0.0  ;;  %1515 = vmatprep.mubr.f32.mxu0 %v5995_v0  ;;  %2732 = vmatprep.mubr.f32.mxu1 %v5995_v0 }
 0x131   : > { %v3532_v41 = vmax.f32 %v1196_v36, 0.0  ;;  %v3534_v42 = vmax.f32 %v2413_v37, 0.0  ;;  %v1199_v43 = vpop.f32.mrb[32].mxu0  ;;  %v2416_v44 = vpop.f32.mrb[32].mxu1 }
 0x132   : > { %v4253_v45 = vadd.f32 %v4252_v28, %v3531_v39  ;;  %v4327_v46 = vadd.f32 %v4326_v29, %v3533_v40  ;;  %v1200_v47 = vadd.f32 %v1199_v43, %v6470_v3  ;;  %v2417_v48 = vadd.f32 %v2416_v44, %v6472_v4  ;;  %v1201_v49 = vpop.f32.mrb[33].mxu0  ;;  %5530 = vmatmul.mubr.msk.f32.gmra.mrb[138].mxu0 %vm451_vm1, %v300_v38  ;;  %v2418_v50 = vpop.f32.mrb[33].mxu1 }
 0x133   : > { %v4290_v51 = vadd.f32 %v4289_v34, %v3532_v41  ;;  %v4364_v52 = vadd.f32 %v4363_v35, %v3534_v42  ;;  %v1202_v53 = vadd.f32 %v1201_v49, %v6474_v5  ;;  %v2419_v54 = vadd.f32 %v2418_v50, %v6476_v6  ;;  %5724 = vmatmul.mubr.msk.f32.gmra.mrb[138].mxu1 %vm451_vm1, %v300_v38  ;;  %v304_v49 = vld [vmem:[%s8323_s0 + $0x248] sm:$0xff] }
 0x134   : > { %v3535_v57 = vmax.f32 %v1200_v47, 0.0  ;;  %v3537_v59 = vmax.f32 %v2417_v48, 0.0  ;;  %1521 = vmatprep.mubr.f32.mxu0 %v5995_v0  ;;  %2738 = vmatprep.mubr.f32.mxu1 %v5995_v0 }
 0x135   : > { %v3536_v60 = vmax.f32 %v1202_v53, 0.0  ;;  %v3538_v61 = vmax.f32 %v2419_v54, 0.0  ;;  %v1205_v62 = vpop.f32.mrb[34].mxu0  ;;  %v2422_v63 = vpop.f32.mrb[34].mxu1 }
 0x136   : > { %v4254_v1 = vadd.f32 %v4253_v45, %v3535_v57  ;;  %v4328_v2 = vadd.f32 %v4327_v46, %v3537_v59  ;;  %v1206_v7 = vadd.f32 %v1205_v62, %v6470_v3  ;;  %v2423_v8 = vadd.f32 %v2422_v63, %v6472_v4  ;;  %v1207_v9 = vpop.f32.mrb[35].mxu0  ;;  %5531 = vmatmul.mubr.msk.f32.gmra.mrb[140].mxu0 %vm451_vm1, %v301_v55  ;;  %v2424_v10 = vpop.f32.mrb[35].mxu1 }
 0x137   : > { %v4291_v11 = vadd.f32 %v4290_v51, %v3536_v60  ;;  %v4365_v12 = vadd.f32 %v4364_v52, %v3538_v61  ;;  %v1208_v13 = vadd.f32 %v1207_v9, %v6474_v5  ;;  %v2425_v14 = vadd.f32 %v2424_v10, %v6476_v6  ;;  %5725 = vmatmul.mubr.msk.f32.gmra.mrb[140].mxu1 %vm451_vm1, %v301_v55  ;;  %v305_v9 = vld [vmem:[%s8323_s0 + $0x250] sm:$0xff] }
 0x138   : > { %v3539_v16 = vmax.f32 %v1206_v7, 0.0  ;;  %v3541_v17 = vmax.f32 %v2423_v8, 0.0  ;;  %1527 = vmatprep.mubr.f32.mxu0 %v5995_v0  ;;  %2744 = vmatprep.mubr.f32.mxu1 %v5995_v0 }
 0x139   : > { %v3540_v18 = vmax.f32 %v1208_v13, 0.0  ;;  %v3542_v19 = vmax.f32 %v2425_v14, 0.0  ;;  %v1211_v20 = vpop.f32.mrb[36].mxu0  ;;  %v2428_v21 = vpop.f32.mrb[36].mxu1 }
 0x13a   : > { %v4255_v22 = vadd.f32 %v4254_v1, %v3539_v16  ;;  %v4329_v23 = vadd.f32 %v4328_v2, %v3541_v17  ;;  %v1212_v24 = vadd.f32 %v1211_v20, %v6470_v3  ;;  %v2429_v25 = vadd.f32 %v2428_v21, %v6472_v4  ;;  %v1213_v26 = vpop.f32.mrb[37].mxu0  ;;  %5532 = vmatmul.mubr.msk.f32.gmra.mrb[142].mxu0 %vm451_vm1, %v302_v15  ;;  %v2430_v27 = vpop.f32.mrb[37].mxu1 }
 0x13b   : > { %v4292_v28 = vadd.f32 %v4291_v11, %v3540_v18  ;;  %v4366_v29 = vadd.f32 %v4365_v12, %v3542_v19  ;;  %v1214_v30 = vadd.f32 %v1213_v26, %v6474_v5  ;;  %v2431_v31 = vadd.f32 %v2430_v27, %v6476_v6  ;;  %5726 = vmatmul.mubr.msk.f32.gmra.mrb[142].mxu1 %vm451_vm1, %v302_v15  ;;  %v306_v26 = vld [vmem:[%s8323_s0 + $0x258] sm:$0xff] }
 0x13c   : > { %v3543_v33 = vmax.f32 %v1212_v24, 0.0  ;;  %v3545_v34 = vmax.f32 %v2429_v25, 0.0  ;;  %1533 = vmatprep.mubr.f32.mxu0 %v5995_v0  ;;  %2750 = vmatprep.mubr.f32.mxu1 %v5995_v0 }
 0x13d   : > { %v3544_v35 = vmax.f32 %v1214_v30, 0.0  ;;  %v3546_v36 = vmax.f32 %v2431_v31, 0.0  ;;  %v1217_v37 = vpop.f32.mrb[38].mxu0  ;;  %v2434_v38 = vpop.f32.mrb[38].mxu1 }
 0x13e   : > { %v4256_v39 = vadd.f32 %v4255_v22, %v3543_v33  ;;  %v4330_v40 = vadd.f32 %v4329_v23, %v3545_v34  ;;  %v1218_v41 = vadd.f32 %v1217_v37, %v6470_v3  ;;  %v2435_v42 = vadd.f32 %v2434_v38, %v6472_v4  ;;  %v1219_v43 = vpop.f32.mrb[39].mxu0  ;;  %5533 = vmatmul.mubr.msk.f32.gmra.mrb[144].mxu0 %vm451_vm1, %v303_v32  ;;  %v2436_v44 = vpop.f32.mrb[39].mxu1 }
 0x13f   : > { %v4293_v45 = vadd.f32 %v4292_v28, %v3544_v35  ;;  %v4367_v46 = vadd.f32 %v4366_v29, %v3546_v36  ;;  %v1220_v47 = vadd.f32 %v1219_v43, %v6474_v5  ;;  %v2437_v48 = vadd.f32 %v2436_v44, %v6476_v6  ;;  %5727 = vmatmul.mubr.msk.f32.gmra.mrb[144].mxu1 %vm451_vm1, %v303_v32  ;;  %v307_v43 = vld [vmem:[%s8323_s0 + $0x260] sm:$0xff] }
 0x140   : > { %v3547_v50 = vmax.f32 %v1218_v41, 0.0  ;;  %v3549_v51 = vmax.f32 %v2435_v42, 0.0  ;;  %1539 = vmatprep.mubr.f32.mxu0 %v5995_v0  ;;  %2756 = vmatprep.mubr.f32.mxu1 %v5995_v0 }
 0x141   : > { %v3548_v52 = vmax.f32 %v1220_v47, 0.0  ;;  %v3550_v53 = vmax.f32 %v2437_v48, 0.0  ;;  %v1223_v54 = vpop.f32.mrb[40].mxu0  ;;  %v2440_v55 = vpop.f32.mrb[40].mxu1 }
 0x142   : > { %v4257_v57 = vadd.f32 %v4256_v39, %v3547_v50  ;;  %v4331_v59 = vadd.f32 %v4330_v40, %v3549_v51  ;;  %v1224_v60 = vadd.f32 %v1223_v54, %v6470_v3  ;;  %v2441_v61 = vadd.f32 %v2440_v55, %v6472_v4  ;;  %v1225_v62 = vpop.f32.mrb[41].mxu0  ;;  %5534 = vmatmul.mubr.msk.f32.gmra.mrb[146].mxu0 %vm451_vm1, %v304_v49  ;;  %v2442_v63 = vpop.f32.mrb[41].mxu1 }
 0x143   : > { %v4294_v1 = vadd.f32 %v4293_v45, %v3548_v52  ;;  %v4368_v2 = vadd.f32 %v4367_v46, %v3550_v53  ;;  %v1226_v7 = vadd.f32 %v1225_v62, %v6474_v5  ;;  %v2443_v8 = vadd.f32 %v2442_v63, %v6476_v6  ;;  %5728 = vmatmul.mubr.msk.f32.gmra.mrb[146].mxu1 %vm451_vm1, %v304_v49  ;;  %v308_v62 = vld [vmem:[%s8323_s0 + $0x268] sm:$0xff] }
 0x144   : > { %v3551_v10 = vmax.f32 %v1224_v60, 0.0  ;;  %v3553_v11 = vmax.f32 %v2441_v61, 0.0  ;;  %1545 = vmatprep.mubr.f32.mxu0 %v5995_v0  ;;  %2762 = vmatprep.mubr.f32.mxu1 %v5995_v0 }
 0x145   : > { %v3552_v12 = vmax.f32 %v1226_v7, 0.0  ;;  %v3554_v13 = vmax.f32 %v2443_v8, 0.0  ;;  %v1229_v14 = vpop.f32.mrb[42].mxu0  ;;  %v2446_v15 = vpop.f32.mrb[42].mxu1 }
 0x146   : > { %v4258_v16 = vadd.f32 %v4257_v57, %v3551_v10  ;;  %v4332_v17 = vadd.f32 %v4331_v59, %v3553_v11  ;;  %v1230_v18 = vadd.f32 %v1229_v14, %v6470_v3  ;;  %v2447_v19 = vadd.f32 %v2446_v15, %v6472_v4  ;;  %v1231_v20 = vpop.f32.mrb[43].mxu0  ;;  %5535 = vmatmul.mubr.msk.f32.gmra.mrb[148].mxu0 %vm451_vm1, %v305_v9  ;;  %v2448_v21 = vpop.f32.mrb[43].mxu1 }
 0x147   : > { %v4295_v22 = vadd.f32 %v4294_v1, %v3552_v12  ;;  %v4369_v23 = vadd.f32 %v4368_v2, %v3554_v13  ;;  %v1232_v24 = vadd.f32 %v1231_v20, %v6474_v5  ;;  %v2449_v25 = vadd.f32 %v2448_v21, %v6476_v6  ;;  %5729 = vmatmul.mubr.msk.f32.gmra.mrb[148].mxu1 %vm451_vm1, %v305_v9  ;;  %v309_v20 = vld [vmem:[%s8323_s0 + $0x270] sm:$0xff] }
 0x148   : > { %v3555_v27 = vmax.f32 %v1230_v18, 0.0  ;;  %v3557_v28 = vmax.f32 %v2447_v19, 0.0  ;;  %1551 = vmatprep.mubr.f32.mxu0 %v5995_v0  ;;  %2768 = vmatprep.mubr.f32.mxu1 %v5995_v0 }
 0x149   : > { %v3556_v29 = vmax.f32 %v1232_v24, 0.0  ;;  %v3558_v30 = vmax.f32 %v2449_v25, 0.0  ;;  %v1235_v31 = vpop.f32.mrb[44].mxu0  ;;  %v2452_v32 = vpop.f32.mrb[44].mxu1 }
 0x14a   : > { %v4259_v33 = vadd.f32 %v4258_v16, %v3555_v27  ;;  %v4333_v34 = vadd.f32 %v4332_v17, %v3557_v28  ;;  %v1236_v35 = vadd.f32 %v1235_v31, %v6470_v3  ;;  %v2453_v36 = vadd.f32 %v2452_v32, %v6472_v4  ;;  %v1237_v37 = vpop.f32.mrb[45].mxu0  ;;  %5536 = vmatmul.mubr.msk.f32.gmra.mrb[150].mxu0 %vm451_vm1, %v306_v26  ;;  %v2454_v38 = vpop.f32.mrb[45].mxu1 }
 0x14b   : > { %v4296_v39 = vadd.f32 %v4295_v22, %v3556_v29  ;;  %v4370_v40 = vadd.f32 %v4369_v23, %v3558_v30  ;;  %v1238_v41 = vadd.f32 %v1237_v37, %v6474_v5  ;;  %v2455_v42 = vadd.f32 %v2454_v38, %v6476_v6  ;;  %5730 = vmatmul.mubr.msk.f32.gmra.mrb[150].mxu1 %vm451_vm1, %v306_v26  ;;  %v310_v37 = vld [vmem:[%s8323_s0 + $0x278] sm:$0xff] }
 0x14c   : > { %v3559_v44 = vmax.f32 %v1236_v35, 0.0  ;;  %v3561_v45 = vmax.f32 %v2453_v36, 0.0  ;;  %1557 = vmatprep.mubr.f32.mxu0 %v5995_v0  ;;  %2774 = vmatprep.mubr.f32.mxu1 %v5995_v0 }
 0x14d   : > { %v3560_v46 = vmax.f32 %v1238_v41, 0.0  ;;  %v3562_v47 = vmax.f32 %v2455_v42, 0.0  ;;  %v1241_v48 = vpop.f32.mrb[46].mxu0  ;;  %v2458_v49 = vpop.f32.mrb[46].mxu1 }
 0x14e   : > { %v4260_v50 = vadd.f32 %v4259_v33, %v3559_v44  ;;  %v4334_v51 = vadd.f32 %v4333_v34, %v3561_v45  ;;  %v1242_v52 = vadd.f32 %v1241_v48, %v6470_v3  ;;  %v2459_v53 = vadd.f32 %v2458_v49, %v6472_v4  ;;  %v1243_v54 = vpop.f32.mrb[47].mxu0  ;;  %5537 = vmatmul.mubr.msk.f32.gmra.mrb[152].mxu0 %vm451_vm1, %v307_v43  ;;  %v2460_v55 = vpop.f32.mrb[47].mxu1 }
 0x14f   : > { %v4297_v57 = vadd.f32 %v4296_v39, %v3560_v46  ;;  %v4371_v59 = vadd.f32 %v4370_v40, %v3562_v47  ;;  %v1244_v60 = vadd.f32 %v1243_v54, %v6474_v5  ;;  %v2461_v61 = vadd.f32 %v2460_v55, %v6476_v6  ;;  %5731 = vmatmul.mubr.msk.f32.gmra.mrb[152].mxu1 %vm451_vm1, %v307_v43  ;;  %v311_v54 = vld [vmem:[%s8323_s0 + $0x280] sm:$0xff] }
 0x150   : > { %v3563_v63 = vmax.f32 %v1242_v52, 0.0  ;;  %v3565_v1 = vmax.f32 %v2459_v53, 0.0  ;;  %1563 = vmatprep.mubr.f32.mxu0 %v5995_v0  ;;  %2780 = vmatprep.mubr.f32.mxu1 %v5995_v0 }
 0x151   : > { %v3564_v2 = vmax.f32 %v1244_v60, 0.0  ;;  %v3566_v7 = vmax.f32 %v2461_v61, 0.0  ;;  %v1247_v8 = vpop.f32.mrb[48].mxu0  ;;  %v2464_v9 = vpop.f32.mrb[48].mxu1 }
 0x152   : > { %v4261_v10 = vadd.f32 %v4260_v50, %v3563_v63  ;;  %v4335_v11 = vadd.f32 %v4334_v51, %v3565_v1  ;;  %v1248_v12 = vadd.f32 %v1247_v8, %v6470_v3  ;;  %v2465_v13 = vadd.f32 %v2464_v9, %v6472_v4  ;;  %v1249_v14 = vpop.f32.mrb[49].mxu0  ;;  %5538 = vmatmul.mubr.msk.f32.gmra.mrb[154].mxu0 %vm451_vm1, %v308_v62  ;;  %v2466_v15 = vpop.f32.mrb[49].mxu1 }
 0x153   : > { %v4298_v16 = vadd.f32 %v4297_v57, %v3564_v2  ;;  %v4372_v17 = vadd.f32 %v4371_v59, %v3566_v7  ;;  %v1250_v18 = vadd.f32 %v1249_v14, %v6474_v5  ;;  %v2467_v19 = vadd.f32 %v2466_v15, %v6476_v6  ;;  %5732 = vmatmul.mubr.msk.f32.gmra.mrb[154].mxu1 %vm451_vm1, %v308_v62  ;;  %v312_v14 = vld [vmem:[%s8323_s0 + $0x288] sm:$0xff] }
 0x154   : > { %v3567_v21 = vmax.f32 %v1248_v12, 0.0  ;;  %v3569_v22 = vmax.f32 %v2465_v13, 0.0  ;;  %1569 = vmatprep.mubr.f32.mxu0 %v5995_v0  ;;  %2786 = vmatprep.mubr.f32.mxu1 %v5995_v0 }
 0x155   : > { %v3568_v23 = vmax.f32 %v1250_v18, 0.0  ;;  %v3570_v24 = vmax.f32 %v2467_v19, 0.0  ;;  %v1253_v25 = vpop.f32.mrb[50].mxu0  ;;  %v2470_v26 = vpop.f32.mrb[50].mxu1 }
 0x156   : > { %v4262_v27 = vadd.f32 %v4261_v10, %v3567_v21  ;;  %v4336_v28 = vadd.f32 %v4335_v11, %v3569_v22  ;;  %v1254_v29 = vadd.f32 %v1253_v25, %v6470_v3  ;;  %v2471_v30 = vadd.f32 %v2470_v26, %v6472_v4  ;;  %v1255_v31 = vpop.f32.mrb[51].mxu0  ;;  %5539 = vmatmul.mubr.msk.f32.gmra.mrb[156].mxu0 %vm451_vm1, %v309_v20  ;;  %v2472_v32 = vpop.f32.mrb[51].mxu1 }
 0x157   : > { %v4299_v33 = vadd.f32 %v4298_v16, %v3568_v23  ;;  %v4373_v34 = vadd.f32 %v4372_v17, %v3570_v24  ;;  %v1256_v35 = vadd.f32 %v1255_v31, %v6474_v5  ;;  %v2473_v36 = vadd.f32 %v2472_v32, %v6476_v6  ;;  %5733 = vmatmul.mubr.msk.f32.gmra.mrb[156].mxu1 %vm451_vm1, %v309_v20  ;;  %v313_v31 = vld [vmem:[%s8323_s0 + $0x290] sm:$0xff] }
 0x158   : > { %v3571_v38 = vmax.f32 %v1254_v29, 0.0  ;;  %v3573_v39 = vmax.f32 %v2471_v30, 0.0  ;;  %1575 = vmatprep.mubr.f32.mxu0 %v5995_v0  ;;  %2792 = vmatprep.mubr.f32.mxu1 %v5995_v0 }
 0x159   : > { %v3572_v40 = vmax.f32 %v1256_v35, 0.0  ;;  %v3574_v41 = vmax.f32 %v2473_v36, 0.0  ;;  %v1259_v42 = vpop.f32.mrb[52].mxu0  ;;  %v2476_v43 = vpop.f32.mrb[52].mxu1 }
 0x15a   : > { %v4263_v44 = vadd.f32 %v4262_v27, %v3571_v38  ;;  %v4337_v45 = vadd.f32 %v4336_v28, %v3573_v39  ;;  %v1260_v46 = vadd.f32 %v1259_v42, %v6470_v3  ;;  %v2477_v47 = vadd.f32 %v2476_v43, %v6472_v4  ;;  %v1261_v48 = vpop.f32.mrb[53].mxu0  ;;  %5540 = vmatmul.mubr.msk.f32.gmra.mrb[158].mxu0 %vm451_vm1, %v310_v37  ;;  %v2478_v49 = vpop.f32.mrb[53].mxu1 }
 0x15b   : > { %v4300_v50 = vadd.f32 %v4299_v33, %v3572_v40  ;;  %v4374_v51 = vadd.f32 %v4373_v34, %v3574_v41  ;;  %v1262_v52 = vadd.f32 %v1261_v48, %v6474_v5  ;;  %v2479_v53 = vadd.f32 %v2478_v49, %v6476_v6  ;;  %5734 = vmatmul.mubr.msk.f32.gmra.mrb[158].mxu1 %vm451_vm1, %v310_v37  ;;  %v314_v48 = vld [vmem:[%s8323_s0 + $0x298] sm:$0xff] }
 0x15c   : > { %v3575_v55 = vmax.f32 %v1260_v46, 0.0  ;;  %v3577_v57 = vmax.f32 %v2477_v47, 0.0  ;;  %1581 = vmatprep.mubr.f32.mxu0 %v5995_v0  ;;  %2798 = vmatprep.mubr.f32.mxu1 %v5995_v0 }
 0x15d   : > { %v3576_v59 = vmax.f32 %v1262_v52, 0.0  ;;  %v3578_v60 = vmax.f32 %v2479_v53, 0.0  ;;  %v1265_v61 = vpop.f32.mrb[54].mxu0  ;;  %v2482_v62 = vpop.f32.mrb[54].mxu1 }
 0x15e   : > { %v4264_v63 = vadd.f32 %v4263_v44, %v3575_v55  ;;  %v4338_v1 = vadd.f32 %v4337_v45, %v3577_v57  ;;  %v1266_v2 = vadd.f32 %v1265_v61, %v6470_v3  ;;  %v2483_v7 = vadd.f32 %v2482_v62, %v6472_v4  ;;  %v1267_v8 = vpop.f32.mrb[55].mxu0  ;;  %5541 = vmatmul.mubr.msk.f32.gmra.mrb[160].mxu0 %vm451_vm1, %v311_v54  ;;  %v2484_v9 = vpop.f32.mrb[55].mxu1 }
 0x15f   : > { %v4301_v10 = vadd.f32 %v4300_v50, %v3576_v59  ;;  %v4375_v11 = vadd.f32 %v4374_v51, %v3578_v60  ;;  %v1268_v12 = vadd.f32 %v1267_v8, %v6474_v5  ;;  %v2485_v13 = vadd.f32 %v2484_v9, %v6476_v6  ;;  %5735 = vmatmul.mubr.msk.f32.gmra.mrb[160].mxu1 %vm451_vm1, %v311_v54 }
 0x160   : > { %v3579_v15 = vmax.f32 %v1266_v2, 0.0  ;;  %v3581_v16 = vmax.f32 %v2483_v7, 0.0  ;;  %1587 = vmatprep.mubr.f32.mxu0 %v5995_v0  ;;  %2804 = vmatprep.mubr.f32.mxu1 %v5995_v0  ;;  %v5996_v55 = vmov 1966171168  }
 0x161   : > { %v3580_v17 = vmax.f32 %v1268_v12, 0.0  ;;  %v3582_v18 = vmax.f32 %v2485_v13, 0.0  ;;  %v1271_v19 = vpop.f32.mrb[56].mxu0  ;;  %v2488_v20 = vpop.f32.mrb[56].mxu1  ;;  %v5179_v57 = vunpack.c.l.s4 %v5996_v55 }
 0x162   : > { %v4265_v21 = vadd.f32 %v4264_v63, %v3579_v15  ;;  %v4339_v22 = vadd.f32 %v4338_v1, %v3581_v16  ;;  %v1272_v23 = vadd.f32 %v1271_v19, %v6470_v3  ;;  %v2489_v24 = vadd.f32 %v2488_v20, %v6472_v4  ;;  %v1273_v25 = vpop.f32.mrb[57].mxu0  ;;  %5542 = vmatmul.mubr.msk.f32.gmra.mrb[162].mxu0 %vm451_vm1, %v312_v14  ;;  %v2490_v26 = vpop.f32.mrb[57].mxu1 }
 0x163   : > { %v4302_v27 = vadd.f32 %v4301_v10, %v3580_v17  ;;  %v4376_v28 = vadd.f32 %v4375_v11, %v3582_v18  ;;  %v1274_v29 = vadd.f32 %v1273_v25, %v6474_v5  ;;  %v2491_v30 = vadd.f32 %v2490_v26, %v6476_v6  ;;  %5736 = vmatmul.mubr.msk.f32.gmra.mrb[162].mxu1 %vm451_vm1, %v312_v14  ;;  %v315_v10 = vld [vmem:[%s8323_s0 + $0x2a0] sm:$0xff] }
 0x164   : > { %v3583_v32 = vmax.f32 %v1272_v23, 0.0  ;;  %v3585_v33 = vmax.f32 %v2489_v24, 0.0  ;;  %1593 = vmatprep.mubr.f32.mxu0 %v5995_v0  ;;  %2810 = vmatprep.mubr.f32.mxu1 %v5995_v0  ;;  %v5180_v17 = vunpack.c.0.s8 %v5179_v57 }
 0x165   : > { %v3584_v34 = vmax.f32 %v1274_v29, 0.0  ;;  %v3586_v35 = vmax.f32 %v2491_v30, 0.0  ;;  %v1277_v36 = vpop.f32.mrb[58].mxu0  ;;  %v2494_v37 = vpop.f32.mrb[58].mxu1 }
 0x166   : > { %v4266_v38 = vadd.f32 %v4265_v21, %v3583_v32  ;;  %v4340_v39 = vadd.f32 %v4339_v22, %v3585_v33  ;;  %v1278_v40 = vadd.f32 %v1277_v36, %v6470_v3  ;;  %v2495_v41 = vadd.f32 %v2494_v37, %v6472_v4  ;;  %v1279_v42 = vpop.f32.mrb[59].mxu0  ;;  %5543 = vmatmul.mubr.msk.f32.gmra.mrb[164].mxu0 %vm451_vm1, %v313_v31  ;;  %v2496_v43 = vpop.f32.mrb[59].mxu1 }
 0x167   : > { %v4303_v44 = vadd.f32 %v4302_v27, %v3584_v34  ;;  %v4377_v45 = vadd.f32 %v4376_v28, %v3586_v35  ;;  %v1280_v46 = vadd.f32 %v1279_v42, %v6474_v5  ;;  %v2497_v47 = vadd.f32 %v2496_v43, %v6476_v6  ;;  %5737 = vmatmul.mubr.msk.f32.gmra.mrb[164].mxu1 %vm451_vm1, %v313_v31  ;;  %v316_v28 = vld [vmem:[%s8323_s0 + $0x2a8] sm:$0xff] }
 0x168   : > { %v3587_v49 = vmax.f32 %v1278_v40, 0.0  ;;  %v3589_v50 = vmax.f32 %v2495_v41, 0.0  ;;  %1599 = vmatprep.mubr.f32.mxu0 %v5995_v0  ;;  %2816 = vmatprep.mubr.f32.mxu1 %v5995_v0  ;;  %v6831_v32 = vsub.s32 %v5180_v17, %v6446_v58 }
 0x169   : > { %v3588_v51 = vmax.f32 %v1280_v46, 0.0  ;;  %v3590_v52 = vmax.f32 %v2497_v47, 0.0  ;;  %v1283_v53 = vpop.f32.mrb[60].mxu0  ;;  %v2500_v54 = vpop.f32.mrb[60].mxu1 }
 0x16a   : > { %v4267_v59 = vadd.f32 %v4266_v38, %v3587_v49  ;;  %v4341_v60 = vadd.f32 %v4340_v39, %v3589_v50  ;;  %v1284_v61 = vadd.f32 %v1283_v53, %v6470_v3  ;;  %v2501_v62 = vadd.f32 %v2500_v54, %v6472_v4  ;;  %v1285_v63 = vpop.f32.mrb[61].mxu0  ;;  %5544 = vmatmul.mubr.msk.f32.gmra.mrb[166].mxu0 %vm451_vm1, %v314_v48  ;;  %v2502_v1 = vpop.f32.mrb[61].mxu1 }
 0x16b   : > { %v4304_v2 = vadd.f32 %v4303_v44, %v3588_v51  ;;  %v4378_v7 = vadd.f32 %v4377_v45, %v3590_v52  ;;  %v1286_v8 = vadd.f32 %v1285_v63, %v6474_v5  ;;  %v2503_v9 = vadd.f32 %v2502_v1, %v6476_v6  ;;  %5738 = vmatmul.mubr.msk.f32.gmra.mrb[166].mxu1 %vm451_vm1, %v314_v48  ;;  %v317_v45 = vld [vmem:[%s8323_s0 + $0x2b0] sm:$0xff] }
 0x16c   : > { %v3591_v11 = vmax.f32 %v1284_v61, 0.0  ;;  %v3593_v12 = vmax.f32 %v2501_v62, 0.0  ;;  %1605 = vmatprep.mubr.f32.mxu0 %v5995_v0  ;;  %2822 = vmatprep.mubr.f32.mxu1 %v5995_v0 }
 0x16d   : > { %v3592_v13 = vmax.f32 %v1286_v8, 0.0  ;;  %v3594_v14 = vmax.f32 %v2503_v9, 0.0  ;;  %v1289_v15 = vpop.f32.mrb[62].mxu0  ;;  %v2506_v16 = vpop.f32.mrb[62].mxu1  ;;  %v318_v9 = vld [vmem:[%s8323_s0 + $0x2b8] sm:$0xff] }
 0x16e   : > { %v4268_v18 = vadd.f32 %v4267_v59, %v3591_v11  ;;  %v4342_v19 = vadd.f32 %v4341_v60, %v3593_v12  ;;  %v1290_v20 = vadd.f32 %v1289_v15, %v6470_v3  ;;  %v2507_v21 = vadd.f32 %v2506_v16, %v6472_v4  ;;  %v1291_v22 = vpop.f32.mrb[63].mxu0  ;;  %5545 = vmatmul.mubr.msk.f32.gmra.mrb[168].mxu0 %vm451_vm1, %v315_v10  ;;  %v2508_v23 = vpop.f32.mrb[63].mxu1 }
 0x16f   : > { %v4305_v24 = vadd.f32 %v4304_v2, %v3592_v13  ;;  %v4379_v25 = vadd.f32 %v4378_v7, %v3594_v14  ;;  %v1292_v26 = vadd.f32 %v1291_v22, %v6474_v5  ;;  %v2509_v27 = vadd.f32 %v2508_v23, %v6476_v6  ;;  %5739 = vmatmul.mubr.msk.f32.gmra.mrb[168].mxu1 %vm451_vm1, %v315_v10 }
 0x170   : > { %v3595_v29 = vmax.f32 %v1290_v20, 0.0  ;;  %v3597_v30 = vmax.f32 %v2507_v21, 0.0  ;;  %1611 = vmatprep.mubr.f32.mxu0 %v5995_v0  ;;  %2828 = vmatprep.mubr.f32.mxu1 %v5995_v0 }
 0x171   : > { %v3596_v31 = vmax.f32 %v1292_v26, 0.0  ;;  %v3598_v33 = vmax.f32 %v2509_v27, 0.0  ;;  %v1295_v34 = vpop.f32.mrb[64].mxu0  ;;  %v2512_v35 = vpop.f32.mrb[64].mxu1 }
 0x172   : > { %v4269_v36 = vadd.f32 %v4268_v18, %v3595_v29  ;;  %v4343_v37 = vadd.f32 %v4342_v19, %v3597_v30  ;;  %v1296_v38 = vadd.f32 %v1295_v34, %v6470_v3  ;;  %v2513_v39 = vadd.f32 %v2512_v35, %v6472_v4  ;;  %v1297_v40 = vpop.f32.mrb[65].mxu0  ;;  %5546 = vmatmul.mubr.msk.f32.gmra.mrb[170].mxu0 %vm451_vm1, %v316_v28  ;;  %v2514_v41 = vpop.f32.mrb[65].mxu1  ;;  %v319_v30 = vld [vmem:[%s8323_s0 + $0x2c0] sm:$0xff] }
 0x173   : > { %v4306_v42 = vadd.f32 %v4305_v24, %v3596_v31  ;;  %v4380_v43 = vadd.f32 %v4379_v25, %v3598_v33  ;;  %v1298_v44 = vadd.f32 %v1297_v40, %v6474_v5  ;;  %v2515_v58 = vadd.f32 %v2514_v41, %v6476_v6  ;;  %5740 = vmatmul.mubr.msk.f32.gmra.mrb[170].mxu1 %vm451_vm1, %v316_v28 }
 0x174   : > { %v4270_v46 = vrot.slane %v4269_v36, 4  ;;  %v4344_v47 = vrot.slane %v4343_v37, 4  ;;  %v3599_v48 = vmax.f32 %v1296_v38, 0.0  ;;  %v3601_v49 = vmax.f32 %v2513_v39, 0.0  ;;  %1617 = vmatprep.mubr.f32.mxu0 %v5995_v0  ;;  %2834 = vmatprep.mubr.f32.mxu1 %v5995_v0 }
 0x175   : > { %v4307_v50 = vrot.slane %v4306_v42, 4  ;;  %v4381_v51 = vrot.slane %v4380_v43, 4  ;;  %v3600_v52 = vmax.f32 %v1298_v44, 0.0  ;;  %v3602_v53 = vmax.f32 %v2515_v58, 0.0  ;;  %v1301_v54 = vpop.f32.mrb[66].mxu0  ;;  %v2518_v55 = vpop.f32.mrb[66].mxu1 }
 0x176   : > { %v4271_v57 = vadd.f32 %v4270_v46, %v4269_v36  ;;  %v4345_v59 = vadd.f32 %v4344_v47, %v4343_v37  ;;  %v1302_v60 = vadd.f32 %v1301_v54, %v6470_v3  ;;  %v2519_v61 = vadd.f32 %v2518_v55, %v6472_v4  ;;  %v1303_v62 = vpop.f32.mrb[67].mxu0  ;;  %5547 = vmatmul.mubr.msk.f32.gmra.mrb[172].mxu0 %vm451_vm1, %v317_v45  ;;  %v2520_v63 = vpop.f32.mrb[67].mxu1 }
 0x177   : > { %v4308_v1 = vadd.f32 %v4307_v50, %v4306_v42  ;;  %v4382_v2 = vadd.f32 %v4381_v51, %v4380_v43  ;;  %v1304_v7 = vadd.f32 %v1303_v62, %v6474_v5  ;;  %v2521_v8 = vadd.f32 %v2520_v63, %v6476_v6  ;;  %5741 = vmatmul.mubr.msk.f32.gmra.mrb[172].mxu1 %vm451_vm1, %v317_v45  ;;  %v320_v51 = vld [vmem:[%s8323_s0 + $0x2c8] sm:$0xff] }
 0x178   : > { %v4272_v10 = vrot.slane %v4271_v57, 2  ;;  %v4346_v11 = vrot.slane %v4345_v59, 2  ;;  %v3603_v12 = vmax.f32 %v1302_v60, 0.0  ;;  %v3605_v13 = vmax.f32 %v2519_v61, 0.0  ;;  %1623 = vmatprep.mubr.f32.mxu0 %v5995_v0  ;;  %2840 = vmatprep.mubr.f32.mxu1 %v5995_v0 }
 0x179   : > { %v4309_v14 = vrot.slane %v4308_v1, 2  ;;  %v4383_v15 = vrot.slane %v4382_v2, 2  ;;  %v3604_v16 = vmax.f32 %v1304_v7, 0.0  ;;  %v3606_v17 = vmax.f32 %v2521_v8, 0.0  ;;  %v1307_v18 = vpop.f32.mrb[68].mxu0  ;;  %v2524_v19 = vpop.f32.mrb[68].mxu1 }
 0x17a   : > { %v4273_v20 = vadd.f32 %v4272_v10, %v4271_v57  ;;  %v4347_v21 = vadd.f32 %v4346_v11, %v4345_v59  ;;  %v4387_v22 = vadd.f32 %v3603_v12, %v3599_v48  ;;  %v4461_v23 = vadd.f32 %v3605_v13, %v3601_v49  ;;  %v1309_v24 = vpop.f32.mrb[69].mxu0  ;;  %5548 = vmatmul.mubr.msk.f32.gmra.mrb[174].mxu0 %vm451_vm1, %v318_v9  ;;  %v2526_v25 = vpop.f32.mrb[69].mxu1 }
 0x17b   : > { %v4310_v26 = vadd.f32 %v4309_v14, %v4308_v1  ;;  %v4384_v27 = vadd.f32 %v4383_v15, %v4382_v2  ;;  %v4424_v28 = vadd.f32 %v3604_v16, %v3600_v52  ;;  %v4498_v29 = vadd.f32 %v3606_v17, %v3602_v53  ;;  %5742 = vmatmul.mubr.msk.f32.gmra.mrb[174].mxu1 %vm451_vm1, %v318_v9  ;;  %v321_v15 = vld [vmem:[%s8323_s0 + $0x2d0] sm:$0xff] }
 0x17c   : > { %v4274_v31 = vrot.slane %v4273_v20, 1  ;;  %v4348_v33 = vrot.slane %v4347_v21, 1  ;;  %v1308_v34 = vadd.f32 %v1307_v18, %v6470_v3  ;;  %v2525_v35 = vadd.f32 %v2524_v19, %v6472_v4  ;;  %1629 = vmatprep.mubr.f32.mxu0 %v5995_v0  ;;  %2846 = vmatprep.mubr.f32.mxu1 %v5995_v0 }
 0x17d   : > { %v4311_v36 = vrot.slane %v4310_v26, 1  ;;  %v4385_v37 = vrot.slane %v4384_v27, 1  ;;  %v1310_v38 = vadd.f32 %v1309_v24, %v6474_v5  ;;  %v2527_v39 = vadd.f32 %v2526_v25, %v6476_v6  ;;  %v1313_v40 = vpop.f32.mrb[70].mxu0  ;;  %v2530_v41 = vpop.f32.mrb[70].mxu1 }
 0x17e   : > { %v4275_v42 = vadd.f32 %v4274_v31, %v4273_v20  ;;  %v4349_v43 = vadd.f32 %v4348_v33, %v4347_v21  ;;  %v3607_v44 = vmax.f32 %v1308_v34, 0.0  ;;  %v3609_v58 = vmax.f32 %v2525_v35, 0.0  ;;  %v1315_v45 = vpop.f32.mrb[71].mxu0  ;;  %5549 = vmatmul.mubr.msk.f32.gmra.mrb[176].mxu0 %vm451_vm1, %v319_v30  ;;  %v2532_v46 = vpop.f32.mrb[71].mxu1 }
 0x17f   : > { %v4312_v47 = vadd.f32 %v4311_v36, %v4310_v26  ;;  %v4386_v48 = vadd.f32 %v4385_v37, %v4384_v27  ;;  %v3608_v49 = vmax.f32 %v1310_v38, 0.0  ;;  %v3610_v50 = vmax.f32 %v2527_v39, 0.0  ;;  %5743 = vmatmul.mubr.msk.f32.gmra.mrb[176].mxu1 %vm451_vm1, %v319_v30  ;;  %1635 = vmatprep.mubr.f32.mxu0 %v5995_v0  ;;  %v322_v37 = vld [vmem:[%s8323_s0 + $0x2d8] sm:$0xff] }
 0x180   : > { %v5128_v52 = vmul.f32 0.00390625, %v4275_v42  ;;  %v5130_v53 = vmul.f32 0.00390625, %v4349_v43  ;;  %v4388_v55 = vadd.f32 %v4387_v22, %v3607_v44  ;;  %v4462_v57 = vadd.f32 %v4461_v23, %v3609_v58  ;;  %2852 = vmatprep.mubr.f32.mxu1 %v5995_v0 }
 0x181   : > { %v5129_v59 = vmul.f32 0.00390625, %v4312_v47  ;;  %v5131_v60 = vmul.f32 0.00390625, %v4386_v48  ;;  %v4425_v61 = vadd.f32 %v4424_v28, %v3608_v49  ;;  %v4499_v62 = vadd.f32 %v4498_v29, %v3610_v50  ;;  %v1319_v63 = vpop.f32.mrb[72].mxu0  ;;  %v2536_v1 = vpop.f32.mrb[72].mxu1 }
 0x182   : > { %v1314_v2 = vadd.f32 %v1313_v40, %v6470_v3  ;;  %v2531_v7 = vadd.f32 %v2530_v41, %v6472_v4  ;;  %v1316_v56 = vadd.f32 %v1315_v45, %v6474_v5  ;;  %v2533_v8 = vadd.f32 %v2532_v46, %v6476_v6  ;;  %v1321_v9 = vpop.f32.mrb[73].mxu0  ;;  %5550 = vmatmul.mubr.msk.f32.gmra.mrb[178].mxu0 %vm451_vm1, %v320_v51  ;;  %v2538_v10 = vpop.f32.mrb[73].mxu1 }
 0x183   : > { %v5176_v11 = vcombine.low %v5128_v52, %v5129_v59  ;;  %v5177_v12 = vcombine.low %v5130_v53, %v5131_v60  ;;  %v1320_v13 = vadd.f32 %v1319_v63, %v6470_v3  ;;  %v2537_v14 = vadd.f32 %v2536_v1, %v6472_v4  ;;  %5744 = vmatmul.mubr.msk.f32.gmra.mrb[178].mxu1 %vm451_vm1, %v320_v51  ;;  %v323_v60 = vld [vmem:[%s8323_s0 + $0x2e0] sm:$0xff] }
 0x184   : > { %v3611_v16 = vmax.f32 %v1314_v2, 0.0  ;;  %v3613_v17 = vmax.f32 %v2531_v7, 0.0  ;;  %v3612_v18 = vmax.f32 %v1316_v56, 0.0  ;;  %v3614_v19 = vmax.f32 %v2533_v8, 0.0  ;;  %1641 = vmatprep.mubr.f32.mxu0 %v5995_v0  ;;  %2858 = vmatprep.mubr.f32.mxu1 %v5995_v0 }
 0x185   : > { %v5184_v20 = vrot.slane %v5176_v11, %v6831_v32  ;;  %v5191_v21 = vrot.slane %v5177_v12, %v6831_v32  ;;  %v3615_v22 = vmax.f32 %v1320_v13, 0.0  ;;  %v3617_v23 = vmax.f32 %v2537_v14, 0.0  ;;  %v1325_v24 = vpop.f32.mrb[74].mxu0  ;;  %v2542_v25 = vpop.f32.mrb[74].mxu1 }
 0x186   : > { %v4389_v26 = vadd.f32 %v4388_v55, %v3611_v16  ;;  %v4463_v27 = vadd.f32 %v4462_v57, %v3613_v17  ;;  %v4426_v28 = vadd.f32 %v4425_v61, %v3612_v18  ;;  %v4500_v29 = vadd.f32 %v4499_v62, %v3614_v19  ;;  %v1327_v30 = vpop.f32.mrb[75].mxu0  ;;  %5551 = vmatmul.mubr.msk.f32.gmra.mrb[180].mxu0 %vm451_vm1, %v321_v15  ;;  %v2544_v31 = vpop.f32.mrb[75].mxu1 }
 0x187   : > { %v5192_v33 = vcombine.low %v5184_v20, %v5191_v21  ;;  %v1322_v34 = vadd.f32 %v1321_v9, %v6474_v5  ;;  %v2539_v35 = vadd.f32 %v2538_v10, %v6476_v6  ;;  %v1326_v36 = vadd.f32 %v1325_v24, %v6470_v3  ;;  %5745 = vmatmul.mubr.msk.f32.gmra.mrb[180].mxu1 %vm451_vm1, %v321_v15  ;;  %v324_v20 = vld [vmem:[%s8323_s0 + $0x2e8] sm:$0xff] }
 0x188   : > { %v4390_v38 = vadd.f32 %v4389_v26, %v3615_v22  ;;  %v4464_v39 = vadd.f32 %v4463_v27, %v3617_v23  ;;  %v2543_v40 = vadd.f32 %v2542_v25, %v6472_v4  ;;  %v1328_v41 = vadd.f32 %v1327_v30, %v6474_v5  ;;  %1647 = vmatprep.mubr.f32.mxu0 %v5995_v0 }
 0x189   : > { %v5199_v42 = vrot.slane %v5192_v33, %v6831_v32  ;;  %v3616_v43 = vmax.f32 %v1322_v34, 0.0  ;;  %v3618_v44 = vmax.f32 %v2539_v35, 0.0  ;;  %v3619_v58 = vmax.f32 %v1326_v36, 0.0  ;;  %v1331_v45 = vpop.f32.mrb[76].mxu0  ;;  %v2548_v46 = vpop.f32.mrb[76].mxu1  ;;  %2864 = vmatprep.mubr.f32.mxu1 %v5995_v0 }
 0x18a   : > { %v3621_v47 = vmax.f32 %v2543_v40, 0.0  ;;  %v3620_v48 = vmax.f32 %v1328_v41, 0.0  ;;  %v2545_v49 = vadd.f32 %v2544_v31, %v6476_v6  ;;  %v1332_v50 = vadd.f32 %v1331_v45, %v6470_v3  ;;  %v1333_v51 = vpop.f32.mrb[77].mxu0  ;;  %5552 = vmatmul.mubr.msk.f32.gmra.mrb[182].mxu0 %vm451_vm1, %v322_v37  ;;  %v2550_v52 = vpop.f32.mrb[77].mxu1  ;;  %v325_v40 = vld [vmem:[%s8323_s0 + $0x2f0] sm:$0xff] }
 0x18b   : > { %5330 = vst.msk [vmem:[%s6915_s18] sm:$0xf] %vm6873_vm2, %v5199_v42  ;;  %v4427_v53 = vadd.f32 %v4426_v28, %v3616_v43  ;;  %v4501_v55 = vadd.f32 %v4500_v29, %v3618_v44  ;;  %v4391_v57 = vadd.f32 %v4390_v38, %v3619_v58  ;;  %v2549_v59 = vadd.f32 %v2548_v46, %v6472_v4 }
 0x18c   : > { %5746 = vmatmul.mubr.msk.f32.gmra.mrb[182].mxu1 %vm451_vm1, %v322_v37  ;;  %v4465_v61 = vadd.f32 %v4464_v39, %v3621_v47  ;;  %v3622_v62 = vmax.f32 %v2545_v49, 0.0  ;;  %v3623_v63 = vmax.f32 %v1332_v50, 0.0  ;;  %v1334_v1 = vadd.f32 %v1333_v51, %v6474_v5  ;;  %1653 = vmatprep.mubr.f32.mxu0 %v5995_v0 }
 0x18d   : > { %2870 = vmatprep.mubr.f32.mxu1 %v5995_v0  ;;  %v4428_v2 = vadd.f32 %v4427_v53, %v3620_v48  ;;  %v3625_v7 = vmax.f32 %v2549_v59, 0.0  ;;  %v2551_v56 = vadd.f32 %v2550_v52, %v6476_v6  ;;  %v1337_v8 = vpop.f32.mrb[78].mxu0  ;;  %v2554_v9 = vpop.f32.mrb[78].mxu1 }
 0x18e   : > { %v4502_v10 = vadd.f32 %v4501_v55, %v3622_v62  ;;  %v4392_v11 = vadd.f32 %v4391_v57, %v3623_v63  ;;  %v3624_v12 = vmax.f32 %v1334_v1, 0.0  ;;  %v1338_v13 = vadd.f32 %v1337_v8, %v6470_v3  ;;  %v1339_v14 = vpop.f32.mrb[79].mxu0  ;;  %5553 = vmatmul.mubr.msk.f32.gmra.mrb[184].mxu0 %vm451_vm1, %v323_v60  ;;  %v2556_v15 = vpop.f32.mrb[79].mxu1 }
 0x18f   : > { %v4466_v16 = vadd.f32 %v4465_v61, %v3625_v7  ;;  %v3626_v17 = vmax.f32 %v2551_v56, 0.0  ;;  %v2555_v18 = vadd.f32 %v2554_v9, %v6472_v4  ;;  %v1340_v19 = vadd.f32 %v1339_v14, %v6474_v5  ;;  %1659 = vmatprep.mubr.f32.mxu0 %v5995_v0 }
 0x190   : > { %5747 = vmatmul.mubr.msk.f32.gmra.mrb[184].mxu1 %vm451_vm1, %v323_v60  ;;  %v4429_v21 = vadd.f32 %v4428_v2, %v3624_v12  ;;  %v3627_v22 = vmax.f32 %v1338_v13, 0.0  ;;  %v2557_v23 = vadd.f32 %v2556_v15, %v6476_v6  ;;  %v326_v60 = vld [vmem:[%s8323_s0 + $0x2f8] sm:$0xff] }
 0x191   : > { %2876 = vmatprep.mubr.f32.mxu1 %v5995_v0  ;;  %v4503_v24 = vadd.f32 %v4502_v10, %v3626_v17  ;;  %v3629_v25 = vmax.f32 %v2555_v18, 0.0  ;;  %v3628_v26 = vmax.f32 %v1340_v19, 0.0  ;;  %v1343_v27 = vpop.f32.mrb[80].mxu0  ;;  %v2560_v28 = vpop.f32.mrb[80].mxu1  ;;  %v327_v17 = vld [vmem:[%s8323_s0 + $0x300] sm:$0xff] }
 0x192   : > { %v4393_v29 = vadd.f32 %v4392_v11, %v3627_v22  ;;  %v3630_v30 = vmax.f32 %v2557_v23, 0.0  ;;  %v1344_v31 = vadd.f32 %v1343_v27, %v6470_v3  ;;  %v2561_v33 = vadd.f32 %v2560_v28, %v6472_v4  ;;  %v1345_v34 = vpop.f32.mrb[81].mxu0  ;;  %5554 = vmatmul.mubr.msk.f32.gmra.mrb[186].mxu0 %vm451_vm1, %v324_v20  ;;  %v2562_v35 = vpop.f32.mrb[81].mxu1 }
 0x193   : > { %v4467_v36 = vadd.f32 %v4466_v16, %v3629_v25  ;;  %v4430_v37 = vadd.f32 %v4429_v21, %v3628_v26  ;;  %v1346_v38 = vadd.f32 %v1345_v34, %v6474_v5  ;;  %v2563_v39 = vadd.f32 %v2562_v35, %v6476_v6  ;;  %1665 = vmatprep.mubr.f32.mxu0 %v5995_v0  ;;  %v328_v35 = vld [vmem:[%s8323_s0 + $0x308] sm:$0xff] }
 0x194   : > { %5748 = vmatmul.mubr.msk.f32.gmra.mrb[186].mxu1 %vm451_vm1, %v324_v20  ;;  %v4504_v41 = vadd.f32 %v4503_v24, %v3630_v30  ;;  %v3631_v42 = vmax.f32 %v1344_v31, 0.0  ;;  %v3633_v43 = vmax.f32 %v2561_v33, 0.0 }
 0x195   : > { %2882 = vmatprep.mubr.f32.mxu1 %v5995_v0  ;;  %v3632_v44 = vmax.f32 %v1346_v38, 0.0  ;;  %v3634_v58 = vmax.f32 %v2563_v39, 0.0  ;;  %v1349_v45 = vpop.f32.mrb[82].mxu0  ;;  %v2566_v46 = vpop.f32.mrb[82].mxu1 }
 0x196   : > { %v4394_v47 = vadd.f32 %v4393_v29, %v3631_v42  ;;  %v4468_v48 = vadd.f32 %v4467_v36, %v3633_v43  ;;  %v1350_v49 = vadd.f32 %v1349_v45, %v6470_v3  ;;  %v2567_v50 = vadd.f32 %v2566_v46, %v6472_v4  ;;  %v1351_v51 = vpop.f32.mrb[83].mxu0  ;;  %5555 = vmatmul.mubr.msk.f32.gmra.mrb[188].mxu0 %vm451_vm1, %v325_v40  ;;  %v2568_v52 = vpop.f32.mrb[83].mxu1 }
 0x197   : > { %v4431_v53 = vadd.f32 %v4430_v37, %v3632_v44  ;;  %v4505_v55 = vadd.f32 %v4504_v41, %v3634_v58  ;;  %v1352_v57 = vadd.f32 %v1351_v51, %v6474_v5  ;;  %v2569_v59 = vadd.f32 %v2568_v52, %v6476_v6  ;;  %1671 = vmatprep.mubr.f32.mxu0 %v5995_v0  ;;  %v329_v51 = vld [vmem:[%s8323_s0 + $0x310] sm:$0xff] }
 0x198   : > { %5749 = vmatmul.mubr.msk.f32.gmra.mrb[188].mxu1 %vm451_vm1, %v325_v40  ;;  %v3635_v61 = vmax.f32 %v1350_v49, 0.0  ;;  %v3637_v62 = vmax.f32 %v2567_v50, 0.0 }
 0x199   : > { %2888 = vmatprep.mubr.f32.mxu1 %v5995_v0  ;;  %v3636_v63 = vmax.f32 %v1352_v57, 0.0  ;;  %v3638_v1 = vmax.f32 %v2569_v59, 0.0  ;;  %v1355_v2 = vpop.f32.mrb[84].mxu0  ;;  %v2572_v7 = vpop.f32.mrb[84].mxu1 }
 0x19a   : > { %v4395_v56 = vadd.f32 %v4394_v47, %v3635_v61  ;;  %v4469_v8 = vadd.f32 %v4468_v48, %v3637_v62  ;;  %v1356_v9 = vadd.f32 %v1355_v2, %v6470_v3  ;;  %v2573_v10 = vadd.f32 %v2572_v7, %v6472_v4  ;;  %v1357_v11 = vpop.f32.mrb[85].mxu0  ;;  %5556 = vmatmul.mubr.msk.f32.gmra.mrb[190].mxu0 %vm451_vm1, %v326_v60  ;;  %v2574_v12 = vpop.f32.mrb[85].mxu1 }
 0x19b   : > { %v4432_v13 = vadd.f32 %v4431_v53, %v3636_v63  ;;  %v4506_v14 = vadd.f32 %v4505_v55, %v3638_v1  ;;  %v1358_v15 = vadd.f32 %v1357_v11, %v6474_v5  ;;  %v2575_v16 = vadd.f32 %v2574_v12, %v6476_v6  ;;  %1677 = vmatprep.mubr.f32.mxu0 %v5995_v0  ;;  %v330_v11 = vld [vmem:[%s8323_s0 + $0x318] sm:$0xff] }
 0x19c   : > { %5750 = vmatmul.mubr.msk.f32.gmra.mrb[190].mxu1 %vm451_vm1, %v326_v60  ;;  %v3639_v18 = vmax.f32 %v1356_v9, 0.0  ;;  %v3641_v19 = vmax.f32 %v2573_v10, 0.0 }
 0x19d   : > { %2894 = vmatprep.mubr.f32.mxu1 %v5995_v0  ;;  %v3640_v20 = vmax.f32 %v1358_v15, 0.0  ;;  %v3642_v21 = vmax.f32 %v2575_v16, 0.0  ;;  %v1361_v22 = vpop.f32.mrb[86].mxu0  ;;  %v2578_v23 = vpop.f32.mrb[86].mxu1 }
 0x19e   : > { %v4396_v24 = vadd.f32 %v4395_v56, %v3639_v18  ;;  %v4470_v25 = vadd.f32 %v4469_v8, %v3641_v19  ;;  %v1362_v26 = vadd.f32 %v1361_v22, %v6470_v3  ;;  %v2579_v27 = vadd.f32 %v2578_v23, %v6472_v4  ;;  %v1363_v28 = vpop.f32.mrb[87].mxu0  ;;  %5557 = vmatmul.mubr.msk.f32.gmra.mrb[192].mxu0 %vm451_vm1, %v327_v17  ;;  %v2580_v29 = vpop.f32.mrb[87].mxu1 }
 0x19f   : > { %v4433_v30 = vadd.f32 %v4432_v13, %v3640_v20  ;;  %v4507_v31 = vadd.f32 %v4506_v14, %v3642_v21  ;;  %v1364_v33 = vadd.f32 %v1363_v28, %v6474_v5  ;;  %v2581_v34 = vadd.f32 %v2580_v29, %v6476_v6  ;;  %1683 = vmatprep.mubr.f32.mxu0 %v5995_v0  ;;  %v331_v28 = vld [vmem:[%s8323_s0 + $0x320] sm:$0xff] }
 0x1a0   : > { %5751 = vmatmul.mubr.msk.f32.gmra.mrb[192].mxu1 %vm451_vm1, %v327_v17  ;;  %v3643_v36 = vmax.f32 %v1362_v26, 0.0  ;;  %v3645_v37 = vmax.f32 %v2579_v27, 0.0 }
 0x1a1   : > { %2900 = vmatprep.mubr.f32.mxu1 %v5995_v0  ;;  %v3644_v38 = vmax.f32 %v1364_v33, 0.0  ;;  %v3646_v39 = vmax.f32 %v2581_v34, 0.0  ;;  %v1367_v40 = vpop.f32.mrb[88].mxu0  ;;  %v2584_v41 = vpop.f32.mrb[88].mxu1 }
 0x1a2   : > { %v4397_v42 = vadd.f32 %v4396_v24, %v3643_v36  ;;  %v4471_v43 = vadd.f32 %v4470_v25, %v3645_v37  ;;  %v1368_v44 = vadd.f32 %v1367_v40, %v6470_v3  ;;  %v2585_v58 = vadd.f32 %v2584_v41, %v6472_v4  ;;  %v1369_v45 = vpop.f32.mrb[89].mxu0  ;;  %5558 = vmatmul.mubr.msk.f32.gmra.mrb[194].mxu0 %vm451_vm1, %v328_v35  ;;  %v2586_v46 = vpop.f32.mrb[89].mxu1 }
 0x1a3   : > { %v4434_v47 = vadd.f32 %v4433_v30, %v3644_v38  ;;  %v4508_v48 = vadd.f32 %v4507_v31, %v3646_v39  ;;  %v1370_v49 = vadd.f32 %v1369_v45, %v6474_v5  ;;  %v2587_v50 = vadd.f32 %v2586_v46, %v6476_v6  ;;  %1689 = vmatprep.mubr.f32.mxu0 %v5995_v0  ;;  %v332_v45 = vld [vmem:[%s8323_s0 + $0x328] sm:$0xff] }
 0x1a4   : > { %5752 = vmatmul.mubr.msk.f32.gmra.mrb[194].mxu1 %vm451_vm1, %v328_v35  ;;  %v3647_v52 = vmax.f32 %v1368_v44, 0.0  ;;  %v3649_v53 = vmax.f32 %v2585_v58, 0.0 }
 0x1a5   : > { %2906 = vmatprep.mubr.f32.mxu1 %v5995_v0  ;;  %v3648_v55 = vmax.f32 %v1370_v49, 0.0  ;;  %v3650_v57 = vmax.f32 %v2587_v50, 0.0  ;;  %v1373_v59 = vpop.f32.mrb[90].mxu0  ;;  %v2590_v60 = vpop.f32.mrb[90].mxu1 }
 0x1a6   : > { %v4398_v61 = vadd.f32 %v4397_v42, %v3647_v52  ;;  %v4472_v62 = vadd.f32 %v4471_v43, %v3649_v53  ;;  %v1374_v63 = vadd.f32 %v1373_v59, %v6470_v3  ;;  %v2591_v1 = vadd.f32 %v2590_v60, %v6472_v4  ;;  %v1375_v2 = vpop.f32.mrb[91].mxu0  ;;  %5559 = vmatmul.mubr.msk.f32.gmra.mrb[196].mxu0 %vm451_vm1, %v329_v51  ;;  %v2592_v7 = vpop.f32.mrb[91].mxu1 }
 0x1a7   : > { %v4435_v56 = vadd.f32 %v4434_v47, %v3648_v55  ;;  %v4509_v8 = vadd.f32 %v4508_v48, %v3650_v57  ;;  %v1376_v9 = vadd.f32 %v1375_v2, %v6474_v5  ;;  %v2593_v10 = vadd.f32 %v2592_v7, %v6476_v6  ;;  %1695 = vmatprep.mubr.f32.mxu0 %v5995_v0  ;;  %v333_v2 = vld [vmem:[%s8323_s0 + $0x330] sm:$0xff] }
 0x1a8   : > { %5753 = vmatmul.mubr.msk.f32.gmra.mrb[196].mxu1 %vm451_vm1, %v329_v51  ;;  %v3651_v12 = vmax.f32 %v1374_v63, 0.0  ;;  %v3653_v13 = vmax.f32 %v2591_v1, 0.0 }
 0x1a9   : > { %2912 = vmatprep.mubr.f32.mxu1 %v5995_v0  ;;  %v3652_v14 = vmax.f32 %v1376_v9, 0.0  ;;  %v3654_v15 = vmax.f32 %v2593_v10, 0.0  ;;  %v1379_v16 = vpop.f32.mrb[92].mxu0  ;;  %v2596_v17 = vpop.f32.mrb[92].mxu1 }
 0x1aa   : > { %v4399_v18 = vadd.f32 %v4398_v61, %v3651_v12  ;;  %v4473_v19 = vadd.f32 %v4472_v62, %v3653_v13  ;;  %v1380_v20 = vadd.f32 %v1379_v16, %v6470_v3  ;;  %v2597_v21 = vadd.f32 %v2596_v17, %v6472_v4  ;;  %v1381_v22 = vpop.f32.mrb[93].mxu0  ;;  %5560 = vmatmul.mubr.msk.f32.gmra.mrb[198].mxu0 %vm451_vm1, %v330_v11  ;;  %v2598_v23 = vpop.f32.mrb[93].mxu1 }
 0x1ab   : > { %v4436_v24 = vadd.f32 %v4435_v56, %v3652_v14  ;;  %v4510_v25 = vadd.f32 %v4509_v8, %v3654_v15  ;;  %v1382_v26 = vadd.f32 %v1381_v22, %v6474_v5  ;;  %v2599_v27 = vadd.f32 %v2598_v23, %v6476_v6  ;;  %1701 = vmatprep.mubr.f32.mxu0 %v5995_v0  ;;  %v334_v22 = vld [vmem:[%s8323_s0 + $0x338] sm:$0xff] }
 0x1ac   : > { %5754 = vmatmul.mubr.msk.f32.gmra.mrb[198].mxu1 %vm451_vm1, %v330_v11  ;;  %v3655_v29 = vmax.f32 %v1380_v20, 0.0  ;;  %v3657_v30 = vmax.f32 %v2597_v21, 0.0 }
 0x1ad   : > { %2918 = vmatprep.mubr.f32.mxu1 %v5995_v0  ;;  %v3656_v31 = vmax.f32 %v1382_v26, 0.0  ;;  %v3658_v33 = vmax.f32 %v2599_v27, 0.0  ;;  %v1385_v34 = vpop.f32.mrb[94].mxu0  ;;  %v2602_v35 = vpop.f32.mrb[94].mxu1 }
 0x1ae   : > { %v4400_v36 = vadd.f32 %v4399_v18, %v3655_v29  ;;  %v4474_v37 = vadd.f32 %v4473_v19, %v3657_v30  ;;  %v1386_v38 = vadd.f32 %v1385_v34, %v6470_v3  ;;  %v2603_v39 = vadd.f32 %v2602_v35, %v6472_v4  ;;  %v1387_v40 = vpop.f32.mrb[95].mxu0  ;;  %5561 = vmatmul.mubr.msk.f32.gmra.mrb[200].mxu0 %vm451_vm1, %v331_v28  ;;  %v2604_v41 = vpop.f32.mrb[95].mxu1 }
 0x1af   : > { %v4437_v42 = vadd.f32 %v4436_v24, %v3656_v31  ;;  %v4511_v43 = vadd.f32 %v4510_v25, %v3658_v33  ;;  %v1388_v44 = vadd.f32 %v1387_v40, %v6474_v5  ;;  %v2605_v58 = vadd.f32 %v2604_v41, %v6476_v6  ;;  %1707 = vmatprep.mubr.f32.mxu0 %v5995_v0  ;;  %v335_v40 = vld [vmem:[%s8323_s0 + $0x340] sm:$0xff] }
 0x1b0   : > { %5755 = vmatmul.mubr.msk.f32.gmra.mrb[200].mxu1 %vm451_vm1, %v331_v28  ;;  %v3659_v46 = vmax.f32 %v1386_v38, 0.0  ;;  %v3661_v47 = vmax.f32 %v2603_v39, 0.0 }
 0x1b1   : > { %2924 = vmatprep.mubr.f32.mxu1 %v5995_v0  ;;  %v3660_v48 = vmax.f32 %v1388_v44, 0.0  ;;  %v3662_v49 = vmax.f32 %v2605_v58, 0.0  ;;  %v1391_v50 = vpop.f32.mrb[96].mxu0  ;;  %v2608_v51 = vpop.f32.mrb[96].mxu1 }
 0x1b2   : > { %v4401_v52 = vadd.f32 %v4400_v36, %v3659_v46  ;;  %v4475_v53 = vadd.f32 %v4474_v37, %v3661_v47  ;;  %v1392_v55 = vadd.f32 %v1391_v50, %v6470_v3  ;;  %v2609_v57 = vadd.f32 %v2608_v51, %v6472_v4  ;;  %v1393_v59 = vpop.f32.mrb[97].mxu0  ;;  %5562 = vmatmul.mubr.msk.f32.gmra.mrb[202].mxu0 %vm451_vm1, %v332_v45  ;;  %v2610_v60 = vpop.f32.mrb[97].mxu1 }
 0x1b3   : > { %v4438_v61 = vadd.f32 %v4437_v42, %v3660_v48  ;;  %v4512_v62 = vadd.f32 %v4511_v43, %v3662_v49  ;;  %v1394_v63 = vadd.f32 %v1393_v59, %v6474_v5  ;;  %v2611_v1 = vadd.f32 %v2610_v60, %v6476_v6  ;;  %1713 = vmatprep.mubr.f32.mxu0 %v5995_v0  ;;  %v336_v59 = vld [vmem:[%s8323_s0 + $0x348] sm:$0xff] }
 0x1b4   : > { %5756 = vmatmul.mubr.msk.f32.gmra.mrb[202].mxu1 %vm451_vm1, %v332_v45  ;;  %v3663_v7 = vmax.f32 %v1392_v55, 0.0  ;;  %v3665_v56 = vmax.f32 %v2609_v57, 0.0 }
 0x1b5   : > { %2930 = vmatprep.mubr.f32.mxu1 %v5995_v0  ;;  %v3664_v8 = vmax.f32 %v1394_v63, 0.0  ;;  %v3666_v9 = vmax.f32 %v2611_v1, 0.0  ;;  %v1397_v10 = vpop.f32.mrb[98].mxu0  ;;  %v2614_v11 = vpop.f32.mrb[98].mxu1 }
 0x1b6   : > { %v4402_v12 = vadd.f32 %v4401_v52, %v3663_v7  ;;  %v4476_v13 = vadd.f32 %v4475_v53, %v3665_v56  ;;  %v1398_v14 = vadd.f32 %v1397_v10, %v6470_v3  ;;  %v2615_v15 = vadd.f32 %v2614_v11, %v6472_v4  ;;  %v1399_v16 = vpop.f32.mrb[99].mxu0  ;;  %5563 = vmatmul.mubr.msk.f32.gmra.mrb[204].mxu0 %vm451_vm1, %v333_v2  ;;  %v2616_v17 = vpop.f32.mrb[99].mxu1 }
 0x1b7   : > { %v4439_v18 = vadd.f32 %v4438_v61, %v3664_v8  ;;  %v4513_v19 = vadd.f32 %v4512_v62, %v3666_v9  ;;  %v1400_v20 = vadd.f32 %v1399_v16, %v6474_v5  ;;  %v2617_v21 = vadd.f32 %v2616_v17, %v6476_v6  ;;  %1719 = vmatprep.mubr.f32.mxu0 %v5995_v0  ;;  %v337_v16 = vld [vmem:[%s8323_s0 + $0x350] sm:$0xff] }
 0x1b8   : > { %5757 = vmatmul.mubr.msk.f32.gmra.mrb[204].mxu1 %vm451_vm1, %v333_v2  ;;  %v3667_v23 = vmax.f32 %v1398_v14, 0.0  ;;  %v3669_v24 = vmax.f32 %v2615_v15, 0.0 }
 0x1b9   : > { %2936 = vmatprep.mubr.f32.mxu1 %v5995_v0  ;;  %v3668_v25 = vmax.f32 %v1400_v20, 0.0  ;;  %v3670_v26 = vmax.f32 %v2617_v21, 0.0  ;;  %v1403_v27 = vpop.f32.mrb[100].mxu0  ;;  %v2620_v28 = vpop.f32.mrb[100].mxu1 }
 0x1ba   : > { %v4403_v29 = vadd.f32 %v4402_v12, %v3667_v23  ;;  %v4477_v30 = vadd.f32 %v4476_v13, %v3669_v24  ;;  %v1404_v31 = vadd.f32 %v1403_v27, %v6470_v3  ;;  %v2621_v33 = vadd.f32 %v2620_v28, %v6472_v4  ;;  %v1405_v34 = vpop.f32.mrb[101].mxu0  ;;  %5564 = vmatmul.mubr.msk.f32.gmra.mrb[206].mxu0 %vm451_vm1, %v334_v22  ;;  %v2622_v35 = vpop.f32.mrb[101].mxu1 }
 0x1bb   : > { %v4440_v36 = vadd.f32 %v4439_v18, %v3668_v25  ;;  %v4514_v37 = vadd.f32 %v4513_v19, %v3670_v26  ;;  %v1406_v38 = vadd.f32 %v1405_v34, %v6474_v5  ;;  %v2623_v39 = vadd.f32 %v2622_v35, %v6476_v6  ;;  %1725 = vmatprep.mubr.f32.mxu0 %v5995_v0  ;;  %v338_v34 = vld [vmem:[%s8323_s0 + $0x358] sm:$0xff] }
 0x1bc   : > { %5758 = vmatmul.mubr.msk.f32.gmra.mrb[206].mxu1 %vm451_vm1, %v334_v22  ;;  %v3671_v41 = vmax.f32 %v1404_v31, 0.0  ;;  %v3673_v42 = vmax.f32 %v2621_v33, 0.0 }
 0x1bd   : > { %2942 = vmatprep.mubr.f32.mxu1 %v5995_v0  ;;  %v3672_v43 = vmax.f32 %v1406_v38, 0.0  ;;  %v3674_v44 = vmax.f32 %v2623_v39, 0.0  ;;  %v1409_v58 = vpop.f32.mrb[102].mxu0  ;;  %v2626_v45 = vpop.f32.mrb[102].mxu1 }
 0x1be   : > { %v4404_v46 = vadd.f32 %v4403_v29, %v3671_v41  ;;  %v4478_v47 = vadd.f32 %v4477_v30, %v3673_v42  ;;  %v1410_v48 = vadd.f32 %v1409_v58, %v6470_v3  ;;  %v2627_v49 = vadd.f32 %v2626_v45, %v6472_v4  ;;  %v1411_v50 = vpop.f32.mrb[103].mxu0  ;;  %5565 = vmatmul.mubr.msk.f32.gmra.mrb[208].mxu0 %vm451_vm1, %v335_v40  ;;  %v2628_v51 = vpop.f32.mrb[103].mxu1 }
 0x1bf   : > { %v4441_v52 = vadd.f32 %v4440_v36, %v3672_v43  ;;  %v4515_v53 = vadd.f32 %v4514_v37, %v3674_v44  ;;  %v1412_v55 = vadd.f32 %v1411_v50, %v6474_v5  ;;  %v2629_v57 = vadd.f32 %v2628_v51, %v6476_v6  ;;  %1731 = vmatprep.mubr.f32.mxu0 %v5995_v0  ;;  %v339_v50 = vld [vmem:[%s8323_s0 + $0x360] sm:$0xff] }
 0x1c0   : > { %5759 = vmatmul.mubr.msk.f32.gmra.mrb[208].mxu1 %vm451_vm1, %v335_v40  ;;  %v3675_v60 = vmax.f32 %v1410_v48, 0.0  ;;  %v3677_v61 = vmax.f32 %v2627_v49, 0.0 }
 0x1c1   : > { %2948 = vmatprep.mubr.f32.mxu1 %v5995_v0  ;;  %v3676_v62 = vmax.f32 %v1412_v55, 0.0  ;;  %v3678_v63 = vmax.f32 %v2629_v57, 0.0  ;;  %v1415_v1 = vpop.f32.mrb[104].mxu0  ;;  %v2632_v2 = vpop.f32.mrb[104].mxu1 }
 0x1c2   : > { %v4405_v7 = vadd.f32 %v4404_v46, %v3675_v60  ;;  %v4479_v56 = vadd.f32 %v4478_v47, %v3677_v61  ;;  %v1416_v8 = vadd.f32 %v1415_v1, %v6470_v3  ;;  %v2633_v9 = vadd.f32 %v2632_v2, %v6472_v4  ;;  %v1417_v10 = vpop.f32.mrb[105].mxu0  ;;  %5566 = vmatmul.mubr.msk.f32.gmra.mrb[210].mxu0 %vm451_vm1, %v336_v59  ;;  %v2634_v11 = vpop.f32.mrb[105].mxu1 }
 0x1c3   : > { %v4442_v12 = vadd.f32 %v4441_v52, %v3676_v62  ;;  %v4516_v13 = vadd.f32 %v4515_v53, %v3678_v63  ;;  %v1418_v14 = vadd.f32 %v1417_v10, %v6474_v5  ;;  %v2635_v15 = vadd.f32 %v2634_v11, %v6476_v6  ;;  %1737 = vmatprep.mubr.f32.mxu0 %v5995_v0 }
 0x1c4   : > { %5760 = vmatmul.mubr.msk.f32.gmra.mrb[210].mxu1 %vm451_vm1, %v336_v59  ;;  %v3679_v17 = vmax.f32 %v1416_v8, 0.0  ;;  %v3681_v18 = vmax.f32 %v2633_v9, 0.0  ;;  %v340_v9 = vld [vmem:[%s8323_s0 + $0x368] sm:$0xff] }
 0x1c5   : > { %2954 = vmatprep.mubr.f32.mxu1 %v5995_v0  ;;  %v3680_v19 = vmax.f32 %v1418_v14, 0.0  ;;  %v3682_v20 = vmax.f32 %v2635_v15, 0.0  ;;  %v1421_v21 = vpop.f32.mrb[106].mxu0  ;;  %v2638_v22 = vpop.f32.mrb[106].mxu1 }
 0x1c6   : > { %v4406_v23 = vadd.f32 %v4405_v7, %v3679_v17  ;;  %v4480_v24 = vadd.f32 %v4479_v56, %v3681_v18  ;;  %v1422_v25 = vadd.f32 %v1421_v21, %v6470_v3  ;;  %v2639_v26 = vadd.f32 %v2638_v22, %v6472_v4  ;;  %v1423_v27 = vpop.f32.mrb[107].mxu0  ;;  %5567 = vmatmul.mubr.msk.f32.gmra.mrb[212].mxu0 %vm451_vm1, %v337_v16  ;;  %v2640_v28 = vpop.f32.mrb[107].mxu1 }
 0x1c7   : > { %v4443_v29 = vadd.f32 %v4442_v12, %v3680_v19  ;;  %v4517_v30 = vadd.f32 %v4516_v13, %v3682_v20  ;;  %v1424_v31 = vadd.f32 %v1423_v27, %v6474_v5  ;;  %v2641_v33 = vadd.f32 %v2640_v28, %v6476_v6  ;;  %1743 = vmatprep.mubr.f32.mxu0 %v5995_v0 }
 0x1c8   : > { %5761 = vmatmul.mubr.msk.f32.gmra.mrb[212].mxu1 %vm451_vm1, %v337_v16  ;;  %v3683_v35 = vmax.f32 %v1422_v25, 0.0  ;;  %v3685_v36 = vmax.f32 %v2639_v26, 0.0  ;;  %v341_v25 = vld [vmem:[%s8323_s0 + $0x370] sm:$0xff] }
 0x1c9   : > { %2960 = vmatprep.mubr.f32.mxu1 %v5995_v0  ;;  %v3684_v37 = vmax.f32 %v1424_v31, 0.0  ;;  %v3686_v38 = vmax.f32 %v2641_v33, 0.0  ;;  %v1427_v39 = vpop.f32.mrb[108].mxu0  ;;  %v2644_v40 = vpop.f32.mrb[108].mxu1 }
 0x1ca   : > { %v4407_v41 = vadd.f32 %v4406_v23, %v3683_v35  ;;  %v4481_v42 = vadd.f32 %v4480_v24, %v3685_v36  ;;  %v1428_v43 = vadd.f32 %v1427_v39, %v6470_v3  ;;  %v2645_v44 = vadd.f32 %v2644_v40, %v6472_v4  ;;  %v1429_v58 = vpop.f32.mrb[109].mxu0  ;;  %5568 = vmatmul.mubr.msk.f32.gmra.mrb[214].mxu0 %vm451_vm1, %v338_v34  ;;  %v2646_v45 = vpop.f32.mrb[109].mxu1 }
 0x1cb   : > { %v4444_v46 = vadd.f32 %v4443_v29, %v3684_v37  ;;  %v4518_v47 = vadd.f32 %v4517_v30, %v3686_v38  ;;  %v1430_v48 = vadd.f32 %v1429_v58, %v6474_v5  ;;  %v2647_v49 = vadd.f32 %v2646_v45, %v6476_v6  ;;  %1749 = vmatprep.mubr.f32.mxu0 %v5995_v0 }
 0x1cc   : > { %5762 = vmatmul.mubr.msk.f32.gmra.mrb[214].mxu1 %vm451_vm1, %v338_v34  ;;  %v3687_v51 = vmax.f32 %v1428_v43, 0.0  ;;  %v3689_v52 = vmax.f32 %v2645_v44, 0.0  ;;  %v342_v43 = vld [vmem:[%s8323_s0 + $0x378] sm:$0xff] }
 0x1cd   : > { %2966 = vmatprep.mubr.f32.mxu1 %v5995_v0  ;;  %v3688_v53 = vmax.f32 %v1430_v48, 0.0  ;;  %v3690_v55 = vmax.f32 %v2647_v49, 0.0  ;;  %v1433_v57 = vpop.f32.mrb[110].mxu0 }
 0x1ce   : > { %v4408_v59 = vadd.f32 %v4407_v41, %v3687_v51  ;;  %v4482_v60 = vadd.f32 %v4481_v42, %v3689_v52  ;;  %v1434_v61 = vadd.f32 %v1433_v57, %v6470_v3  ;;  %v2650_v62 = vpop.f32.mrb[110].mxu1  ;;  %v1435_v63 = vpop.f32.mrb[111].mxu0  ;;  %5569 = vmatmul.mubr.msk.f32.gmra.mrb[216].mxu0 %vm451_vm1, %v339_v50 }
 0x1cf   : > { %v4445_v1 = vadd.f32 %v4444_v46, %v3688_v53  ;;  %v4519_v2 = vadd.f32 %v4518_v47, %v3690_v55  ;;  %v2651_v7 = vadd.f32 %v2650_v62, %v6472_v4  ;;  %v1436_v56 = vadd.f32 %v1435_v63, %v6474_v5  ;;  %v2652_v8 = vpop.f32.mrb[111].mxu1  ;;  %1755 = vmatprep.mubr.f32.mxu0 %v5995_v0  ;;  %v343_v62 = vld [vmem:[%s8323_s0 + $0x380] sm:$0xff] }
 0x1d0   : > { %5763 = vmatmul.mubr.msk.f32.gmra.mrb[216].mxu1 %vm451_vm1, %v339_v50  ;;  %v3691_v10 = vmax.f32 %v1434_v61, 0.0  ;;  %v2653_v11 = vadd.f32 %v2652_v8, %v6476_v6 }
 0x1d1   : > { %2972 = vmatprep.mubr.f32.mxu1 %v5995_v0  ;;  %v3693_v12 = vmax.f32 %v2651_v7, 0.0  ;;  %v3692_v13 = vmax.f32 %v1436_v56, 0.0  ;;  %v1439_v14 = vpop.f32.mrb[112].mxu0 }
 0x1d2   : > { %v4409_v15 = vadd.f32 %v4408_v59, %v3691_v10  ;;  %v3694_v16 = vmax.f32 %v2653_v11, 0.0  ;;  %v1440_v17 = vadd.f32 %v1439_v14, %v6470_v3  ;;  %v2656_v18 = vpop.f32.mrb[112].mxu1  ;;  %v1441_v19 = vpop.f32.mrb[113].mxu0  ;;  %5570 = vmatmul.mubr.msk.f32.gmra.mrb[218].mxu0 %vm451_vm1, %v340_v9 }
 0x1d3   : > { %v4483_v20 = vadd.f32 %v4482_v60, %v3693_v12  ;;  %v4446_v21 = vadd.f32 %v4445_v1, %v3692_v13  ;;  %v2657_v22 = vadd.f32 %v2656_v18, %v6472_v4  ;;  %v1442_v23 = vadd.f32 %v1441_v19, %v6474_v5  ;;  %v2658_v24 = vpop.f32.mrb[113].mxu1  ;;  %1761 = vmatprep.mubr.f32.mxu0 %v5995_v0  ;;  %v344_v19 = vld [vmem:[%s8323_s0 + $0x388] sm:$0xff] }
 0x1d4   : > { %5764 = vmatmul.mubr.msk.f32.gmra.mrb[218].mxu1 %vm451_vm1, %v340_v9  ;;  %v4520_v26 = vadd.f32 %v4519_v2, %v3694_v16  ;;  %v3695_v27 = vmax.f32 %v1440_v17, 0.0  ;;  %v2659_v28 = vadd.f32 %v2658_v24, %v6476_v6 }
 0x1d5   : > { %2978 = vmatprep.mubr.f32.mxu1 %v5995_v0  ;;  %v3697_v29 = vmax.f32 %v2657_v22, 0.0  ;;  %v3696_v30 = vmax.f32 %v1442_v23, 0.0  ;;  %v1445_v31 = vpop.f32.mrb[114].mxu0 }
 0x1d6   : > { %v4410_v33 = vadd.f32 %v4409_v15, %v3695_v27  ;;  %v3698_v34 = vmax.f32 %v2659_v28, 0.0  ;;  %v1446_v35 = vadd.f32 %v1445_v31, %v6470_v3  ;;  %v2662_v36 = vpop.f32.mrb[114].mxu1  ;;  %v1447_v37 = vpop.f32.mrb[115].mxu0  ;;  %5571 = vmatmul.mubr.msk.f32.gmra.mrb[220].mxu0 %vm451_vm1, %v341_v25 }
 0x1d7   : > { %v4484_v38 = vadd.f32 %v4483_v20, %v3697_v29  ;;  %v4447_v39 = vadd.f32 %v4446_v21, %v3696_v30  ;;  %v2663_v40 = vadd.f32 %v2662_v36, %v6472_v4  ;;  %v1448_v41 = vadd.f32 %v1447_v37, %v6474_v5  ;;  %v2664_v42 = vpop.f32.mrb[115].mxu1  ;;  %1767 = vmatprep.mubr.f32.mxu0 %v5995_v0  ;;  %v345_v37 = vld [vmem:[%s8323_s0 + $0x390] sm:$0xff] }
 0x1d8   : > { %5765 = vmatmul.mubr.msk.f32.gmra.mrb[220].mxu1 %vm451_vm1, %v341_v25  ;;  %v4521_v44 = vadd.f32 %v4520_v26, %v3698_v34  ;;  %v3699_v58 = vmax.f32 %v1446_v35, 0.0  ;;  %v2665_v45 = vadd.f32 %v2664_v42, %v6476_v6 }
 0x1d9   : > { %2984 = vmatprep.mubr.f32.mxu1 %v5995_v0  ;;  %v3701_v46 = vmax.f32 %v2663_v40, 0.0  ;;  %v3700_v47 = vmax.f32 %v1448_v41, 0.0  ;;  %v1451_v48 = vpop.f32.mrb[116].mxu0 }
 0x1da   : > { %v4411_v49 = vadd.f32 %v4410_v33, %v3699_v58  ;;  %v3702_v50 = vmax.f32 %v2665_v45, 0.0  ;;  %v1452_v51 = vadd.f32 %v1451_v48, %v6470_v3  ;;  %v2668_v52 = vpop.f32.mrb[116].mxu1  ;;  %v1453_v53 = vpop.f32.mrb[117].mxu0  ;;  %5572 = vmatmul.mubr.msk.f32.gmra.mrb[222].mxu0 %vm451_vm1, %v342_v43 }
 0x1db   : > { %v4485_v55 = vadd.f32 %v4484_v38, %v3701_v46  ;;  %v4448_v57 = vadd.f32 %v4447_v39, %v3700_v47  ;;  %v2669_v59 = vadd.f32 %v2668_v52, %v6472_v4  ;;  %v1454_v60 = vadd.f32 %v1453_v53, %v6474_v5  ;;  %v2670_v61 = vpop.f32.mrb[117].mxu1  ;;  %1773 = vmatprep.mubr.f32.mxu0 %v5995_v0  ;;  %v346_v53 = vld [vmem:[%s8323_s0 + $0x398] sm:$0xff] }
 0x1dc   : > { %5766 = vmatmul.mubr.msk.f32.gmra.mrb[222].mxu1 %vm451_vm1, %v342_v43  ;;  %v4522_v63 = vadd.f32 %v4521_v44, %v3702_v50  ;;  %v3703_v1 = vmax.f32 %v1452_v51, 0.0  ;;  %v2671_v2 = vadd.f32 %v2670_v61, %v6476_v6 }
 0x1dd   : > { %2990 = vmatprep.mubr.f32.mxu1 %v5995_v0  ;;  %v3705_v7 = vmax.f32 %v2669_v59, 0.0  ;;  %v3704_v56 = vmax.f32 %v1454_v60, 0.0  ;;  %v1457_v8 = vpop.f32.mrb[118].mxu0 }
 0x1de   : > { %v4412_v9 = vadd.f32 %v4411_v49, %v3703_v1  ;;  %v3706_v10 = vmax.f32 %v2671_v2, 0.0  ;;  %v1458_v11 = vadd.f32 %v1457_v8, %v6470_v3  ;;  %v2674_v12 = vpop.f32.mrb[118].mxu1  ;;  %v1459_v13 = vpop.f32.mrb[119].mxu0  ;;  %5573 = vmatmul.mubr.msk.f32.gmra.mrb[224].mxu0 %vm451_vm1, %v343_v62 }
 0x1df   : > { %v4486_v14 = vadd.f32 %v4485_v55, %v3705_v7  ;;  %v4449_v15 = vadd.f32 %v4448_v57, %v3704_v56  ;;  %v2675_v16 = vadd.f32 %v2674_v12, %v6472_v4  ;;  %v1460_v17 = vadd.f32 %v1459_v13, %v6474_v5  ;;  %v2676_v18 = vpop.f32.mrb[119].mxu1  ;;  %1779 = vmatprep.mubr.f32.mxu0 %v5995_v0  ;;  %v347_v13 = vld [vmem:[%s8323_s0 + $0x3a0] sm:$0xff] }
 0x1e0   : > { %5767 = vmatmul.mubr.msk.f32.gmra.mrb[224].mxu1 %vm451_vm1, %v343_v62  ;;  %v4523_v20 = vadd.f32 %v4522_v63, %v3706_v10  ;;  %v3707_v21 = vmax.f32 %v1458_v11, 0.0  ;;  %v2677_v22 = vadd.f32 %v2676_v18, %v6476_v6 }
 0x1e1   : > { %2996 = vmatprep.mubr.f32.mxu1 %v5995_v0  ;;  %v3709_v23 = vmax.f32 %v2675_v16, 0.0  ;;  %v3708_v24 = vmax.f32 %v1460_v17, 0.0  ;;  %v1463_v25 = vpop.f32.mrb[120].mxu0 }
 0x1e2   : > { %v4413_v26 = vadd.f32 %v4412_v9, %v3707_v21  ;;  %v3710_v27 = vmax.f32 %v2677_v22, 0.0  ;;  %v1464_v28 = vadd.f32 %v1463_v25, %v6470_v3  ;;  %v2680_v29 = vpop.f32.mrb[120].mxu1  ;;  %v1465_v30 = vpop.f32.mrb[121].mxu0  ;;  %5574 = vmatmul.mubr.msk.f32.gmra.mrb[226].mxu0 %vm451_vm1, %v344_v19 }
 0x1e3   : > { %v4487_v31 = vadd.f32 %v4486_v14, %v3709_v23  ;;  %v4450_v33 = vadd.f32 %v4449_v15, %v3708_v24  ;;  %v2681_v34 = vadd.f32 %v2680_v29, %v6472_v4  ;;  %v1466_v35 = vadd.f32 %v1465_v30, %v6474_v5  ;;  %v2682_v36 = vpop.f32.mrb[121].mxu1  ;;  %1785 = vmatprep.mubr.f32.mxu0 %v5995_v0  ;;  %v348_v30 = vld [vmem:[%s8323_s0 + $0x3a8] sm:$0xff] }
 0x1e4   : > { %5768 = vmatmul.mubr.msk.f32.gmra.mrb[226].mxu1 %vm451_vm1, %v344_v19  ;;  %v4524_v38 = vadd.f32 %v4523_v20, %v3710_v27  ;;  %v3711_v39 = vmax.f32 %v1464_v28, 0.0  ;;  %v2683_v40 = vadd.f32 %v2682_v36, %v6476_v6 }
 0x1e5   : > { %3002 = vmatprep.mubr.f32.mxu1 %v5995_v0  ;;  %v3713_v41 = vmax.f32 %v2681_v34, 0.0  ;;  %v3712_v42 = vmax.f32 %v1466_v35, 0.0  ;;  %v1469_v43 = vpop.f32.mrb[122].mxu0 }
 0x1e6   : > { %v4414_v44 = vadd.f32 %v4413_v26, %v3711_v39  ;;  %v3714_v58 = vmax.f32 %v2683_v40, 0.0  ;;  %v1470_v45 = vadd.f32 %v1469_v43, %v6470_v3  ;;  %v2686_v46 = vpop.f32.mrb[122].mxu1  ;;  %v1471_v47 = vpop.f32.mrb[123].mxu0  ;;  %5575 = vmatmul.mubr.msk.f32.gmra.mrb[228].mxu0 %vm451_vm1, %v345_v37 }
 0x1e7   : > { %v4488_v48 = vadd.f32 %v4487_v31, %v3713_v41  ;;  %v4451_v49 = vadd.f32 %v4450_v33, %v3712_v42  ;;  %v2687_v50 = vadd.f32 %v2686_v46, %v6472_v4  ;;  %v1472_v51 = vadd.f32 %v1471_v47, %v6474_v5  ;;  %v2688_v52 = vpop.f32.mrb[123].mxu1  ;;  %1791 = vmatprep.mubr.f32.mxu0 %v5995_v0  ;;  %v349_v47 = vld [vmem:[%s8323_s0 + $0x3b0] sm:$0xff] }
 0x1e8   : > { %5769 = vmatmul.mubr.msk.f32.gmra.mrb[228].mxu1 %vm451_vm1, %v345_v37  ;;  %v4525_v55 = vadd.f32 %v4524_v38, %v3714_v58  ;;  %v3715_v57 = vmax.f32 %v1470_v45, 0.0  ;;  %v2689_v59 = vadd.f32 %v2688_v52, %v6476_v6 }
 0x1e9   : > { %3008 = vmatprep.mubr.f32.mxu1 %v5995_v0  ;;  %v3717_v60 = vmax.f32 %v2687_v50, 0.0  ;;  %v3716_v61 = vmax.f32 %v1472_v51, 0.0  ;;  %v1475_v62 = vpop.f32.mrb[124].mxu0 }
 0x1ea   : > { %v4415_v63 = vadd.f32 %v4414_v44, %v3715_v57  ;;  %v3718_v1 = vmax.f32 %v2689_v59, 0.0  ;;  %v1476_v2 = vadd.f32 %v1475_v62, %v6470_v3  ;;  %v2692_v7 = vpop.f32.mrb[124].mxu1  ;;  %v1477_v56 = vpop.f32.mrb[125].mxu0  ;;  %5576 = vmatmul.mubr.msk.f32.gmra.mrb[230].mxu0 %vm451_vm1, %v346_v53 }
 0x1eb   : > { %v4489_v8 = vadd.f32 %v4488_v48, %v3717_v60  ;;  %v4452_v9 = vadd.f32 %v4451_v49, %v3716_v61  ;;  %v2693_v10 = vadd.f32 %v2692_v7, %v6472_v4  ;;  %v1478_v11 = vadd.f32 %v1477_v56, %v6474_v5  ;;  %v2694_v12 = vpop.f32.mrb[125].mxu1  ;;  %1797 = vmatprep.mubr.f32.mxu0 %v5995_v0 }
 0x1ec   : > { %5770 = vmatmul.mubr.msk.f32.gmra.mrb[230].mxu1 %vm451_vm1, %v346_v53  ;;  %v4526_v14 = vadd.f32 %v4525_v55, %v3718_v1  ;;  %v3719_v15 = vmax.f32 %v1476_v2, 0.0  ;;  %v2695_v16 = vadd.f32 %v2694_v12, %v6476_v6 }
 0x1ed   : > { %3014 = vmatprep.mubr.f32.mxu1 %v5995_v0  ;;  %v3721_v17 = vmax.f32 %v2693_v10, 0.0  ;;  %v3720_v18 = vmax.f32 %v1478_v11, 0.0  ;;  %v1481_v19 = vpop.f32.mrb[126].mxu0  ;;  %v350_v11 = vld [vmem:[%s8323_s0 + $0x3b8] sm:$0xff] }
 0x1ee   : > { %v4416_v20 = vadd.f32 %v4415_v63, %v3719_v15  ;;  %v3722_v21 = vmax.f32 %v2695_v16, 0.0  ;;  %v1482_v22 = vadd.f32 %v1481_v19, %v6470_v3  ;;  %v2698_v23 = vpop.f32.mrb[126].mxu1  ;;  %v1483_v24 = vpop.f32.mrb[127].mxu0  ;;  %5577 = vmatmul.mubr.msk.f32.gmra.mrb[232].mxu0 %vm451_vm1, %v347_v13 }
 0x1ef   : > { %v4490_v25 = vadd.f32 %v4489_v8, %v3721_v17  ;;  %v4453_v26 = vadd.f32 %v4452_v9, %v3720_v18  ;;  %v2699_v27 = vadd.f32 %v2698_v23, %v6472_v4  ;;  %v1484_v28 = vadd.f32 %v1483_v24, %v6474_v5  ;;  %v2700_v29 = vpop.f32.mrb[127].mxu1  ;;  %1803 = vmatprep.mubr.f32.mxu0 %v5995_v0 }
 0x1f0   : > { %5771 = vmatmul.mubr.msk.f32.gmra.mrb[232].mxu1 %vm451_vm1, %v347_v13  ;;  %v4527_v31 = vadd.f32 %v4526_v14, %v3722_v21  ;;  %v3723_v33 = vmax.f32 %v1482_v22, 0.0  ;;  %v2701_v34 = vadd.f32 %v2700_v29, %v6476_v6 }
 0x1f1   : > { %3020 = vmatprep.mubr.f32.mxu1 %v5995_v0  ;;  %v3725_v35 = vmax.f32 %v2699_v27, 0.0  ;;  %v3724_v36 = vmax.f32 %v1484_v28, 0.0  ;;  %v1487_v37 = vpop.f32.mrb[128].mxu0 }
 0x1f2   : > { %v4417_v38 = vadd.f32 %v4416_v20, %v3723_v33  ;;  %v3726_v39 = vmax.f32 %v2701_v34, 0.0  ;;  %v1488_v40 = vadd.f32 %v1487_v37, %v6470_v3  ;;  %v2704_v41 = vpop.f32.mrb[128].mxu1  ;;  %v1489_v42 = vpop.f32.mrb[129].mxu0  ;;  %5578 = vmatmul.mubr.msk.f32.gmra.mrb[234].mxu0 %vm451_vm1, %v348_v30  ;;  %v351_v33 = vld [vmem:[%s8323_s0 + $0x3c0] sm:$0xff] }
 0x1f3   : > { %v4491_v43 = vadd.f32 %v4490_v25, %v3725_v35  ;;  %v4454_v44 = vadd.f32 %v4453_v26, %v3724_v36  ;;  %v2705_v58 = vadd.f32 %v2704_v41, %v6472_v4  ;;  %v1490_v45 = vadd.f32 %v1489_v42, %v6474_v5  ;;  %v2706_v46 = vpop.f32.mrb[129].mxu1  ;;  %1809 = vmatprep.mubr.f32.mxu0 %v5995_v0 }
 0x1f4   : > { %5772 = vmatmul.mubr.msk.f32.gmra.mrb[234].mxu1 %vm451_vm1, %v348_v30  ;;  %v4418_v48 = vrot.slane %v4417_v38, 4  ;;  %v4528_v49 = vadd.f32 %v4527_v31, %v3726_v39  ;;  %v3727_v50 = vmax.f32 %v1488_v40, 0.0  ;;  %v2707_v51 = vadd.f32 %v2706_v46, %v6476_v6 }
 0x1f5   : > { %3026 = vmatprep.mubr.f32.mxu1 %v5995_v0  ;;  %v4492_v52 = vrot.slane %v4491_v43, 4  ;;  %v4455_v53 = vrot.slane %v4454_v44, 4  ;;  %v3729_v55 = vmax.f32 %v2705_v58, 0.0  ;;  %v3728_v57 = vmax.f32 %v1490_v45, 0.0  ;;  %v1493_v59 = vpop.f32.mrb[130].mxu0 }
 0x1f6   : > { %v4419_v60 = vadd.f32 %v4418_v48, %v4417_v38  ;;  %v4529_v61 = vrot.slane %v4528_v49, 4  ;;  %v3730_v62 = vmax.f32 %v2707_v51, 0.0  ;;  %v1494_v63 = vadd.f32 %v1493_v59, %v6470_v3  ;;  %v2710_v1 = vpop.f32.mrb[130].mxu1  ;;  %v1495_v2 = vpop.f32.mrb[131].mxu0  ;;  %5579 = vmatmul.mubr.msk.f32.gmra.mrb[236].mxu0 %vm451_vm1, %v349_v47 }
 0x1f7   : > { %v4493_v7 = vadd.f32 %v4492_v52, %v4491_v43  ;;  %v4456_v56 = vadd.f32 %v4455_v53, %v4454_v44  ;;  %v2711_v8 = vadd.f32 %v2710_v1, %v6472_v4  ;;  %v1496_v9 = vadd.f32 %v1495_v2, %v6474_v5  ;;  %v2712_v10 = vpop.f32.mrb[131].mxu1  ;;  %1815 = vmatprep.mubr.f32.mxu0 %v5995_v0  ;;  %v352_v53 = vld [vmem:[%s8323_s0 + $0x3c8] sm:$0xff] }
 0x1f8   : > { %5773 = vmatmul.mubr.msk.f32.gmra.mrb[236].mxu1 %vm451_vm1, %v349_v47  ;;  %v4420_v12 = vrot.slane %v4419_v60, 2  ;;  %v4530_v13 = vadd.f32 %v4529_v61, %v4528_v49  ;;  %v3731_v14 = vmax.f32 %v1494_v63, 0.0  ;;  %v2713_v15 = vadd.f32 %v2712_v10, %v6476_v6 }
 0x1f9   : > { %3032 = vmatprep.mubr.f32.mxu1 %v5995_v0  ;;  %v4494_v16 = vrot.slane %v4493_v7, 2  ;;  %v4457_v17 = vrot.slane %v4456_v56, 2  ;;  %v3733_v18 = vmax.f32 %v2711_v8, 0.0  ;;  %v3732_v19 = vmax.f32 %v1496_v9, 0.0  ;;  %v1499_v20 = vpop.f32.mrb[132].mxu0 }
 0x1fa   : > { %v4421_v21 = vadd.f32 %v4420_v12, %v4419_v60  ;;  %v4531_v22 = vrot.slane %v4530_v13, 2  ;;  %v4535_v23 = vadd.f32 %v3731_v14, %v3727_v50  ;;  %v3734_v24 = vmax.f32 %v2713_v15, 0.0  ;;  %v2716_v25 = vpop.f32.mrb[132].mxu1  ;;  %v1501_v26 = vpop.f32.mrb[133].mxu0  ;;  %5580 = vmatmul.mubr.msk.f32.gmra.mrb[238].mxu0 %vm451_vm1, %v350_v11 }
 0x1fb   : > { %v4495_v27 = vadd.f32 %v4494_v16, %v4493_v7  ;;  %v4458_v28 = vadd.f32 %v4457_v17, %v4456_v56  ;;  %v4609_v29 = vadd.f32 %v3733_v18, %v3729_v55  ;;  %v4572_v30 = vadd.f32 %v3732_v19, %v3728_v57  ;;  %v2718_v31 = vpop.f32.mrb[133].mxu1  ;;  %1821 = vmatprep.mubr.f32.mxu0 %v5995_v0  ;;  %v353_v17 = vld [vmem:[%s8323_s0 + $0x3d0] sm:$0xff] }
 0x1fc   : > { %5774 = vmatmul.mubr.msk.f32.gmra.mrb[238].mxu1 %vm451_vm1, %v350_v11  ;;  %v4422_v34 = vrot.slane %v4421_v21, 1  ;;  %v4532_v35 = vadd.f32 %v4531_v22, %v4530_v13  ;;  %v4646_v36 = vadd.f32 %v3734_v24, %v3730_v62  ;;  %v1500_v37 = vadd.f32 %v1499_v20, %v6470_v3 }
 0x1fd   : > { %3038 = vmatprep.mubr.f32.mxu1 %v5995_v0  ;;  %v4496_v38 = vrot.slane %v4495_v27, 1  ;;  %v4459_v39 = vrot.slane %v4458_v28, 1  ;;  %v2717_v40 = vadd.f32 %v2716_v25, %v6472_v4  ;;  %v1502_v41 = vadd.f32 %v1501_v26, %v6474_v5  ;;  %v1505_v42 = vpop.f32.mrb[134].mxu0 }
 0x1fe   : > { %v4423_v43 = vadd.f32 %v4422_v34, %v4421_v21  ;;  %v4533_v44 = vrot.slane %v4532_v35, 1  ;;  %v3735_v58 = vmax.f32 %v1500_v37, 0.0  ;;  %v2719_v45 = vadd.f32 %v2718_v31, %v6476_v6  ;;  %v2722_v46 = vpop.f32.mrb[134].mxu1  ;;  %v1507_v47 = vpop.f32.mrb[135].mxu0  ;;  %5581 = vmatmul.mubr.msk.f32.gmra.mrb[240].mxu0 %vm451_vm1, %v351_v33 }
 0x1ff   : > { %v4497_v48 = vadd.f32 %v4496_v38, %v4495_v27  ;;  %v4460_v49 = vadd.f32 %v4459_v39, %v4458_v28  ;;  %v3737_v50 = vmax.f32 %v2717_v40, 0.0  ;;  %v3736_v51 = vmax.f32 %v1502_v41, 0.0  ;;  %v2724_v52 = vpop.f32.mrb[135].mxu1  ;;  %1827 = vmatprep.mubr.f32.mxu0 %v5995_v0  ;;  %v354_v39 = vld [vmem:[%s8323_s0 + $0x3d8] sm:$0xff] }
 0x200   : > { %5775 = vmatmul.mubr.msk.f32.gmra.mrb[240].mxu1 %vm451_vm1, %v351_v33  ;;  %v5132_v55 = vmul.f32 0.00390625, %v4423_v43  ;;  %v4534_v57 = vadd.f32 %v4533_v44, %v4532_v35  ;;  %v4536_v59 = vadd.f32 %v4535_v23, %v3735_v58  ;;  %v3738_v60 = vmax.f32 %v2719_v45, 0.0 }
 0x201   : > { %3044 = vmatprep.mubr.f32.mxu1 %v5995_v0  ;;  %v5134_v61 = vmul.f32 0.00390625, %v4497_v48  ;;  %v5133_v62 = vmul.f32 0.00390625, %v4460_v49  ;;  %v4610_v63 = vadd.f32 %v4609_v29, %v3737_v50  ;;  %v4573_v1 = vadd.f32 %v4572_v30, %v3736_v51  ;;  %v1511_v2 = vpop.f32.mrb[136].mxu0 }
 0x202   : > { %v5135_v7 = vmul.f32 0.00390625, %v4534_v57  ;;  %v4647_v56 = vadd.f32 %v4646_v36, %v3738_v60  ;;  %v1506_v8 = vadd.f32 %v1505_v42, %v6470_v3  ;;  %v2723_v9 = vadd.f32 %v2722_v46, %v6472_v4  ;;  %v2728_v10 = vpop.f32.mrb[136].mxu1  ;;  %v1513_v11 = vpop.f32.mrb[137].mxu0  ;;  %5582 = vmatmul.mubr.msk.f32.gmra.mrb[242].mxu0 %vm451_vm1, %v352_v53 }
 0x203   : > { %v5200_v12 = vcombine.low %v5132_v55, %v5133_v62  ;;  %v1508_v13 = vadd.f32 %v1507_v47, %v6474_v5  ;;  %v2725_v14 = vadd.f32 %v2724_v52, %v6476_v6  ;;  %v1512_v15 = vadd.f32 %v1511_v2, %v6470_v3  ;;  %v2730_v16 = vpop.f32.mrb[137].mxu1  ;;  %1833 = vmatprep.mubr.f32.mxu0 %v5995_v0  ;;  %v355_v62 = vld [vmem:[%s8323_s0 + $0x3e0] sm:$0xff] }
 0x204   : > { %5776 = vmatmul.mubr.msk.f32.gmra.mrb[242].mxu1 %vm451_vm1, %v352_v53  ;;  %v5201_v18 = vcombine.low %v5134_v61, %v5135_v7  ;;  %v3739_v19 = vmax.f32 %v1506_v8, 0.0  ;;  %v3741_v20 = vmax.f32 %v2723_v9, 0.0  ;;  %v2729_v21 = vadd.f32 %v2728_v10, %v6472_v4 }
 0x205   : > { %3050 = vmatprep.mubr.f32.mxu1 %v5995_v0  ;;  %v5208_v22 = vrot.slane %v5200_v12, %v6831_v32  ;;  %v3740_v23 = vmax.f32 %v1508_v13, 0.0  ;;  %v3742_v24 = vmax.f32 %v2725_v14, 0.0  ;;  %v3743_v25 = vmax.f32 %v1512_v15, 0.0  ;;  %v1517_v26 = vpop.f32.mrb[138].mxu0 }
 0x206   : > { %v5215_v27 = vrot.slane %v5201_v18, %v6831_v32  ;;  %v4537_v28 = vadd.f32 %v4536_v59, %v3739_v19  ;;  %v4611_v29 = vadd.f32 %v4610_v63, %v3741_v20  ;;  %v3745_v30 = vmax.f32 %v2729_v21, 0.0  ;;  %v2734_v31 = vpop.f32.mrb[138].mxu1  ;;  %v1519_v33 = vpop.f32.mrb[139].mxu0  ;;  %5583 = vmatmul.mubr.msk.f32.gmra.mrb[244].mxu0 %vm451_vm1, %v353_v17 }
 0x207   : > { %v4574_v34 = vadd.f32 %v4573_v1, %v3740_v23  ;;  %v4648_v35 = vadd.f32 %v4647_v56, %v3742_v24  ;;  %v1514_v36 = vadd.f32 %v1513_v11, %v6474_v5  ;;  %v2731_v37 = vadd.f32 %v2730_v16, %v6476_v6  ;;  %v2736_v38 = vpop.f32.mrb[139].mxu1  ;;  %1839 = vmatprep.mubr.f32.mxu0 %v5995_v0  ;;  %v356_v23 = vld [vmem:[%s8323_s0 + $0x3e8] sm:$0xff] }
 0x208   : > { %5777 = vmatmul.mubr.msk.f32.gmra.mrb[244].mxu1 %vm451_vm1, %v353_v17  ;;  %v5216_v40 = vcombine.low %v5208_v22, %v5215_v27  ;;  %v4538_v41 = vadd.f32 %v4537_v28, %v3743_v25  ;;  %v4612_v42 = vadd.f32 %v4611_v29, %v3745_v30  ;;  %v1518_v43 = vadd.f32 %v1517_v26, %v6470_v3 }
 0x209   : > { %v3744_v44 = vmax.f32 %v1514_v36, 0.0  ;;  %v3746_v58 = vmax.f32 %v2731_v37, 0.0  ;;  %v2735_v45 = vadd.f32 %v2734_v31, %v6472_v4  ;;  %v1520_v46 = vadd.f32 %v1519_v33, %v6474_v5  ;;  %v1523_v47 = vpop.f32.mrb[140].mxu0  ;;  %3056 = vmatprep.mubr.f32.mxu1 %v5995_v0 }
 0x20a   : > { %v5223_v48 = vrot.slane %v5216_v40, %v6831_v32  ;;  %v3747_v49 = vmax.f32 %v1518_v43, 0.0  ;;  %v2737_v50 = vadd.f32 %v2736_v38, %v6476_v6  ;;  %v1524_v51 = vadd.f32 %v1523_v47, %v6470_v3  ;;  %v2740_v52 = vpop.f32.mrb[140].mxu1  ;;  %v1525_v53 = vpop.f32.mrb[141].mxu0  ;;  %5584 = vmatmul.mubr.msk.f32.gmra.mrb[246].mxu0 %vm451_vm1, %v354_v39  ;;  %v357_v43 = vld [vmem:[%s8323_s0 + $0x3f0] sm:$0xff] }
 0x20b   : > { %v4575_v55 = vadd.f32 %v4574_v34, %v3744_v44  ;;  %v4649_v57 = vadd.f32 %v4648_v35, %v3746_v58  ;;  %v3749_v59 = vmax.f32 %v2735_v45, 0.0  ;;  %v3748_v60 = vmax.f32 %v1520_v46, 0.0  ;;  %v2742_v61 = vpop.f32.mrb[141].mxu1  ;;  %1845 = vmatprep.mubr.f32.mxu0 %v5995_v0 }
 0x20c   : > { %5778 = vmatmul.mubr.msk.f32.gmra.mrb[246].mxu1 %vm451_vm1, %v354_v39  ;;  %5331 = vst.msk [vmem:[%s6915_s18 + $0x4] sm:$0xf] %vm6873_vm2, %v5223_v48  ;;  %v4539_v63 = vadd.f32 %v4538_v41, %v3747_v49  ;;  %v3750_v1 = vmax.f32 %v2737_v50, 0.0  ;;  %v3751_v2 = vmax.f32 %v1524_v51, 0.0  ;;  %v2741_v7 = vadd.f32 %v2740_v52, %v6472_v4 }
 0x20d   : > { %3062 = vmatprep.mubr.f32.mxu1 %v5995_v0  ;;  %v4613_v56 = vadd.f32 %v4612_v42, %v3749_v59  ;;  %v4576_v8 = vadd.f32 %v4575_v55, %v3748_v60  ;;  %v1526_v9 = vadd.f32 %v1525_v53, %v6474_v5  ;;  %v2743_v10 = vadd.f32 %v2742_v61, %v6476_v6  ;;  %v1529_v11 = vpop.f32.mrb[142].mxu0 }
 0x20e   : > { %v4650_v12 = vadd.f32 %v4649_v57, %v3750_v1  ;;  %v4540_v13 = vadd.f32 %v4539_v63, %v3751_v2  ;;  %v3753_v14 = vmax.f32 %v2741_v7, 0.0  ;;  %v1530_v15 = vadd.f32 %v1529_v11, %v6470_v3  ;;  %v2746_v16 = vpop.f32.mrb[142].mxu1  ;;  %v1531_v17 = vpop.f32.mrb[143].mxu0  ;;  %5585 = vmatmul.mubr.msk.f32.gmra.mrb[248].mxu0 %vm451_vm1, %v355_v62 }
 0x20f   : > { %v3752_v18 = vmax.f32 %v1526_v9, 0.0  ;;  %v3754_v19 = vmax.f32 %v2743_v10, 0.0  ;;  %v2747_v20 = vadd.f32 %v2746_v16, %v6472_v4  ;;  %v1532_v21 = vadd.f32 %v1531_v17, %v6474_v5  ;;  %v2748_v22 = vpop.f32.mrb[143].mxu1  ;;  %1851 = vmatprep.mubr.f32.mxu0 %v5995_v0 }
 0x210   : > { %5779 = vmatmul.mubr.msk.f32.gmra.mrb[248].mxu1 %vm451_vm1, %v355_v62  ;;  %v4614_v24 = vadd.f32 %v4613_v56, %v3753_v14  ;;  %v3755_v25 = vmax.f32 %v1530_v15, 0.0  ;;  %v2749_v26 = vadd.f32 %v2748_v22, %v6476_v6  ;;  %v358_v62 = vld [vmem:[%s8323_s0 + $0x3f8] sm:$0xff] }
 0x211   : > { %3068 = vmatprep.mubr.f32.mxu1 %v5995_v0  ;;  %v4577_v27 = vadd.f32 %v4576_v8, %v3752_v18  ;;  %v4651_v28 = vadd.f32 %v4650_v12, %v3754_v19  ;;  %v3757_v29 = vmax.f32 %v2747_v20, 0.0  ;;  %v3756_v30 = vmax.f32 %v1532_v21, 0.0  ;;  %v1535_v31 = vpop.f32.mrb[144].mxu0  ;;  %v359_v19 = vld [vmem:[%s8323_s0 + $0x400] sm:$0xff] }
 0x212   : > { %v4541_v33 = vadd.f32 %v4540_v13, %v3755_v25  ;;  %v3758_v34 = vmax.f32 %v2749_v26, 0.0  ;;  %v1536_v35 = vadd.f32 %v1535_v31, %v6470_v3  ;;  %v2752_v36 = vpop.f32.mrb[144].mxu1  ;;  %v1537_v37 = vpop.f32.mrb[145].mxu0  ;;  %5586 = vmatmul.mubr.msk.f32.gmra.mrb[250].mxu0 %vm451_vm1, %v356_v23 }
 0x213   : > { %v4615_v38 = vadd.f32 %v4614_v24, %v3757_v29  ;;  %v4578_v39 = vadd.f32 %v4577_v27, %v3756_v30  ;;  %v2753_v40 = vadd.f32 %v2752_v36, %v6472_v4  ;;  %v1538_v41 = vadd.f32 %v1537_v37, %v6474_v5  ;;  %v2754_v42 = vpop.f32.mrb[145].mxu1  ;;  %1857 = vmatprep.mubr.f32.mxu0 %v5995_v0  ;;  %v360_v37 = vld [vmem:[%s8323_s0 + $0x408] sm:$0xff] }
 0x214   : > { %5780 = vmatmul.mubr.msk.f32.gmra.mrb[250].mxu1 %vm451_vm1, %v356_v23  ;;  %v4652_v44 = vadd.f32 %v4651_v28, %v3758_v34  ;;  %v3759_v58 = vmax.f32 %v1536_v35, 0.0  ;;  %v2755_v45 = vadd.f32 %v2754_v42, %v6476_v6 }
 0x215   : > { %3074 = vmatprep.mubr.f32.mxu1 %v5995_v0  ;;  %v3761_v46 = vmax.f32 %v2753_v40, 0.0  ;;  %v3760_v47 = vmax.f32 %v1538_v41, 0.0  ;;  %v1541_v48 = vpop.f32.mrb[146].mxu0 }
 0x216   : > { %v4542_v49 = vadd.f32 %v4541_v33, %v3759_v58  ;;  %v3762_v50 = vmax.f32 %v2755_v45, 0.0  ;;  %v1542_v51 = vadd.f32 %v1541_v48, %v6470_v3  ;;  %v2758_v52 = vpop.f32.mrb[146].mxu1  ;;  %v1543_v53 = vpop.f32.mrb[147].mxu0  ;;  %5587 = vmatmul.mubr.msk.f32.gmra.mrb[252].mxu0 %vm451_vm1, %v357_v43 }
 0x217   : > { %v4616_v55 = vadd.f32 %v4615_v38, %v3761_v46  ;;  %v4579_v57 = vadd.f32 %v4578_v39, %v3760_v47  ;;  %v2759_v59 = vadd.f32 %v2758_v52, %v6472_v4  ;;  %v1544_v60 = vadd.f32 %v1543_v53, %v6474_v5  ;;  %v2760_v61 = vpop.f32.mrb[147].mxu1  ;;  %1863 = vmatprep.mubr.f32.mxu0 %v5995_v0  ;;  %v361_v53 = vld [vmem:[%s8323_s0 + $0x410] sm:$0xff] }
 0x218   : > { %5781 = vmatmul.mubr.msk.f32.gmra.mrb[252].mxu1 %vm451_vm1, %v357_v43  ;;  %v4653_v63 = vadd.f32 %v4652_v44, %v3762_v50  ;;  %v3763_v1 = vmax.f32 %v1542_v51, 0.0  ;;  %v2761_v2 = vadd.f32 %v2760_v61, %v6476_v6 }
 0x219   : > { %3080 = vmatprep.mubr.f32.mxu1 %v5995_v0  ;;  %v3765_v7 = vmax.f32 %v2759_v59, 0.0  ;;  %v3764_v56 = vmax.f32 %v1544_v60, 0.0  ;;  %v1547_v8 = vpop.f32.mrb[148].mxu0 }
 0x21a   : > { %v4543_v9 = vadd.f32 %v4542_v49, %v3763_v1  ;;  %v3766_v10 = vmax.f32 %v2761_v2, 0.0  ;;  %v1548_v11 = vadd.f32 %v1547_v8, %v6470_v3  ;;  %v2764_v12 = vpop.f32.mrb[148].mxu1  ;;  %v1549_v13 = vpop.f32.mrb[149].mxu0  ;;  %5588 = vmatmul.mubr.msk.f32.gmra.mrb[254].mxu0 %vm451_vm1, %v358_v62 }
 0x21b   : > { %v4617_v14 = vadd.f32 %v4616_v55, %v3765_v7  ;;  %v4580_v15 = vadd.f32 %v4579_v57, %v3764_v56  ;;  %v2765_v16 = vadd.f32 %v2764_v12, %v6472_v4  ;;  %v1550_v17 = vadd.f32 %v1549_v13, %v6474_v5  ;;  %v2766_v18 = vpop.f32.mrb[149].mxu1  ;;  %1869 = vmatprep.mubr.f32.mxu0 %v5995_v0  ;;  %v362_v13 = vld [vmem:[%s8323_s0 + $0x418] sm:$0xff] }
 0x21c   : > { %5782 = vmatmul.mubr.msk.f32.gmra.mrb[254].mxu1 %vm451_vm1, %v358_v62  ;;  %v4654_v20 = vadd.f32 %v4653_v63, %v3766_v10  ;;  %v3767_v21 = vmax.f32 %v1548_v11, 0.0  ;;  %v2767_v22 = vadd.f32 %v2766_v18, %v6476_v6 }
 0x21d   : > { %3086 = vmatprep.mubr.f32.mxu1 %v5995_v0  ;;  %v3769_v23 = vmax.f32 %v2765_v16, 0.0  ;;  %v3768_v24 = vmax.f32 %v1550_v17, 0.0  ;;  %v1553_v25 = vpop.f32.mrb[150].mxu0 }
 0x21e   : > { %v4544_v26 = vadd.f32 %v4543_v9, %v3767_v21  ;;  %v3770_v27 = vmax.f32 %v2767_v22, 0.0  ;;  %v1554_v28 = vadd.f32 %v1553_v25, %v6470_v3  ;;  %v2770_v29 = vpop.f32.mrb[150].mxu1  ;;  %v1555_v30 = vpop.f32.mrb[151].mxu0  ;;  %5589 = vmatmul.mubr.msk.f32.gmra.mrb[0].mxu0 %vm451_vm1, %v359_v19 }
 0x21f   : > { %v4618_v31 = vadd.f32 %v4617_v14, %v3769_v23  ;;  %v4581_v33 = vadd.f32 %v4580_v15, %v3768_v24  ;;  %v2771_v34 = vadd.f32 %v2770_v29, %v6472_v4  ;;  %v1556_v35 = vadd.f32 %v1555_v30, %v6474_v5  ;;  %v2772_v36 = vpop.f32.mrb[151].mxu1  ;;  %1875 = vmatprep.mubr.f32.mxu0 %v5995_v0  ;;  %v363_v30 = vld [vmem:[%s8323_s0 + $0x420] sm:$0xff] }
 0x220   : > { %5783 = vmatmul.mubr.msk.f32.gmra.mrb[0].mxu1 %vm451_vm1, %v359_v19  ;;  %v4655_v38 = vadd.f32 %v4654_v20, %v3770_v27  ;;  %v3771_v39 = vmax.f32 %v1554_v28, 0.0  ;;  %v2773_v40 = vadd.f32 %v2772_v36, %v6476_v6 }
 0x221   : > { %3092 = vmatprep.mubr.f32.mxu1 %v5995_v0  ;;  %v3773_v41 = vmax.f32 %v2771_v34, 0.0  ;;  %v3772_v42 = vmax.f32 %v1556_v35, 0.0  ;;  %v1559_v43 = vpop.f32.mrb[152].mxu0 }
 0x222   : > { %v4545_v44 = vadd.f32 %v4544_v26, %v3771_v39  ;;  %v3774_v58 = vmax.f32 %v2773_v40, 0.0  ;;  %v1560_v45 = vadd.f32 %v1559_v43, %v6470_v3  ;;  %v2776_v46 = vpop.f32.mrb[152].mxu1  ;;  %v1561_v47 = vpop.f32.mrb[153].mxu0  ;;  %5590 = vmatmul.mubr.msk.f32.gmra.mrb[2].mxu0 %vm451_vm1, %v360_v37 }
 0x223   : > { %v4619_v48 = vadd.f32 %v4618_v31, %v3773_v41  ;;  %v4582_v49 = vadd.f32 %v4581_v33, %v3772_v42  ;;  %v2777_v50 = vadd.f32 %v2776_v46, %v6472_v4  ;;  %v1562_v51 = vadd.f32 %v1561_v47, %v6474_v5  ;;  %v2778_v52 = vpop.f32.mrb[153].mxu1  ;;  %1881 = vmatprep.mubr.f32.mxu0 %v5995_v0  ;;  %v364_v47 = vld [vmem:[%s8323_s0 + $0x428] sm:$0xff] }
 0x224   : > { %5784 = vmatmul.mubr.msk.f32.gmra.mrb[2].mxu1 %vm451_vm1, %v360_v37  ;;  %v4656_v55 = vadd.f32 %v4655_v38, %v3774_v58  ;;  %v3775_v57 = vmax.f32 %v1560_v45, 0.0  ;;  %v2779_v59 = vadd.f32 %v2778_v52, %v6476_v6 }
 0x225   : > { %3098 = vmatprep.mubr.f32.mxu1 %v5995_v0  ;;  %v3777_v60 = vmax.f32 %v2777_v50, 0.0  ;;  %v3776_v61 = vmax.f32 %v1562_v51, 0.0  ;;  %v1565_v62 = vpop.f32.mrb[154].mxu0 }
 0x226   : > { %v4546_v63 = vadd.f32 %v4545_v44, %v3775_v57  ;;  %v3778_v1 = vmax.f32 %v2779_v59, 0.0  ;;  %v1566_v2 = vadd.f32 %v1565_v62, %v6470_v3  ;;  %v2782_v7 = vpop.f32.mrb[154].mxu1  ;;  %v1567_v56 = vpop.f32.mrb[155].mxu0  ;;  %5591 = vmatmul.mubr.msk.f32.gmra.mrb[4].mxu0 %vm451_vm1, %v361_v53 }
 0x227   : > { %v4620_v8 = vadd.f32 %v4619_v48, %v3777_v60  ;;  %v4583_v9 = vadd.f32 %v4582_v49, %v3776_v61  ;;  %v2783_v10 = vadd.f32 %v2782_v7, %v6472_v4  ;;  %v1568_v11 = vadd.f32 %v1567_v56, %v6474_v5  ;;  %v2784_v12 = vpop.f32.mrb[155].mxu1  ;;  %1887 = vmatprep.mubr.f32.mxu0 %v5995_v0  ;;  %v365_v56 = vld [vmem:[%s8323_s0 + $0x430] sm:$0xff] }
 0x228   : > { %5785 = vmatmul.mubr.msk.f32.gmra.mrb[4].mxu1 %vm451_vm1, %v361_v53  ;;  %v4657_v14 = vadd.f32 %v4656_v55, %v3778_v1  ;;  %v3779_v15 = vmax.f32 %v1566_v2, 0.0  ;;  %v2785_v16 = vadd.f32 %v2784_v12, %v6476_v6 }
 0x229   : > { %3104 = vmatprep.mubr.f32.mxu1 %v5995_v0  ;;  %v3781_v17 = vmax.f32 %v2783_v10, 0.0  ;;  %v3780_v18 = vmax.f32 %v1568_v11, 0.0  ;;  %v1571_v19 = vpop.f32.mrb[156].mxu0 }
 0x22a   : > { %v4547_v20 = vadd.f32 %v4546_v63, %v3779_v15  ;;  %v3782_v21 = vmax.f32 %v2785_v16, 0.0  ;;  %v1572_v22 = vadd.f32 %v1571_v19, %v6470_v3  ;;  %v2788_v23 = vpop.f32.mrb[156].mxu1  ;;  %v1573_v24 = vpop.f32.mrb[157].mxu0  ;;  %5592 = vmatmul.mubr.msk.f32.gmra.mrb[6].mxu0 %vm451_vm1, %v362_v13 }
 0x22b   : > { %v4621_v25 = vadd.f32 %v4620_v8, %v3781_v17  ;;  %v4584_v26 = vadd.f32 %v4583_v9, %v3780_v18  ;;  %v2789_v27 = vadd.f32 %v2788_v23, %v6472_v4  ;;  %v1574_v28 = vadd.f32 %v1573_v24, %v6474_v5  ;;  %v2790_v29 = vpop.f32.mrb[157].mxu1  ;;  %1893 = vmatprep.mubr.f32.mxu0 %v5995_v0  ;;  %v366_v24 = vld [vmem:[%s8323_s0 + $0x438] sm:$0xff] }
 0x22c   : > { %5786 = vmatmul.mubr.msk.f32.gmra.mrb[6].mxu1 %vm451_vm1, %v362_v13  ;;  %v4658_v31 = vadd.f32 %v4657_v14, %v3782_v21  ;;  %v3783_v33 = vmax.f32 %v1572_v22, 0.0  ;;  %v2791_v34 = vadd.f32 %v2790_v29, %v6476_v6 }
 0x22d   : > { %3110 = vmatprep.mubr.f32.mxu1 %v5995_v0  ;;  %v3785_v35 = vmax.f32 %v2789_v27, 0.0  ;;  %v3784_v36 = vmax.f32 %v1574_v28, 0.0  ;;  %v1577_v37 = vpop.f32.mrb[158].mxu0 }
 0x22e   : > { %v4548_v38 = vadd.f32 %v4547_v20, %v3783_v33  ;;  %v3786_v39 = vmax.f32 %v2791_v34, 0.0  ;;  %v1578_v40 = vadd.f32 %v1577_v37, %v6470_v3  ;;  %v2794_v41 = vpop.f32.mrb[158].mxu1  ;;  %v1579_v42 = vpop.f32.mrb[159].mxu0  ;;  %5593 = vmatmul.mubr.msk.f32.gmra.mrb[8].mxu0 %vm451_vm1, %v363_v30 }
 0x22f   : > { %v4622_v43 = vadd.f32 %v4621_v25, %v3785_v35  ;;  %v4585_v44 = vadd.f32 %v4584_v26, %v3784_v36  ;;  %v2795_v58 = vadd.f32 %v2794_v41, %v6472_v4  ;;  %v1580_v45 = vadd.f32 %v1579_v42, %v6474_v5  ;;  %v2796_v46 = vpop.f32.mrb[159].mxu1  ;;  %1899 = vmatprep.mubr.f32.mxu0 %v5995_v0  ;;  %v367_v42 = vld [vmem:[%s8323_s0 + $0x440] sm:$0xff] }
 0x230   : > { %5787 = vmatmul.mubr.msk.f32.gmra.mrb[8].mxu1 %vm451_vm1, %v363_v30  ;;  %v4659_v48 = vadd.f32 %v4658_v31, %v3786_v39  ;;  %v3787_v49 = vmax.f32 %v1578_v40, 0.0  ;;  %v2797_v50 = vadd.f32 %v2796_v46, %v6476_v6 }
 0x231   : > { %3116 = vmatprep.mubr.f32.mxu1 %v5995_v0  ;;  %v3789_v51 = vmax.f32 %v2795_v58, 0.0  ;;  %v3788_v52 = vmax.f32 %v1580_v45, 0.0  ;;  %v1583_v53 = vpop.f32.mrb[160].mxu0 }
 0x232   : > { %v4549_v55 = vadd.f32 %v4548_v38, %v3787_v49  ;;  %v3790_v57 = vmax.f32 %v2797_v50, 0.0  ;;  %v1584_v59 = vadd.f32 %v1583_v53, %v6470_v3  ;;  %v2800_v60 = vpop.f32.mrb[160].mxu1  ;;  %v1585_v61 = vpop.f32.mrb[161].mxu0  ;;  %5594 = vmatmul.mubr.msk.f32.gmra.mrb[10].mxu0 %vm451_vm1, %v364_v47 }
 0x233   : > { %v4623_v62 = vadd.f32 %v4622_v43, %v3789_v51  ;;  %v4586_v63 = vadd.f32 %v4585_v44, %v3788_v52  ;;  %v2801_v1 = vadd.f32 %v2800_v60, %v6472_v4  ;;  %v1586_v2 = vadd.f32 %v1585_v61, %v6474_v5  ;;  %v2802_v7 = vpop.f32.mrb[161].mxu1  ;;  %1905 = vmatprep.mubr.f32.mxu0 %v5995_v0  ;;  %v368_v61 = vld [vmem:[%s8323_s0 + $0x448] sm:$0xff] }
 0x234   : > { %5788 = vmatmul.mubr.msk.f32.gmra.mrb[10].mxu1 %vm451_vm1, %v364_v47  ;;  %v4660_v8 = vadd.f32 %v4659_v48, %v3790_v57  ;;  %v3791_v9 = vmax.f32 %v1584_v59, 0.0  ;;  %v2803_v10 = vadd.f32 %v2802_v7, %v6476_v6 }
 0x235   : > { %3122 = vmatprep.mubr.f32.mxu1 %v5995_v0  ;;  %v3793_v11 = vmax.f32 %v2801_v1, 0.0  ;;  %v3792_v12 = vmax.f32 %v1586_v2, 0.0  ;;  %v1589_v13 = vpop.f32.mrb[162].mxu0 }
 0x236   : > { %v4550_v14 = vadd.f32 %v4549_v55, %v3791_v9  ;;  %v3794_v15 = vmax.f32 %v2803_v10, 0.0  ;;  %v1590_v16 = vadd.f32 %v1589_v13, %v6470_v3  ;;  %v2806_v17 = vpop.f32.mrb[162].mxu1  ;;  %v1591_v18 = vpop.f32.mrb[163].mxu0  ;;  %5595 = vmatmul.mubr.msk.f32.gmra.mrb[12].mxu0 %vm451_vm1, %v365_v56 }
 0x237   : > { %v4624_v19 = vadd.f32 %v4623_v62, %v3793_v11  ;;  %v4587_v20 = vadd.f32 %v4586_v63, %v3792_v12  ;;  %v2807_v21 = vadd.f32 %v2806_v17, %v6472_v4  ;;  %v1592_v22 = vadd.f32 %v1591_v18, %v6474_v5  ;;  %v2808_v23 = vpop.f32.mrb[163].mxu1  ;;  %1911 = vmatprep.mubr.f32.mxu0 %v5995_v0  ;;  %v369_v18 = vld [vmem:[%s8323_s0 + $0x450] sm:$0xff] }
 0x238   : > { %5789 = vmatmul.mubr.msk.f32.gmra.mrb[12].mxu1 %vm451_vm1, %v365_v56  ;;  %v4661_v25 = vadd.f32 %v4660_v8, %v3794_v15  ;;  %v3795_v26 = vmax.f32 %v1590_v16, 0.0  ;;  %v2809_v27 = vadd.f32 %v2808_v23, %v6476_v6 }
 0x239   : > { %3128 = vmatprep.mubr.f32.mxu1 %v5995_v0  ;;  %v3797_v28 = vmax.f32 %v2807_v21, 0.0  ;;  %v3796_v29 = vmax.f32 %v1592_v22, 0.0  ;;  %v1595_v30 = vpop.f32.mrb[164].mxu0 }
 0x23a   : > { %v4551_v31 = vadd.f32 %v4550_v14, %v3795_v26  ;;  %v3798_v33 = vmax.f32 %v2809_v27, 0.0  ;;  %v1596_v34 = vadd.f32 %v1595_v30, %v6470_v3  ;;  %v2812_v35 = vpop.f32.mrb[164].mxu1  ;;  %v1597_v36 = vpop.f32.mrb[165].mxu0  ;;  %5596 = vmatmul.mubr.msk.f32.gmra.mrb[14].mxu0 %vm451_vm1, %v366_v24 }
 0x23b   : > { %v4625_v37 = vadd.f32 %v4624_v19, %v3797_v28  ;;  %v4588_v38 = vadd.f32 %v4587_v20, %v3796_v29  ;;  %v2813_v39 = vadd.f32 %v2812_v35, %v6472_v4  ;;  %v1598_v40 = vadd.f32 %v1597_v36, %v6474_v5  ;;  %v2814_v41 = vpop.f32.mrb[165].mxu1  ;;  %1917 = vmatprep.mubr.f32.mxu0 %v5995_v0  ;;  %v370_v36 = vld [vmem:[%s8323_s0 + $0x458] sm:$0xff] }
 0x23c   : > { %5790 = vmatmul.mubr.msk.f32.gmra.mrb[14].mxu1 %vm451_vm1, %v366_v24  ;;  %v4662_v43 = vadd.f32 %v4661_v25, %v3798_v33  ;;  %v3799_v44 = vmax.f32 %v1596_v34, 0.0  ;;  %v2815_v58 = vadd.f32 %v2814_v41, %v6476_v6 }
 0x23d   : > { %3134 = vmatprep.mubr.f32.mxu1 %v5995_v0  ;;  %v3801_v45 = vmax.f32 %v2813_v39, 0.0  ;;  %v3800_v46 = vmax.f32 %v1598_v40, 0.0  ;;  %v1601_v47 = vpop.f32.mrb[166].mxu0 }
 0x23e   : > { %v4552_v48 = vadd.f32 %v4551_v31, %v3799_v44  ;;  %v3802_v49 = vmax.f32 %v2815_v58, 0.0  ;;  %v1602_v50 = vadd.f32 %v1601_v47, %v6470_v3  ;;  %v2818_v51 = vpop.f32.mrb[166].mxu1  ;;  %v1603_v52 = vpop.f32.mrb[167].mxu0  ;;  %5597 = vmatmul.mubr.msk.f32.gmra.mrb[16].mxu0 %vm451_vm1, %v367_v42 }
 0x23f   : > { %v4626_v53 = vadd.f32 %v4625_v37, %v3801_v45  ;;  %v4589_v55 = vadd.f32 %v4588_v38, %v3800_v46  ;;  %v2819_v57 = vadd.f32 %v2818_v51, %v6472_v4  ;;  %v1604_v59 = vadd.f32 %v1603_v52, %v6474_v5  ;;  %v2820_v60 = vpop.f32.mrb[167].mxu1  ;;  %1923 = vmatprep.mubr.f32.mxu0 %v5995_v0  ;;  %v371_v52 = vld [vmem:[%s8323_s0 + $0x460] sm:$0xff] }
 0x240   : > { %5791 = vmatmul.mubr.msk.f32.gmra.mrb[16].mxu1 %vm451_vm1, %v367_v42  ;;  %v4663_v62 = vadd.f32 %v4662_v43, %v3802_v49  ;;  %v3803_v63 = vmax.f32 %v1602_v50, 0.0  ;;  %v2821_v1 = vadd.f32 %v2820_v60, %v6476_v6 }
 0x241   : > { %3140 = vmatprep.mubr.f32.mxu1 %v5995_v0  ;;  %v3805_v2 = vmax.f32 %v2819_v57, 0.0  ;;  %v3804_v7 = vmax.f32 %v1604_v59, 0.0  ;;  %v1607_v56 = vpop.f32.mrb[168].mxu0 }
 0x242   : > { %v4553_v8 = vadd.f32 %v4552_v48, %v3803_v63  ;;  %v3806_v9 = vmax.f32 %v2821_v1, 0.0  ;;  %v1608_v10 = vadd.f32 %v1607_v56, %v6470_v3  ;;  %v2824_v11 = vpop.f32.mrb[168].mxu1  ;;  %v1609_v12 = vpop.f32.mrb[169].mxu0  ;;  %5598 = vmatmul.mubr.msk.f32.gmra.mrb[18].mxu0 %vm451_vm1, %v368_v61 }
 0x243   : > { %v4627_v13 = vadd.f32 %v4626_v53, %v3805_v2  ;;  %v4590_v14 = vadd.f32 %v4589_v55, %v3804_v7  ;;  %v2825_v15 = vadd.f32 %v2824_v11, %v6472_v4  ;;  %v1610_v16 = vadd.f32 %v1609_v12, %v6474_v5  ;;  %v2826_v17 = vpop.f32.mrb[169].mxu1  ;;  %1929 = vmatprep.mubr.f32.mxu0 %v5995_v0  ;;  %v372_v12 = vld [vmem:[%s8323_s0 + $0x468] sm:$0xff] }
 0x244   : > { %5792 = vmatmul.mubr.msk.f32.gmra.mrb[18].mxu1 %vm451_vm1, %v368_v61  ;;  %v4664_v19 = vadd.f32 %v4663_v62, %v3806_v9  ;;  %v3807_v20 = vmax.f32 %v1608_v10, 0.0  ;;  %v2827_v21 = vadd.f32 %v2826_v17, %v6476_v6 }
 0x245   : > { %3146 = vmatprep.mubr.f32.mxu1 %v5995_v0  ;;  %v3809_v22 = vmax.f32 %v2825_v15, 0.0  ;;  %v3808_v23 = vmax.f32 %v1610_v16, 0.0  ;;  %v1613_v24 = vpop.f32.mrb[170].mxu0 }
 0x246   : > { %v4554_v25 = vadd.f32 %v4553_v8, %v3807_v20  ;;  %v3810_v26 = vmax.f32 %v2827_v21, 0.0  ;;  %v1614_v27 = vadd.f32 %v1613_v24, %v6470_v3  ;;  %v2830_v28 = vpop.f32.mrb[170].mxu1  ;;  %v1615_v29 = vpop.f32.mrb[171].mxu0  ;;  %5599 = vmatmul.mubr.msk.f32.gmra.mrb[20].mxu0 %vm451_vm1, %v369_v18 }
 0x247   : > { %v4628_v30 = vadd.f32 %v4627_v13, %v3809_v22  ;;  %v4591_v31 = vadd.f32 %v4590_v14, %v3808_v23  ;;  %v2831_v33 = vadd.f32 %v2830_v28, %v6472_v4  ;;  %v1616_v34 = vadd.f32 %v1615_v29, %v6474_v5  ;;  %v2832_v35 = vpop.f32.mrb[171].mxu1  ;;  %1935 = vmatprep.mubr.f32.mxu0 %v5995_v0  ;;  %v373_v29 = vld [vmem:[%s8323_s0 + $0x470] sm:$0xff] }
 0x248   : > { %5793 = vmatmul.mubr.msk.f32.gmra.mrb[20].mxu1 %vm451_vm1, %v369_v18  ;;  %v4665_v37 = vadd.f32 %v4664_v19, %v3810_v26  ;;  %v3811_v38 = vmax.f32 %v1614_v27, 0.0  ;;  %v2833_v39 = vadd.f32 %v2832_v35, %v6476_v6 }
 0x249   : > { %3152 = vmatprep.mubr.f32.mxu1 %v5995_v0  ;;  %v3813_v40 = vmax.f32 %v2831_v33, 0.0  ;;  %v3812_v41 = vmax.f32 %v1616_v34, 0.0  ;;  %v1619_v42 = vpop.f32.mrb[172].mxu0 }
 0x24a   : > { %v4555_v43 = vadd.f32 %v4554_v25, %v3811_v38  ;;  %v3814_v44 = vmax.f32 %v2833_v39, 0.0  ;;  %v1620_v58 = vadd.f32 %v1619_v42, %v6470_v3  ;;  %v2836_v45 = vpop.f32.mrb[172].mxu1  ;;  %v1621_v46 = vpop.f32.mrb[173].mxu0  ;;  %5600 = vmatmul.mubr.msk.f32.gmra.mrb[22].mxu0 %vm451_vm1, %v370_v36 }
 0x24b   : > { %v4629_v47 = vadd.f32 %v4628_v30, %v3813_v40  ;;  %v4592_v48 = vadd.f32 %v4591_v31, %v3812_v41  ;;  %v2837_v49 = vadd.f32 %v2836_v45, %v6472_v4  ;;  %v1622_v50 = vadd.f32 %v1621_v46, %v6474_v5  ;;  %v2838_v51 = vpop.f32.mrb[173].mxu1  ;;  %1941 = vmatprep.mubr.f32.mxu0 %v5995_v0  ;;  %v374_v46 = vld [vmem:[%s8323_s0 + $0x478] sm:$0xff] }
 0x24c   : > { %5794 = vmatmul.mubr.msk.f32.gmra.mrb[22].mxu1 %vm451_vm1, %v370_v36  ;;  %v4666_v53 = vadd.f32 %v4665_v37, %v3814_v44  ;;  %v3815_v55 = vmax.f32 %v1620_v58, 0.0  ;;  %v2839_v57 = vadd.f32 %v2838_v51, %v6476_v6 }
 0x24d   : > { %3158 = vmatprep.mubr.f32.mxu1 %v5995_v0  ;;  %v3817_v59 = vmax.f32 %v2837_v49, 0.0  ;;  %v3816_v60 = vmax.f32 %v1622_v50, 0.0  ;;  %v1625_v61 = vpop.f32.mrb[174].mxu0 }
 0x24e   : > { %v4556_v62 = vadd.f32 %v4555_v43, %v3815_v55  ;;  %v3818_v63 = vmax.f32 %v2839_v57, 0.0  ;;  %v1626_v1 = vadd.f32 %v1625_v61, %v6470_v3  ;;  %v2842_v2 = vpop.f32.mrb[174].mxu1  ;;  %v1627_v7 = vpop.f32.mrb[175].mxu0  ;;  %5601 = vmatmul.mubr.msk.f32.gmra.mrb[24].mxu0 %vm451_vm1, %v371_v52 }
 0x24f   : > { %v4630_v56 = vadd.f32 %v4629_v47, %v3817_v59  ;;  %v4593_v8 = vadd.f32 %v4592_v48, %v3816_v60  ;;  %v2843_v9 = vadd.f32 %v2842_v2, %v6472_v4  ;;  %v1628_v10 = vadd.f32 %v1627_v7, %v6474_v5  ;;  %v2844_v11 = vpop.f32.mrb[175].mxu1  ;;  %1947 = vmatprep.mubr.f32.mxu0 %v5995_v0  ;;  %v375_v7 = vld [vmem:[%s8323_s0 + $0x480] sm:$0xff] }
 0x250   : > { %5795 = vmatmul.mubr.msk.f32.gmra.mrb[24].mxu1 %vm451_vm1, %v371_v52  ;;  %v4667_v13 = vadd.f32 %v4666_v53, %v3818_v63  ;;  %v3819_v14 = vmax.f32 %v1626_v1, 0.0  ;;  %v2845_v15 = vadd.f32 %v2844_v11, %v6476_v6 }
 0x251   : > { %3164 = vmatprep.mubr.f32.mxu1 %v5995_v0  ;;  %v3821_v16 = vmax.f32 %v2843_v9, 0.0  ;;  %v3820_v17 = vmax.f32 %v1628_v10, 0.0  ;;  %v1631_v18 = vpop.f32.mrb[176].mxu0 }
 0x252   : > { %v4557_v19 = vadd.f32 %v4556_v62, %v3819_v14  ;;  %v3822_v20 = vmax.f32 %v2845_v15, 0.0  ;;  %v1632_v21 = vadd.f32 %v1631_v18, %v6470_v3  ;;  %v2848_v22 = vpop.f32.mrb[176].mxu1  ;;  %v1633_v23 = vpop.f32.mrb[177].mxu0  ;;  %5602 = vmatmul.mubr.msk.f32.gmra.mrb[26].mxu0 %vm451_vm1, %v372_v12 }
 0x253   : > { %v4631_v24 = vadd.f32 %v4630_v56, %v3821_v16  ;;  %v4594_v25 = vadd.f32 %v4593_v8, %v3820_v17  ;;  %v2849_v26 = vadd.f32 %v2848_v22, %v6472_v4  ;;  %v1634_v27 = vadd.f32 %v1633_v23, %v6474_v5  ;;  %v2850_v28 = vpop.f32.mrb[177].mxu1  ;;  %1953 = vmatprep.mubr.f32.mxu0 %v5995_v0  ;;  %v376_v23 = vld [vmem:[%s8323_s0 + $0x488] sm:$0xff] }
 0x254   : > { %5796 = vmatmul.mubr.msk.f32.gmra.mrb[26].mxu1 %vm451_vm1, %v372_v12  ;;  %v4668_v30 = vadd.f32 %v4667_v13, %v3822_v20  ;;  %v3823_v31 = vmax.f32 %v1632_v21, 0.0  ;;  %v2851_v33 = vadd.f32 %v2850_v28, %v6476_v6 }
 0x255   : > { %3170 = vmatprep.mubr.f32.mxu1 %v5995_v0  ;;  %v3825_v34 = vmax.f32 %v2849_v26, 0.0  ;;  %v3824_v35 = vmax.f32 %v1634_v27, 0.0  ;;  %v1637_v36 = vpop.f32.mrb[178].mxu0 }
 0x256   : > { %v4558_v37 = vadd.f32 %v4557_v19, %v3823_v31  ;;  %v3826_v38 = vmax.f32 %v2851_v33, 0.0  ;;  %v1638_v39 = vadd.f32 %v1637_v36, %v6470_v3  ;;  %v2854_v40 = vpop.f32.mrb[178].mxu1  ;;  %v1639_v41 = vpop.f32.mrb[179].mxu0  ;;  %5603 = vmatmul.mubr.msk.f32.gmra.mrb[28].mxu0 %vm451_vm1, %v373_v29 }
 0x257   : > { %v4632_v42 = vadd.f32 %v4631_v24, %v3825_v34  ;;  %v4595_v43 = vadd.f32 %v4594_v25, %v3824_v35  ;;  %v2855_v44 = vadd.f32 %v2854_v40, %v6472_v4  ;;  %v1640_v58 = vadd.f32 %v1639_v41, %v6474_v5  ;;  %v2856_v45 = vpop.f32.mrb[179].mxu1  ;;  %1959 = vmatprep.mubr.f32.mxu0 %v5995_v0  ;;  %v377_v41 = vld [vmem:[%s8323_s0 + $0x490] sm:$0xff] }
 0x258   : > { %5797 = vmatmul.mubr.msk.f32.gmra.mrb[28].mxu1 %vm451_vm1, %v373_v29  ;;  %v4669_v47 = vadd.f32 %v4668_v30, %v3826_v38  ;;  %v3827_v48 = vmax.f32 %v1638_v39, 0.0  ;;  %v2857_v49 = vadd.f32 %v2856_v45, %v6476_v6 }
 0x259   : > { %3176 = vmatprep.mubr.f32.mxu1 %v5995_v0  ;;  %v3829_v50 = vmax.f32 %v2855_v44, 0.0  ;;  %v3828_v51 = vmax.f32 %v1640_v58, 0.0  ;;  %v1643_v52 = vpop.f32.mrb[180].mxu0 }
 0x25a   : > { %v4559_v53 = vadd.f32 %v4558_v37, %v3827_v48  ;;  %v3830_v55 = vmax.f32 %v2857_v49, 0.0  ;;  %v1644_v57 = vadd.f32 %v1643_v52, %v6470_v3  ;;  %v2860_v59 = vpop.f32.mrb[180].mxu1  ;;  %v1645_v60 = vpop.f32.mrb[181].mxu0  ;;  %5604 = vmatmul.mubr.msk.f32.gmra.mrb[30].mxu0 %vm451_vm1, %v374_v46 }
 0x25b   : > { %v4633_v61 = vadd.f32 %v4632_v42, %v3829_v50  ;;  %v4596_v62 = vadd.f32 %v4595_v43, %v3828_v51  ;;  %v2861_v63 = vadd.f32 %v2860_v59, %v6472_v4  ;;  %v1646_v1 = vadd.f32 %v1645_v60, %v6474_v5  ;;  %v2862_v2 = vpop.f32.mrb[181].mxu1  ;;  %1965 = vmatprep.mubr.f32.mxu0 %v5995_v0  ;;  %v378_v60 = vld [vmem:[%s8323_s0 + $0x498] sm:$0xff] }
 0x25c   : > { %5798 = vmatmul.mubr.msk.f32.gmra.mrb[30].mxu1 %vm451_vm1, %v374_v46  ;;  %v4670_v56 = vadd.f32 %v4669_v47, %v3830_v55  ;;  %v3831_v8 = vmax.f32 %v1644_v57, 0.0  ;;  %v2863_v9 = vadd.f32 %v2862_v2, %v6476_v6 }
 0x25d   : > { %3182 = vmatprep.mubr.f32.mxu1 %v5995_v0  ;;  %v3833_v10 = vmax.f32 %v2861_v63, 0.0  ;;  %v3832_v11 = vmax.f32 %v1646_v1, 0.0  ;;  %v1649_v12 = vpop.f32.mrb[182].mxu0 }
 0x25e   : > { %v4560_v13 = vadd.f32 %v4559_v53, %v3831_v8  ;;  %v3834_v14 = vmax.f32 %v2863_v9, 0.0  ;;  %v1650_v15 = vadd.f32 %v1649_v12, %v6470_v3  ;;  %v1651_v17 = vpop.f32.mrb[183].mxu0  ;;  %5605 = vmatmul.mubr.msk.f32.gmra.mrb[32].mxu0 %vm451_vm1, %v375_v7 }
 0x25f   : > { %v2866_v16 = vpop.f32.mrb[182].mxu1  ;;  %v4634_v18 = vadd.f32 %v4633_v61, %v3833_v10  ;;  %v4597_v19 = vadd.f32 %v4596_v62, %v3832_v11  ;;  %v1652_v21 = vadd.f32 %v1651_v17, %v6474_v5  ;;  %1971 = vmatprep.mubr.f32.mxu0 %v5995_v0  ;;  %v379_v17 = vld [vmem:[%s8323_s0 + $0x4a0] sm:$0xff] }
 0x260   : > { %v2867_v20 = vadd.f32 %v2866_v16, %v6472_v4  ;;  %v2868_v22 = vpop.f32.mrb[183].mxu1  ;;  %5799 = vmatmul.mubr.msk.f32.gmra.mrb[32].mxu1 %vm451_vm1, %v375_v7  ;;  %v4671_v24 = vadd.f32 %v4670_v56, %v3834_v14  ;;  %v3835_v25 = vmax.f32 %v1650_v15, 0.0 }
 0x261   : > { %v2869_v26 = vadd.f32 %v2868_v22, %v6476_v6  ;;  %3188 = vmatprep.mubr.f32.mxu1 %v5995_v0  ;;  %v3836_v28 = vmax.f32 %v1652_v21, 0.0  ;;  %v1655_v29 = vpop.f32.mrb[184].mxu0 }
 0x262   : > { %v3837_v27 = vmax.f32 %v2867_v20, 0.0  ;;  %v4561_v30 = vadd.f32 %v4560_v13, %v3835_v25  ;;  %v1656_v33 = vadd.f32 %v1655_v29, %v6470_v3  ;;  %v1657_v35 = vpop.f32.mrb[185].mxu0  ;;  %5606 = vmatmul.mubr.msk.f32.gmra.mrb[34].mxu0 %vm451_vm1, %v376_v23 }
 0x263   : > { %v3838_v31 = vmax.f32 %v2869_v26, 0.0  ;;  %v2872_v34 = vpop.f32.mrb[184].mxu1  ;;  %v4598_v37 = vadd.f32 %v4597_v19, %v3836_v28  ;;  %v1658_v39 = vadd.f32 %v1657_v35, %v6474_v5  ;;  %1977 = vmatprep.mubr.f32.mxu0 %v5995_v0  ;;  %v380_v35 = vld [vmem:[%s8323_s0 + $0x4a8] sm:$0xff] }
 0x264   : > { %v4635_v36 = vadd.f32 %v4634_v18, %v3837_v27  ;;  %v2873_v38 = vadd.f32 %v2872_v34, %v6472_v4  ;;  %v2874_v40 = vpop.f32.mrb[185].mxu1  ;;  %5800 = vmatmul.mubr.msk.f32.gmra.mrb[34].mxu1 %vm451_vm1, %v376_v23  ;;  %v3839_v43 = vmax.f32 %v1656_v33, 0.0 }
 0x265   : > { %v4672_v42 = vadd.f32 %v4671_v24, %v3838_v31  ;;  %v2875_v44 = vadd.f32 %v2874_v40, %v6476_v6  ;;  %3194 = vmatprep.mubr.f32.mxu1 %v5995_v0  ;;  %v3840_v45 = vmax.f32 %v1658_v39, 0.0  ;;  %v1661_v46 = vpop.f32.mrb[186].mxu0 }
 0x266   : > { %v3841_v58 = vmax.f32 %v2873_v38, 0.0  ;;  %v4562_v47 = vadd.f32 %v4561_v30, %v3839_v43  ;;  %v1662_v49 = vadd.f32 %v1661_v46, %v6470_v3  ;;  %v1663_v51 = vpop.f32.mrb[187].mxu0  ;;  %5607 = vmatmul.mubr.msk.f32.gmra.mrb[36].mxu0 %vm451_vm1, %v377_v41 }
 0x267   : > { %v3842_v48 = vmax.f32 %v2875_v44, 0.0  ;;  %v2878_v50 = vpop.f32.mrb[186].mxu1  ;;  %v4599_v53 = vadd.f32 %v4598_v37, %v3840_v45  ;;  %v1664_v57 = vadd.f32 %v1663_v51, %v6474_v5  ;;  %1983 = vmatprep.mubr.f32.mxu0 %v5995_v0  ;;  %v381_v51 = vld [vmem:[%s8323_s0 + $0x4b0] sm:$0xff] }
 0x268   : > { %v4636_v52 = vadd.f32 %v4635_v36, %v3841_v58  ;;  %v2879_v55 = vadd.f32 %v2878_v50, %v6472_v4  ;;  %v2880_v59 = vpop.f32.mrb[187].mxu1  ;;  %5801 = vmatmul.mubr.msk.f32.gmra.mrb[36].mxu1 %vm451_vm1, %v377_v41  ;;  %v3843_v62 = vmax.f32 %v1662_v49, 0.0 }
 0x269   : > { %v4673_v61 = vadd.f32 %v4672_v42, %v3842_v48  ;;  %v2881_v63 = vadd.f32 %v2880_v59, %v6476_v6  ;;  %3200 = vmatprep.mubr.f32.mxu1 %v5995_v0  ;;  %v3844_v2 = vmax.f32 %v1664_v57, 0.0  ;;  %v1667_v7 = vpop.f32.mrb[188].mxu0 }
 0x26a   : > { %v3845_v1 = vmax.f32 %v2879_v55, 0.0  ;;  %v4563_v56 = vadd.f32 %v4562_v47, %v3843_v62  ;;  %v1668_v9 = vadd.f32 %v1667_v7, %v6470_v3  ;;  %v1669_v11 = vpop.f32.mrb[189].mxu0  ;;  %5608 = vmatmul.mubr.msk.f32.gmra.mrb[38].mxu0 %vm451_vm1, %v378_v60 }
 0x26b   : > { %v3846_v8 = vmax.f32 %v2881_v63, 0.0  ;;  %v2884_v10 = vpop.f32.mrb[188].mxu1  ;;  %v4600_v13 = vadd.f32 %v4599_v53, %v3844_v2  ;;  %v1670_v15 = vadd.f32 %v1669_v11, %v6474_v5  ;;  %1989 = vmatprep.mubr.f32.mxu0 %v5995_v0 }
 0x26c   : > { %v4637_v12 = vadd.f32 %v4636_v52, %v3845_v1  ;;  %v2885_v14 = vadd.f32 %v2884_v10, %v6472_v4  ;;  %v2886_v16 = vpop.f32.mrb[189].mxu1  ;;  %5802 = vmatmul.mubr.msk.f32.gmra.mrb[38].mxu1 %vm451_vm1, %v378_v60  ;;  %v3847_v19 = vmax.f32 %v1668_v9, 0.0 }
 0x26d   : > { %v4674_v18 = vadd.f32 %v4673_v61, %v3846_v8  ;;  %v2887_v20 = vadd.f32 %v2886_v16, %v6476_v6  ;;  %3206 = vmatprep.mubr.f32.mxu1 %v5995_v0  ;;  %v3848_v22 = vmax.f32 %v1670_v15, 0.0  ;;  %v1673_v23 = vpop.f32.mrb[190].mxu0  ;;  %v382_v15 = vld [vmem:[%s8323_s0 + $0x4b8] sm:$0xff] }
 0x26e   : > { %v3849_v21 = vmax.f32 %v2885_v14, 0.0  ;;  %v4564_v24 = vadd.f32 %v4563_v56, %v3847_v19  ;;  %v1674_v26 = vadd.f32 %v1673_v23, %v6470_v3  ;;  %v1675_v28 = vpop.f32.mrb[191].mxu0  ;;  %5609 = vmatmul.mubr.msk.f32.gmra.mrb[40].mxu0 %vm451_vm1, %v379_v17 }
 0x26f   : > { %v3850_v25 = vmax.f32 %v2887_v20, 0.0  ;;  %v2890_v27 = vpop.f32.mrb[190].mxu1  ;;  %v4601_v30 = vadd.f32 %v4600_v13, %v3848_v22  ;;  %v1676_v33 = vadd.f32 %v1675_v28, %v6474_v5  ;;  %1995 = vmatprep.mubr.f32.mxu0 %v5995_v0 }
 0x270   : > { %v4638_v29 = vadd.f32 %v4637_v12, %v3849_v21  ;;  %v2891_v31 = vadd.f32 %v2890_v27, %v6472_v4  ;;  %v2892_v34 = vpop.f32.mrb[191].mxu1  ;;  %5803 = vmatmul.mubr.msk.f32.gmra.mrb[40].mxu1 %vm451_vm1, %v379_v17  ;;  %v3851_v37 = vmax.f32 %v1674_v26, 0.0 }
 0x271   : > { %v4675_v36 = vadd.f32 %v4674_v18, %v3850_v25  ;;  %v2893_v38 = vadd.f32 %v2892_v34, %v6476_v6  ;;  %3212 = vmatprep.mubr.f32.mxu1 %v5995_v0  ;;  %v3852_v40 = vmax.f32 %v1676_v33, 0.0  ;;  %v1679_v41 = vpop.f32.mrb[192].mxu0 }
 0x272   : > { %v3853_v39 = vmax.f32 %v2891_v31, 0.0  ;;  %v4565_v42 = vadd.f32 %v4564_v24, %v3851_v37  ;;  %v1680_v44 = vadd.f32 %v1679_v41, %v6470_v3  ;;  %v1681_v45 = vpop.f32.mrb[193].mxu0  ;;  %5610 = vmatmul.mubr.msk.f32.gmra.mrb[42].mxu0 %vm451_vm1, %v380_v35  ;;  %v383_v37 = vld [vmem:[%s8323_s0 + $0x4c0] sm:$0xff] }
 0x273   : > { %v3854_v43 = vmax.f32 %v2893_v38, 0.0  ;;  %v2896_v58 = vpop.f32.mrb[192].mxu1  ;;  %v4602_v47 = vadd.f32 %v4601_v30, %v3852_v40  ;;  %v1682_v49 = vadd.f32 %v1681_v45, %v6474_v5  ;;  %2001 = vmatprep.mubr.f32.mxu0 %v5995_v0 }
 0x274   : > { %v4639_v46 = vadd.f32 %v4638_v29, %v3853_v39  ;;  %v2897_v48 = vadd.f32 %v2896_v58, %v6472_v4  ;;  %v2898_v50 = vpop.f32.mrb[193].mxu1  ;;  %5804 = vmatmul.mubr.msk.f32.gmra.mrb[42].mxu1 %vm451_vm1, %v380_v35  ;;  %v4566_v52 = vrot.slane %v4565_v42, 4  ;;  %v3855_v55 = vmax.f32 %v1680_v44, 0.0 }
 0x275   : > { %v4676_v53 = vadd.f32 %v4675_v36, %v3854_v43  ;;  %v2899_v57 = vadd.f32 %v2898_v50, %v6476_v6  ;;  %3218 = vmatprep.mubr.f32.mxu1 %v5995_v0  ;;  %v4603_v60 = vrot.slane %v4602_v47, 4  ;;  %v3856_v62 = vmax.f32 %v1682_v49, 0.0  ;;  %v1685_v63 = vpop.f32.mrb[194].mxu0 }
 0x276   : > { %v4640_v59 = vrot.slane %v4639_v46, 4  ;;  %v3857_v61 = vmax.f32 %v2897_v48, 0.0  ;;  %v4567_v1 = vadd.f32 %v4566_v52, %v4565_v42  ;;  %v1686_v56 = vadd.f32 %v1685_v63, %v6470_v3  ;;  %v1687_v9 = vpop.f32.mrb[195].mxu0  ;;  %5611 = vmatmul.mubr.msk.f32.gmra.mrb[44].mxu0 %vm451_vm1, %v381_v51 }
 0x277   : > { %v4677_v2 = vrot.slane %v4676_v53, 4  ;;  %v3858_v7 = vmax.f32 %v2899_v57, 0.0  ;;  %v2902_v8 = vpop.f32.mrb[194].mxu1  ;;  %v4604_v11 = vadd.f32 %v4603_v60, %v4602_v47  ;;  %v1688_v13 = vadd.f32 %v1687_v9, %v6474_v5  ;;  %2007 = vmatprep.mubr.f32.mxu0 %v5995_v0  ;;  %v384_v60 = vld [vmem:[%s8323_s0 + $0x4c8] sm:$0xff] }
 0x278   : > { %v4641_v10 = vadd.f32 %v4640_v59, %v4639_v46  ;;  %v2903_v12 = vadd.f32 %v2902_v8, %v6472_v4  ;;  %v2904_v14 = vpop.f32.mrb[195].mxu1  ;;  %5805 = vmatmul.mubr.msk.f32.gmra.mrb[44].mxu1 %vm451_vm1, %v381_v51  ;;  %v4568_v16 = vrot.slane %v4567_v1, 2  ;;  %v3859_v18 = vmax.f32 %v1686_v56, 0.0 }
 0x279   : > { %v4678_v17 = vadd.f32 %v4677_v2, %v4676_v53  ;;  %v2905_v19 = vadd.f32 %v2904_v14, %v6476_v6  ;;  %3224 = vmatprep.mubr.f32.mxu1 %v5995_v0  ;;  %v4605_v21 = vrot.slane %v4604_v11, 2  ;;  %v3860_v23 = vmax.f32 %v1688_v13, 0.0  ;;  %v1691_v24 = vpop.f32.mrb[196].mxu0 }
 0x27a   : > { %v4642_v20 = vrot.slane %v4641_v10, 2  ;;  %v3861_v22 = vmax.f32 %v2903_v12, 0.0  ;;  %v4569_v25 = vadd.f32 %v4568_v16, %v4567_v1  ;;  %v4683_v27 = vadd.f32 %v3859_v18, %v3855_v55  ;;  %v1693_v30 = vpop.f32.mrb[197].mxu0  ;;  %5612 = vmatmul.mubr.msk.f32.gmra.mrb[46].mxu0 %vm451_vm1, %v382_v15 }
 0x27b   : > { %v4679_v26 = vrot.slane %v4678_v17, 2  ;;  %v3862_v28 = vmax.f32 %v2905_v19, 0.0  ;;  %v2908_v29 = vpop.f32.mrb[196].mxu1  ;;  %v4606_v33 = vadd.f32 %v4605_v21, %v4604_v11  ;;  %v4720_v35 = vadd.f32 %v3860_v23, %v3856_v62  ;;  %2013 = vmatprep.mubr.f32.mxu0 %v5995_v0  ;;  %v385_v21 = vld [vmem:[%s8323_s0 + $0x4d0] sm:$0xff] }
 0x27c   : > { %v4643_v31 = vadd.f32 %v4642_v20, %v4641_v10  ;;  %v4757_v34 = vadd.f32 %v3861_v22, %v3857_v61  ;;  %v2910_v36 = vpop.f32.mrb[197].mxu1  ;;  %5806 = vmatmul.mubr.msk.f32.gmra.mrb[46].mxu1 %vm451_vm1, %v382_v15  ;;  %v4570_v38 = vrot.slane %v4569_v25, 1  ;;  %v1692_v41 = vadd.f32 %v1691_v24, %v6470_v3 }
 0x27d   : > { %v4680_v39 = vadd.f32 %v4679_v26, %v4678_v17  ;;  %v4794_v40 = vadd.f32 %v3862_v28, %v3858_v7  ;;  %3230 = vmatprep.mubr.f32.mxu1 %v5995_v0  ;;  %v4607_v43 = vrot.slane %v4606_v33, 1  ;;  %v2909_v44 = vadd.f32 %v2908_v29, %v6472_v4  ;;  %v1697_v45 = vpop.f32.mrb[198].mxu0 }
 0x27e   : > { %v4644_v42 = vrot.slane %v4643_v31, 1  ;;  %v1694_v58 = vadd.f32 %v1693_v30, %v6474_v5  ;;  %v4571_v46 = vadd.f32 %v4570_v38, %v4569_v25  ;;  %v3863_v48 = vmax.f32 %v1692_v41, 0.0  ;;  %v1699_v51 = vpop.f32.mrb[199].mxu0  ;;  %5613 = vmatmul.mubr.msk.f32.gmra.mrb[48].mxu0 %vm451_vm1, %v383_v37 }
 0x27f   : > { %v4681_v47 = vrot.slane %v4680_v39, 1  ;;  %v2911_v49 = vadd.f32 %v2910_v36, %v6476_v6  ;;  %v2914_v50 = vpop.f32.mrb[198].mxu1  ;;  %v4608_v53 = vadd.f32 %v4607_v43, %v4606_v33  ;;  %v3865_v55 = vmax.f32 %v2909_v44, 0.0  ;;  %2019 = vmatprep.mubr.f32.mxu0 %v5995_v0  ;;  %v386_v43 = vld [vmem:[%s8323_s0 + $0x4d8] sm:$0xff] }
 0x280   : > { %v4645_v52 = vadd.f32 %v4644_v42, %v4643_v31  ;;  %v3864_v57 = vmax.f32 %v1694_v58, 0.0  ;;  %v2916_v59 = vpop.f32.mrb[199].mxu1  ;;  %5807 = vmatmul.mubr.msk.f32.gmra.mrb[48].mxu1 %vm451_vm1, %v383_v37  ;;  %v5136_v61 = vmul.f32 0.00390625, %v4571_v46  ;;  %v4684_v63 = vadd.f32 %v4683_v27, %v3863_v48 }
 0x281   : > { %v4682_v62 = vadd.f32 %v4681_v47, %v4680_v39  ;;  %v3866_v1 = vmax.f32 %v2911_v49, 0.0  ;;  %3236 = vmatprep.mubr.f32.mxu1 %v5995_v0  ;;  %v5137_v7 = vmul.f32 0.00390625, %v4608_v53  ;;  %v4758_v56 = vadd.f32 %v4757_v34, %v3865_v55  ;;  %v1703_v9 = vpop.f32.mrb[200].mxu0 }
 0x282   : > { %v5138_v2 = vmul.f32 0.00390625, %v4645_v52  ;;  %v4721_v8 = vadd.f32 %v4720_v35, %v3864_v57  ;;  %v1698_v12 = vadd.f32 %v1697_v45, %v6470_v3  ;;  %v2915_v13 = vadd.f32 %v2914_v50, %v6472_v4  ;;  %v1705_v15 = vpop.f32.mrb[201].mxu0  ;;  %5614 = vmatmul.mubr.msk.f32.gmra.mrb[50].mxu0 %vm451_vm1, %v384_v60 }
 0x283   : > { %v5139_v10 = vmul.f32 0.00390625, %v4682_v62  ;;  %v4795_v11 = vadd.f32 %v4794_v40, %v3866_v1  ;;  %v2920_v14 = vpop.f32.mrb[200].mxu1  ;;  %v5224_v16 = vcombine.low %v5136_v61, %v5137_v7  ;;  %v1700_v17 = vadd.f32 %v1699_v51, %v6474_v5  ;;  %2025 = vmatprep.mubr.f32.mxu0 %v5995_v0  ;;  %v387_v7 = vld [vmem:[%s8323_s0 + $0x4e0] sm:$0xff] }
 0x284   : > { %v2917_v18 = vadd.f32 %v2916_v59, %v6476_v6  ;;  %v1704_v19 = vadd.f32 %v1703_v9, %v6470_v3  ;;  %v2922_v20 = vpop.f32.mrb[201].mxu1  ;;  %5808 = vmatmul.mubr.msk.f32.gmra.mrb[50].mxu1 %vm451_vm1, %v384_v60  ;;  %v3867_v23 = vmax.f32 %v1698_v12, 0.0  ;;  %v3869_v24 = vmax.f32 %v2915_v13, 0.0 }
 0x285   : > { %v5225_v22 = vcombine.low %v5138_v2, %v5139_v10  ;;  %v2921_v25 = vadd.f32 %v2920_v14, %v6472_v4  ;;  %3242 = vmatprep.mubr.f32.mxu1 %v5995_v0  ;;  %v5232_v26 = vrot.slane %v5224_v16, %v6831_v32  ;;  %v3868_v27 = vmax.f32 %v1700_v17, 0.0  ;;  %v1709_v30 = vpop.f32.mrb[202].mxu0 }
 0x286   : > { %v3870_v28 = vmax.f32 %v2917_v18, 0.0  ;;  %v3871_v29 = vmax.f32 %v1704_v19, 0.0  ;;  %v4685_v33 = vadd.f32 %v4684_v63, %v3867_v23  ;;  %v4759_v34 = vadd.f32 %v4758_v56, %v3869_v24  ;;  %v1711_v37 = vpop.f32.mrb[203].mxu0  ;;  %5615 = vmatmul.mubr.msk.f32.gmra.mrb[52].mxu0 %vm451_vm1, %v385_v21 }
 0x287   : > { %v5239_v31 = vrot.slane %v5225_v22, %v6831_v32  ;;  %v3873_v35 = vmax.f32 %v2921_v25, 0.0  ;;  %v2926_v36 = vpop.f32.mrb[202].mxu1  ;;  %v4722_v38 = vadd.f32 %v4721_v8, %v3868_v27  ;;  %v1706_v40 = vadd.f32 %v1705_v15, %v6474_v5  ;;  %2031 = vmatprep.mubr.f32.mxu0 %v5995_v0  ;;  %v388_v27 = vld [vmem:[%s8323_s0 + $0x4e8] sm:$0xff] }
 0x288   : > { %v4796_v39 = vadd.f32 %v4795_v11, %v3870_v28  ;;  %v2923_v41 = vadd.f32 %v2922_v20, %v6476_v6  ;;  %v2928_v42 = vpop.f32.mrb[203].mxu1  ;;  %5809 = vmatmul.mubr.msk.f32.gmra.mrb[52].mxu1 %vm451_vm1, %v385_v21  ;;  %v4686_v58 = vadd.f32 %v4685_v33, %v3871_v29  ;;  %v1710_v46 = vadd.f32 %v1709_v30, %v6470_v3 }
 0x289   : > { %v5240_v44 = vcombine.low %v5232_v26, %v5239_v31  ;;  %v4760_v45 = vadd.f32 %v4759_v34, %v3873_v35  ;;  %v3872_v47 = vmax.f32 %v1706_v40, 0.0  ;;  %v2927_v49 = vadd.f32 %v2926_v36, %v6472_v4  ;;  %v1715_v51 = vpop.f32.mrb[204].mxu0  ;;  %3248 = vmatprep.mubr.f32.mxu1 %v5995_v0 }
 0x28a   : > { %v3874_v48 = vmax.f32 %v2923_v41, 0.0  ;;  %v1712_v50 = vadd.f32 %v1711_v37, %v6474_v5  ;;  %v3875_v53 = vmax.f32 %v1710_v46, 0.0  ;;  %v2929_v55 = vadd.f32 %v2928_v42, %v6476_v6  ;;  %v1717_v60 = vpop.f32.mrb[205].mxu0  ;;  %5616 = vmatmul.mubr.msk.f32.gmra.mrb[54].mxu0 %vm451_vm1, %v386_v43  ;;  %v389_v46 = vld [vmem:[%s8323_s0 + $0x4f0] sm:$0xff] }
 0x28b   : > { %v5247_v52 = vrot.slane %v5240_v44, %v6831_v32  ;;  %v1716_v57 = vadd.f32 %v1715_v51, %v6470_v3  ;;  %v2932_v59 = vpop.f32.mrb[204].mxu1  ;;  %v4723_v61 = vadd.f32 %v4722_v38, %v3872_v47  ;;  %v3877_v63 = vmax.f32 %v2927_v49, 0.0  ;;  %2037 = vmatprep.mubr.f32.mxu0 %v5995_v0 }
 0x28c   : > { %v4797_v62 = vadd.f32 %v4796_v39, %v3874_v48  ;;  %v3876_v1 = vmax.f32 %v1712_v50, 0.0  ;;  %v2934_v2 = vpop.f32.mrb[205].mxu1  ;;  %5810 = vmatmul.mubr.msk.f32.gmra.mrb[54].mxu1 %vm451_vm1, %v386_v43  ;;  %v4687_v56 = vadd.f32 %v4686_v58, %v3875_v53  ;;  %v3878_v8 = vmax.f32 %v2929_v55, 0.0 }
 0x28d   : > { %5332 = vst.msk [vmem:[%s6915_s18 + $0x8] sm:$0xf] %vm6873_vm2, %v5247_v52  ;;  %v3879_v9 = vmax.f32 %v1716_v57, 0.0  ;;  %v2933_v10 = vadd.f32 %v2932_v59, %v6472_v4  ;;  %3254 = vmatprep.mubr.f32.mxu1 %v5995_v0  ;;  %v4761_v11 = vadd.f32 %v4760_v45, %v3877_v63  ;;  %v1718_v13 = vadd.f32 %v1717_v60, %v6474_v5  ;;  %v1721_v15 = vpop.f32.mrb[206].mxu0 }
 0x28e   : > { %v4724_v12 = vadd.f32 %v4723_v61, %v3876_v1  ;;  %v2935_v14 = vadd.f32 %v2934_v2, %v6476_v6  ;;  %v4798_v16 = vadd.f32 %v4797_v62, %v3878_v8  ;;  %v1722_v19 = vadd.f32 %v1721_v15, %v6470_v3  ;;  %v1723_v21 = vpop.f32.mrb[207].mxu0  ;;  %5617 = vmatmul.mubr.msk.f32.gmra.mrb[56].mxu0 %vm451_vm1, %v387_v7 }
 0x28f   : > { %v4688_v17 = vadd.f32 %v4687_v56, %v3879_v9  ;;  %v3881_v18 = vmax.f32 %v2933_v10, 0.0  ;;  %v2938_v20 = vpop.f32.mrb[206].mxu1  ;;  %v3880_v22 = vmax.f32 %v1718_v13, 0.0  ;;  %v1724_v25 = vadd.f32 %v1723_v21, %v6474_v5  ;;  %2043 = vmatprep.mubr.f32.mxu0 %v5995_v0 }
 0x290   : > { %v3882_v23 = vmax.f32 %v2935_v14, 0.0  ;;  %v2939_v24 = vadd.f32 %v2938_v20, %v6472_v4  ;;  %v2940_v26 = vpop.f32.mrb[207].mxu1  ;;  %5811 = vmatmul.mubr.msk.f32.gmra.mrb[56].mxu1 %vm451_vm1, %v387_v7  ;;  %v3883_v29 = vmax.f32 %v1722_v19, 0.0  ;;  %v390_v7 = vld [vmem:[%s8323_s0 + $0x4f8] sm:$0xff] }
 0x291   : > { %v4762_v28 = vadd.f32 %v4761_v11, %v3881_v18  ;;  %v2941_v30 = vadd.f32 %v2940_v26, %v6476_v6  ;;  %3260 = vmatprep.mubr.f32.mxu1 %v5995_v0  ;;  %v4725_v31 = vadd.f32 %v4724_v12, %v3880_v22  ;;  %v3884_v35 = vmax.f32 %v1724_v25, 0.0  ;;  %v1727_v36 = vpop.f32.mrb[208].mxu0 }
 0x292   : > { %v4799_v33 = vadd.f32 %v4798_v16, %v3882_v23  ;;  %v3885_v34 = vmax.f32 %v2939_v24, 0.0  ;;  %v4689_v37 = vadd.f32 %v4688_v17, %v3883_v29  ;;  %v1728_v39 = vadd.f32 %v1727_v36, %v6470_v3  ;;  %v1729_v41 = vpop.f32.mrb[209].mxu0  ;;  %5618 = vmatmul.mubr.msk.f32.gmra.mrb[58].mxu0 %vm451_vm1, %v388_v27  ;;  %v391_v23 = vld [vmem:[%s8323_s0 + $0x500] sm:$0xff] }
 0x293   : > { %v3886_v38 = vmax.f32 %v2941_v30, 0.0  ;;  %v2944_v40 = vpop.f32.mrb[208].mxu1  ;;  %v4726_v43 = vadd.f32 %v4725_v31, %v3884_v35  ;;  %v1730_v58 = vadd.f32 %v1729_v41, %v6474_v5  ;;  %2049 = vmatprep.mubr.f32.mxu0 %v5995_v0  ;;  %v392_v41 = vld [vmem:[%s8323_s0 + $0x508] sm:$0xff] }
 0x294   : > { %v4763_v42 = vadd.f32 %v4762_v28, %v3885_v34  ;;  %v2945_v44 = vadd.f32 %v2944_v40, %v6472_v4  ;;  %v2946_v45 = vpop.f32.mrb[209].mxu1  ;;  %5812 = vmatmul.mubr.msk.f32.gmra.mrb[58].mxu1 %vm451_vm1, %v388_v27  ;;  %v3887_v48 = vmax.f32 %v1728_v39, 0.0 }
 0x295   : > { %v4800_v47 = vadd.f32 %v4799_v33, %v3886_v38  ;;  %v2947_v49 = vadd.f32 %v2946_v45, %v6476_v6  ;;  %3266 = vmatprep.mubr.f32.mxu1 %v5995_v0  ;;  %v3888_v51 = vmax.f32 %v1730_v58, 0.0  ;;  %v1733_v52 = vpop.f32.mrb[210].mxu0 }
 0x296   : > { %v3889_v50 = vmax.f32 %v2945_v44, 0.0  ;;  %v4690_v53 = vadd.f32 %v4689_v37, %v3887_v48  ;;  %v1734_v57 = vadd.f32 %v1733_v52, %v6470_v3  ;;  %v1735_v60 = vpop.f32.mrb[211].mxu0  ;;  %5619 = vmatmul.mubr.msk.f32.gmra.mrb[60].mxu0 %vm451_vm1, %v389_v46 }
 0x297   : > { %v3890_v55 = vmax.f32 %v2947_v49, 0.0  ;;  %v2950_v59 = vpop.f32.mrb[210].mxu1  ;;  %v4727_v62 = vadd.f32 %v4726_v43, %v3888_v51  ;;  %v1736_v1 = vadd.f32 %v1735_v60, %v6474_v5  ;;  %2055 = vmatprep.mubr.f32.mxu0 %v5995_v0  ;;  %v393_v60 = vld [vmem:[%s8323_s0 + $0x510] sm:$0xff] }
 0x298   : > { %v4764_v61 = vadd.f32 %v4763_v42, %v3889_v50  ;;  %v2951_v63 = vadd.f32 %v2950_v59, %v6472_v4  ;;  %v2952_v2 = vpop.f32.mrb[211].mxu1  ;;  %5813 = vmatmul.mubr.msk.f32.gmra.mrb[60].mxu1 %vm451_vm1, %v389_v46  ;;  %v3891_v8 = vmax.f32 %v1734_v57, 0.0 }
 0x299   : > { %v4801_v56 = vadd.f32 %v4800_v47, %v3890_v55  ;;  %v2953_v9 = vadd.f32 %v2952_v2, %v6476_v6  ;;  %3272 = vmatprep.mubr.f32.mxu1 %v5995_v0  ;;  %v3892_v11 = vmax.f32 %v1736_v1, 0.0  ;;  %v1739_v12 = vpop.f32.mrb[212].mxu0 }
 0x29a   : > { %v3893_v10 = vmax.f32 %v2951_v63, 0.0  ;;  %v4691_v13 = vadd.f32 %v4690_v53, %v3891_v8  ;;  %v1740_v15 = vadd.f32 %v1739_v12, %v6470_v3  ;;  %v1741_v17 = vpop.f32.mrb[213].mxu0  ;;  %5620 = vmatmul.mubr.msk.f32.gmra.mrb[62].mxu0 %vm451_vm1, %v390_v7 }
 0x29b   : > { %v3894_v14 = vmax.f32 %v2953_v9, 0.0  ;;  %v2956_v16 = vpop.f32.mrb[212].mxu1  ;;  %v4728_v19 = vadd.f32 %v4727_v62, %v3892_v11  ;;  %v1742_v21 = vadd.f32 %v1741_v17, %v6474_v5  ;;  %2061 = vmatprep.mubr.f32.mxu0 %v5995_v0  ;;  %v394_v17 = vld [vmem:[%s8323_s0 + $0x518] sm:$0xff] }
 0x29c   : > { %v4765_v18 = vadd.f32 %v4764_v61, %v3893_v10  ;;  %v2957_v20 = vadd.f32 %v2956_v16, %v6472_v4  ;;  %v2958_v22 = vpop.f32.mrb[213].mxu1  ;;  %5814 = vmatmul.mubr.msk.f32.gmra.mrb[62].mxu1 %vm451_vm1, %v390_v7  ;;  %v3895_v25 = vmax.f32 %v1740_v15, 0.0 }
 0x29d   : > { %v4802_v24 = vadd.f32 %v4801_v56, %v3894_v14  ;;  %v2959_v26 = vadd.f32 %v2958_v22, %v6476_v6  ;;  %3278 = vmatprep.mubr.f32.mxu1 %v5995_v0  ;;  %v3896_v28 = vmax.f32 %v1742_v21, 0.0  ;;  %v1745_v29 = vpop.f32.mrb[214].mxu0 }
 0x29e   : > { %v3897_v27 = vmax.f32 %v2957_v20, 0.0  ;;  %v4692_v30 = vadd.f32 %v4691_v13, %v3895_v25  ;;  %v1746_v33 = vadd.f32 %v1745_v29, %v6470_v3  ;;  %v1747_v35 = vpop.f32.mrb[215].mxu0  ;;  %5621 = vmatmul.mubr.msk.f32.gmra.mrb[64].mxu0 %vm451_vm1, %v391_v23 }
 0x29f   : > { %v3898_v31 = vmax.f32 %v2959_v26, 0.0  ;;  %v2962_v34 = vpop.f32.mrb[214].mxu1  ;;  %v4729_v37 = vadd.f32 %v4728_v19, %v3896_v28  ;;  %v1748_v39 = vadd.f32 %v1747_v35, %v6474_v5  ;;  %2067 = vmatprep.mubr.f32.mxu0 %v5995_v0  ;;  %v395_v35 = vld [vmem:[%s8323_s0 + $0x520] sm:$0xff] }
 0x2a0   : > { %v4766_v36 = vadd.f32 %v4765_v18, %v3897_v27  ;;  %v2963_v38 = vadd.f32 %v2962_v34, %v6472_v4  ;;  %v2964_v40 = vpop.f32.mrb[215].mxu1  ;;  %5815 = vmatmul.mubr.msk.f32.gmra.mrb[64].mxu1 %vm451_vm1, %v391_v23  ;;  %v3899_v43 = vmax.f32 %v1746_v33, 0.0 }
 0x2a1   : > { %v4803_v42 = vadd.f32 %v4802_v24, %v3898_v31  ;;  %v2965_v44 = vadd.f32 %v2964_v40, %v6476_v6  ;;  %3284 = vmatprep.mubr.f32.mxu1 %v5995_v0  ;;  %v3900_v45 = vmax.f32 %v1748_v39, 0.0  ;;  %v1751_v46 = vpop.f32.mrb[216].mxu0 }
 0x2a2   : > { %v3901_v58 = vmax.f32 %v2963_v38, 0.0  ;;  %v4693_v47 = vadd.f32 %v4692_v30, %v3899_v43  ;;  %v1752_v49 = vadd.f32 %v1751_v46, %v6470_v3  ;;  %v1753_v51 = vpop.f32.mrb[217].mxu0  ;;  %5622 = vmatmul.mubr.msk.f32.gmra.mrb[66].mxu0 %vm451_vm1, %v392_v41 }
 0x2a3   : > { %v3902_v48 = vmax.f32 %v2965_v44, 0.0  ;;  %v2968_v50 = vpop.f32.mrb[216].mxu1  ;;  %v4730_v53 = vadd.f32 %v4729_v37, %v3900_v45  ;;  %v1754_v57 = vadd.f32 %v1753_v51, %v6474_v5  ;;  %2073 = vmatprep.mubr.f32.mxu0 %v5995_v0  ;;  %v396_v51 = vld [vmem:[%s8323_s0 + $0x528] sm:$0xff] }
 0x2a4   : > { %v4767_v52 = vadd.f32 %v4766_v36, %v3901_v58  ;;  %v2969_v55 = vadd.f32 %v2968_v50, %v6472_v4  ;;  %v2970_v59 = vpop.f32.mrb[217].mxu1  ;;  %5816 = vmatmul.mubr.msk.f32.gmra.mrb[66].mxu1 %vm451_vm1, %v392_v41  ;;  %v3903_v62 = vmax.f32 %v1752_v49, 0.0 }
 0x2a5   : > { %v4804_v61 = vadd.f32 %v4803_v42, %v3902_v48  ;;  %v2971_v63 = vadd.f32 %v2970_v59, %v6476_v6  ;;  %3290 = vmatprep.mubr.f32.mxu1 %v5995_v0  ;;  %v3904_v2 = vmax.f32 %v1754_v57, 0.0  ;;  %v1757_v7 = vpop.f32.mrb[218].mxu0 }
 0x2a6   : > { %v3905_v1 = vmax.f32 %v2969_v55, 0.0  ;;  %v4694_v56 = vadd.f32 %v4693_v47, %v3903_v62  ;;  %v1758_v9 = vadd.f32 %v1757_v7, %v6470_v3  ;;  %v1759_v11 = vpop.f32.mrb[219].mxu0  ;;  %5623 = vmatmul.mubr.msk.f32.gmra.mrb[68].mxu0 %vm451_vm1, %v393_v60 }
 0x2a7   : > { %v3906_v8 = vmax.f32 %v2971_v63, 0.0  ;;  %v2974_v10 = vpop.f32.mrb[218].mxu1  ;;  %v4731_v13 = vadd.f32 %v4730_v53, %v3904_v2  ;;  %v1760_v15 = vadd.f32 %v1759_v11, %v6474_v5  ;;  %2079 = vmatprep.mubr.f32.mxu0 %v5995_v0  ;;  %v397_v11 = vld [vmem:[%s8323_s0 + $0x530] sm:$0xff] }
 0x2a8   : > { %v4768_v12 = vadd.f32 %v4767_v52, %v3905_v1  ;;  %v2975_v14 = vadd.f32 %v2974_v10, %v6472_v4  ;;  %v2976_v16 = vpop.f32.mrb[219].mxu1  ;;  %5817 = vmatmul.mubr.msk.f32.gmra.mrb[68].mxu1 %vm451_vm1, %v393_v60  ;;  %v3907_v19 = vmax.f32 %v1758_v9, 0.0 }
 0x2a9   : > { %v4805_v18 = vadd.f32 %v4804_v61, %v3906_v8  ;;  %v2977_v20 = vadd.f32 %v2976_v16, %v6476_v6  ;;  %3296 = vmatprep.mubr.f32.mxu1 %v5995_v0  ;;  %v3908_v22 = vmax.f32 %v1760_v15, 0.0  ;;  %v1763_v23 = vpop.f32.mrb[220].mxu0 }
 0x2aa   : > { %v3909_v21 = vmax.f32 %v2975_v14, 0.0  ;;  %v4695_v24 = vadd.f32 %v4694_v56, %v3907_v19  ;;  %v1764_v26 = vadd.f32 %v1763_v23, %v6470_v3  ;;  %v1765_v28 = vpop.f32.mrb[221].mxu0  ;;  %5624 = vmatmul.mubr.msk.f32.gmra.mrb[70].mxu0 %vm451_vm1, %v394_v17 }
 0x2ab   : > { %v3910_v25 = vmax.f32 %v2977_v20, 0.0  ;;  %v2980_v27 = vpop.f32.mrb[220].mxu1  ;;  %v4732_v30 = vadd.f32 %v4731_v13, %v3908_v22  ;;  %v1766_v33 = vadd.f32 %v1765_v28, %v6474_v5  ;;  %2085 = vmatprep.mubr.f32.mxu0 %v5995_v0  ;;  %v398_v28 = vld [vmem:[%s8323_s0 + $0x538] sm:$0xff] }
 0x2ac   : > { %v4769_v29 = vadd.f32 %v4768_v12, %v3909_v21  ;;  %v2981_v31 = vadd.f32 %v2980_v27, %v6472_v4  ;;  %v2982_v34 = vpop.f32.mrb[221].mxu1  ;;  %5818 = vmatmul.mubr.msk.f32.gmra.mrb[70].mxu1 %vm451_vm1, %v394_v17  ;;  %v3911_v37 = vmax.f32 %v1764_v26, 0.0 }
 0x2ad   : > { %v4806_v36 = vadd.f32 %v4805_v18, %v3910_v25  ;;  %v2983_v38 = vadd.f32 %v2982_v34, %v6476_v6  ;;  %3302 = vmatprep.mubr.f32.mxu1 %v5995_v0  ;;  %v3912_v40 = vmax.f32 %v1766_v33, 0.0  ;;  %v1769_v41 = vpop.f32.mrb[222].mxu0 }
 0x2ae   : > { %v3913_v39 = vmax.f32 %v2981_v31, 0.0  ;;  %v4696_v42 = vadd.f32 %v4695_v24, %v3911_v37  ;;  %v1770_v44 = vadd.f32 %v1769_v41, %v6470_v3  ;;  %v1771_v45 = vpop.f32.mrb[223].mxu0  ;;  %5625 = vmatmul.mubr.msk.f32.gmra.mrb[72].mxu0 %vm451_vm1, %v395_v35 }
 0x2af   : > { %v3914_v43 = vmax.f32 %v2983_v38, 0.0  ;;  %v2986_v58 = vpop.f32.mrb[222].mxu1  ;;  %v4733_v47 = vadd.f32 %v4732_v30, %v3912_v40  ;;  %v1772_v49 = vadd.f32 %v1771_v45, %v6474_v5  ;;  %2091 = vmatprep.mubr.f32.mxu0 %v5995_v0  ;;  %v399_v45 = vld [vmem:[%s8323_s0 + $0x540] sm:$0xff] }
 0x2b0   : > { %v4770_v46 = vadd.f32 %v4769_v29, %v3913_v39  ;;  %v2987_v48 = vadd.f32 %v2986_v58, %v6472_v4  ;;  %v2988_v50 = vpop.f32.mrb[223].mxu1  ;;  %5819 = vmatmul.mubr.msk.f32.gmra.mrb[72].mxu1 %vm451_vm1, %v395_v35  ;;  %v3915_v53 = vmax.f32 %v1770_v44, 0.0 }
 0x2b1   : > { %v4807_v52 = vadd.f32 %v4806_v36, %v3914_v43  ;;  %v2989_v55 = vadd.f32 %v2988_v50, %v6476_v6  ;;  %3308 = vmatprep.mubr.f32.mxu1 %v5995_v0  ;;  %v3916_v59 = vmax.f32 %v1772_v49, 0.0  ;;  %v1775_v60 = vpop.f32.mrb[224].mxu0 }
 0x2b2   : > { %v3917_v57 = vmax.f32 %v2987_v48, 0.0  ;;  %v4697_v61 = vadd.f32 %v4696_v42, %v3915_v53  ;;  %v1776_v63 = vadd.f32 %v1775_v60, %v6470_v3  ;;  %v1777_v2 = vpop.f32.mrb[225].mxu0  ;;  %5626 = vmatmul.mubr.msk.f32.gmra.mrb[74].mxu0 %vm451_vm1, %v396_v51 }
 0x2b3   : > { %v3918_v62 = vmax.f32 %v2989_v55, 0.0  ;;  %v2992_v1 = vpop.f32.mrb[224].mxu1  ;;  %v4734_v56 = vadd.f32 %v4733_v47, %v3916_v59  ;;  %v1778_v9 = vadd.f32 %v1777_v2, %v6474_v5  ;;  %2097 = vmatprep.mubr.f32.mxu0 %v5995_v0  ;;  %v400_v2 = vld [vmem:[%s8323_s0 + $0x548] sm:$0xff] }
 0x2b4   : > { %v4771_v7 = vadd.f32 %v4770_v46, %v3917_v57  ;;  %v2993_v8 = vadd.f32 %v2992_v1, %v6472_v4  ;;  %v2994_v10 = vpop.f32.mrb[225].mxu1  ;;  %5820 = vmatmul.mubr.msk.f32.gmra.mrb[74].mxu1 %vm451_vm1, %v396_v51  ;;  %v3919_v13 = vmax.f32 %v1776_v63, 0.0 }
 0x2b5   : > { %v4808_v12 = vadd.f32 %v4807_v52, %v3918_v62  ;;  %v2995_v14 = vadd.f32 %v2994_v10, %v6476_v6  ;;  %3314 = vmatprep.mubr.f32.mxu1 %v5995_v0  ;;  %v3920_v16 = vmax.f32 %v1778_v9, 0.0  ;;  %v1781_v17 = vpop.f32.mrb[226].mxu0 }
 0x2b6   : > { %v3921_v15 = vmax.f32 %v2993_v8, 0.0  ;;  %v4698_v18 = vadd.f32 %v4697_v61, %v3919_v13  ;;  %v1782_v20 = vadd.f32 %v1781_v17, %v6470_v3  ;;  %v1783_v22 = vpop.f32.mrb[227].mxu0  ;;  %5627 = vmatmul.mubr.msk.f32.gmra.mrb[76].mxu0 %vm451_vm1, %v397_v11 }
 0x2b7   : > { %v3922_v19 = vmax.f32 %v2995_v14, 0.0  ;;  %v2998_v21 = vpop.f32.mrb[226].mxu1  ;;  %v4735_v24 = vadd.f32 %v4734_v56, %v3920_v16  ;;  %v1784_v26 = vadd.f32 %v1783_v22, %v6474_v5  ;;  %2103 = vmatprep.mubr.f32.mxu0 %v5995_v0  ;;  %v401_v22 = vld [vmem:[%s8323_s0 + $0x550] sm:$0xff] }
 0x2b8   : > { %v4772_v23 = vadd.f32 %v4771_v7, %v3921_v15  ;;  %v2999_v25 = vadd.f32 %v2998_v21, %v6472_v4  ;;  %v3000_v27 = vpop.f32.mrb[227].mxu1  ;;  %5821 = vmatmul.mubr.msk.f32.gmra.mrb[76].mxu1 %vm451_vm1, %v397_v11  ;;  %v3923_v30 = vmax.f32 %v1782_v20, 0.0 }
 0x2b9   : > { %v4809_v29 = vadd.f32 %v4808_v12, %v3922_v19  ;;  %v3001_v31 = vadd.f32 %v3000_v27, %v6476_v6  ;;  %3320 = vmatprep.mubr.f32.mxu1 %v5995_v0  ;;  %v3924_v34 = vmax.f32 %v1784_v26, 0.0  ;;  %v1787_v35 = vpop.f32.mrb[228].mxu0 }
 0x2ba   : > { %v3925_v33 = vmax.f32 %v2999_v25, 0.0  ;;  %v4699_v36 = vadd.f32 %v4698_v18, %v3923_v30  ;;  %v1788_v38 = vadd.f32 %v1787_v35, %v6470_v3  ;;  %v1789_v40 = vpop.f32.mrb[229].mxu0  ;;  %5628 = vmatmul.mubr.msk.f32.gmra.mrb[78].mxu0 %vm451_vm1, %v398_v28 }
 0x2bb   : > { %v3926_v37 = vmax.f32 %v3001_v31, 0.0  ;;  %v3004_v39 = vpop.f32.mrb[228].mxu1  ;;  %v4736_v42 = vadd.f32 %v4735_v24, %v3924_v34  ;;  %v1790_v44 = vadd.f32 %v1789_v40, %v6474_v5  ;;  %2109 = vmatprep.mubr.f32.mxu0 %v5995_v0  ;;  %v402_v40 = vld [vmem:[%s8323_s0 + $0x558] sm:$0xff] }
 0x2bc   : > { %v4773_v41 = vadd.f32 %v4772_v23, %v3925_v33  ;;  %v3005_v43 = vadd.f32 %v3004_v39, %v6472_v4  ;;  %v3006_v58 = vpop.f32.mrb[229].mxu1  ;;  %5822 = vmatmul.mubr.msk.f32.gmra.mrb[78].mxu1 %vm451_vm1, %v398_v28  ;;  %v3927_v47 = vmax.f32 %v1788_v38, 0.0 }
 0x2bd   : > { %v4810_v46 = vadd.f32 %v4809_v29, %v3926_v37  ;;  %v3007_v48 = vadd.f32 %v3006_v58, %v6476_v6  ;;  %3326 = vmatprep.mubr.f32.mxu1 %v5995_v0  ;;  %v3928_v50 = vmax.f32 %v1790_v44, 0.0  ;;  %v1793_v51 = vpop.f32.mrb[230].mxu0 }
 0x2be   : > { %v3929_v49 = vmax.f32 %v3005_v43, 0.0  ;;  %v4700_v52 = vadd.f32 %v4699_v36, %v3927_v47  ;;  %v1794_v55 = vadd.f32 %v1793_v51, %v6470_v3  ;;  %v1795_v59 = vpop.f32.mrb[231].mxu0  ;;  %5629 = vmatmul.mubr.msk.f32.gmra.mrb[80].mxu0 %vm451_vm1, %v399_v45 }
 0x2bf   : > { %v3930_v53 = vmax.f32 %v3007_v48, 0.0  ;;  %v3010_v57 = vpop.f32.mrb[230].mxu1  ;;  %v4737_v61 = vadd.f32 %v4736_v42, %v3928_v50  ;;  %v1796_v63 = vadd.f32 %v1795_v59, %v6474_v5  ;;  %2115 = vmatprep.mubr.f32.mxu0 %v5995_v0  ;;  %v403_v59 = vld [vmem:[%s8323_s0 + $0x560] sm:$0xff] }
 0x2c0   : > { %v4774_v60 = vadd.f32 %v4773_v41, %v3929_v49  ;;  %v3011_v62 = vadd.f32 %v3010_v57, %v6472_v4  ;;  %v3012_v1 = vpop.f32.mrb[231].mxu1  ;;  %5823 = vmatmul.mubr.msk.f32.gmra.mrb[80].mxu1 %vm451_vm1, %v399_v45  ;;  %v3931_v56 = vmax.f32 %v1794_v55, 0.0 }
 0x2c1   : > { %v4811_v7 = vadd.f32 %v4810_v46, %v3930_v53  ;;  %v3013_v8 = vadd.f32 %v3012_v1, %v6476_v6  ;;  %3332 = vmatprep.mubr.f32.mxu1 %v5995_v0  ;;  %v3932_v10 = vmax.f32 %v1796_v63, 0.0  ;;  %v1799_v11 = vpop.f32.mrb[232].mxu0 }
 0x2c2   : > { %v3933_v9 = vmax.f32 %v3011_v62, 0.0  ;;  %v4701_v12 = vadd.f32 %v4700_v52, %v3931_v56  ;;  %v1800_v14 = vadd.f32 %v1799_v11, %v6470_v3  ;;  %v1801_v16 = vpop.f32.mrb[233].mxu0  ;;  %5630 = vmatmul.mubr.msk.f32.gmra.mrb[82].mxu0 %vm451_vm1, %v400_v2 }
 0x2c3   : > { %v3934_v13 = vmax.f32 %v3013_v8, 0.0  ;;  %v3016_v15 = vpop.f32.mrb[232].mxu1  ;;  %v4738_v18 = vadd.f32 %v4737_v61, %v3932_v10  ;;  %v1802_v20 = vadd.f32 %v1801_v16, %v6474_v5  ;;  %2121 = vmatprep.mubr.f32.mxu0 %v5995_v0  ;;  %v404_v16 = vld [vmem:[%s8323_s0 + $0x568] sm:$0xff] }
 0x2c4   : > { %v4775_v17 = vadd.f32 %v4774_v60, %v3933_v9  ;;  %v3017_v19 = vadd.f32 %v3016_v15, %v6472_v4  ;;  %v3018_v21 = vpop.f32.mrb[233].mxu1  ;;  %5824 = vmatmul.mubr.msk.f32.gmra.mrb[82].mxu1 %vm451_vm1, %v400_v2  ;;  %v3935_v24 = vmax.f32 %v1800_v14, 0.0 }
 0x2c5   : > { %v4812_v23 = vadd.f32 %v4811_v7, %v3934_v13  ;;  %v3019_v25 = vadd.f32 %v3018_v21, %v6476_v6  ;;  %3338 = vmatprep.mubr.f32.mxu1 %v5995_v0  ;;  %v3936_v27 = vmax.f32 %v1802_v20, 0.0  ;;  %v1805_v28 = vpop.f32.mrb[234].mxu0 }
 0x2c6   : > { %v3937_v26 = vmax.f32 %v3017_v19, 0.0  ;;  %v4702_v29 = vadd.f32 %v4701_v12, %v3935_v24  ;;  %v1806_v31 = vadd.f32 %v1805_v28, %v6470_v3  ;;  %v1807_v34 = vpop.f32.mrb[235].mxu0  ;;  %5631 = vmatmul.mubr.msk.f32.gmra.mrb[84].mxu0 %vm451_vm1, %v401_v22 }
 0x2c7   : > { %v3938_v30 = vmax.f32 %v3019_v25, 0.0  ;;  %v3022_v33 = vpop.f32.mrb[234].mxu1  ;;  %v4739_v36 = vadd.f32 %v4738_v18, %v3936_v27  ;;  %v1808_v38 = vadd.f32 %v1807_v34, %v6474_v5  ;;  %2127 = vmatprep.mubr.f32.mxu0 %v5995_v0  ;;  %v405_v34 = vld [vmem:[%s8323_s0 + $0x570] sm:$0xff] }
 0x2c8   : > { %v4776_v35 = vadd.f32 %v4775_v17, %v3937_v26  ;;  %v3023_v37 = vadd.f32 %v3022_v33, %v6472_v4  ;;  %v3024_v39 = vpop.f32.mrb[235].mxu1  ;;  %5825 = vmatmul.mubr.msk.f32.gmra.mrb[84].mxu1 %vm451_vm1, %v401_v22  ;;  %v3939_v42 = vmax.f32 %v1806_v31, 0.0 }
 0x2c9   : > { %v4813_v41 = vadd.f32 %v4812_v23, %v3938_v30  ;;  %v3025_v43 = vadd.f32 %v3024_v39, %v6476_v6  ;;  %3344 = vmatprep.mubr.f32.mxu1 %v5995_v0  ;;  %v3940_v58 = vmax.f32 %v1808_v38, 0.0  ;;  %v1811_v45 = vpop.f32.mrb[236].mxu0 }
 0x2ca   : > { %v3941_v44 = vmax.f32 %v3023_v37, 0.0  ;;  %v4703_v46 = vadd.f32 %v4702_v29, %v3939_v42  ;;  %v1812_v48 = vadd.f32 %v1811_v45, %v6470_v3  ;;  %v1813_v50 = vpop.f32.mrb[237].mxu0  ;;  %5632 = vmatmul.mubr.msk.f32.gmra.mrb[86].mxu0 %vm451_vm1, %v402_v40 }
 0x2cb   : > { %v3942_v47 = vmax.f32 %v3025_v43, 0.0  ;;  %v3028_v49 = vpop.f32.mrb[236].mxu1  ;;  %v4740_v52 = vadd.f32 %v4739_v36, %v3940_v58  ;;  %v1814_v55 = vadd.f32 %v1813_v50, %v6474_v5  ;;  %2133 = vmatprep.mubr.f32.mxu0 %v5995_v0  ;;  %v406_v50 = vld [vmem:[%s8323_s0 + $0x578] sm:$0xff] }
 0x2cc   : > { %v4777_v51 = vadd.f32 %v4776_v35, %v3941_v44  ;;  %v3029_v53 = vadd.f32 %v3028_v49, %v6472_v4  ;;  %v3030_v57 = vpop.f32.mrb[237].mxu1  ;;  %5826 = vmatmul.mubr.msk.f32.gmra.mrb[86].mxu1 %vm451_vm1, %v402_v40  ;;  %v3943_v61 = vmax.f32 %v1812_v48, 0.0 }
 0x2cd   : > { %v4814_v60 = vadd.f32 %v4813_v41, %v3942_v47  ;;  %v3031_v62 = vadd.f32 %v3030_v57, %v6476_v6  ;;  %3350 = vmatprep.mubr.f32.mxu1 %v5995_v0  ;;  %v3944_v1 = vmax.f32 %v1814_v55, 0.0  ;;  %v1817_v2 = vpop.f32.mrb[238].mxu0 }
 0x2ce   : > { %v3945_v63 = vmax.f32 %v3029_v53, 0.0  ;;  %v4704_v7 = vadd.f32 %v4703_v46, %v3943_v61  ;;  %v1818_v8 = vadd.f32 %v1817_v2, %v6470_v3  ;;  %v1819_v10 = vpop.f32.mrb[239].mxu0  ;;  %5633 = vmatmul.mubr.msk.f32.gmra.mrb[88].mxu0 %vm451_vm1, %v403_v59 }
 0x2cf   : > { %v3946_v56 = vmax.f32 %v3031_v62, 0.0  ;;  %v3034_v9 = vpop.f32.mrb[238].mxu1  ;;  %v4741_v12 = vadd.f32 %v4740_v52, %v3944_v1  ;;  %v1820_v14 = vadd.f32 %v1819_v10, %v6474_v5  ;;  %2139 = vmatprep.mubr.f32.mxu0 %v5995_v0  ;;  %v407_v10 = vld [vmem:[%s8323_s0 + $0x580] sm:$0xff] }
 0x2d0   : > { %v4778_v11 = vadd.f32 %v4777_v51, %v3945_v63  ;;  %v3035_v13 = vadd.f32 %v3034_v9, %v6472_v4  ;;  %v3036_v15 = vpop.f32.mrb[239].mxu1  ;;  %5827 = vmatmul.mubr.msk.f32.gmra.mrb[88].mxu1 %vm451_vm1, %v403_v59  ;;  %v3947_v18 = vmax.f32 %v1818_v8, 0.0 }
 0x2d1   : > { %v4815_v17 = vadd.f32 %v4814_v60, %v3946_v56  ;;  %v3037_v19 = vadd.f32 %v3036_v15, %v6476_v6  ;;  %3356 = vmatprep.mubr.f32.mxu1 %v5995_v0  ;;  %v3948_v21 = vmax.f32 %v1820_v14, 0.0  ;;  %v1823_v22 = vpop.f32.mrb[240].mxu0 }
 0x2d2   : > { %v3949_v20 = vmax.f32 %v3035_v13, 0.0  ;;  %v4705_v23 = vadd.f32 %v4704_v7, %v3947_v18  ;;  %v1824_v25 = vadd.f32 %v1823_v22, %v6470_v3  ;;  %v1825_v27 = vpop.f32.mrb[241].mxu0  ;;  %5634 = vmatmul.mubr.msk.f32.gmra.mrb[90].mxu0 %vm451_vm1, %v404_v16 }
 0x2d3   : > { %v3950_v24 = vmax.f32 %v3037_v19, 0.0  ;;  %v3040_v26 = vpop.f32.mrb[240].mxu1  ;;  %v4742_v29 = vadd.f32 %v4741_v12, %v3948_v21  ;;  %v1826_v31 = vadd.f32 %v1825_v27, %v6474_v5  ;;  %2145 = vmatprep.mubr.f32.mxu0 %v5995_v0  ;;  %v408_v27 = vld [vmem:[%s8323_s0 + $0x588] sm:$0xff] }
 0x2d4   : > { %v4779_v28 = vadd.f32 %v4778_v11, %v3949_v20  ;;  %v3041_v30 = vadd.f32 %v3040_v26, %v6472_v4  ;;  %v3042_v33 = vpop.f32.mrb[241].mxu1  ;;  %5828 = vmatmul.mubr.msk.f32.gmra.mrb[90].mxu1 %vm451_vm1, %v404_v16  ;;  %v3951_v36 = vmax.f32 %v1824_v25, 0.0 }
 0x2d5   : > { %v4816_v35 = vadd.f32 %v4815_v17, %v3950_v24  ;;  %v3043_v37 = vadd.f32 %v3042_v33, %v6476_v6  ;;  %3362 = vmatprep.mubr.f32.mxu1 %v5995_v0  ;;  %v3952_v39 = vmax.f32 %v1826_v31, 0.0  ;;  %v1829_v40 = vpop.f32.mrb[242].mxu0 }
 0x2d6   : > { %v3953_v38 = vmax.f32 %v3041_v30, 0.0  ;;  %v4706_v41 = vadd.f32 %v4705_v23, %v3951_v36  ;;  %v1830_v43 = vadd.f32 %v1829_v40, %v6470_v3  ;;  %v1831_v58 = vpop.f32.mrb[243].mxu0  ;;  %5635 = vmatmul.mubr.msk.f32.gmra.mrb[92].mxu0 %vm451_vm1, %v405_v34 }
 0x2d7   : > { %v3954_v42 = vmax.f32 %v3043_v37, 0.0  ;;  %v3046_v44 = vpop.f32.mrb[242].mxu1  ;;  %v4743_v46 = vadd.f32 %v4742_v29, %v3952_v39  ;;  %v1832_v48 = vadd.f32 %v1831_v58, %v6474_v5  ;;  %2151 = vmatprep.mubr.f32.mxu0 %v5995_v0  ;;  %v409_v58 = vld [vmem:[%s8323_s0 + $0x590] sm:$0xff] }
 0x2d8   : > { %v4780_v45 = vadd.f32 %v4779_v28, %v3953_v38  ;;  %v3047_v47 = vadd.f32 %v3046_v44, %v6472_v4  ;;  %v3048_v49 = vpop.f32.mrb[243].mxu1  ;;  %5829 = vmatmul.mubr.msk.f32.gmra.mrb[92].mxu1 %vm451_vm1, %v405_v34  ;;  %v3955_v52 = vmax.f32 %v1830_v43, 0.0 }
 0x2d9   : > { %v4817_v51 = vadd.f32 %v4816_v35, %v3954_v42  ;;  %v3049_v53 = vadd.f32 %v3048_v49, %v6476_v6  ;;  %3368 = vmatprep.mubr.f32.mxu1 %v5995_v0  ;;  %v3956_v57 = vmax.f32 %v1832_v48, 0.0  ;;  %v1835_v59 = vpop.f32.mrb[244].mxu0 }
 0x2da   : > { %v3957_v55 = vmax.f32 %v3047_v47, 0.0  ;;  %v4707_v60 = vadd.f32 %v4706_v41, %v3955_v52  ;;  %v1836_v62 = vadd.f32 %v1835_v59, %v6470_v3  ;;  %v1837_v1 = vpop.f32.mrb[245].mxu0  ;;  %5636 = vmatmul.mubr.msk.f32.gmra.mrb[94].mxu0 %vm451_vm1, %v406_v50 }
 0x2db   : > { %v3958_v61 = vmax.f32 %v3049_v53, 0.0  ;;  %v3052_v63 = vpop.f32.mrb[244].mxu1  ;;  %v4744_v7 = vadd.f32 %v4743_v46, %v3956_v57  ;;  %v1838_v8 = vadd.f32 %v1837_v1, %v6474_v5  ;;  %2157 = vmatprep.mubr.f32.mxu0 %v5995_v0  ;;  %v410_v1 = vld [vmem:[%s8323_s0 + $0x598] sm:$0xff] }
 0x2dc   : > { %v4781_v2 = vadd.f32 %v4780_v45, %v3957_v55  ;;  %v3053_v56 = vadd.f32 %v3052_v63, %v6472_v4  ;;  %v3054_v9 = vpop.f32.mrb[245].mxu1  ;;  %5830 = vmatmul.mubr.msk.f32.gmra.mrb[94].mxu1 %vm451_vm1, %v406_v50  ;;  %v3959_v12 = vmax.f32 %v1836_v62, 0.0 }
 0x2dd   : > { %v4818_v11 = vadd.f32 %v4817_v51, %v3958_v61  ;;  %v3055_v13 = vadd.f32 %v3054_v9, %v6476_v6  ;;  %3374 = vmatprep.mubr.f32.mxu1 %v5995_v0  ;;  %v3960_v15 = vmax.f32 %v1838_v8, 0.0  ;;  %v1841_v16 = vpop.f32.mrb[246].mxu0 }
 0x2de   : > { %v3961_v14 = vmax.f32 %v3053_v56, 0.0  ;;  %v4708_v17 = vadd.f32 %v4707_v60, %v3959_v12  ;;  %v1842_v19 = vadd.f32 %v1841_v16, %v6470_v3  ;;  %v1843_v21 = vpop.f32.mrb[247].mxu0  ;;  %5637 = vmatmul.mubr.msk.f32.gmra.mrb[96].mxu0 %vm451_vm1, %v407_v10 }
 0x2df   : > { %v3962_v18 = vmax.f32 %v3055_v13, 0.0  ;;  %v3058_v20 = vpop.f32.mrb[246].mxu1  ;;  %v4745_v23 = vadd.f32 %v4744_v7, %v3960_v15  ;;  %v1844_v25 = vadd.f32 %v1843_v21, %v6474_v5  ;;  %2163 = vmatprep.mubr.f32.mxu0 %v5995_v0  ;;  %v411_v21 = vld [vmem:[%s8323_s0 + $0x5a0] sm:$0xff] }
 0x2e0   : > { %v4782_v22 = vadd.f32 %v4781_v2, %v3961_v14  ;;  %v3059_v24 = vadd.f32 %v3058_v20, %v6472_v4  ;;  %v3060_v26 = vpop.f32.mrb[247].mxu1  ;;  %5831 = vmatmul.mubr.msk.f32.gmra.mrb[96].mxu1 %vm451_vm1, %v407_v10  ;;  %v3963_v29 = vmax.f32 %v1842_v19, 0.0 }
 0x2e1   : > { %v4819_v28 = vadd.f32 %v4818_v11, %v3962_v18  ;;  %v3061_v30 = vadd.f32 %v3060_v26, %v6476_v6  ;;  %3380 = vmatprep.mubr.f32.mxu1 %v5995_v0  ;;  %v3964_v33 = vmax.f32 %v1844_v25, 0.0  ;;  %v1847_v34 = vpop.f32.mrb[248].mxu0 }
 0x2e2   : > { %v3965_v31 = vmax.f32 %v3059_v24, 0.0  ;;  %v4709_v35 = vadd.f32 %v4708_v17, %v3963_v29  ;;  %v1848_v37 = vadd.f32 %v1847_v34, %v6470_v3  ;;  %v1849_v39 = vpop.f32.mrb[249].mxu0  ;;  %5638 = vmatmul.mubr.msk.f32.gmra.mrb[98].mxu0 %vm451_vm1, %v408_v27 }
 0x2e3   : > { %v3966_v36 = vmax.f32 %v3061_v30, 0.0  ;;  %v3064_v38 = vpop.f32.mrb[248].mxu1  ;;  %v4746_v41 = vadd.f32 %v4745_v23, %v3964_v33  ;;  %v1850_v43 = vadd.f32 %v1849_v39, %v6474_v5  ;;  %2169 = vmatprep.mubr.f32.mxu0 %v5995_v0  ;;  %v412_v39 = vld [vmem:[%s8323_s0 + $0x5a8] sm:$0xff] }
 0x2e4   : > { %v4783_v40 = vadd.f32 %v4782_v22, %v3965_v31  ;;  %v3065_v42 = vadd.f32 %v3064_v38, %v6472_v4  ;;  %v3066_v44 = vpop.f32.mrb[249].mxu1  ;;  %5832 = vmatmul.mubr.msk.f32.gmra.mrb[98].mxu1 %vm451_vm1, %v408_v27  ;;  %v3967_v46 = vmax.f32 %v1848_v37, 0.0 }
 0x2e5   : > { %v4820_v45 = vadd.f32 %v4819_v28, %v3966_v36  ;;  %v3067_v47 = vadd.f32 %v3066_v44, %v6476_v6  ;;  %3386 = vmatprep.mubr.f32.mxu1 %v5995_v0  ;;  %v3968_v49 = vmax.f32 %v1850_v43, 0.0  ;;  %v1853_v50 = vpop.f32.mrb[250].mxu0 }
 0x2e6   : > { %v3969_v48 = vmax.f32 %v3065_v42, 0.0  ;;  %v4710_v51 = vadd.f32 %v4709_v35, %v3967_v46  ;;  %v1854_v53 = vadd.f32 %v1853_v50, %v6470_v3  ;;  %v1855_v57 = vpop.f32.mrb[251].mxu0  ;;  %5639 = vmatmul.mubr.msk.f32.gmra.mrb[100].mxu0 %vm451_vm1, %v409_v58 }
 0x2e7   : > { %v3970_v52 = vmax.f32 %v3067_v47, 0.0  ;;  %v3070_v55 = vpop.f32.mrb[250].mxu1  ;;  %v4747_v60 = vadd.f32 %v4746_v41, %v3968_v49  ;;  %v1856_v62 = vadd.f32 %v1855_v57, %v6474_v5  ;;  %2175 = vmatprep.mubr.f32.mxu0 %v5995_v0  ;;  %v413_v57 = vld [vmem:[%s8323_s0 + $0x5b0] sm:$0xff] }
 0x2e8   : > { %v4784_v59 = vadd.f32 %v4783_v40, %v3969_v48  ;;  %v3071_v61 = vadd.f32 %v3070_v55, %v6472_v4  ;;  %v3072_v63 = vpop.f32.mrb[251].mxu1  ;;  %5833 = vmatmul.mubr.msk.f32.gmra.mrb[100].mxu1 %vm451_vm1, %v409_v58  ;;  %v3971_v7 = vmax.f32 %v1854_v53, 0.0 }
 0x2e9   : > { %v4821_v2 = vadd.f32 %v4820_v45, %v3970_v52  ;;  %v3073_v56 = vadd.f32 %v3072_v63, %v6476_v6  ;;  %3392 = vmatprep.mubr.f32.mxu1 %v5995_v0  ;;  %v3972_v9 = vmax.f32 %v1856_v62, 0.0  ;;  %v1859_v10 = vpop.f32.mrb[252].mxu0 }
 0x2ea   : > { %v3973_v8 = vmax.f32 %v3071_v61, 0.0  ;;  %v4711_v11 = vadd.f32 %v4710_v51, %v3971_v7  ;;  %v1860_v13 = vadd.f32 %v1859_v10, %v6470_v3  ;;  %v1861_v15 = vpop.f32.mrb[253].mxu0  ;;  %5640 = vmatmul.mubr.msk.f32.gmra.mrb[102].mxu0 %vm451_vm1, %v410_v1 }
 0x2eb   : > { %v3974_v12 = vmax.f32 %v3073_v56, 0.0  ;;  %v3076_v14 = vpop.f32.mrb[252].mxu1  ;;  %v4748_v17 = vadd.f32 %v4747_v60, %v3972_v9  ;;  %v1862_v19 = vadd.f32 %v1861_v15, %v6474_v5  ;;  %2181 = vmatprep.mubr.f32.mxu0 %v5995_v0 }
 0x2ec   : > { %v4785_v16 = vadd.f32 %v4784_v59, %v3973_v8  ;;  %v3077_v18 = vadd.f32 %v3076_v14, %v6472_v4  ;;  %v3078_v20 = vpop.f32.mrb[253].mxu1  ;;  %5834 = vmatmul.mubr.msk.f32.gmra.mrb[102].mxu1 %vm451_vm1, %v410_v1  ;;  %v3975_v23 = vmax.f32 %v1860_v13, 0.0 }
 0x2ed   : > { %v4822_v22 = vadd.f32 %v4821_v2, %v3974_v12  ;;  %v3079_v24 = vadd.f32 %v3078_v20, %v6476_v6  ;;  %3398 = vmatprep.mubr.f32.mxu1 %v5995_v0  ;;  %v3976_v26 = vmax.f32 %v1862_v19, 0.0  ;;  %v1865_v27 = vpop.f32.mrb[254].mxu0  ;;  %v414_v19 = vld [vmem:[%s8323_s0 + $0x5b8] sm:$0xff] }
 0x2ee   : > { %v3977_v25 = vmax.f32 %v3077_v18, 0.0  ;;  %v4712_v28 = vadd.f32 %v4711_v11, %v3975_v23  ;;  %v1866_v30 = vadd.f32 %v1865_v27, %v6470_v3  ;;  %v1867_v33 = vpop.f32.mrb[255].mxu0  ;;  %5641 = vmatmul.mubr.msk.f32.gmra.mrb[104].mxu0 %vm451_vm1, %v411_v21 }
 0x2ef   : > { %v3978_v29 = vmax.f32 %v3079_v24, 0.0  ;;  %v3082_v31 = vpop.f32.mrb[254].mxu1  ;;  %v4749_v35 = vadd.f32 %v4748_v17, %v3976_v26  ;;  %v1868_v37 = vadd.f32 %v1867_v33, %v6474_v5  ;;  %2187 = vmatprep.mubr.f32.mxu0 %v5995_v0 }
 0x2f0   : > { %v4786_v34 = vadd.f32 %v4785_v16, %v3977_v25  ;;  %v3083_v36 = vadd.f32 %v3082_v31, %v6472_v4  ;;  %v3084_v38 = vpop.f32.mrb[255].mxu1  ;;  %5835 = vmatmul.mubr.msk.f32.gmra.mrb[104].mxu1 %vm451_vm1, %v411_v21  ;;  %v3979_v41 = vmax.f32 %v1866_v30, 0.0 }
 0x2f1   : > { %v4823_v40 = vadd.f32 %v4822_v22, %v3978_v29  ;;  %v3085_v42 = vadd.f32 %v3084_v38, %v6476_v6  ;;  %3404 = vmatprep.mubr.f32.mxu1 %v5995_v0  ;;  %v3980_v44 = vmax.f32 %v1868_v37, 0.0  ;;  %v1871_v58 = vpop.f32.mrb[0].mxu0 }
 0x2f2   : > { %v3981_v43 = vmax.f32 %v3083_v36, 0.0  ;;  %v4713_v45 = vadd.f32 %v4712_v28, %v3979_v41  ;;  %v1872_v47 = vadd.f32 %v1871_v58, %v6470_v3  ;;  %v1873_v49 = vpop.f32.mrb[1].mxu0  ;;  %5642 = vmatmul.mubr.msk.f32.gmra.mrb[106].mxu0 %vm451_vm1, %v412_v39  ;;  %v415_v41 = vld [vmem:[%s8323_s0 + $0x5c0] sm:$0xff] }
 0x2f3   : > { %v3982_v46 = vmax.f32 %v3085_v42, 0.0  ;;  %v3088_v48 = vpop.f32.mrb[0].mxu1  ;;  %v4750_v51 = vadd.f32 %v4749_v35, %v3980_v44  ;;  %v1874_v53 = vadd.f32 %v1873_v49, %v6474_v5  ;;  %2193 = vmatprep.mubr.f32.mxu0 %v5995_v0 }
 0x2f4   : > { %v4787_v50 = vadd.f32 %v4786_v34, %v3981_v43  ;;  %v3089_v52 = vadd.f32 %v3088_v48, %v6472_v4  ;;  %v3090_v55 = vpop.f32.mrb[1].mxu1  ;;  %5836 = vmatmul.mubr.msk.f32.gmra.mrb[106].mxu1 %vm451_vm1, %v412_v39  ;;  %v4714_v59 = vrot.slane %v4713_v45, 4  ;;  %v3983_v61 = vmax.f32 %v1872_v47, 0.0 }
 0x2f5   : > { %v4824_v60 = vadd.f32 %v4823_v40, %v3982_v46  ;;  %v3091_v62 = vadd.f32 %v3090_v55, %v6476_v6  ;;  %3410 = vmatprep.mubr.f32.mxu1 %v5995_v0  ;;  %v4751_v1 = vrot.slane %v4750_v51, 4  ;;  %v3984_v7 = vmax.f32 %v1874_v53, 0.0  ;;  %v1877_v56 = vpop.f32.mrb[2].mxu0 }
 0x2f6   : > { %v4788_v63 = vrot.slane %v4787_v50, 4  ;;  %v3985_v2 = vmax.f32 %v3089_v52, 0.0  ;;  %v4715_v8 = vadd.f32 %v4714_v59, %v4713_v45  ;;  %v1878_v11 = vadd.f32 %v1877_v56, %v6470_v3  ;;  %v1879_v13 = vpop.f32.mrb[3].mxu0  ;;  %5643 = vmatmul.mubr.msk.f32.gmra.mrb[108].mxu0 %vm451_vm1, %v413_v57 }
 0x2f7   : > { %v4825_v9 = vrot.slane %v4824_v60, 4  ;;  %v3986_v10 = vmax.f32 %v3091_v62, 0.0  ;;  %v3094_v12 = vpop.f32.mrb[2].mxu1  ;;  %v4752_v15 = vadd.f32 %v4751_v1, %v4750_v51  ;;  %v1880_v17 = vadd.f32 %v1879_v13, %v6474_v5  ;;  %2199 = vmatprep.mubr.f32.mxu0 %v5995_v0  ;;  %v416_v1 = vld [vmem:[%s8323_s0 + $0x5c8] sm:$0xff] }
 0x2f8   : > { %v4789_v14 = vadd.f32 %v4788_v63, %v4787_v50  ;;  %v3095_v16 = vadd.f32 %v3094_v12, %v6472_v4  ;;  %v3096_v18 = vpop.f32.mrb[3].mxu1  ;;  %5837 = vmatmul.mubr.msk.f32.gmra.mrb[108].mxu1 %vm451_vm1, %v413_v57  ;;  %v4716_v20 = vrot.slane %v4715_v8, 2  ;;  %v3987_v22 = vmax.f32 %v1878_v11, 0.0 }
 0x2f9   : > { %v4826_v21 = vadd.f32 %v4825_v9, %v4824_v60  ;;  %v3097_v23 = vadd.f32 %v3096_v18, %v6476_v6  ;;  %3416 = vmatprep.mubr.f32.mxu1 %v5995_v0  ;;  %v4753_v25 = vrot.slane %v4752_v15, 2  ;;  %v3988_v27 = vmax.f32 %v1880_v17, 0.0  ;;  %v1883_v28 = vpop.f32.mrb[4].mxu0 }
 0x2fa   : > { %v4790_v24 = vrot.slane %v4789_v14, 2  ;;  %v3989_v26 = vmax.f32 %v3095_v16, 0.0  ;;  %v4717_v29 = vadd.f32 %v4716_v20, %v4715_v8  ;;  %v4831_v31 = vadd.f32 %v3987_v22, %v3983_v61  ;;  %v1885_v35 = vpop.f32.mrb[5].mxu0  ;;  %5644 = vmatmul.mubr.msk.f32.gmra.mrb[110].mxu0 %vm451_vm1, %v414_v19 }
 0x2fb   : > { %v4827_v30 = vrot.slane %v4826_v21, 2  ;;  %v3990_v33 = vmax.f32 %v3097_v23, 0.0  ;;  %v3100_v34 = vpop.f32.mrb[4].mxu1  ;;  %v4754_v37 = vadd.f32 %v4753_v25, %v4752_v15  ;;  %v4868_v39 = vadd.f32 %v3988_v27, %v3984_v7  ;;  %2205 = vmatprep.mubr.f32.mxu0 %v5995_v0  ;;  %v417_v25 = vld [vmem:[%s8323_s0 + $0x5d0] sm:$0xff] }
 0x2fc   : > { %v4791_v36 = vadd.f32 %v4790_v24, %v4789_v14  ;;  %v4905_v38 = vadd.f32 %v3989_v26, %v3985_v2  ;;  %v3102_v40 = vpop.f32.mrb[5].mxu1  ;;  %5838 = vmatmul.mubr.msk.f32.gmra.mrb[110].mxu1 %vm451_vm1, %v414_v19  ;;  %v4718_v42 = vrot.slane %v4717_v29, 1  ;;  %v1884_v58 = vadd.f32 %v1883_v28, %v6470_v3 }
 0x2fd   : > { %v4828_v43 = vadd.f32 %v4827_v30, %v4826_v21  ;;  %v4942_v44 = vadd.f32 %v3990_v33, %v3986_v10  ;;  %3422 = vmatprep.mubr.f32.mxu1 %v5995_v0  ;;  %v4755_v46 = vrot.slane %v4754_v37, 1  ;;  %v3101_v47 = vadd.f32 %v3100_v34, %v6472_v4  ;;  %v1889_v49 = vpop.f32.mrb[6].mxu0 }
 0x2fe   : > { %v4792_v45 = vrot.slane %v4791_v36, 1  ;;  %v1886_v48 = vadd.f32 %v1885_v35, %v6474_v5  ;;  %v4719_v50 = vadd.f32 %v4718_v42, %v4717_v29  ;;  %v3991_v52 = vmax.f32 %v1884_v58, 0.0  ;;  %v1891_v57 = vpop.f32.mrb[7].mxu0  ;;  %5645 = vmatmul.mubr.msk.f32.gmra.mrb[112].mxu0 %vm451_vm1, %v415_v41 }
 0x2ff   : > { %v4829_v51 = vrot.slane %v4828_v43, 1  ;;  %v3103_v53 = vadd.f32 %v3102_v40, %v6476_v6  ;;  %v3106_v55 = vpop.f32.mrb[6].mxu1  ;;  %v4756_v60 = vadd.f32 %v4755_v46, %v4754_v37  ;;  %v3993_v61 = vmax.f32 %v3101_v47, 0.0  ;;  %2211 = vmatprep.mubr.f32.mxu0 %v5995_v0  ;;  %v418_v46 = vld [vmem:[%s8323_s0 + $0x5d8] sm:$0xff] }
 0x300   : > { %v4793_v59 = vadd.f32 %v4792_v45, %v4791_v36  ;;  %v3992_v62 = vmax.f32 %v1886_v48, 0.0  ;;  %v3108_v63 = vpop.f32.mrb[7].mxu1  ;;  %5839 = vmatmul.mubr.msk.f32.gmra.mrb[112].mxu1 %vm451_vm1, %v415_v41  ;;  %v5140_v2 = vmul.f32 0.00390625, %v4719_v50  ;;  %v4832_v56 = vadd.f32 %v4831_v31, %v3991_v52 }
 0x301   : > { %v4830_v7 = vadd.f32 %v4829_v51, %v4828_v43  ;;  %v3994_v8 = vmax.f32 %v3103_v53, 0.0  ;;  %3428 = vmatprep.mubr.f32.mxu1 %v5995_v0  ;;  %v5141_v10 = vmul.f32 0.00390625, %v4756_v60  ;;  %v4906_v11 = vadd.f32 %v4905_v38, %v3993_v61  ;;  %v1895_v13 = vpop.f32.mrb[8].mxu0 }
 0x302   : > { %v5142_v9 = vmul.f32 0.00390625, %v4793_v59  ;;  %v4869_v12 = vadd.f32 %v4868_v39, %v3992_v62  ;;  %v1890_v16 = vadd.f32 %v1889_v49, %v6470_v3  ;;  %v3107_v17 = vadd.f32 %v3106_v55, %v6472_v4  ;;  %v1897_v19 = vpop.f32.mrb[9].mxu0  ;;  %5646 = vmatmul.mubr.msk.f32.gmra.mrb[114].mxu0 %vm451_vm1, %v416_v1 }
 0x303   : > { %v5143_v14 = vmul.f32 0.00390625, %v4830_v7  ;;  %v4943_v15 = vadd.f32 %v4942_v44, %v3994_v8  ;;  %v3112_v18 = vpop.f32.mrb[8].mxu1  ;;  %v5248_v20 = vcombine.low %v5140_v2, %v5141_v10  ;;  %v1892_v21 = vadd.f32 %v1891_v57, %v6474_v5  ;;  %2217 = vmatprep.mubr.f32.mxu0 %v5995_v0  ;;  %v419_v10 = vld [vmem:[%s8323_s0 + $0x5e0] sm:$0xff] }
 0x304   : > { %v3109_v22 = vadd.f32 %v3108_v63, %v6476_v6  ;;  %v1896_v23 = vadd.f32 %v1895_v13, %v6470_v3  ;;  %v3114_v24 = vpop.f32.mrb[9].mxu1  ;;  %5840 = vmatmul.mubr.msk.f32.gmra.mrb[114].mxu1 %vm451_vm1, %v416_v1  ;;  %v3995_v27 = vmax.f32 %v1890_v16, 0.0  ;;  %v3997_v28 = vmax.f32 %v3107_v17, 0.0 }
 0x305   : > { %v5249_v26 = vcombine.low %v5142_v9, %v5143_v14  ;;  %v3113_v29 = vadd.f32 %v3112_v18, %v6472_v4  ;;  %3434 = vmatprep.mubr.f32.mxu1 %v5995_v0  ;;  %v5256_v30 = vrot.slane %v5248_v20, %v6831_v32  ;;  %v3996_v31 = vmax.f32 %v1892_v21, 0.0  ;;  %v1901_v35 = vpop.f32.mrb[10].mxu0 }
 0x306   : > { %v3998_v33 = vmax.f32 %v3109_v22, 0.0  ;;  %v3999_v34 = vmax.f32 %v1896_v23, 0.0  ;;  %v4833_v37 = vadd.f32 %v4832_v56, %v3995_v27  ;;  %v4907_v38 = vadd.f32 %v4906_v11, %v3997_v28  ;;  %v1903_v41 = vpop.f32.mrb[11].mxu0  ;;  %5647 = vmatmul.mubr.msk.f32.gmra.mrb[116].mxu0 %vm451_vm1, %v417_v25 }
 0x307   : > { %v5263_v36 = vrot.slane %v5249_v26, %v6831_v32  ;;  %v4001_v39 = vmax.f32 %v3113_v29, 0.0  ;;  %v3118_v40 = vpop.f32.mrb[10].mxu1  ;;  %v4870_v42 = vadd.f32 %v4869_v12, %v3996_v31  ;;  %v1898_v44 = vadd.f32 %v1897_v19, %v6474_v5  ;;  %2223 = vmatprep.mubr.f32.mxu0 %v5995_v0  ;;  %v420_v31 = vld [vmem:[%s8323_s0 + $0x5e8] sm:$0xff] }
 0x308   : > { %v4944_v43 = vadd.f32 %v4943_v15, %v3998_v33  ;;  %v3115_v58 = vadd.f32 %v3114_v24, %v6476_v6  ;;  %v3120_v45 = vpop.f32.mrb[11].mxu1  ;;  %5841 = vmatmul.mubr.msk.f32.gmra.mrb[116].mxu1 %vm451_vm1, %v417_v25  ;;  %v4834_v48 = vadd.f32 %v4833_v37, %v3999_v34  ;;  %v1902_v50 = vadd.f32 %v1901_v35, %v6470_v3 }
 0x309   : > { %v5264_v47 = vcombine.low %v5256_v30, %v5263_v36  ;;  %v4908_v49 = vadd.f32 %v4907_v38, %v4001_v39  ;;  %v4000_v51 = vmax.f32 %v1898_v44, 0.0  ;;  %v3119_v53 = vadd.f32 %v3118_v40, %v6472_v4  ;;  %v1907_v57 = vpop.f32.mrb[12].mxu0  ;;  %3440 = vmatprep.mubr.f32.mxu1 %v5995_v0 }
 0x30a   : > { %v4002_v52 = vmax.f32 %v3115_v58, 0.0  ;;  %v1904_v55 = vadd.f32 %v1903_v41, %v6474_v5  ;;  %v4003_v60 = vmax.f32 %v1902_v50, 0.0  ;;  %v3121_v61 = vadd.f32 %v3120_v45, %v6476_v6  ;;  %v1909_v1 = vpop.f32.mrb[13].mxu0  ;;  %5648 = vmatmul.mubr.msk.f32.gmra.mrb[118].mxu0 %vm451_vm1, %v418_v46  ;;  %v421_v50 = vld [vmem:[%s8323_s0 + $0x5f0] sm:$0xff] }
 0x30b   : > { %v5271_v59 = vrot.slane %v5264_v47, %v6831_v32  ;;  %v1908_v62 = vadd.f32 %v1907_v57, %v6470_v3  ;;  %v3124_v63 = vpop.f32.mrb[12].mxu1  ;;  %v4871_v2 = vadd.f32 %v4870_v42, %v4000_v51  ;;  %v4005_v56 = vmax.f32 %v3119_v53, 0.0  ;;  %2229 = vmatprep.mubr.f32.mxu0 %v5995_v0 }
 0x30c   : > { %v4945_v7 = vadd.f32 %v4944_v43, %v4002_v52  ;;  %v4004_v8 = vmax.f32 %v1904_v55, 0.0  ;;  %v3126_v9 = vpop.f32.mrb[13].mxu1  ;;  %5842 = vmatmul.mubr.msk.f32.gmra.mrb[118].mxu1 %vm451_vm1, %v418_v46  ;;  %v4835_v11 = vadd.f32 %v4834_v48, %v4003_v60  ;;  %v4006_v12 = vmax.f32 %v3121_v61, 0.0 }
 0x30d   : > { %5333 = vst.msk [vmem:[%s6915_s18 + $0xc] sm:$0xf] %vm6873_vm2, %v5271_v59  ;;  %v4007_v13 = vmax.f32 %v1908_v62, 0.0  ;;  %v3125_v14 = vadd.f32 %v3124_v63, %v6472_v4  ;;  %3446 = vmatprep.mubr.f32.mxu1 %v5995_v0  ;;  %v4909_v15 = vadd.f32 %v4908_v49, %v4005_v56  ;;  %v1910_v17 = vadd.f32 %v1909_v1, %v6474_v5  ;;  %v1913_v19 = vpop.f32.mrb[14].mxu0 }
 0x30e   : > { %v4872_v16 = vadd.f32 %v4871_v2, %v4004_v8  ;;  %v3127_v18 = vadd.f32 %v3126_v9, %v6476_v6  ;;  %v4946_v20 = vadd.f32 %v4945_v7, %v4006_v12  ;;  %v1914_v23 = vadd.f32 %v1913_v19, %v6470_v3  ;;  %v1915_v25 = vpop.f32.mrb[15].mxu0  ;;  %5649 = vmatmul.mubr.msk.f32.gmra.mrb[120].mxu0 %vm451_vm1, %v419_v10 }
 0x30f   : > { %v4836_v21 = vadd.f32 %v4835_v11, %v4007_v13  ;;  %v4009_v22 = vmax.f32 %v3125_v14, 0.0  ;;  %v3130_v24 = vpop.f32.mrb[14].mxu1  ;;  %v4008_v26 = vmax.f32 %v1910_v17, 0.0  ;;  %v1916_v29 = vadd.f32 %v1915_v25, %v6474_v5  ;;  %2235 = vmatprep.mubr.f32.mxu0 %v5995_v0 }
 0x310   : > { %v4010_v27 = vmax.f32 %v3127_v18, 0.0  ;;  %v3131_v28 = vadd.f32 %v3130_v24, %v6472_v4  ;;  %v3132_v30 = vpop.f32.mrb[15].mxu1  ;;  %5843 = vmatmul.mubr.msk.f32.gmra.mrb[120].mxu1 %vm451_vm1, %v419_v10  ;;  %v4011_v34 = vmax.f32 %v1914_v23, 0.0  ;;  %v422_v10 = vld [vmem:[%s8323_s0 + $0x5f8] sm:$0xff] }
 0x311   : > { %v4910_v33 = vadd.f32 %v4909_v15, %v4009_v22  ;;  %v3133_v35 = vadd.f32 %v3132_v30, %v6476_v6  ;;  %3452 = vmatprep.mubr.f32.mxu1 %v5995_v0  ;;  %v4873_v36 = vadd.f32 %v4872_v16, %v4008_v26  ;;  %v4012_v39 = vmax.f32 %v1916_v29, 0.0  ;;  %v1919_v40 = vpop.f32.mrb[16].mxu0 }
 0x312   : > { %v4947_v37 = vadd.f32 %v4946_v20, %v4010_v27  ;;  %v4013_v38 = vmax.f32 %v3131_v28, 0.0  ;;  %v4837_v41 = vadd.f32 %v4836_v21, %v4011_v34  ;;  %v1920_v43 = vadd.f32 %v1919_v40, %v6470_v3  ;;  %v1921_v58 = vpop.f32.mrb[17].mxu0  ;;  %5650 = vmatmul.mubr.msk.f32.gmra.mrb[122].mxu0 %vm451_vm1, %v420_v31 }
 0x313   : > { %v4014_v42 = vmax.f32 %v3133_v35, 0.0  ;;  %v3136_v44 = vpop.f32.mrb[16].mxu1  ;;  %v4874_v46 = vadd.f32 %v4873_v36, %v4012_v39  ;;  %v1922_v48 = vadd.f32 %v1921_v58, %v6474_v5  ;;  %2241 = vmatprep.mubr.f32.mxu0 %v5995_v0 }
 0x314   : > { %v4911_v45 = vadd.f32 %v4910_v33, %v4013_v38  ;;  %v3137_v47 = vadd.f32 %v3136_v44, %v6472_v4  ;;  %v3138_v49 = vpop.f32.mrb[17].mxu1  ;;  %5844 = vmatmul.mubr.msk.f32.gmra.mrb[122].mxu1 %vm451_vm1, %v420_v31  ;;  %v4015_v52 = vmax.f32 %v1920_v43, 0.0 }
 0x315   : > { %v4948_v51 = vadd.f32 %v4947_v37, %v4014_v42  ;;  %v3139_v53 = vadd.f32 %v3138_v49, %v6476_v6  ;;  %3458 = vmatprep.mubr.f32.mxu1 %v5995_v0  ;;  %v4016_v57 = vmax.f32 %v1922_v48, 0.0  ;;  %v1925_v59 = vpop.f32.mrb[18].mxu0 }
 0x316   : > { %v4017_v55 = vmax.f32 %v3137_v47, 0.0  ;;  %v4838_v60 = vadd.f32 %v4837_v41, %v4015_v52  ;;  %v1926_v62 = vadd.f32 %v1925_v59, %v6470_v3  ;;  %v1927_v1 = vpop.f32.mrb[19].mxu0  ;;  %5651 = vmatmul.mubr.msk.f32.gmra.mrb[124].mxu0 %vm451_vm1, %v421_v50 }
 0x317   : > { %v4018_v61 = vmax.f32 %v3139_v53, 0.0  ;;  %v3142_v63 = vpop.f32.mrb[18].mxu1  ;;  %v4875_v7 = vadd.f32 %v4874_v46, %v4016_v57  ;;  %v1928_v8 = vadd.f32 %v1927_v1, %v6474_v5  ;;  %2247 = vmatprep.mubr.f32.mxu0 %v5995_v0 }
 0x318   : > { %v4912_v2 = vadd.f32 %v4911_v45, %v4017_v55  ;;  %v3143_v56 = vadd.f32 %v3142_v63, %v6472_v4  ;;  %v3144_v9 = vpop.f32.mrb[19].mxu1  ;;  %5845 = vmatmul.mubr.msk.f32.gmra.mrb[124].mxu1 %vm451_vm1, %v421_v50  ;;  %v4019_v12 = vmax.f32 %v1926_v62, 0.0 }
 0x319   : > { %v4949_v11 = vadd.f32 %v4948_v51, %v4018_v61  ;;  %v3145_v13 = vadd.f32 %v3144_v9, %v6476_v6  ;;  %3464 = vmatprep.mubr.f32.mxu1 %v5995_v0  ;;  %v4020_v15 = vmax.f32 %v1928_v8, 0.0  ;;  %v1931_v16 = vpop.f32.mrb[20].mxu0 }
 0x31a   : > { %v4021_v14 = vmax.f32 %v3143_v56, 0.0  ;;  %v4839_v17 = vadd.f32 %v4838_v60, %v4019_v12  ;;  %v1932_v19 = vadd.f32 %v1931_v16, %v6470_v3  ;;  %v1933_v21 = vpop.f32.mrb[21].mxu0  ;;  %5652 = vmatmul.mubr.msk.f32.gmra.mrb[126].mxu0 %vm451_vm1, %v422_v10 }
 0x31b   : > { %v4022_v18 = vmax.f32 %v3145_v13, 0.0  ;;  %v3148_v20 = vpop.f32.mrb[20].mxu1  ;;  %v4876_v23 = vadd.f32 %v4875_v7, %v4020_v15  ;;  %v1934_v25 = vadd.f32 %v1933_v21, %v6474_v5 }
 0x31c   : > { %v4913_v22 = vadd.f32 %v4912_v2, %v4021_v14  ;;  %v3149_v24 = vadd.f32 %v3148_v20, %v6472_v4  ;;  %v3150_v26 = vpop.f32.mrb[21].mxu1  ;;  %5846 = vmatmul.mubr.msk.f32.gmra.mrb[126].mxu1 %vm451_vm1, %v422_v10  ;;  %v4023_v27 = vmax.f32 %v1932_v19, 0.0 }
 0x31d   : > { %v4950_v0 = vadd.f32 %v4949_v11, %v4022_v18  ;;  %v3151_v28 = vadd.f32 %v3150_v26, %v6476_v6  ;;  %v4024_v30 = vmax.f32 %v1934_v25, 0.0  ;;  %v1937_v31 = vpop.f32.mrb[22].mxu0 }
 0x31e   : > { %v4025_v29 = vmax.f32 %v3149_v24, 0.0  ;;  %v4840_v33 = vadd.f32 %v4839_v17, %v4023_v27  ;;  %v1938_v35 = vadd.f32 %v1937_v31, %v6470_v3  ;;  %v1939_v37 = vpop.f32.mrb[23].mxu0 }
 0x31f   : > { %v4026_v34 = vmax.f32 %v3151_v28, 0.0  ;;  %v3154_v36 = vpop.f32.mrb[22].mxu1  ;;  %v4877_v39 = vadd.f32 %v4876_v23, %v4024_v30  ;;  %v1940_v41 = vadd.f32 %v1939_v37, %v6474_v5 }
 0x320   : > { %v4914_v38 = vadd.f32 %v4913_v22, %v4025_v29  ;;  %v3155_v40 = vadd.f32 %v3154_v36, %v6472_v4  ;;  %v3156_v42 = vpop.f32.mrb[23].mxu1  ;;  %v4027_v44 = vmax.f32 %v1938_v35, 0.0 }
 0x321   : > { %v4951_v43 = vadd.f32 %v4950_v0, %v4026_v34  ;;  %v3157_v58 = vadd.f32 %v3156_v42, %v6476_v6  ;;  %v4028_v46 = vmax.f32 %v1940_v41, 0.0  ;;  %v1943_v47 = vpop.f32.mrb[24].mxu0 }
 0x322   : > { %v4029_v45 = vmax.f32 %v3155_v40, 0.0  ;;  %v4841_v48 = vadd.f32 %v4840_v33, %v4027_v44  ;;  %v1944_v50 = vadd.f32 %v1943_v47, %v6470_v3  ;;  %v1945_v52 = vpop.f32.mrb[25].mxu0 }
 0x323   : > { %v4030_v49 = vmax.f32 %v3157_v58, 0.0  ;;  %v3160_v51 = vpop.f32.mrb[24].mxu1  ;;  %v4878_v55 = vadd.f32 %v4877_v39, %v4028_v46  ;;  %v1946_v59 = vadd.f32 %v1945_v52, %v6474_v5 }
 0x324   : > { %v4915_v53 = vadd.f32 %v4914_v38, %v4029_v45  ;;  %v3161_v57 = vadd.f32 %v3160_v51, %v6472_v4  ;;  %v3162_v60 = vpop.f32.mrb[25].mxu1  ;;  %v4031_v62 = vmax.f32 %v1944_v50, 0.0 }
 0x325   : > { %v4952_v61 = vadd.f32 %v4951_v43, %v4030_v49  ;;  %v3163_v63 = vadd.f32 %v3162_v60, %v6476_v6  ;;  %v4032_v2 = vmax.f32 %v1946_v59, 0.0  ;;  %v1949_v7 = vpop.f32.mrb[26].mxu0 }
 0x326   : > { %v4033_v1 = vmax.f32 %v3161_v57, 0.0  ;;  %v4842_v56 = vadd.f32 %v4841_v48, %v4031_v62  ;;  %v1950_v9 = vadd.f32 %v1949_v7, %v6470_v3  ;;  %v1951_v11 = vpop.f32.mrb[27].mxu0 }
 0x327   : > { %v4034_v8 = vmax.f32 %v3163_v63, 0.0  ;;  %v3166_v10 = vpop.f32.mrb[26].mxu1  ;;  %v4879_v13 = vadd.f32 %v4878_v55, %v4032_v2  ;;  %v1952_v15 = vadd.f32 %v1951_v11, %v6474_v5 }
 0x328   : > { %v4916_v12 = vadd.f32 %v4915_v53, %v4033_v1  ;;  %v3167_v14 = vadd.f32 %v3166_v10, %v6472_v4  ;;  %v3168_v16 = vpop.f32.mrb[27].mxu1  ;;  %v4035_v18 = vmax.f32 %v1950_v9, 0.0 }
 0x329   : > { %v4953_v17 = vadd.f32 %v4952_v61, %v4034_v8  ;;  %v3169_v19 = vadd.f32 %v3168_v16, %v6476_v6  ;;  %v4036_v21 = vmax.f32 %v1952_v15, 0.0  ;;  %v1955_v22 = vpop.f32.mrb[28].mxu0 }
 0x32a   : > { %v4037_v20 = vmax.f32 %v3167_v14, 0.0  ;;  %v4843_v23 = vadd.f32 %v4842_v56, %v4035_v18  ;;  %v1956_v25 = vadd.f32 %v1955_v22, %v6470_v3  ;;  %v1957_v0 = vpop.f32.mrb[29].mxu0 }
 0x32b   : > { %v4038_v24 = vmax.f32 %v3169_v19, 0.0  ;;  %v3172_v26 = vpop.f32.mrb[28].mxu1  ;;  %v4880_v28 = vadd.f32 %v4879_v13, %v4036_v21  ;;  %v1958_v30 = vadd.f32 %v1957_v0, %v6474_v5 }
 0x32c   : > { %v4917_v27 = vadd.f32 %v4916_v12, %v4037_v20  ;;  %v3173_v29 = vadd.f32 %v3172_v26, %v6472_v4  ;;  %v3174_v31 = vpop.f32.mrb[29].mxu1  ;;  %v4039_v34 = vmax.f32 %v1956_v25, 0.0 }
 0x32d   : > { %v4954_v33 = vadd.f32 %v4953_v17, %v4038_v24  ;;  %v3175_v35 = vadd.f32 %v3174_v31, %v6476_v6  ;;  %v4040_v37 = vmax.f32 %v1958_v30, 0.0  ;;  %v1961_v38 = vpop.f32.mrb[30].mxu0 }
 0x32e   : > { %v4041_v36 = vmax.f32 %v3173_v29, 0.0  ;;  %v4844_v39 = vadd.f32 %v4843_v23, %v4039_v34  ;;  %v1962_v41 = vadd.f32 %v1961_v38, %v6470_v3  ;;  %v1963_v43 = vpop.f32.mrb[31].mxu0 }
 0x32f   : > { %v4042_v40 = vmax.f32 %v3175_v35, 0.0  ;;  %v3178_v42 = vpop.f32.mrb[30].mxu1  ;;  %v4881_v58 = vadd.f32 %v4880_v28, %v4040_v37  ;;  %v1964_v46 = vadd.f32 %v1963_v43, %v6474_v5 }
 0x330   : > { %v4918_v44 = vadd.f32 %v4917_v27, %v4041_v36  ;;  %v3179_v45 = vadd.f32 %v3178_v42, %v6472_v4  ;;  %v3180_v47 = vpop.f32.mrb[31].mxu1  ;;  %v4043_v49 = vmax.f32 %v1962_v41, 0.0 }
 0x331   : > { %v4955_v48 = vadd.f32 %v4954_v33, %v4042_v40  ;;  %v3181_v50 = vadd.f32 %v3180_v47, %v6476_v6  ;;  %v4044_v52 = vmax.f32 %v1964_v46, 0.0  ;;  %v1967_v53 = vpop.f32.mrb[32].mxu0 }
 0x332   : > { %v4045_v51 = vmax.f32 %v3179_v45, 0.0  ;;  %v4845_v55 = vadd.f32 %v4844_v39, %v4043_v49  ;;  %v1968_v59 = vadd.f32 %v1967_v53, %v6470_v3  ;;  %v1969_v61 = vpop.f32.mrb[33].mxu0 }
 0x333   : > { %v4046_v57 = vmax.f32 %v3181_v50, 0.0  ;;  %v3184_v60 = vpop.f32.mrb[32].mxu1  ;;  %v4882_v63 = vadd.f32 %v4881_v58, %v4044_v52  ;;  %v1970_v2 = vadd.f32 %v1969_v61, %v6474_v5 }
 0x334   : > { %v4919_v62 = vadd.f32 %v4918_v44, %v4045_v51  ;;  %v3185_v1 = vadd.f32 %v3184_v60, %v6472_v4  ;;  %v3186_v7 = vpop.f32.mrb[33].mxu1  ;;  %v4047_v8 = vmax.f32 %v1968_v59, 0.0 }
 0x335   : > { %v4956_v56 = vadd.f32 %v4955_v48, %v4046_v57  ;;  %v3187_v9 = vadd.f32 %v3186_v7, %v6476_v6  ;;  %v4048_v11 = vmax.f32 %v1970_v2, 0.0  ;;  %v1973_v12 = vpop.f32.mrb[34].mxu0 }
 0x336   : > { %v4049_v10 = vmax.f32 %v3185_v1, 0.0  ;;  %v4846_v13 = vadd.f32 %v4845_v55, %v4047_v8  ;;  %v1974_v15 = vadd.f32 %v1973_v12, %v6470_v3  ;;  %v1975_v17 = vpop.f32.mrb[35].mxu0 }
 0x337   : > { %v4050_v14 = vmax.f32 %v3187_v9, 0.0  ;;  %v3190_v16 = vpop.f32.mrb[34].mxu1  ;;  %v4883_v19 = vadd.f32 %v4882_v63, %v4048_v11  ;;  %v1976_v21 = vadd.f32 %v1975_v17, %v6474_v5 }
 0x338   : > { %v4920_v18 = vadd.f32 %v4919_v62, %v4049_v10  ;;  %v3191_v20 = vadd.f32 %v3190_v16, %v6472_v4  ;;  %v3192_v22 = vpop.f32.mrb[35].mxu1  ;;  %v4051_v24 = vmax.f32 %v1974_v15, 0.0 }
 0x339   : > { %v4957_v23 = vadd.f32 %v4956_v56, %v4050_v14  ;;  %v3193_v25 = vadd.f32 %v3192_v22, %v6476_v6  ;;  %v4052_v0 = vmax.f32 %v1976_v21, 0.0  ;;  %v1979_v27 = vpop.f32.mrb[36].mxu0 }
 0x33a   : > { %v4053_v26 = vmax.f32 %v3191_v20, 0.0  ;;  %v4847_v28 = vadd.f32 %v4846_v13, %v4051_v24  ;;  %v1980_v30 = vadd.f32 %v1979_v27, %v6470_v3  ;;  %v1981_v33 = vpop.f32.mrb[37].mxu0 }
 0x33b   : > { %v4054_v29 = vmax.f32 %v3193_v25, 0.0  ;;  %v3196_v31 = vpop.f32.mrb[36].mxu1  ;;  %v4884_v35 = vadd.f32 %v4883_v19, %v4052_v0  ;;  %v1982_v37 = vadd.f32 %v1981_v33, %v6474_v5 }
 0x33c   : > { %v4921_v34 = vadd.f32 %v4920_v18, %v4053_v26  ;;  %v3197_v36 = vadd.f32 %v3196_v31, %v6472_v4  ;;  %v3198_v38 = vpop.f32.mrb[37].mxu1  ;;  %v4055_v40 = vmax.f32 %v1980_v30, 0.0 }
 0x33d   : > { %v4958_v39 = vadd.f32 %v4957_v23, %v4054_v29  ;;  %v3199_v41 = vadd.f32 %v3198_v38, %v6476_v6  ;;  %v4056_v43 = vmax.f32 %v1982_v37, 0.0  ;;  %v1985_v44 = vpop.f32.mrb[38].mxu0 }
 0x33e   : > { %v4057_v42 = vmax.f32 %v3197_v36, 0.0  ;;  %v4848_v58 = vadd.f32 %v4847_v28, %v4055_v40  ;;  %v1986_v46 = vadd.f32 %v1985_v44, %v6470_v3  ;;  %v1987_v48 = vpop.f32.mrb[39].mxu0 }
 0x33f   : > { %v4058_v45 = vmax.f32 %v3199_v41, 0.0  ;;  %v3202_v47 = vpop.f32.mrb[38].mxu1  ;;  %v4885_v50 = vadd.f32 %v4884_v35, %v4056_v43  ;;  %v1988_v52 = vadd.f32 %v1987_v48, %v6474_v5 }
 0x340   : > { %v4922_v49 = vadd.f32 %v4921_v34, %v4057_v42  ;;  %v3203_v51 = vadd.f32 %v3202_v47, %v6472_v4  ;;  %v3204_v53 = vpop.f32.mrb[39].mxu1  ;;  %v4059_v57 = vmax.f32 %v1986_v46, 0.0 }
 0x341   : > { %v4959_v55 = vadd.f32 %v4958_v39, %v4058_v45  ;;  %v3205_v59 = vadd.f32 %v3204_v53, %v6476_v6  ;;  %v4060_v61 = vmax.f32 %v1988_v52, 0.0  ;;  %v1991_v62 = vpop.f32.mrb[40].mxu0 }
 0x342   : > { %v4061_v60 = vmax.f32 %v3203_v51, 0.0  ;;  %v4849_v63 = vadd.f32 %v4848_v58, %v4059_v57  ;;  %v1992_v2 = vadd.f32 %v1991_v62, %v6470_v3  ;;  %v1993_v56 = vpop.f32.mrb[41].mxu0 }
 0x343   : > { %v4062_v1 = vmax.f32 %v3205_v59, 0.0  ;;  %v3208_v7 = vpop.f32.mrb[40].mxu1  ;;  %v4886_v9 = vadd.f32 %v4885_v50, %v4060_v61  ;;  %v1994_v11 = vadd.f32 %v1993_v56, %v6474_v5 }
 0x344   : > { %v4923_v8 = vadd.f32 %v4922_v49, %v4061_v60  ;;  %v3209_v10 = vadd.f32 %v3208_v7, %v6472_v4  ;;  %v3210_v12 = vpop.f32.mrb[41].mxu1  ;;  %v4063_v14 = vmax.f32 %v1992_v2, 0.0 }
 0x345   : > { %v4960_v13 = vadd.f32 %v4959_v55, %v4062_v1  ;;  %v3211_v15 = vadd.f32 %v3210_v12, %v6476_v6  ;;  %v4064_v17 = vmax.f32 %v1994_v11, 0.0  ;;  %v1997_v18 = vpop.f32.mrb[42].mxu0 }
 0x346   : > { %v4065_v16 = vmax.f32 %v3209_v10, 0.0  ;;  %v4850_v19 = vadd.f32 %v4849_v63, %v4063_v14  ;;  %v1998_v21 = vadd.f32 %v1997_v18, %v6470_v3  ;;  %v1999_v23 = vpop.f32.mrb[43].mxu0 }
 0x347   : > { %v4066_v20 = vmax.f32 %v3211_v15, 0.0  ;;  %v3214_v22 = vpop.f32.mrb[42].mxu1  ;;  %v4887_v25 = vadd.f32 %v4886_v9, %v4064_v17  ;;  %v2000_v0 = vadd.f32 %v1999_v23, %v6474_v5 }
 0x348   : > { %v4924_v24 = vadd.f32 %v4923_v8, %v4065_v16  ;;  %v3215_v26 = vadd.f32 %v3214_v22, %v6472_v4  ;;  %v3216_v27 = vpop.f32.mrb[43].mxu1  ;;  %v4067_v29 = vmax.f32 %v1998_v21, 0.0 }
 0x349   : > { %v4961_v28 = vadd.f32 %v4960_v13, %v4066_v20  ;;  %v3217_v30 = vadd.f32 %v3216_v27, %v6476_v6  ;;  %v4068_v33 = vmax.f32 %v2000_v0, 0.0  ;;  %v2003_v34 = vpop.f32.mrb[44].mxu0 }
 0x34a   : > { %v4069_v31 = vmax.f32 %v3215_v26, 0.0  ;;  %v4851_v35 = vadd.f32 %v4850_v19, %v4067_v29  ;;  %v2004_v37 = vadd.f32 %v2003_v34, %v6470_v3  ;;  %v2005_v39 = vpop.f32.mrb[45].mxu0 }
 0x34b   : > { %v4070_v36 = vmax.f32 %v3217_v30, 0.0  ;;  %v3220_v38 = vpop.f32.mrb[44].mxu1  ;;  %v4888_v41 = vadd.f32 %v4887_v25, %v4068_v33  ;;  %v2006_v43 = vadd.f32 %v2005_v39, %v6474_v5 }
 0x34c   : > { %v4925_v40 = vadd.f32 %v4924_v24, %v4069_v31  ;;  %v3221_v42 = vadd.f32 %v3220_v38, %v6472_v4  ;;  %v3222_v44 = vpop.f32.mrb[45].mxu1  ;;  %v4071_v45 = vmax.f32 %v2004_v37, 0.0 }
 0x34d   : > { %v4962_v58 = vadd.f32 %v4961_v28, %v4070_v36  ;;  %v3223_v46 = vadd.f32 %v3222_v44, %v6476_v6  ;;  %v4072_v48 = vmax.f32 %v2006_v43, 0.0  ;;  %v2009_v49 = vpop.f32.mrb[46].mxu0 }
 0x34e   : > { %v4073_v47 = vmax.f32 %v3221_v42, 0.0  ;;  %v4852_v50 = vadd.f32 %v4851_v35, %v4071_v45  ;;  %v2010_v52 = vadd.f32 %v2009_v49, %v6470_v3  ;;  %v2011_v55 = vpop.f32.mrb[47].mxu0 }
 0x34f   : > { %v4074_v51 = vmax.f32 %v3223_v46, 0.0  ;;  %v3226_v53 = vpop.f32.mrb[46].mxu1  ;;  %v4889_v59 = vadd.f32 %v4888_v41, %v4072_v48  ;;  %v2012_v61 = vadd.f32 %v2011_v55, %v6474_v5 }
 0x350   : > { %v4926_v57 = vadd.f32 %v4925_v40, %v4073_v47  ;;  %v3227_v60 = vadd.f32 %v3226_v53, %v6472_v4  ;;  %v3228_v62 = vpop.f32.mrb[47].mxu1  ;;  %v4075_v1 = vmax.f32 %v2010_v52, 0.0 }
 0x351   : > { %v4963_v63 = vadd.f32 %v4962_v58, %v4074_v51  ;;  %v3229_v2 = vadd.f32 %v3228_v62, %v6476_v6  ;;  %v4076_v56 = vmax.f32 %v2012_v61, 0.0  ;;  %v2015_v8 = vpop.f32.mrb[48].mxu0 }
 0x352   : > { %v4077_v7 = vmax.f32 %v3227_v60, 0.0  ;;  %v4853_v9 = vadd.f32 %v4852_v50, %v4075_v1  ;;  %v2016_v11 = vadd.f32 %v2015_v8, %v6470_v3  ;;  %v2017_v13 = vpop.f32.mrb[49].mxu0 }
 0x353   : > { %v4078_v10 = vmax.f32 %v3229_v2, 0.0  ;;  %v3232_v12 = vpop.f32.mrb[48].mxu1  ;;  %v4890_v15 = vadd.f32 %v4889_v59, %v4076_v56  ;;  %v2018_v17 = vadd.f32 %v2017_v13, %v6474_v5 }
 0x354   : > { %v4927_v14 = vadd.f32 %v4926_v57, %v4077_v7  ;;  %v3233_v16 = vadd.f32 %v3232_v12, %v6472_v4  ;;  %v3234_v18 = vpop.f32.mrb[49].mxu1  ;;  %v4079_v20 = vmax.f32 %v2016_v11, 0.0 }
 0x355   : > { %v4964_v19 = vadd.f32 %v4963_v63, %v4078_v10  ;;  %v3235_v21 = vadd.f32 %v3234_v18, %v6476_v6  ;;  %v4080_v23 = vmax.f32 %v2018_v17, 0.0  ;;  %v2021_v24 = vpop.f32.mrb[50].mxu0 }
 0x356   : > { %v4081_v22 = vmax.f32 %v3233_v16, 0.0  ;;  %v4854_v25 = vadd.f32 %v4853_v9, %v4079_v20  ;;  %v2022_v0 = vadd.f32 %v2021_v24, %v6470_v3  ;;  %v2023_v28 = vpop.f32.mrb[51].mxu0 }
 0x357   : > { %v4082_v26 = vmax.f32 %v3235_v21, 0.0  ;;  %v3238_v27 = vpop.f32.mrb[50].mxu1  ;;  %v4891_v30 = vadd.f32 %v4890_v15, %v4080_v23  ;;  %v2024_v33 = vadd.f32 %v2023_v28, %v6474_v5 }
 0x358   : > { %v4928_v29 = vadd.f32 %v4927_v14, %v4081_v22  ;;  %v3239_v31 = vadd.f32 %v3238_v27, %v6472_v4  ;;  %v3240_v34 = vpop.f32.mrb[51].mxu1  ;;  %v4083_v36 = vmax.f32 %v2022_v0, 0.0 }
 0x359   : > { %v4965_v35 = vadd.f32 %v4964_v19, %v4082_v26  ;;  %v3241_v37 = vadd.f32 %v3240_v34, %v6476_v6  ;;  %v4084_v39 = vmax.f32 %v2024_v33, 0.0  ;;  %v2027_v40 = vpop.f32.mrb[52].mxu0 }
 0x35a   : > { %v4085_v38 = vmax.f32 %v3239_v31, 0.0  ;;  %v4855_v41 = vadd.f32 %v4854_v25, %v4083_v36  ;;  %v2028_v43 = vadd.f32 %v2027_v40, %v6470_v3  ;;  %v2029_v58 = vpop.f32.mrb[53].mxu0 }
 0x35b   : > { %v4086_v42 = vmax.f32 %v3241_v37, 0.0  ;;  %v3244_v44 = vpop.f32.mrb[52].mxu1  ;;  %v4892_v46 = vadd.f32 %v4891_v30, %v4084_v39  ;;  %v2030_v48 = vadd.f32 %v2029_v58, %v6474_v5 }
 0x35c   : > { %v4929_v45 = vadd.f32 %v4928_v29, %v4085_v38  ;;  %v3245_v47 = vadd.f32 %v3244_v44, %v6472_v4  ;;  %v3246_v49 = vpop.f32.mrb[53].mxu1  ;;  %v4087_v51 = vmax.f32 %v2028_v43, 0.0 }
 0x35d   : > { %v4966_v50 = vadd.f32 %v4965_v35, %v4086_v42  ;;  %v3247_v52 = vadd.f32 %v3246_v49, %v6476_v6  ;;  %v4088_v55 = vmax.f32 %v2030_v48, 0.0  ;;  %v2033_v57 = vpop.f32.mrb[54].mxu0 }
 0x35e   : > { %v4089_v53 = vmax.f32 %v3245_v47, 0.0  ;;  %v4856_v59 = vadd.f32 %v4855_v41, %v4087_v51  ;;  %v2034_v61 = vadd.f32 %v2033_v57, %v6470_v3  ;;  %v2035_v63 = vpop.f32.mrb[55].mxu0 }
 0x35f   : > { %v4090_v60 = vmax.f32 %v3247_v52, 0.0  ;;  %v3250_v62 = vpop.f32.mrb[54].mxu1  ;;  %v4893_v2 = vadd.f32 %v4892_v46, %v4088_v55  ;;  %v2036_v56 = vadd.f32 %v2035_v63, %v6474_v5 }
 0x360   : > { %v4930_v1 = vadd.f32 %v4929_v45, %v4089_v53  ;;  %v3251_v7 = vadd.f32 %v3250_v62, %v6472_v4  ;;  %v3252_v8 = vpop.f32.mrb[55].mxu1  ;;  %v4091_v10 = vmax.f32 %v2034_v61, 0.0 }
 0x361   : > { %v4967_v9 = vadd.f32 %v4966_v50, %v4090_v60  ;;  %v3253_v11 = vadd.f32 %v3252_v8, %v6476_v6  ;;  %v4092_v13 = vmax.f32 %v2036_v56, 0.0  ;;  %v2039_v14 = vpop.f32.mrb[56].mxu0 }
 0x362   : > { %v4093_v12 = vmax.f32 %v3251_v7, 0.0  ;;  %v4857_v15 = vadd.f32 %v4856_v59, %v4091_v10  ;;  %v2040_v17 = vadd.f32 %v2039_v14, %v6470_v3  ;;  %v2041_v19 = vpop.f32.mrb[57].mxu0 }
 0x363   : > { %v4094_v16 = vmax.f32 %v3253_v11, 0.0  ;;  %v3256_v18 = vpop.f32.mrb[56].mxu1  ;;  %v4894_v21 = vadd.f32 %v4893_v2, %v4092_v13  ;;  %v2042_v23 = vadd.f32 %v2041_v19, %v6474_v5 }
 0x364   : > { %v4931_v20 = vadd.f32 %v4930_v1, %v4093_v12  ;;  %v3257_v22 = vadd.f32 %v3256_v18, %v6472_v4  ;;  %v3258_v24 = vpop.f32.mrb[57].mxu1  ;;  %v4095_v26 = vmax.f32 %v2040_v17, 0.0 }
 0x365   : > { %v4968_v25 = vadd.f32 %v4967_v9, %v4094_v16  ;;  %v3259_v0 = vadd.f32 %v3258_v24, %v6476_v6  ;;  %v4096_v28 = vmax.f32 %v2042_v23, 0.0  ;;  %v2045_v29 = vpop.f32.mrb[58].mxu0 }
 0x366   : > { %v4097_v27 = vmax.f32 %v3257_v22, 0.0  ;;  %v4858_v30 = vadd.f32 %v4857_v15, %v4095_v26  ;;  %v2046_v33 = vadd.f32 %v2045_v29, %v6470_v3  ;;  %v2047_v35 = vpop.f32.mrb[59].mxu0 }
 0x367   : > { %v4098_v31 = vmax.f32 %v3259_v0, 0.0  ;;  %v3262_v34 = vpop.f32.mrb[58].mxu1  ;;  %v4895_v37 = vadd.f32 %v4894_v21, %v4096_v28  ;;  %v2048_v39 = vadd.f32 %v2047_v35, %v6474_v5 }
 0x368   : > { %v4932_v36 = vadd.f32 %v4931_v20, %v4097_v27  ;;  %v3263_v38 = vadd.f32 %v3262_v34, %v6472_v4  ;;  %v3264_v40 = vpop.f32.mrb[59].mxu1  ;;  %v4099_v42 = vmax.f32 %v2046_v33, 0.0 }
 0x369   : > { %v4969_v41 = vadd.f32 %v4968_v25, %v4098_v31  ;;  %v3265_v43 = vadd.f32 %v3264_v40, %v6476_v6  ;;  %v4100_v58 = vmax.f32 %v2048_v39, 0.0  ;;  %v2051_v45 = vpop.f32.mrb[60].mxu0 }
 0x36a   : > { %v4101_v44 = vmax.f32 %v3263_v38, 0.0  ;;  %v4859_v46 = vadd.f32 %v4858_v30, %v4099_v42  ;;  %v2052_v48 = vadd.f32 %v2051_v45, %v6470_v3  ;;  %v2053_v50 = vpop.f32.mrb[61].mxu0 }
 0x36b   : > { %v4102_v47 = vmax.f32 %v3265_v43, 0.0  ;;  %v3268_v49 = vpop.f32.mrb[60].mxu1  ;;  %v4896_v52 = vadd.f32 %v4895_v37, %v4100_v58  ;;  %v2054_v55 = vadd.f32 %v2053_v50, %v6474_v5 }
 0x36c   : > { %v4933_v51 = vadd.f32 %v4932_v36, %v4101_v44  ;;  %v3269_v53 = vadd.f32 %v3268_v49, %v6472_v4  ;;  %v3270_v57 = vpop.f32.mrb[61].mxu1  ;;  %v4103_v60 = vmax.f32 %v2052_v48, 0.0 }
 0x36d   : > { %v4970_v59 = vadd.f32 %v4969_v41, %v4102_v47  ;;  %v3271_v61 = vadd.f32 %v3270_v57, %v6476_v6  ;;  %v4104_v63 = vmax.f32 %v2054_v55, 0.0  ;;  %v2057_v1 = vpop.f32.mrb[62].mxu0 }
 0x36e   : > { %v4105_v62 = vmax.f32 %v3269_v53, 0.0  ;;  %v4860_v2 = vadd.f32 %v4859_v46, %v4103_v60  ;;  %v2058_v56 = vadd.f32 %v2057_v1, %v6470_v3  ;;  %v2059_v9 = vpop.f32.mrb[63].mxu0 }
 0x36f   : > { %v4106_v7 = vmax.f32 %v3271_v61, 0.0  ;;  %v3274_v8 = vpop.f32.mrb[62].mxu1  ;;  %v4897_v11 = vadd.f32 %v4896_v52, %v4104_v63  ;;  %v2060_v13 = vadd.f32 %v2059_v9, %v6474_v5 }
 0x370   : > { %v4934_v10 = vadd.f32 %v4933_v51, %v4105_v62  ;;  %v3275_v12 = vadd.f32 %v3274_v8, %v6472_v4  ;;  %v3276_v14 = vpop.f32.mrb[63].mxu1  ;;  %v4107_v16 = vmax.f32 %v2058_v56, 0.0 }
 0x371   : > { %v4971_v15 = vadd.f32 %v4970_v59, %v4106_v7  ;;  %v3277_v17 = vadd.f32 %v3276_v14, %v6476_v6  ;;  %v4108_v19 = vmax.f32 %v2060_v13, 0.0  ;;  %v2063_v20 = vpop.f32.mrb[64].mxu0 }
 0x372   : > { %v4109_v18 = vmax.f32 %v3275_v12, 0.0  ;;  %v4861_v21 = vadd.f32 %v4860_v2, %v4107_v16  ;;  %v2064_v23 = vadd.f32 %v2063_v20, %v6470_v3  ;;  %v2065_v25 = vpop.f32.mrb[65].mxu0 }
 0x373   : > { %v4110_v22 = vmax.f32 %v3277_v17, 0.0  ;;  %v3280_v24 = vpop.f32.mrb[64].mxu1  ;;  %v4898_v0 = vadd.f32 %v4897_v11, %v4108_v19  ;;  %v2066_v28 = vadd.f32 %v2065_v25, %v6474_v5 }
 0x374   : > { %v4935_v26 = vadd.f32 %v4934_v10, %v4109_v18  ;;  %v3281_v27 = vadd.f32 %v3280_v24, %v6472_v4  ;;  %v3282_v29 = vpop.f32.mrb[65].mxu1  ;;  %v4862_v30 = vrot.slane %v4861_v21, 4  ;;  %v4111_v33 = vmax.f32 %v2064_v23, 0.0 }
 0x375   : > { %v4972_v31 = vadd.f32 %v4971_v15, %v4110_v22  ;;  %v3283_v34 = vadd.f32 %v3282_v29, %v6476_v6  ;;  %v4899_v36 = vrot.slane %v4898_v0, 4  ;;  %v4112_v38 = vmax.f32 %v2066_v28, 0.0  ;;  %v2069_v39 = vpop.f32.mrb[66].mxu0 }
 0x376   : > { %v4936_v35 = vrot.slane %v4935_v26, 4  ;;  %v4113_v37 = vmax.f32 %v3281_v27, 0.0  ;;  %v4863_v40 = vadd.f32 %v4862_v30, %v4861_v21  ;;  %v2070_v43 = vadd.f32 %v2069_v39, %v6470_v3  ;;  %v2071_v58 = vpop.f32.mrb[67].mxu0 }
 0x377   : > { %v4973_v41 = vrot.slane %v4972_v31, 4  ;;  %v4114_v42 = vmax.f32 %v3283_v34, 0.0  ;;  %v3286_v44 = vpop.f32.mrb[66].mxu1  ;;  %v4900_v46 = vadd.f32 %v4899_v36, %v4898_v0  ;;  %v2072_v48 = vadd.f32 %v2071_v58, %v6474_v5 }
 0x378   : > { %v4937_v45 = vadd.f32 %v4936_v35, %v4935_v26  ;;  %v3287_v47 = vadd.f32 %v3286_v44, %v6472_v4  ;;  %v3288_v49 = vpop.f32.mrb[67].mxu1  ;;  %v4864_v50 = vrot.slane %v4863_v40, 2  ;;  %v4115_v52 = vmax.f32 %v2070_v43, 0.0 }
 0x379   : > { %v4974_v51 = vadd.f32 %v4973_v41, %v4972_v31  ;;  %v3289_v53 = vadd.f32 %v3288_v49, %v6476_v6  ;;  %v4901_v57 = vrot.slane %v4900_v46, 2  ;;  %v4116_v60 = vmax.f32 %v2072_v48, 0.0  ;;  %v2075_v61 = vpop.f32.mrb[68].mxu0 }
 0x37a   : > { %v4938_v55 = vrot.slane %v4937_v45, 2  ;;  %v4117_v59 = vmax.f32 %v3287_v47, 0.0  ;;  %v4865_v62 = vadd.f32 %v4864_v50, %v4863_v40  ;;  %v4979_v1 = vadd.f32 %v4115_v52, %v4111_v33  ;;  %v2077_v56 = vpop.f32.mrb[69].mxu0 }
 0x37b   : > { %v4975_v63 = vrot.slane %v4974_v51, 2  ;;  %v4118_v2 = vmax.f32 %v3289_v53, 0.0  ;;  %v3292_v7 = vpop.f32.mrb[68].mxu1  ;;  %v4902_v9 = vadd.f32 %v4901_v57, %v4900_v46  ;;  %v5016_v11 = vadd.f32 %v4116_v60, %v4112_v38 }
 0x37c   : > { %v4939_v8 = vadd.f32 %v4938_v55, %v4937_v45  ;;  %v5053_v10 = vadd.f32 %v4117_v59, %v4113_v37  ;;  %v3294_v12 = vpop.f32.mrb[69].mxu1  ;;  %v4866_v13 = vrot.slane %v4865_v62, 1  ;;  %v2076_v16 = vadd.f32 %v2075_v61, %v6470_v3 }
 0x37d   : > { %v4976_v14 = vadd.f32 %v4975_v63, %v4974_v51  ;;  %v5090_v15 = vadd.f32 %v4118_v2, %v4114_v42  ;;  %v4903_v18 = vrot.slane %v4902_v9, 1  ;;  %v3293_v19 = vadd.f32 %v3292_v7, %v6472_v4  ;;  %v2081_v21 = vpop.f32.mrb[70].mxu0 }
 0x37e   : > { %v4940_v17 = vrot.slane %v4939_v8, 1  ;;  %v2078_v20 = vadd.f32 %v2077_v56, %v6474_v5  ;;  %v4867_v22 = vadd.f32 %v4866_v13, %v4865_v62  ;;  %v4119_v24 = vmax.f32 %v2076_v16, 0.0  ;;  %v2083_v0 = vpop.f32.mrb[71].mxu0 }
 0x37f   : > { %v4977_v23 = vrot.slane %v4976_v14, 1  ;;  %v3295_v25 = vadd.f32 %v3294_v12, %v6476_v6  ;;  %v3298_v26 = vpop.f32.mrb[70].mxu1  ;;  %v4904_v28 = vadd.f32 %v4903_v18, %v4902_v9  ;;  %v4121_v29 = vmax.f32 %v3293_v19, 0.0 }
 0x380   : > { %v4941_v27 = vadd.f32 %v4940_v17, %v4939_v8  ;;  %v4120_v30 = vmax.f32 %v2078_v20, 0.0  ;;  %v3300_v31 = vpop.f32.mrb[71].mxu1  ;;  %v5144_v33 = vmul.f32 0.00390625, %v4867_v22  ;;  %v4980_v35 = vadd.f32 %v4979_v1, %v4119_v24 }
 0x381   : > { %v4978_v34 = vadd.f32 %v4977_v23, %v4976_v14  ;;  %v4122_v36 = vmax.f32 %v3295_v25, 0.0  ;;  %v5145_v38 = vmul.f32 0.00390625, %v4904_v28  ;;  %v5054_v39 = vadd.f32 %v5053_v10, %v4121_v29  ;;  %v2087_v41 = vpop.f32.mrb[72].mxu0 }
 0x382   : > { %v5146_v37 = vmul.f32 0.00390625, %v4941_v27  ;;  %v5017_v40 = vadd.f32 %v5016_v11, %v4120_v30  ;;  %v2082_v44 = vadd.f32 %v2081_v21, %v6470_v3  ;;  %v3299_v58 = vadd.f32 %v3298_v26, %v6472_v4  ;;  %v2089_v46 = vpop.f32.mrb[73].mxu0 }
 0x383   : > { %v5147_v42 = vmul.f32 0.00390625, %v4978_v34  ;;  %v5091_v43 = vadd.f32 %v5090_v15, %v4122_v36  ;;  %v3304_v45 = vpop.f32.mrb[72].mxu1  ;;  %v5272_v47 = vcombine.low %v5144_v33, %v5145_v38  ;;  %v2084_v48 = vadd.f32 %v2083_v0, %v6474_v5 }
 0x384   : > { %v3301_v49 = vadd.f32 %v3300_v31, %v6476_v6  ;;  %v2088_v50 = vadd.f32 %v2087_v41, %v6470_v3  ;;  %v3306_v51 = vpop.f32.mrb[73].mxu1  ;;  %v4123_v53 = vmax.f32 %v2082_v44, 0.0  ;;  %v4125_v55 = vmax.f32 %v3299_v58, 0.0 }
 0x385   : > { %v5273_v52 = vcombine.low %v5146_v37, %v5147_v42  ;;  %v3305_v57 = vadd.f32 %v3304_v45, %v6472_v4  ;;  %v5280_v59 = vrot.slane %v5272_v47, %v6831_v32  ;;  %v4124_v60 = vmax.f32 %v2084_v48, 0.0  ;;  %v2093_v63 = vpop.f32.mrb[74].mxu0 }
 0x386   : > { %v4126_v61 = vmax.f32 %v3301_v49, 0.0  ;;  %v4127_v62 = vmax.f32 %v2088_v50, 0.0  ;;  %v4981_v2 = vadd.f32 %v4980_v35, %v4123_v53  ;;  %v5055_v7 = vadd.f32 %v5054_v39, %v4125_v55  ;;  %v2095_v9 = vpop.f32.mrb[75].mxu0 }
 0x387   : > { %v5287_v1 = vrot.slane %v5273_v52, %v6831_v32  ;;  %v4129_v56 = vmax.f32 %v3305_v57, 0.0  ;;  %v3310_v8 = vpop.f32.mrb[74].mxu1  ;;  %v5018_v10 = vadd.f32 %v5017_v40, %v4124_v60  ;;  %v2090_v12 = vadd.f32 %v2089_v46, %v6474_v5 }
 0x388   : > { %v5092_v11 = vadd.f32 %v5091_v43, %v4126_v61  ;;  %v3307_v13 = vadd.f32 %v3306_v51, %v6476_v6  ;;  %v3312_v14 = vpop.f32.mrb[75].mxu1  ;;  %v4982_v16 = vadd.f32 %v4981_v2, %v4127_v62  ;;  %v2094_v18 = vadd.f32 %v2093_v63, %v6470_v3 }
 0x389   : > { %v5288_v15 = vcombine.low %v5280_v59, %v5287_v1  ;;  %v5056_v17 = vadd.f32 %v5055_v7, %v4129_v56  ;;  %v4128_v19 = vmax.f32 %v2090_v12, 0.0  ;;  %v3311_v21 = vadd.f32 %v3310_v8, %v6472_v4  ;;  %v2099_v23 = vpop.f32.mrb[76].mxu0 }
 0x38a   : > { %v4130_v20 = vmax.f32 %v3307_v13, 0.0  ;;  %v2096_v22 = vadd.f32 %v2095_v9, %v6474_v5  ;;  %v4131_v25 = vmax.f32 %v2094_v18, 0.0  ;;  %v3313_v26 = vadd.f32 %v3312_v14, %v6476_v6  ;;  %v2101_v28 = vpop.f32.mrb[77].mxu0 }
 0x38b   : > { %v5295_v24 = vrot.slane %v5288_v15, %v6831_v32  ;;  %v2100_v0 = vadd.f32 %v2099_v23, %v6470_v3  ;;  %v3316_v27 = vpop.f32.mrb[76].mxu1  ;;  %v5019_v29 = vadd.f32 %v5018_v10, %v4128_v19  ;;  %v4133_v31 = vmax.f32 %v3311_v21, 0.0 }
 0x38c   : > { %v5093_v30 = vadd.f32 %v5092_v11, %v4130_v20  ;;  %v4132_v33 = vmax.f32 %v2096_v22, 0.0  ;;  %v3318_v34 = vpop.f32.mrb[77].mxu1  ;;  %v4983_v35 = vadd.f32 %v4982_v16, %v4131_v25  ;;  %v4134_v36 = vmax.f32 %v3313_v26, 0.0 }
 0x38d   : > { %5334 = vst.msk [vmem:[%s6915_s18 + $0x10] sm:$0xf] %vm6873_vm2, %v5295_v24  ;;  %v4135_v37 = vmax.f32 %v2100_v0, 0.0  ;;  %v3317_v38 = vadd.f32 %v3316_v27, %v6472_v4  ;;  %v5057_v39 = vadd.f32 %v5056_v17, %v4133_v31  ;;  %v2102_v41 = vadd.f32 %v2101_v28, %v6474_v5  ;;  %v2105_v43 = vpop.f32.mrb[78].mxu0 }
 0x38e   : > { %v5020_v40 = vadd.f32 %v5019_v29, %v4132_v33  ;;  %v3319_v42 = vadd.f32 %v3318_v34, %v6476_v6  ;;  %v5094_v44 = vadd.f32 %v5093_v30, %v4134_v36  ;;  %v2106_v46 = vadd.f32 %v2105_v43, %v6470_v3  ;;  %v2107_v48 = vpop.f32.mrb[79].mxu0 }
 0x38f   : > { %v4984_v58 = vadd.f32 %v4983_v35, %v4135_v37  ;;  %v4137_v45 = vmax.f32 %v3317_v38, 0.0  ;;  %v3322_v47 = vpop.f32.mrb[78].mxu1  ;;  %v4136_v49 = vmax.f32 %v2102_v41, 0.0  ;;  %v2108_v52 = vadd.f32 %v2107_v48, %v6474_v5 }
 0x390   : > { %v4138_v50 = vmax.f32 %v3319_v42, 0.0  ;;  %v3323_v51 = vadd.f32 %v3322_v47, %v6472_v4  ;;  %v3324_v53 = vpop.f32.mrb[79].mxu1  ;;  %v4139_v57 = vmax.f32 %v2106_v46, 0.0 }
 0x391   : > { %v5058_v55 = vadd.f32 %v5057_v39, %v4137_v45  ;;  %v3325_v59 = vadd.f32 %v3324_v53, %v6476_v6  ;;  %v5021_v60 = vadd.f32 %v5020_v40, %v4136_v49  ;;  %v4140_v63 = vmax.f32 %v2108_v52, 0.0  ;;  %v2111_v1 = vpop.f32.mrb[80].mxu0 }
 0x392   : > { %v5095_v61 = vadd.f32 %v5094_v44, %v4138_v50  ;;  %v4141_v62 = vmax.f32 %v3323_v51, 0.0  ;;  %v4985_v2 = vadd.f32 %v4984_v58, %v4139_v57  ;;  %v2112_v56 = vadd.f32 %v2111_v1, %v6470_v3  ;;  %v2113_v9 = vpop.f32.mrb[81].mxu0 }
 0x393   : > { %v4142_v7 = vmax.f32 %v3325_v59, 0.0  ;;  %v3328_v8 = vpop.f32.mrb[80].mxu1  ;;  %v5022_v11 = vadd.f32 %v5021_v60, %v4140_v63  ;;  %v2114_v13 = vadd.f32 %v2113_v9, %v6474_v5 }
 0x394   : > { %v5059_v10 = vadd.f32 %v5058_v55, %v4141_v62  ;;  %v3329_v12 = vadd.f32 %v3328_v8, %v6472_v4  ;;  %v3330_v14 = vpop.f32.mrb[81].mxu1  ;;  %v4143_v16 = vmax.f32 %v2112_v56, 0.0 }
 0x395   : > { %v5096_v15 = vadd.f32 %v5095_v61, %v4142_v7  ;;  %v3331_v17 = vadd.f32 %v3330_v14, %v6476_v6  ;;  %v4144_v19 = vmax.f32 %v2114_v13, 0.0  ;;  %v2117_v20 = vpop.f32.mrb[82].mxu0 }
 0x396   : > { %v4145_v18 = vmax.f32 %v3329_v12, 0.0  ;;  %v4986_v21 = vadd.f32 %v4985_v2, %v4143_v16  ;;  %v2118_v23 = vadd.f32 %v2117_v20, %v6470_v3  ;;  %v2119_v25 = vpop.f32.mrb[83].mxu0 }
 0x397   : > { %v4146_v22 = vmax.f32 %v3331_v17, 0.0  ;;  %v3334_v24 = vpop.f32.mrb[82].mxu1  ;;  %v5023_v0 = vadd.f32 %v5022_v11, %v4144_v19  ;;  %v2120_v28 = vadd.f32 %v2119_v25, %v6474_v5 }
 0x398   : > { %v5060_v26 = vadd.f32 %v5059_v10, %v4145_v18  ;;  %v3335_v27 = vadd.f32 %v3334_v24, %v6472_v4  ;;  %v3336_v29 = vpop.f32.mrb[83].mxu1  ;;  %v4147_v31 = vmax.f32 %v2118_v23, 0.0 }
 0x399   : > { %v5097_v30 = vadd.f32 %v5096_v15, %v4146_v22  ;;  %v3337_v33 = vadd.f32 %v3336_v29, %v6476_v6  ;;  %v4148_v35 = vmax.f32 %v2120_v28, 0.0  ;;  %v2123_v36 = vpop.f32.mrb[84].mxu0 }
 0x39a   : > { %v4149_v34 = vmax.f32 %v3335_v27, 0.0  ;;  %v4987_v37 = vadd.f32 %v4986_v21, %v4147_v31  ;;  %v2124_v39 = vadd.f32 %v2123_v36, %v6470_v3  ;;  %v2125_v41 = vpop.f32.mrb[85].mxu0 }
 0x39b   : > { %v4150_v38 = vmax.f32 %v3337_v33, 0.0  ;;  %v3340_v40 = vpop.f32.mrb[84].mxu1  ;;  %v5024_v43 = vadd.f32 %v5023_v0, %v4148_v35  ;;  %v2126_v58 = vadd.f32 %v2125_v41, %v6474_v5 }
 0x39c   : > { %v5061_v42 = vadd.f32 %v5060_v26, %v4149_v34  ;;  %v3341_v44 = vadd.f32 %v3340_v40, %v6472_v4  ;;  %v3342_v45 = vpop.f32.mrb[85].mxu1  ;;  %v4151_v47 = vmax.f32 %v2124_v39, 0.0 }
 0x39d   : > { %v5098_v46 = vadd.f32 %v5097_v30, %v4150_v38  ;;  %v3343_v48 = vadd.f32 %v3342_v45, %v6476_v6  ;;  %v4152_v50 = vmax.f32 %v2126_v58, 0.0  ;;  %v2129_v51 = vpop.f32.mrb[86].mxu0 }
 0x39e   : > { %v4153_v49 = vmax.f32 %v3341_v44, 0.0  ;;  %v4988_v52 = vadd.f32 %v4987_v37, %v4151_v47  ;;  %v2130_v55 = vadd.f32 %v2129_v51, %v6470_v3  ;;  %v2131_v59 = vpop.f32.mrb[87].mxu0 }
 0x39f   : > { %v4154_v53 = vmax.f32 %v3343_v48, 0.0  ;;  %v3346_v57 = vpop.f32.mrb[86].mxu1  ;;  %v5025_v61 = vadd.f32 %v5024_v43, %v4152_v50  ;;  %v2132_v63 = vadd.f32 %v2131_v59, %v6474_v5 }
 0x3a0   : > { %v5062_v60 = vadd.f32 %v5061_v42, %v4153_v49  ;;  %v3347_v62 = vadd.f32 %v3346_v57, %v6472_v4  ;;  %v3348_v1 = vpop.f32.mrb[87].mxu1  ;;  %v4155_v7 = vmax.f32 %v2130_v55, 0.0 }
 0x3a1   : > { %v5099_v2 = vadd.f32 %v5098_v46, %v4154_v53  ;;  %v3349_v56 = vadd.f32 %v3348_v1, %v6476_v6  ;;  %v4156_v9 = vmax.f32 %v2132_v63, 0.0  ;;  %v2135_v10 = vpop.f32.mrb[88].mxu0 }
 0x3a2   : > { %v4157_v8 = vmax.f32 %v3347_v62, 0.0  ;;  %v4989_v11 = vadd.f32 %v4988_v52, %v4155_v7  ;;  %v2136_v13 = vadd.f32 %v2135_v10, %v6470_v3  ;;  %v2137_v15 = vpop.f32.mrb[89].mxu0 }
 0x3a3   : > { %v4158_v12 = vmax.f32 %v3349_v56, 0.0  ;;  %v3352_v14 = vpop.f32.mrb[88].mxu1  ;;  %v5026_v17 = vadd.f32 %v5025_v61, %v4156_v9  ;;  %v2138_v19 = vadd.f32 %v2137_v15, %v6474_v5 }
 0x3a4   : > { %v5063_v16 = vadd.f32 %v5062_v60, %v4157_v8  ;;  %v3353_v18 = vadd.f32 %v3352_v14, %v6472_v4  ;;  %v3354_v20 = vpop.f32.mrb[89].mxu1  ;;  %v4159_v22 = vmax.f32 %v2136_v13, 0.0 }
 0x3a5   : > { %v5100_v21 = vadd.f32 %v5099_v2, %v4158_v12  ;;  %v3355_v23 = vadd.f32 %v3354_v20, %v6476_v6  ;;  %v4160_v25 = vmax.f32 %v2138_v19, 0.0  ;;  %v2141_v26 = vpop.f32.mrb[90].mxu0 }
 0x3a6   : > { %v4161_v24 = vmax.f32 %v3353_v18, 0.0  ;;  %v4990_v0 = vadd.f32 %v4989_v11, %v4159_v22  ;;  %v2142_v28 = vadd.f32 %v2141_v26, %v6470_v3  ;;  %v2143_v30 = vpop.f32.mrb[91].mxu0 }
 0x3a7   : > { %v4162_v27 = vmax.f32 %v3355_v23, 0.0  ;;  %v3358_v29 = vpop.f32.mrb[90].mxu1  ;;  %v5027_v33 = vadd.f32 %v5026_v17, %v4160_v25  ;;  %v2144_v35 = vadd.f32 %v2143_v30, %v6474_v5 }
 0x3a8   : > { %v5064_v31 = vadd.f32 %v5063_v16, %v4161_v24  ;;  %v3359_v34 = vadd.f32 %v3358_v29, %v6472_v4  ;;  %v3360_v36 = vpop.f32.mrb[91].mxu1  ;;  %v4163_v38 = vmax.f32 %v2142_v28, 0.0 }
 0x3a9   : > { %v5101_v37 = vadd.f32 %v5100_v21, %v4162_v27  ;;  %v3361_v39 = vadd.f32 %v3360_v36, %v6476_v6  ;;  %v4164_v41 = vmax.f32 %v2144_v35, 0.0  ;;  %v2147_v42 = vpop.f32.mrb[92].mxu0 }
 0x3aa   : > { %v4165_v40 = vmax.f32 %v3359_v34, 0.0  ;;  %v4991_v43 = vadd.f32 %v4990_v0, %v4163_v38  ;;  %v2148_v58 = vadd.f32 %v2147_v42, %v6470_v3  ;;  %v2149_v46 = vpop.f32.mrb[93].mxu0 }
 0x3ab   : > { %v4166_v44 = vmax.f32 %v3361_v39, 0.0  ;;  %v3364_v45 = vpop.f32.mrb[92].mxu1  ;;  %v5028_v48 = vadd.f32 %v5027_v33, %v4164_v41  ;;  %v2150_v50 = vadd.f32 %v2149_v46, %v6474_v5 }
 0x3ac   : > { %v5065_v47 = vadd.f32 %v5064_v31, %v4165_v40  ;;  %v3365_v49 = vadd.f32 %v3364_v45, %v6472_v4  ;;  %v3366_v51 = vpop.f32.mrb[93].mxu1  ;;  %v4167_v53 = vmax.f32 %v2148_v58, 0.0 }
 0x3ad   : > { %v5102_v52 = vadd.f32 %v5101_v37, %v4166_v44  ;;  %v3367_v55 = vadd.f32 %v3366_v51, %v6476_v6  ;;  %v4168_v59 = vmax.f32 %v2150_v50, 0.0  ;;  %v2153_v60 = vpop.f32.mrb[94].mxu0 }
 0x3ae   : > { %v4169_v57 = vmax.f32 %v3365_v49, 0.0  ;;  %v4992_v61 = vadd.f32 %v4991_v43, %v4167_v53  ;;  %v2154_v63 = vadd.f32 %v2153_v60, %v6470_v3  ;;  %v2155_v2 = vpop.f32.mrb[95].mxu0 }
 0x3af   : > { %v4170_v62 = vmax.f32 %v3367_v55, 0.0  ;;  %v3370_v1 = vpop.f32.mrb[94].mxu1  ;;  %v5029_v56 = vadd.f32 %v5028_v48, %v4168_v59  ;;  %v2156_v9 = vadd.f32 %v2155_v2, %v6474_v5 }
 0x3b0   : > { %v5066_v7 = vadd.f32 %v5065_v47, %v4169_v57  ;;  %v3371_v8 = vadd.f32 %v3370_v1, %v6472_v4  ;;  %v3372_v10 = vpop.f32.mrb[95].mxu1  ;;  %v4171_v12 = vmax.f32 %v2154_v63, 0.0 }
 0x3b1   : > { %v5103_v11 = vadd.f32 %v5102_v52, %v4170_v62  ;;  %v3373_v13 = vadd.f32 %v3372_v10, %v6476_v6  ;;  %v4172_v15 = vmax.f32 %v2156_v9, 0.0  ;;  %v2159_v16 = vpop.f32.mrb[96].mxu0 }
 0x3b2   : > { %v4173_v14 = vmax.f32 %v3371_v8, 0.0  ;;  %v4993_v17 = vadd.f32 %v4992_v61, %v4171_v12  ;;  %v2160_v19 = vadd.f32 %v2159_v16, %v6470_v3  ;;  %v2161_v21 = vpop.f32.mrb[97].mxu0 }
 0x3b3   : > { %v4174_v18 = vmax.f32 %v3373_v13, 0.0  ;;  %v3376_v20 = vpop.f32.mrb[96].mxu1  ;;  %v5030_v23 = vadd.f32 %v5029_v56, %v4172_v15  ;;  %v2162_v25 = vadd.f32 %v2161_v21, %v6474_v5 }
 0x3b4   : > { %v5067_v22 = vadd.f32 %v5066_v7, %v4173_v14  ;;  %v3377_v24 = vadd.f32 %v3376_v20, %v6472_v4  ;;  %v3378_v26 = vpop.f32.mrb[97].mxu1  ;;  %v4175_v27 = vmax.f32 %v2160_v19, 0.0 }
 0x3b5   : > { %v5104_v0 = vadd.f32 %v5103_v11, %v4174_v18  ;;  %v3379_v28 = vadd.f32 %v3378_v26, %v6476_v6  ;;  %v4176_v30 = vmax.f32 %v2162_v25, 0.0  ;;  %v2165_v31 = vpop.f32.mrb[98].mxu0 }
 0x3b6   : > { %v4177_v29 = vmax.f32 %v3377_v24, 0.0  ;;  %v4994_v33 = vadd.f32 %v4993_v17, %v4175_v27  ;;  %v2166_v35 = vadd.f32 %v2165_v31, %v6470_v3  ;;  %v2167_v37 = vpop.f32.mrb[99].mxu0 }
 0x3b7   : > { %v4178_v34 = vmax.f32 %v3379_v28, 0.0  ;;  %v3382_v36 = vpop.f32.mrb[98].mxu1  ;;  %v5031_v39 = vadd.f32 %v5030_v23, %v4176_v30  ;;  %v2168_v41 = vadd.f32 %v2167_v37, %v6474_v5 }
 0x3b8   : > { %v5068_v38 = vadd.f32 %v5067_v22, %v4177_v29  ;;  %v3383_v40 = vadd.f32 %v3382_v36, %v6472_v4  ;;  %v3384_v42 = vpop.f32.mrb[99].mxu1  ;;  %v4179_v44 = vmax.f32 %v2166_v35, 0.0 }
 0x3b9   : > { %v5105_v43 = vadd.f32 %v5104_v0, %v4178_v34  ;;  %v3385_v58 = vadd.f32 %v3384_v42, %v6476_v6  ;;  %v4180_v46 = vmax.f32 %v2168_v41, 0.0  ;;  %v2171_v47 = vpop.f32.mrb[100].mxu0 }
 0x3ba   : > { %v4181_v45 = vmax.f32 %v3383_v40, 0.0  ;;  %v4995_v48 = vadd.f32 %v4994_v33, %v4179_v44  ;;  %v2172_v50 = vadd.f32 %v2171_v47, %v6470_v3  ;;  %v2173_v52 = vpop.f32.mrb[101].mxu0 }
 0x3bb   : > { %v4182_v49 = vmax.f32 %v3385_v58, 0.0  ;;  %v3388_v51 = vpop.f32.mrb[100].mxu1  ;;  %v5032_v55 = vadd.f32 %v5031_v39, %v4180_v46  ;;  %v2174_v59 = vadd.f32 %v2173_v52, %v6474_v5 }
 0x3bc   : > { %v5069_v53 = vadd.f32 %v5068_v38, %v4181_v45  ;;  %v3389_v57 = vadd.f32 %v3388_v51, %v6472_v4  ;;  %v3390_v60 = vpop.f32.mrb[101].mxu1  ;;  %v4183_v62 = vmax.f32 %v2172_v50, 0.0 }
 0x3bd   : > { %v5106_v61 = vadd.f32 %v5105_v43, %v4182_v49  ;;  %v3391_v63 = vadd.f32 %v3390_v60, %v6476_v6  ;;  %v4184_v2 = vmax.f32 %v2174_v59, 0.0  ;;  %v2177_v7 = vpop.f32.mrb[102].mxu0 }
 0x3be   : > { %v4185_v1 = vmax.f32 %v3389_v57, 0.0  ;;  %v4996_v56 = vadd.f32 %v4995_v48, %v4183_v62  ;;  %v2178_v9 = vadd.f32 %v2177_v7, %v6470_v3  ;;  %v2179_v11 = vpop.f32.mrb[103].mxu0 }
 0x3bf   : > { %v4186_v8 = vmax.f32 %v3391_v63, 0.0  ;;  %v3394_v10 = vpop.f32.mrb[102].mxu1  ;;  %v5033_v13 = vadd.f32 %v5032_v55, %v4184_v2  ;;  %v2180_v15 = vadd.f32 %v2179_v11, %v6474_v5 }
 0x3c0   : > { %v5070_v12 = vadd.f32 %v5069_v53, %v4185_v1  ;;  %v3395_v14 = vadd.f32 %v3394_v10, %v6472_v4  ;;  %v3396_v16 = vpop.f32.mrb[103].mxu1  ;;  %v4187_v18 = vmax.f32 %v2178_v9, 0.0 }
 0x3c1   : > { %v5107_v17 = vadd.f32 %v5106_v61, %v4186_v8  ;;  %v3397_v19 = vadd.f32 %v3396_v16, %v6476_v6  ;;  %v4188_v21 = vmax.f32 %v2180_v15, 0.0  ;;  %v2183_v22 = vpop.f32.mrb[104].mxu0 }
 0x3c2   : > { %v4189_v20 = vmax.f32 %v3395_v14, 0.0  ;;  %v4997_v23 = vadd.f32 %v4996_v56, %v4187_v18  ;;  %v2184_v25 = vadd.f32 %v2183_v22, %v6470_v3  ;;  %v2185_v0 = vpop.f32.mrb[105].mxu0 }
 0x3c3   : > { %v4190_v24 = vmax.f32 %v3397_v19, 0.0  ;;  %v3400_v26 = vpop.f32.mrb[104].mxu1  ;;  %v5034_v28 = vadd.f32 %v5033_v13, %v4188_v21  ;;  %v2186_v30 = vadd.f32 %v2185_v0, %v6474_v5 }
 0x3c4   : > { %v5071_v27 = vadd.f32 %v5070_v12, %v4189_v20  ;;  %v3401_v29 = vadd.f32 %v3400_v26, %v6472_v4  ;;  %v3402_v31 = vpop.f32.mrb[105].mxu1  ;;  %v4191_v34 = vmax.f32 %v2184_v25, 0.0 }
 0x3c5   : > { %v5108_v33 = vadd.f32 %v5107_v17, %v4190_v24  ;;  %v3403_v35 = vadd.f32 %v3402_v31, %v6476_v6  ;;  %v4192_v37 = vmax.f32 %v2186_v30, 0.0  ;;  %v2189_v38 = vpop.f32.mrb[106].mxu0 }
 0x3c6   : > { %v4193_v36 = vmax.f32 %v3401_v29, 0.0  ;;  %v4998_v39 = vadd.f32 %v4997_v23, %v4191_v34  ;;  %v2190_v41 = vadd.f32 %v2189_v38, %v6470_v3  ;;  %v2191_v43 = vpop.f32.mrb[107].mxu0 }
 0x3c7   : > { %v4194_v40 = vmax.f32 %v3403_v35, 0.0  ;;  %v3406_v42 = vpop.f32.mrb[106].mxu1  ;;  %v5035_v58 = vadd.f32 %v5034_v28, %v4192_v37  ;;  %v2192_v46 = vadd.f32 %v2191_v43, %v6474_v5 }
 0x3c8   : > { %v5072_v44 = vadd.f32 %v5071_v27, %v4193_v36  ;;  %v3407_v45 = vadd.f32 %v3406_v42, %v6472_v4  ;;  %v3408_v47 = vpop.f32.mrb[107].mxu1  ;;  %v4195_v49 = vmax.f32 %v2190_v41, 0.0 }
 0x3c9   : > { %v5109_v48 = vadd.f32 %v5108_v33, %v4194_v40  ;;  %v3409_v50 = vadd.f32 %v3408_v47, %v6476_v6  ;;  %v4196_v52 = vmax.f32 %v2192_v46, 0.0  ;;  %v2195_v53 = vpop.f32.mrb[108].mxu0 }
 0x3ca   : > { %v4197_v51 = vmax.f32 %v3407_v45, 0.0  ;;  %v4999_v55 = vadd.f32 %v4998_v39, %v4195_v49  ;;  %v2196_v59 = vadd.f32 %v2195_v53, %v6470_v3  ;;  %v2197_v61 = vpop.f32.mrb[109].mxu0 }
 0x3cb   : > { %v4198_v57 = vmax.f32 %v3409_v50, 0.0  ;;  %v3412_v60 = vpop.f32.mrb[108].mxu1  ;;  %v5036_v63 = vadd.f32 %v5035_v58, %v4196_v52  ;;  %v2198_v2 = vadd.f32 %v2197_v61, %v6474_v5 }
 0x3cc   : > { %v5073_v62 = vadd.f32 %v5072_v44, %v4197_v51  ;;  %v3413_v1 = vadd.f32 %v3412_v60, %v6472_v4  ;;  %v3414_v7 = vpop.f32.mrb[109].mxu1  ;;  %v4199_v8 = vmax.f32 %v2196_v59, 0.0 }
 0x3cd   : > { %v5110_v56 = vadd.f32 %v5109_v48, %v4198_v57  ;;  %v3415_v9 = vadd.f32 %v3414_v7, %v6476_v6  ;;  %v4200_v11 = vmax.f32 %v2198_v2, 0.0  ;;  %v2201_v12 = vpop.f32.mrb[110].mxu0 }
 0x3ce   : > { %v4201_v10 = vmax.f32 %v3413_v1, 0.0  ;;  %v5000_v13 = vadd.f32 %v4999_v55, %v4199_v8  ;;  %v2202_v15 = vadd.f32 %v2201_v12, %v6470_v3  ;;  %v2203_v17 = vpop.f32.mrb[111].mxu0 }
 0x3cf   : > { %v4202_v14 = vmax.f32 %v3415_v9, 0.0  ;;  %v3418_v16 = vpop.f32.mrb[110].mxu1  ;;  %v5037_v19 = vadd.f32 %v5036_v63, %v4200_v11  ;;  %v2204_v21 = vadd.f32 %v2203_v17, %v6474_v5 }
 0x3d0   : > { %v5074_v18 = vadd.f32 %v5073_v62, %v4201_v10  ;;  %v3419_v20 = vadd.f32 %v3418_v16, %v6472_v4  ;;  %v3420_v22 = vpop.f32.mrb[111].mxu1  ;;  %v4203_v24 = vmax.f32 %v2202_v15, 0.0 }
 0x3d1   : > { %v5111_v23 = vadd.f32 %v5110_v56, %v4202_v14  ;;  %v3421_v25 = vadd.f32 %v3420_v22, %v6476_v6  ;;  %v4204_v0 = vmax.f32 %v2204_v21, 0.0  ;;  %v2207_v27 = vpop.f32.mrb[112].mxu0 }
 0x3d2   : > { %v4205_v26 = vmax.f32 %v3419_v20, 0.0  ;;  %v5001_v28 = vadd.f32 %v5000_v13, %v4203_v24  ;;  %v2208_v30 = vadd.f32 %v2207_v27, %v6470_v3  ;;  %v2209_v33 = vpop.f32.mrb[113].mxu0 }
 0x3d3   : > { %v4206_v29 = vmax.f32 %v3421_v25, 0.0  ;;  %v3424_v31 = vpop.f32.mrb[112].mxu1  ;;  %v5038_v35 = vadd.f32 %v5037_v19, %v4204_v0  ;;  %v2210_v37 = vadd.f32 %v2209_v33, %v6474_v5 }
 0x3d4   : > { %v5075_v34 = vadd.f32 %v5074_v18, %v4205_v26  ;;  %v3425_v36 = vadd.f32 %v3424_v31, %v6472_v4  ;;  %v3426_v38 = vpop.f32.mrb[113].mxu1  ;;  %v4207_v40 = vmax.f32 %v2208_v30, 0.0 }
 0x3d5   : > { %v5112_v39 = vadd.f32 %v5111_v23, %v4206_v29  ;;  %v3427_v41 = vadd.f32 %v3426_v38, %v6476_v6  ;;  %v4208_v43 = vmax.f32 %v2210_v37, 0.0  ;;  %v2213_v44 = vpop.f32.mrb[114].mxu0 }
 0x3d6   : > { %v4209_v42 = vmax.f32 %v3425_v36, 0.0  ;;  %v5002_v58 = vadd.f32 %v5001_v28, %v4207_v40  ;;  %v2214_v46 = vadd.f32 %v2213_v44, %v6470_v3  ;;  %v2215_v48 = vpop.f32.mrb[115].mxu0 }
 0x3d7   : > { %v4210_v45 = vmax.f32 %v3427_v41, 0.0  ;;  %v3430_v47 = vpop.f32.mrb[114].mxu1  ;;  %v5039_v50 = vadd.f32 %v5038_v35, %v4208_v43  ;;  %v2216_v52 = vadd.f32 %v2215_v48, %v6474_v5 }
 0x3d8   : > { %v5076_v49 = vadd.f32 %v5075_v34, %v4209_v42  ;;  %v3431_v51 = vadd.f32 %v3430_v47, %v6472_v4  ;;  %v3432_v53 = vpop.f32.mrb[115].mxu1  ;;  %v4211_v57 = vmax.f32 %v2214_v46, 0.0 }
 0x3d9   : > { %v5113_v55 = vadd.f32 %v5112_v39, %v4210_v45  ;;  %v3433_v59 = vadd.f32 %v3432_v53, %v6476_v6  ;;  %v4212_v61 = vmax.f32 %v2216_v52, 0.0  ;;  %v2219_v62 = vpop.f32.mrb[116].mxu0 }
 0x3da   : > { %v4213_v60 = vmax.f32 %v3431_v51, 0.0  ;;  %v5003_v63 = vadd.f32 %v5002_v58, %v4211_v57  ;;  %v2220_v2 = vadd.f32 %v2219_v62, %v6470_v3  ;;  %v2221_v56 = vpop.f32.mrb[117].mxu0 }
 0x3db   : > { %v4214_v1 = vmax.f32 %v3433_v59, 0.0  ;;  %v3436_v7 = vpop.f32.mrb[116].mxu1  ;;  %v5040_v9 = vadd.f32 %v5039_v50, %v4212_v61  ;;  %v2222_v11 = vadd.f32 %v2221_v56, %v6474_v5 }
 0x3dc   : > { %v5077_v8 = vadd.f32 %v5076_v49, %v4213_v60  ;;  %v3437_v10 = vadd.f32 %v3436_v7, %v6472_v4  ;;  %v3438_v12 = vpop.f32.mrb[117].mxu1  ;;  %v4215_v14 = vmax.f32 %v2220_v2, 0.0 }
 0x3dd   : > { %v5114_v13 = vadd.f32 %v5113_v55, %v4214_v1  ;;  %v3439_v15 = vadd.f32 %v3438_v12, %v6476_v6  ;;  %v4216_v17 = vmax.f32 %v2222_v11, 0.0  ;;  %v2225_v18 = vpop.f32.mrb[118].mxu0 }
 0x3de   : > { %v4217_v16 = vmax.f32 %v3437_v10, 0.0  ;;  %v5004_v19 = vadd.f32 %v5003_v63, %v4215_v14  ;;  %v2226_v21 = vadd.f32 %v2225_v18, %v6470_v3  ;;  %v2227_v23 = vpop.f32.mrb[119].mxu0 }
 0x3df   : > { %v4218_v20 = vmax.f32 %v3439_v15, 0.0  ;;  %v3442_v22 = vpop.f32.mrb[118].mxu1  ;;  %v5041_v25 = vadd.f32 %v5040_v9, %v4216_v17  ;;  %v2228_v0 = vadd.f32 %v2227_v23, %v6474_v5 }
 0x3e0   : > { %v5078_v24 = vadd.f32 %v5077_v8, %v4217_v16  ;;  %v3443_v26 = vadd.f32 %v3442_v22, %v6472_v4  ;;  %v3444_v27 = vpop.f32.mrb[119].mxu1  ;;  %v4219_v29 = vmax.f32 %v2226_v21, 0.0 }
 0x3e1   : > { %v5115_v28 = vadd.f32 %v5114_v13, %v4218_v20  ;;  %v3445_v30 = vadd.f32 %v3444_v27, %v6476_v6  ;;  %v4220_v33 = vmax.f32 %v2228_v0, 0.0  ;;  %v2231_v34 = vpop.f32.mrb[120].mxu0 }
 0x3e2   : > { %v4221_v31 = vmax.f32 %v3443_v26, 0.0  ;;  %v5005_v35 = vadd.f32 %v5004_v19, %v4219_v29  ;;  %v2232_v37 = vadd.f32 %v2231_v34, %v6470_v3  ;;  %v2233_v39 = vpop.f32.mrb[121].mxu0 }
 0x3e3   : > { %v4222_v36 = vmax.f32 %v3445_v30, 0.0  ;;  %v3448_v38 = vpop.f32.mrb[120].mxu1  ;;  %v5042_v41 = vadd.f32 %v5041_v25, %v4220_v33  ;;  %v2234_v43 = vadd.f32 %v2233_v39, %v6474_v5 }
 0x3e4   : > { %v5079_v40 = vadd.f32 %v5078_v24, %v4221_v31  ;;  %v3449_v42 = vadd.f32 %v3448_v38, %v6472_v4  ;;  %v3450_v44 = vpop.f32.mrb[121].mxu1  ;;  %v4223_v45 = vmax.f32 %v2232_v37, 0.0 }
 0x3e5   : > { %v5116_v58 = vadd.f32 %v5115_v28, %v4222_v36  ;;  %v3451_v46 = vadd.f32 %v3450_v44, %v6476_v6  ;;  %v4224_v48 = vmax.f32 %v2234_v43, 0.0  ;;  %v2237_v49 = vpop.f32.mrb[122].mxu0 }
 0x3e6   : > { %v4225_v47 = vmax.f32 %v3449_v42, 0.0  ;;  %v5006_v50 = vadd.f32 %v5005_v35, %v4223_v45  ;;  %v2238_v52 = vadd.f32 %v2237_v49, %v6470_v3  ;;  %v2239_v55 = vpop.f32.mrb[123].mxu0 }
 0x3e7   : > { %v4226_v51 = vmax.f32 %v3451_v46, 0.0  ;;  %v3454_v53 = vpop.f32.mrb[122].mxu1  ;;  %v5043_v59 = vadd.f32 %v5042_v41, %v4224_v48  ;;  %v2240_v61 = vadd.f32 %v2239_v55, %v6474_v5 }
 0x3e8   : > { %v5080_v57 = vadd.f32 %v5079_v40, %v4225_v47  ;;  %v3455_v60 = vadd.f32 %v3454_v53, %v6472_v4  ;;  %v3456_v62 = vpop.f32.mrb[123].mxu1  ;;  %v4227_v1 = vmax.f32 %v2238_v52, 0.0 }
 0x3e9   : > { %v5117_v63 = vadd.f32 %v5116_v58, %v4226_v51  ;;  %v3457_v2 = vadd.f32 %v3456_v62, %v6476_v6  ;;  %v4228_v56 = vmax.f32 %v2240_v61, 0.0  ;;  %v2243_v8 = vpop.f32.mrb[124].mxu0 }
 0x3ea   : > { %v4229_v7 = vmax.f32 %v3455_v60, 0.0  ;;  %v5007_v9 = vadd.f32 %v5006_v50, %v4227_v1  ;;  %v2244_v11 = vadd.f32 %v2243_v8, %v6470_v3  ;;  %v2245_v13 = vpop.f32.mrb[125].mxu0 }
 0x3eb   : > { %v4230_v10 = vmax.f32 %v3457_v2, 0.0  ;;  %v3460_v12 = vpop.f32.mrb[124].mxu1  ;;  %v5044_v15 = vadd.f32 %v5043_v59, %v4228_v56  ;;  %v2246_v17 = vadd.f32 %v2245_v13, %v6474_v5 }
 0x3ec   : > { %v5081_v14 = vadd.f32 %v5080_v57, %v4229_v7  ;;  %v3461_v16 = vadd.f32 %v3460_v12, %v6472_v4  ;;  %v3462_v18 = vpop.f32.mrb[125].mxu1  ;;  %v4231_v20 = vmax.f32 %v2244_v11, 0.0 }
 0x3ed   : > { %v5118_v19 = vadd.f32 %v5117_v63, %v4230_v10  ;;  %v3463_v21 = vadd.f32 %v3462_v18, %v6476_v6  ;;  %v4232_v23 = vmax.f32 %v2246_v17, 0.0  ;;  %v2249_v24 = vpop.f32.mrb[126].mxu0 }
 0x3ee   : > { %v4233_v22 = vmax.f32 %v3461_v16, 0.0  ;;  %v5008_v25 = vadd.f32 %v5007_v9, %v4231_v20  ;;  %v2250_v0 = vadd.f32 %v2249_v24, %v6470_v3  ;;  %v2251_v28 = vpop.f32.mrb[127].mxu0 }
 0x3ef   : > { %v4234_v26 = vmax.f32 %v3463_v21, 0.0  ;;  %v3466_v27 = vpop.f32.mrb[126].mxu1  ;;  %v5045_v30 = vadd.f32 %v5044_v15, %v4232_v23  ;;  %v2252_v33 = vadd.f32 %v2251_v28, %v6474_v5 }
 0x3f0   : > { %v5082_v29 = vadd.f32 %v5081_v14, %v4233_v22  ;;  %v3467_v31 = vadd.f32 %v3466_v27, %v6472_v4  ;;  %v3468_v34 = vpop.f32.mrb[127].mxu1  ;;  %v4235_v36 = vmax.f32 %v2250_v0, 0.0 }
 0x3f1   : > { %v5119_v35 = vadd.f32 %v5118_v19, %v4234_v26  ;;  %v3469_v37 = vadd.f32 %v3468_v34, %v6476_v6  ;;  %v4236_v39 = vmax.f32 %v2252_v33, 0.0 }
 0x3f2   : > { %v4237_v38 = vmax.f32 %v3467_v31, 0.0  ;;  %v5009_v40 = vadd.f32 %v5008_v25, %v4235_v36 }
 0x3f3   : > { %v4238_v41 = vmax.f32 %v3469_v37, 0.0  ;;  %v5046_v43 = vadd.f32 %v5045_v30, %v4236_v39 }
 0x3f4   : > { %v5083_v42 = vadd.f32 %v5082_v29, %v4237_v38  ;;  %v5010_v3 = vrot.slane %v5009_v40, 4 }
 0x3f5   : > { %v5120_v44 = vadd.f32 %v5119_v35, %v4238_v41  ;;  %v5047_v45 = vrot.slane %v5046_v43, 4 }
 0x3f6   : > { %v5084_v58 = vrot.slane %v5083_v42, 4  ;;  %v5011_v46 = vadd.f32 %v5010_v3, %v5009_v40 }
 0x3f7   : > { %v5121_v47 = vrot.slane %v5120_v44, 4  ;;  %v5048_v48 = vadd.f32 %v5047_v45, %v5046_v43 }
 0x3f8   : > { %v5085_v4 = vadd.f32 %v5084_v58, %v5083_v42  ;;  %v5012_v5 = vrot.slane %v5011_v46, 2 }
 0x3f9   : > { %v5122_v49 = vadd.f32 %v5121_v47, %v5120_v44  ;;  %v5049_v51 = vrot.slane %v5048_v48, 2 }
 0x3fa   : > { %v5086_v50 = vrot.slane %v5085_v4, 2  ;;  %v5013_v52 = vadd.f32 %v5012_v5, %v5011_v46 }
 0x3fb   : > { %v5123_v6 = vrot.slane %v5122_v49, 2  ;;  %v5050_v55 = vadd.f32 %v5049_v51, %v5048_v48 }
 0x3fc   : > { %v5087_v53 = vadd.f32 %v5086_v50, %v5085_v4  ;;  %v5014_v57 = vrot.slane %v5013_v52, 1 }
 0x3fd   : > { %v5124_v59 = vadd.f32 %v5123_v6, %v5122_v49  ;;  %v5051_v61 = vrot.slane %v5050_v55, 1 }
 0x3fe   : > { %v5088_v60 = vrot.slane %v5087_v53, 1  ;;  %v5015_v62 = vadd.f32 %v5014_v57, %v5013_v52 }
 0x3ff   : > { %v5125_v63 = vrot.slane %v5124_v59, 1  ;;  %v5052_v2 = vadd.f32 %v5051_v61, %v5050_v55 }
 0x400   : > { %v5089_v1 = vadd.f32 %v5088_v60, %v5087_v53  ;;  %v5148_v7 = vmul.f32 0.00390625, %v5015_v62 }
 0x401   : > { %v5126_v56 = vadd.f32 %v5125_v63, %v5124_v59  ;;  %v5149_v9 = vmul.f32 0.00390625, %v5052_v2 }
 0x402   : > { %v5150_v8 = vmul.f32 0.00390625, %v5089_v1 }
 0x403   : > { %v5151_v10 = vmul.f32 0.00390625, %v5126_v56  ;;  %v5296_v11 = vcombine.low %v5148_v7, %v5149_v9 }
 0x405   : > { %v5297_v12 = vcombine.low %v5150_v8, %v5151_v10  ;;  %v5304_v13 = vrot.slane %v5296_v11, %v6831_v32 }
 0x407   : > { %v5311_v14 = vrot.slane %v5297_v12, %v6831_v32 }
 0x409   : > { %v5312_v15 = vcombine.low %v5304_v13, %v5311_v14 }
 0x40b   : > { %v5319_v16 = vrot.slane %v5312_v15, %v6831_v32 }
 0x40d   : > { %5335 = vst.msk [vmem:[%s6915_s18 + $0x14] sm:$0xf] %vm6873_vm2, %v5319_v16 }
 0x40e   : > { %5928 = shalt.err (!%p5925_p5)
}
 0x40f   : > { %s5929_s6 = scalar_lea.hbm %s8267_s5, 384  ;;  %s5933_s19 = scalar_lea.hbm %s8326_s3, 1536 }
 0x410   : > { %p5930_p6 = scmp.ne.s32.totalorder %s8267_s5, %s5929_s6  ;;  %p5934_p10 = scmp.lt.u32.totalorder %s8267_s5, %s8326_s3 }
 0x411   : > { %p5935_p11 = scmp.lt.u32.totalorder %s5933_s19, %s5929_s6  ;;  %p5937_p13 = scmp.lt.u32.totalorder %s5929_s6, %s8267_s5 }
 0x412   : > { %p5931_p7 = pnand %p5930_p6, %p6061_p4 }
 0x413   : > { %p5936_p12 = por %p5935_p11, %p5934_p10 }
 0x414   : > { %p5932_p9 = pneg %p5931_p7 }
 0x415   : > { %p5938_p0 = por %p5937_p13, %p5936_p12 }
 0x417   : > { %p5939_p1 = pnand %p5938_p0, %p5932_p9 }
 0x419   : > { %5942 = shalt.err (!%p5939_p1)
}
 0x41a   : > { %s5998_s27 = smov 64   ;;  %s5999_s26 = smov 256  }
 0x41b   : > { %s6000_s28 = smov 4  }
 0x41c   : > { %5853 = dma.vmem_to_hbm [thread:$0]  (%p6061_p4), %s8269_s29, 384, %s8267_s5, %s8277_s15, %s5998_s27, %s5999_s26, %s6000_s28  }
 0x41d PF: > { %p5859_p2 = scmp.ge.s32.totalorder %s5993_s17, 2  ;;  %s5368_s30 = sand.u32 1, %s5973_s12  }
 0x41e   : > { %s5369_s4 = scalar_lea.sflag [#allocation3], %s5368_s30 }
 0x41f   : > { %p5856_p3 = pnand %p5859_p2, %p6068_p8 }
 0x421   : > { %5968 = dma.done.wait (!%p5856_p3), %s5369_s4, 384  }
 0x422   : > { %5970 = vsyncadd (!%p5856_p3), %s5369_s4, 4294966912  ;;  %s16_s17 = sadd.s32 1, %s5993_s17   ;;  %s8331_s12 = smov %s5977_s13 }
 0x423   : > { %p13_p5 = scmp.ge.s32.totalorder %s16_s17, 6   ;;  %s8332_s13 = smov %s5981_s14 }
 0x424   : > { %s8333_s14 = smov %s6074_s25  ;;  %s8334_s15 = smov %s5989_s16 }
 0x425   : > { %s8335_s16 = smov %s8337_s20  ;;  %15 = sbr.rel (!%p13_p5) target bundleno = 4 (0x4), region = 73 }
 0x42c   :  { %5374 = vsyncpa [#allocation3], 1 }
 0x42d   :  { %5376 = vsyncpa [#allocation3 + $0x1], 1 }

</bundles_post_ra>
